<compile_context>
chip_gen: v7x
topology: tpu7x:2x2x1
jax: 0.10.0
libtpu: 0.0.40
codegen_flags: <defaults>
</compile_context>

<pallas_src>
import jax
import jax.numpy as jnp
from jax import lax
from jax.experimental import pallas as pl
from jax.experimental.pallas import tpu as pltpu

EPS = 1e-5            # InstanceNorm2d default eps
NEG_SLOPE = 0.01      # LeakyReLU default negative_slope
LANE = 128
SUBLANE = 8
HALO = 8              # halo rows DMA'd for the tiled path (supports k <= 9)

FUSED_BYTES_BUDGET = 18 * 1024 * 1024   # per-step VMEM budget for the fused path
TILED_BYTES_BUDGET = 20 * 1024 * 1024   # per-step VMEM budget for the tiled path

_VMEM_LIMIT_CACHE = [None]


def _vmem_limit():
    """64 MiB scoped VMEM on 128 MiB chips (v5e/v6e), 48 MiB on 64 MiB chips (v7x)."""
    if _VMEM_LIMIT_CACHE[0] is None:
        try:
            cap = int(pltpu.get_tpu_info().vmem_capacity_bytes)
        except Exception:
            cap = 64 * 1024 * 1024
        _VMEM_LIMIT_CACHE[0] = (64 if cap >= 128 * 1024 * 1024 else 48) * 1024 * 1024
    return _VMEM_LIMIT_CACHE[0]


def _round_up(x, m):
    return (x + m - 1) // m * m


# --------------------------------------------------------------------------
# Glue helpers (run once per block at most; stride-1 blocks need none)
# --------------------------------------------------------------------------
def _initial_buffer(x_nhwc, k):
    """Zero-pad the network input into the padded-buffer convention of conv #0."""
    p = (k - 1) // 2
    _, H, W, _ = x_nhwc.shape
    W8 = _round_up(W, SUBLANE)
    return jnp.pad(x_nhwc, ((0, 0), (p, p), (p, p + (W8 - W)), (0, 0)))


def _phases(B, s, Ht, Wt):
    """Space-to-batch phase decomposition of a padded NHWC buffer.

    Returns (N*s*s, Ht, Wt, C); entries past the end of B are zero.  For s == 1
    and a buffer already of the right size this is a no-op (zero glue)."""
    N, HB, WB, _ = B.shape
    Hreq, Wreq = s * Ht, s * Wt
    if HB < Hreq or WB < Wreq:
        B = jnp.pad(B, ((0, 0), (0, max(0, Hreq - HB)), (0, max(0, Wreq - WB)), (0, 0)))
    if s == 1:
        if B.shape[1] == Ht and B.shape[2] == Wt:
            return B
        return B[:, :Ht, :Wt, :]
    ph = [B[:, a::s, b::s, :][:, :Ht, :Wt, :] for a in range(s) for b in range(s)]
    return jnp.stack(ph, axis=1).reshape(N * s * s, Ht, Wt, B.shape[3])


# --------------------------------------------------------------------------
# Fused single-call kernel: conv (fused-K MXU matmul) + InstanceNorm + LeakyReLU
# --------------------------------------------------------------------------
def _make_fused_kernel(KH, KW, s, Ho, Wo, Wo8, Cin, CPout, pad_next):
    KF = KH * KW * Cin
    inv_cnt = 1.0 / float(Ho * Wo)

    def kernel(x_ref, w_ref, gb_ref, o_ref):
        # x_ref : (s*s, Hx, Wx, CX) bf16 phase-decomposed padded input (one sample)
        # w_ref : (KF, CPout)       bf16 fused im2col weights
        # gb_ref: (8, CPout)        f32  row0=gamma, row1=beta
        # o_ref : (1, HBn, WBn, CPout) bf16 padded output buffer for the next conv
        taps = []
        for kh in range(KH):                       # static tap loop -> one fused-K dot
            a, dh = kh % s, kh // s
            for kw in range(KW):
                b, dw = kw % s, kw // s
                ph = a * s + b
                taps.append(x_ref[ph, pl.ds(dh, Ho), pl.ds(dw, Wo8), pl.ds(0, Cin)])
        lhs = jnp.concatenate(taps, axis=-1).reshape(Ho * Wo8, KF)
        acc = jnp.dot(lhs, w_ref[...], preferred_element_type=jnp.float32)
        acc3 = acc.reshape(Ho, Wo8, CPout)

        rr = lax.broadcasted_iota(jnp.int32, (Ho, Wo8, 1), 0)
        cc = lax.broadcasted_iota(jnp.int32, (Ho, Wo8, 1), 1)
        valid = jnp.logical_and(rr < Ho, cc < Wo)

        am = jnp.where(valid, acc3, 0.0).reshape(Ho * Wo8, CPout)
        mean = jnp.sum(am, axis=0, keepdims=True) * inv_cnt
        ex2 = jnp.sum(am * am, axis=0, keepdims=True) * inv_cnt
        var = ex2 - mean * mean
        inv = lax.rsqrt(var + EPS)
        gamma = gb_ref[0:1, :]
        beta = gb_ref[1:2, :]
        scale = (gamma * inv).reshape(1, 1, CPout)
        shift = (beta - mean * gamma * inv).reshape(1, 1, CPout)

        yn = acc3 * scale + shift
        yn = jnp.where(yn >= 0.0, yn, NEG_SLOPE * yn)
        yn = jnp.where(valid, yn, 0.0)              # keep padded positions exactly zero
        yb = yn.astype(o_ref.dtype)

        if pad_next > 0:
            o_ref[...] = jnp.zeros(o_ref.shape, o_ref.dtype)
        o_ref[0, pl.ds(pad_next, Ho), pl.ds(pad_next, Wo8), :] = yb

    return kernel


# --------------------------------------------------------------------------
# Tiled path, pass 1: fused-K conv + masked partial stats (bf16 y writeback)
# --------------------------------------------------------------------------
def _make_tiled_conv_kernel(KH, KW, s, TH, Wo8, Cin, CPout, Ho, Wo):
    KF = KH * KW * Cin
    SS = s * s

    def kernel(xa_ref, xh_ref, w_ref, y_ref, st_ref, xs_ref):
        # xa_ref: (s*s, TH,   WB, CX) bf16   current row tile (all phases)
        # xh_ref: (s*s, HALO, WB, CX) bf16   halo rows of the next tile
        # w_ref : (KF, CPout)          bf16
        # y_ref : (1, TH, Wo8, CPout)  bf16  conv output tile
        # st_ref: (1, 8, CPout)        f32   row0=sum, row1=sum(y^2) of valid positions
        # xs_ref: (s*s, TH+HALO, WB, CX) bf16 VMEM scratch (tile + halo merged once)
        i = pl.program_id(1)
        for ph in range(SS):
            xs_ref[ph, pl.ds(0, TH), :, :] = xa_ref[ph, :, :, :]
            xs_ref[ph, pl.ds(TH, HALO), :, :] = xh_ref[ph, :, :, :]

        taps = []
        for kh in range(KH):
            a, dh = kh % s, kh // s
            for kw in range(KW):
                b, dw = kw % s, kw // s
                ph = a * s + b
                taps.append(xs_ref[ph, pl.ds(dh, TH), pl.ds(dw, Wo8), pl.ds(0, Cin)])
        lhs = jnp.concatenate(taps, axis=-1).reshape(TH * Wo8, KF)
        acc = jnp.dot(lhs, w_ref[...], preferred_element_type=jnp.float32)
        acc3 = acc.reshape(TH, Wo8, CPout)

        rr = lax.broadcasted_iota(jnp.int32, (TH, Wo8, 1), 0)
        cc = lax.broadcasted_iota(jnp.int32, (TH, Wo8, 1), 1)
        valid = jnp.logical_and(i * TH + rr < Ho, cc < Wo)
        am = jnp.where(valid, acc3, 0.0).reshape(TH * Wo8, CPout)
        psum = jnp.sum(am, axis=0, keepdims=True)
        psq = jnp.sum(am * am, axis=0, keepdims=True)
        rid = lax.broadcasted_iota(jnp.int32, (8, CPout), 0)
        st_ref[0] = jnp.where(rid == 0, psum, jnp.where(rid == 1, psq, 0.0))
        y_ref[0] = acc3.astype(y_ref.dtype)        # bf16 inter-pass y

    return kernel


# --------------------------------------------------------------------------
# Tiled path, pass 2: InstanceNorm (precomputed stats) + affine + LeakyReLU
# --------------------------------------------------------------------------
def _make_tiled_norm_kernel(CPout, count, Ho, Wo, TH2, Wo8):
    inv_cnt = 1.0 / float(count)

    def kernel(y_ref, st_ref, gb_ref, o_ref):
        i = pl.program_id(1)
        mean = st_ref[0, 0:1, :] * inv_cnt
        var = st_ref[0, 1:2, :] * inv_cnt - mean * mean
        inv = lax.rsqrt(var + EPS)
        gamma = gb_ref[0:1, :]
        beta = gb_ref[1:2, :]
        scale = (gamma * inv).reshape(1, 1, CPout)
        shift = (beta - mean * gamma * inv).reshape(1, 1, CPout)

        y = y_ref[0].astype(jnp.float32)
        yn = y * scale + shift
        yn = jnp.where(yn >= 0.0, yn, NEG_SLOPE * yn)

        rr = lax.broadcasted_iota(jnp.int32, (TH2, Wo8, 1), 0)
        cc = lax.broadcasted_iota(jnp.int32, (TH2, Wo8, 1), 1)
        valid = jnp.logical_and(i * TH2 + rr < Ho, cc < Wo)
        o_ref[0] = jnp.where(valid, yn, 0.0).astype(o_ref.dtype)

    return kernel


# --------------------------------------------------------------------------
# One ConvDropoutNormReLU block (dispatches fused vs. tiled path)
# --------------------------------------------------------------------------
def conv_block(buf, H, W, Cin, w_oihw, gamma, beta, stride, pad_next,
               force_tiled=False, tile_rows=None):
    """Conv2d(bias=False) + InstanceNorm2d + LeakyReLU on a padded NHWC buffer.

    buf: (N, H+2p, 2p+W8-ish, CX) bf16; interior [p, p+H) x [p, p+W) holds the
         activation (channels [0, Cin)), everything else zero, p = (k-1)//2.
    Returns (out_buf, Ho, Wo) where out_buf has `pad_next` baked in the same way.
    """
    N, _, _, CX = buf.shape
    Cout, Cin_w, KH, KW = w_oihw.shape
    assert Cin_w == Cin and KH == KW, "square kernels only in this instantiation"
    s = int(stride)
    p = (KH - 1) // 2
    Ho = (H + 2 * p - KH) // s + 1
    Wo = (W + 2 * p - KW) // s + 1
    Wo8 = _round_up(Wo, SUBLANE)
    CPout = _round_up(Cout, LANE)
    KF = KH * KW * Cin
    dh_max, dw_max = (KH - 1) // s, (KW - 1) // s
    assert dh_max <= HALO

    # weights -> (KH*KW*Cin, CPout) bf16 (matches the in-kernel tap concat order)
    w_f = jnp.transpose(w_oihw, (2, 3, 1, 0)).reshape(KF, Cout)
    w_f = jnp.pad(w_f, ((0, 0), (0, CPout - Cout))).astype(jnp.bfloat16)
    gb = jnp.stack([gamma, beta], axis=0)
    gb = jnp.pad(gb, ((0, 6), (0, CPout - Cout))).astype(jnp.float32)

    HBn = Ho + 2 * pad_next
    WBn = Wo8 + 2 * pad_next
    vmem_limit = _vmem_limit()
    flops = 2 * N * Ho * Wo8 * KF * CPout

    # ---------------- fused single-call path (small / tail stages) ----------------
    Hmin, Wmin = dh_max + Ho, dw_max + Wo8
    M = Ho * Wo8
    fused_bytes = (2 * (s * s * Hmin * Wmin * CX * 2) + 2 * (HBn * WBn * CPout * 2)
                   + M * KF * 2 + 5 * M * CPout * 4)
    if (not force_tiled) and fused_bytes <= FUSED_BYTES_BUDGET:
        if s == 1:
            Ht, Wt = max(Hmin, buf.shape[1]), max(Wmin, buf.shape[2])
        else:
            Ht, Wt = Hmin, Wmin
        xph = _phases(buf, s, Ht, Wt)              # s==1: zero glue
        _, Hx, Wx, _ = xph.shape

        kern = _make_fused_kernel(KH, KW, s, Ho, Wo, Wo8, Cin, CPout, pad_next)
        bytes_acc = int(xph.size * 2 + w_f.size * 2 + gb.size * 4
                        + N * HBn * WBn * CPout * 2)
        out = pl.pallas_call(
            kern,
            out_shape=jax.ShapeDtypeStruct((N, HBn, WBn, CPout), jnp.bfloat16),
            grid_spec=pltpu.PrefetchScalarGridSpec(
                num_scalar_prefetch=0,
                grid=(N,),
                in_specs=[
                    pl.BlockSpec((s * s, Hx, Wx, CX), lambda n: (n, 0, 0, 0)),
                    pl.BlockSpec((KF, CPout), lambda n: (0, 0)),
                    pl.BlockSpec((8, CPout), lambda n: (0, 0)),
                ],
                out_specs=pl.BlockSpec((1, HBn, WBn, CPout), lambda n: (n, 0, 0, 0)),
            ),
            compiler_params=pltpu.CompilerParams(
                dimension_semantics=("parallel",),
                vmem_limit_bytes=vmem_limit),
            cost_estimate=pl.CostEstimate(flops=int(flops),
                                          transcendentals=int(N * CPout),
                                          bytes_accessed=bytes_acc),
        )(xph, w_f, gb)
        return out, Ho, Wo

    # ---------------- tiled two-pass path (large stages) --------------------------
    WB = Wo8 + dw_max
    if tile_rows is not None:
        TH = max(SUBLANE, _round_up(tile_rows, SUBLANE))
    else:
        TH = max(SUBLANE, _round_up(min(Ho, max(1, 2048 // Wo8)), SUBLANE))

    def _step_bytes(th):
        m = th * Wo8
        return (2 * (s * s * th * WB * CX * 2) + 2 * (s * s * HALO * WB * CX * 2)
                + s * s * (th + HALO) * WB * CX * 2 + 2 * m * CPout * 2
                + m * KF * 2 + 5 * m * CPout * 4)

    while TH > SUBLANE and _step_bytes(TH) > TILED_BYTES_BUDGET:
        TH -= SUBLANE
    n_tiles = pl.cdiv(Ho, TH)
    Ho_pad = n_tiles * TH
    Hph = Ho_pad + HALO

    xph = _phases(buf, s, Hph, WB)                 # (N*s*s, Hph, WB, CX)

    kern1 = _make_tiled_conv_kernel(KH, KW, s, TH, Wo8, Cin, CPout, Ho, Wo)
    bytes1 = int(xph.size * 2 + w_f.size * 2
                 + N * Ho_pad * Wo8 * CPout * 2 + N * n_tiles * 8 * CPout * 4)
    y, st_part = pl.pallas_call(
        kern1,
        out_shape=(jax.ShapeDtypeStruct((N, Ho_pad, Wo8, CPout), jnp.bfloat16),
                   jax.ShapeDtypeStruct((N * n_tiles, 8, CPout), jnp.float32)),
        grid_spec=pltpu.PrefetchScalarGridSpec(
            num_scalar_prefetch=0,
            grid=(N, n_tiles),
            in_specs=[
                pl.BlockSpec((s * s, TH, WB, CX), lambda n, i: (n, i, 0, 0)),
                pl.BlockSpec((s * s, HALO, WB, CX),
                             lambda n, i: (n, (i + 1) * (TH // HALO), 0, 0)),
                pl.BlockSpec((KF, CPout), lambda n, i: (0, 0)),
            ],
            out_specs=[
                pl.BlockSpec((1, TH, Wo8, CPout), lambda n, i: (n, i, 0, 0)),
                pl.BlockSpec((1, 8, CPout), lambda n, i: (n * n_tiles + i, 0, 0)),
            ],
            scratch_shapes=[pltpu.VMEM((s * s, TH + HALO, WB, CX), jnp.bfloat16)],
        ),
        compiler_params=pltpu.CompilerParams(
            dimension_semantics=("parallel", "parallel"),
            vmem_limit_bytes=vmem_limit),
        cost_estimate=pl.CostEstimate(flops=int(flops), transcendentals=0,
                                      bytes_accessed=bytes1),
    )(xph, xph, w_f)

    # tiny cross-tile stats reduction in glue
    st = st_part.reshape(N, n_tiles, 8, CPout).sum(axis=1)

    # pass 2: pure streaming elementwise -> use the largest block that fits
    TH2 = TH
    for kdiv in range(n_tiles, 0, -1):
        if n_tiles % kdiv == 0 and (kdiv * TH) * Wo8 * CPout * 12 <= TILED_BYTES_BUDGET:
            TH2 = kdiv * TH
            break
    n2 = Ho_pad // TH2

    kern2 = _make_tiled_norm_kernel(CPout, Ho * Wo, Ho, Wo, TH2, Wo8)
    bytes2 = int(N * Ho_pad * Wo8 * CPout * 4 + st.size * 4 + gb.size * 4)
    out = pl.pallas_call(
        kern2,
        out_shape=jax.ShapeDtypeStruct((N, Ho_pad, Wo8, CPout), jnp.bfloat16),
        grid_spec=pltpu.PrefetchScalarGridSpec(
            num_scalar_prefetch=0,
            grid=(N, n2),
            in_specs=[
                pl.BlockSpec((1, TH2, Wo8, CPout), lambda n, i: (n, i, 0, 0)),
                pl.BlockSpec((1, 8, CPout), lambda n, i: (n, 0, 0)),
                pl.BlockSpec((8, CPout), lambda n, i: (0, 0)),
            ],
            out_specs=pl.BlockSpec((1, TH2, Wo8, CPout), lambda n, i: (n, i, 0, 0)),
        ),
        compiler_params=pltpu.CompilerParams(
            dimension_semantics=("parallel", "parallel"),
            vmem_limit_bytes=vmem_limit),
        cost_estimate=pl.CostEstimate(flops=int(6 * N * Ho_pad * Wo8 * CPout),
                                      transcendentals=int(N * CPout),
                                      bytes_accessed=bytes2),
    )(y, st, gb)

    # Re-wrap into the next conv's padded-buffer layout (one small glue pad).
    # TODO(synk): write pass-2 output directly in the padded layout to drop this copy.
    if pad_next > 0 or Ho_pad != Ho:
        out = jnp.pad(out[:, :Ho],
                      ((0, 0), (pad_next, pad_next), (pad_next, pad_next), (0, 0)))
    return out, Ho, Wo


# --------------------------------------------------------------------------
# Parameters and Encoder.forward
# --------------------------------------------------------------------------
def init_encoder_params(key, input_channels, num_features_per_stage,
                        num_conv_per_stage, kernel_sizes):
    params = []
    cin = input_channels
    for si, cout in enumerate(num_features_per_stage):
        stage = []
        k = kernel_sizes[si]
        for _ in range(num_conv_per_stage[si]):
            key, sub = jax.random.split(key)
            w = jax.random.normal(sub, (cout, cin, k, k), jnp.float32) * 0.1
            stage.append((w, jnp.ones((cout,), jnp.float32),
                          jnp.zeros((cout,), jnp.float32)))
            cin = cout
        params.append(stage)
    return params


def encoder_forward(x_nchw, params, strides, return_skips=False):
    """Encoder.forward: sequentially apply StackedConvBlock stages."""
    x = jnp.transpose(x_nchw, (0, 2, 3, 1)).astype(jnp.bfloat16)   # NCHW -> NHWC once
    convs = []
    for si, stage in enumerate(params):
        for ci, (w, g, b) in enumerate(stage):
            s = int(strides[si]) if ci == 0 else 1                 # initial_stride only
            convs.append((w, g, b, s, ci == len(stage) - 1))
    n_convs = len(convs)
    _, H, W, C = x.shape
    buf = _initial_buffer(x, convs[0][0].shape[2])
    Hc, Wc, Cc = H, W, C
    skips = []
    for j, (w, g, b, s, last_of_stage) in enumerate(convs):
        pad_next = ((convs[j + 1][0].shape[2] - 1) // 2) if j + 1 < n_convs else 0
        buf, Hc, Wc = conv_block(buf, Hc, Wc, Cc, w, g, b, s, pad_next)
        Cc = w.shape[0]
        if last_of_stage and (return_skips or j == n_convs - 1):
            out = buf[:, pad_next:pad_next + Hc, pad_next:pad_next + Wc, :Cc]
            skips.append(jnp.transpose(out, (0, 3, 1, 2)).astype(jnp.float32))
    return skips if return_skips else skips[-1]


# --------------------------------------------------------------------------
# Pure-JAX reference (same bf16 rounding of inputs/weights) for validation
# --------------------------------------------------------------------------
def _conv_block_ref(x_nhwc, w, gamma, beta, stride):
    ph, pw = (w.shape[2] - 1) // 2, (w.shape[3] - 1) // 2
    y = lax.conv_general_dilated(
        x_nhwc.astype(jnp.bfloat16),
        jnp.transpose(w, (2, 3, 1, 0)).astype(jnp.bfloat16),
        window_strides=(stride, stride), padding=[(ph, ph), (pw, pw)],
        dimension_numbers=("NHWC", "HWIO", "NHWC"),
        preferred_element_type=jnp.float32)
    mean = jnp.mean(y, axis=(1, 2), keepdims=True)
    var = jnp.mean((y - mean) ** 2, axis=(1, 2), keepdims=True)
    yn = (y - mean) * lax.rsqrt(var + EPS) * gamma + beta
    return jnp.where(yn >= 0, yn, NEG_SLOPE * yn).astype(jnp.bfloat16)


def encoder_forward_ref(x_nchw, params, strides):
    x = jnp.transpose(x_nchw, (0, 2, 3, 1)).astype(jnp.bfloat16)
    for si, stage in enumerate(params):
        for ci, (w, g, b) in enumerate(stage):
            stride = strides[si] if ci == 0 else 1
            x = _conv_block_ref(x, w, g, b, stride)
    return jnp.transpose(x, (0, 3, 1, 2)).astype(jnp.float32)


if __name__ == "__main__":
    key = jax.random.PRNGKey(0)
    kx, kp, kt = jax.random.split(key, 3)

    # Small Encoder config: 3 stages, 2 convs per stage, 3x3 kernels, strides [1,2,2]
    N, Cin, H, W = 2, 4, 16, 16
    num_features = [8, 16, 32]
    num_convs = [2, 2, 2]
    kernel_sizes = [3, 3, 3]
    strides = [1, 2, 2]

    x = jax.random.normal(kx, (N, Cin, H, W), jnp.float32)
    params = init_encoder_params(kp, Cin, num_features, num_convs, kernel_sizes)

    fwd = jax.jit(lambda xx, pp: encoder_forward(xx, pp, strides, return_skips=False))
    out = jax.block_until_ready(fwd(x, params))
    assert out.shape == (N, num_features[-1], 4, 4), out.shape
    assert bool(jnp.all(jnp.isfinite(out)))

    ref = encoder_forward_ref(x, params, strides)
    err = float(jnp.max(jnp.abs(out - ref)))
    assert err < 5e-2, f"encoder mismatch vs reference: {err}"

    # Exercise the tiled (large-stage) two-pass path on a single block (stride 1 & 2).
    xt = jax.random.normal(kt, (1, 24, 24, 8), jnp.float32)
    wt = jax.random.normal(jax.random.fold_in(kt, 1), (16, 8, 3, 3), jnp.float32) * 0.1
    gt = jnp.ones((16,), jnp.float32)
    bt = jnp.zeros((16,), jnp.float32)
    for st in (1, 2):
        buf0 = _initial_buffer(xt.astype(jnp.bfloat16), 3)
        got, Ho_t, Wo_t = conv_block(buf0, 24, 24, 8, wt, gt, bt, st, 0,
                                     force_tiled=True, tile_rows=8)
        got = got[:, :Ho_t, :Wo_t, :16].astype(jnp.float32)
        want = _conv_block_ref(xt.astype(jnp.bfloat16), wt, gt, bt, st).astype(jnp.float32)
        errt = float(jnp.max(jnp.abs(got - want)))
        assert errt < 5e-2, f"tiled path mismatch (stride={st}): {errt}"

    print("KERNEL_OK")
</pallas_src>

<mosaic_0001>
module attributes {stable_mosaic.version = 11 : i64} {
  func.func @kernel(%arg0: i32, %arg1: memref<1x18x18x128xbf16, #tpu.memory_space<vmem>>, %arg2: memref<72x128xbf16, #tpu.memory_space<vmem>>, %arg3: memref<8x128xf32, #tpu.memory_space<vmem>>, %arg4: memref<1x18x18x128xbf16, #tpu.memory_space<vmem>>) attributes {dimension_semantics = [#tpu.dimension_semantics<parallel>], iteration_bounds = array<i64: 2>, scalar_prefetch = 0 : i64, scratch_operands = 0 : i64, tpu.core_type = #tpu.core_type<tc>, window_params = [{transform_indices = @transform_0, window_bounds = array<i64: 1, 18, 18, 128>}, {pipeline_mode = #tpu.pipeline_mode<synchronous>, transform_indices = @transform_1, window_bounds = array<i64: 72, 128>}, {pipeline_mode = #tpu.pipeline_mode<synchronous>, transform_indices = @transform_2, window_bounds = array<i64: 8, 128>}, {transform_indices = @transform_3, window_bounds = array<i64: 1, 18, 18, 128>}]} {
    %c0 = arith.constant 0 : index
    %c0_0 = arith.constant 0 : index
    %c0_1 = arith.constant 0 : index
    %c0_2 = arith.constant 0 : index
    %0 = vector.load %arg1[%c0, %c0_0, %c0_1, %c0_2] : memref<1x18x18x128xbf16, #tpu.memory_space<vmem>>, vector<1x16x16x8xbf16>
    %1 = vector.shape_cast %0 : vector<1x16x16x8xbf16> to vector<16x16x8xbf16>
    %c0_3 = arith.constant 0 : index
    %c0_4 = arith.constant 0 : index
    %c1 = arith.constant 1 : index
    %c0_5 = arith.constant 0 : index
    %2 = vector.load %arg1[%c0_3, %c0_4, %c1, %c0_5] : memref<1x18x18x128xbf16, #tpu.memory_space<vmem>>, vector<1x16x16x8xbf16>
    %3 = vector.shape_cast %2 : vector<1x16x16x8xbf16> to vector<16x16x8xbf16>
    %c0_6 = arith.constant 0 : index
    %c0_7 = arith.constant 0 : index
    %c2 = arith.constant 2 : index
    %c0_8 = arith.constant 0 : index
    %4 = vector.load %arg1[%c0_6, %c0_7, %c2, %c0_8] : memref<1x18x18x128xbf16, #tpu.memory_space<vmem>>, vector<1x16x16x8xbf16>
    %5 = vector.shape_cast %4 : vector<1x16x16x8xbf16> to vector<16x16x8xbf16>
    %c0_9 = arith.constant 0 : index
    %c1_10 = arith.constant 1 : index
    %c0_11 = arith.constant 0 : index
    %c0_12 = arith.constant 0 : index
    %6 = vector.load %arg1[%c0_9, %c1_10, %c0_11, %c0_12] : memref<1x18x18x128xbf16, #tpu.memory_space<vmem>>, vector<1x16x16x8xbf16>
    %7 = vector.shape_cast %6 : vector<1x16x16x8xbf16> to vector<16x16x8xbf16>
    %c0_13 = arith.constant 0 : index
    %c1_14 = arith.constant 1 : index
    %c1_15 = arith.constant 1 : index
    %c0_16 = arith.constant 0 : index
    %8 = vector.load %arg1[%c0_13, %c1_14, %c1_15, %c0_16] : memref<1x18x18x128xbf16, #tpu.memory_space<vmem>>, vector<1x16x16x8xbf16>
    %9 = vector.shape_cast %8 : vector<1x16x16x8xbf16> to vector<16x16x8xbf16>
    %c0_17 = arith.constant 0 : index
    %c1_18 = arith.constant 1 : index
    %c2_19 = arith.constant 2 : index
    %c0_20 = arith.constant 0 : index
    %10 = vector.load %arg1[%c0_17, %c1_18, %c2_19, %c0_20] : memref<1x18x18x128xbf16, #tpu.memory_space<vmem>>, vector<1x16x16x8xbf16>
    %11 = vector.shape_cast %10 : vector<1x16x16x8xbf16> to vector<16x16x8xbf16>
    %c0_21 = arith.constant 0 : index
    %c2_22 = arith.constant 2 : index
    %c0_23 = arith.constant 0 : index
    %c0_24 = arith.constant 0 : index
    %12 = vector.load %arg1[%c0_21, %c2_22, %c0_23, %c0_24] : memref<1x18x18x128xbf16, #tpu.memory_space<vmem>>, vector<1x16x16x8xbf16>
    %13 = vector.shape_cast %12 : vector<1x16x16x8xbf16> to vector<16x16x8xbf16>
    %c0_25 = arith.constant 0 : index
    %c2_26 = arith.constant 2 : index
    %c1_27 = arith.constant 1 : index
    %c0_28 = arith.constant 0 : index
    %14 = vector.load %arg1[%c0_25, %c2_26, %c1_27, %c0_28] : memref<1x18x18x128xbf16, #tpu.memory_space<vmem>>, vector<1x16x16x8xbf16>
    %15 = vector.shape_cast %14 : vector<1x16x16x8xbf16> to vector<16x16x8xbf16>
    %c0_29 = arith.constant 0 : index
    %c2_30 = arith.constant 2 : index
    %c2_31 = arith.constant 2 : index
    %c0_32 = arith.constant 0 : index
    %16 = vector.load %arg1[%c0_29, %c2_30, %c2_31, %c0_32] : memref<1x18x18x128xbf16, #tpu.memory_space<vmem>>, vector<1x16x16x8xbf16>
    %17 = vector.shape_cast %16 : vector<1x16x16x8xbf16> to vector<16x16x8xbf16>
    %18 = tpu.concatenate %1, %3, %5, %7, %9, %11, %13, %15, %17 in 2 : vector<16x16x8xbf16>, vector<16x16x8xbf16>, vector<16x16x8xbf16>, vector<16x16x8xbf16>, vector<16x16x8xbf16>, vector<16x16x8xbf16>, vector<16x16x8xbf16>, vector<16x16x8xbf16>, vector<16x16x8xbf16> -> vector<16x16x72xbf16>
    %19 = vector.shape_cast %18 : vector<16x16x72xbf16> to vector<256x72xbf16>
    %c0_33 = arith.constant 0 : index
    %c0_34 = arith.constant 0 : index
    %20 = vector.load %arg2[%c0_33, %c0_34] : memref<72x128xbf16, #tpu.memory_space<vmem>>, vector<72x128xbf16>
    %cst = arith.constant dense<0.000000e+00> : vector<256x128xf32>
    %21 = tpu.matmul %19, %20, %cst {dimension_numbers = #tpu.dot_dimension_numbers<[1], [0], [0], [1], [0, 0, 1, 1], [], []>} : vector<256x72xbf16>, vector<72x128xbf16>, vector<256x128xf32> -> vector<256x128xf32>
    %22 = vector.shape_cast %21 : vector<256x128xf32> to vector<16x16x128xf32>
    %23 = tpu.iota {dimensions = array<i32: 0>} : vector<16x16x1xi32>
    %24 = tpu.iota {dimensions = array<i32: 1>} : vector<16x16x1xi32>
    %c16_i32 = arith.constant 16 : i32
    %25 = vector.broadcast %c16_i32 : i32 to vector<16x16x1xi32>
    %26 = arith.cmpi slt, %23, %25 : vector<16x16x1xi32>
    %c16_i32_35 = arith.constant 16 : i32
    %27 = vector.broadcast %c16_i32_35 : i32 to vector<16x16x1xi32>
    %28 = arith.cmpi slt, %24, %27 : vector<16x16x1xi32>
    %29 = arith.andi %26, %28 : vector<16x16x1xi1>
    %cst_36 = arith.constant 0.000000e+00 : f32
    %30 = vector.shape_cast %29 : vector<16x16x1xi1> to vector<16x16x1xi1>
    %31 = vector.broadcast %30 : vector<16x16x1xi1> to vector<16x16x128xi1>
    %32 = vector.broadcast %cst_36 : f32 to vector<16x16x128xf32>
    %33 = arith.select %31, %22, %32 : vector<16x16x128xi1>, vector<16x16x128xf32>
    %34 = vector.shape_cast %33 : vector<16x16x128xf32> to vector<256x128xf32>
    %cst_37 = arith.constant dense<0.000000e+00> : vector<128xf32>
    %35 = vector.multi_reduction <add>, %34, %cst_37 [0] : vector<256x128xf32> to vector<128xf32>
    %36 = vector.shape_cast %35 : vector<128xf32> to vector<1x128xf32>
    %cst_38 = arith.constant 3.906250e-03 : f32
    %37 = vector.broadcast %cst_38 : f32 to vector<1x128xf32>
    %38 = arith.mulf %36, %37 : vector<1x128xf32>
    %39 = arith.mulf %34, %34 : vector<256x128xf32>
    %cst_39 = arith.constant dense<0.000000e+00> : vector<128xf32>
    %40 = vector.multi_reduction <add>, %39, %cst_39 [0] : vector<256x128xf32> to vector<128xf32>
    %41 = vector.shape_cast %40 : vector<128xf32> to vector<1x128xf32>
    %cst_40 = arith.constant 3.906250e-03 : f32
    %42 = vector.broadcast %cst_40 : f32 to vector<1x128xf32>
    %43 = arith.mulf %41, %42 : vector<1x128xf32>
    %44 = arith.mulf %38, %38 : vector<1x128xf32>
    %45 = arith.subf %43, %44 : vector<1x128xf32>
    %cst_41 = arith.constant 9.99999974E-6 : f32
    %46 = vector.broadcast %cst_41 : f32 to vector<1x128xf32>
    %47 = arith.addf %45, %46 : vector<1x128xf32>
    %48 = math.rsqrt %47 : vector<1x128xf32>
    %c0_42 = arith.constant 0 : index
    %c0_43 = arith.constant 0 : index
    %49 = vector.load %arg3[%c0_42, %c0_43] : memref<8x128xf32, #tpu.memory_space<vmem>>, vector<1x128xf32>
    %c1_44 = arith.constant 1 : index
    %c0_45 = arith.constant 0 : index
    %50 = vector.load %arg3[%c1_44, %c0_45] : memref<8x128xf32, #tpu.memory_space<vmem>>, vector<1x128xf32>
    %51 = arith.mulf %49, %48 : vector<1x128xf32>
    %52 = vector.shape_cast %51 : vector<1x128xf32> to vector<1x1x128xf32>
    %53 = arith.mulf %38, %49 : vector<1x128xf32>
    %54 = arith.mulf %53, %48 : vector<1x128xf32>
    %55 = arith.subf %50, %54 : vector<1x128xf32>
    %56 = vector.shape_cast %55 : vector<1x128xf32> to vector<1x1x128xf32>
    %57 = vector.broadcast %52 : vector<1x1x128xf32> to vector<16x16x128xf32>
    %58 = arith.mulf %22, %57 : vector<16x16x128xf32>
    %59 = vector.broadcast %56 : vector<1x1x128xf32> to vector<16x16x128xf32>
    %60 = arith.addf %58, %59 : vector<16x16x128xf32>
    %cst_46 = arith.constant 0.000000e+00 : f32
    %61 = vector.broadcast %cst_46 : f32 to vector<16x16x128xf32>
    %62 = arith.cmpf oge, %60, %61 : vector<16x16x128xf32>
    %cst_47 = arith.constant 0.00999999977 : f32
    %63 = vector.broadcast %cst_47 : f32 to vector<16x16x128xf32>
    %64 = arith.mulf %63, %60 : vector<16x16x128xf32>
    %65 = arith.select %62, %60, %64 : vector<16x16x128xi1>, vector<16x16x128xf32>
    %cst_48 = arith.constant 0.000000e+00 : f32
    %66 = vector.shape_cast %29 : vector<16x16x1xi1> to vector<16x16x1xi1>
    %67 = vector.broadcast %66 : vector<16x16x1xi1> to vector<16x16x128xi1>
    %68 = vector.broadcast %cst_48 : f32 to vector<16x16x128xf32>
    %69 = arith.select %67, %65, %68 : vector<16x16x128xi1>, vector<16x16x128xf32>
    %70 = arith.truncf %69 : vector<16x16x128xf32> to vector<16x16x128xbf16>
    %cst_49 = arith.constant 0.000000e+00 : bf16
    %71 = vector.broadcast %cst_49 : bf16 to vector<1x18x18x128xbf16>
    %c0_50 = arith.constant 0 : index
    %c0_51 = arith.constant 0 : index
    %c0_52 = arith.constant 0 : index
    %c0_53 = arith.constant 0 : index
    %72 = vector.load %arg4[%c0_50, %c0_51, %c0_52, %c0_53] : memref<1x18x18x128xbf16, #tpu.memory_space<vmem>>, vector<1x18x18x128xbf16>
    tpu.vector_store %arg4[%c0_50, %c0_51, %c0_52, %c0_53], %71 {strides = array<i32>} : memref<1x18x18x128xbf16, #tpu.memory_space<vmem>>, vector<1x18x18x128xbf16>,
    %c0_54 = arith.constant 0 : index
    %c1_55 = arith.constant 1 : index
    %c1_56 = arith.constant 1 : index
    %c0_57 = arith.constant 0 : index
    %73 = vector.load %arg4[%c0_54, %c1_55, %c1_56, %c0_57] : memref<1x18x18x128xbf16, #tpu.memory_space<vmem>>, vector<1x16x16x128xbf16>
    %74 = vector.shape_cast %73 : vector<1x16x16x128xbf16> to vector<16x16x128xbf16>
    %75 = vector.shape_cast %70 : vector<16x16x128xbf16> to vector<1x16x16x128xbf16>
    tpu.vector_store %arg4[%c0_54, %c1_55, %c1_56, %c0_57], %75 {strides = array<i32>} : memref<1x18x18x128xbf16, #tpu.memory_space<vmem>>, vector<1x16x16x128xbf16>,
    return
  }
  func.func @transform_0(%arg0: i32) -> (i32, i32, i32, i32) {
    %c0_i32 = arith.constant 0 : i32
    %c0_i32_0 = arith.constant 0 : i32
    %c0_i32_1 = arith.constant 0 : i32
    %c0_i32_2 = arith.constant 0 : i32
    return %arg0, %c0_i32, %c0_i32_0, %c0_i32_1 : i32, i32, i32, i32
  }
  func.func @transform_1(%arg0: i32) -> (i32, i32) {
    %c0_i32 = arith.constant 0 : i32
    %c0_i32_0 = arith.constant 0 : i32
    %c0_i32_1 = arith.constant 0 : i32
    return %c0_i32, %c0_i32_0 : i32, i32
  }
  func.func @transform_2(%arg0: i32) -> (i32, i32) {
    %c0_i32 = arith.constant 0 : i32
    %c0_i32_0 = arith.constant 0 : i32
    %c0_i32_1 = arith.constant 0 : i32
    return %c0_i32, %c0_i32_0 : i32, i32
  }
  func.func @transform_3(%arg0: i32) -> (i32, i32, i32, i32) {
    %c0_i32 = arith.constant 0 : i32
    %c0_i32_0 = arith.constant 0 : i32
    %c0_i32_1 = arith.constant 0 : i32
    %c0_i32_2 = arith.constant 0 : i32
    return %arg0, %c0_i32, %c0_i32_0, %c0_i32_1 : i32, i32, i32, i32
  }
}

module attributes {stable_mosaic.version = 11 : i64} {
  func.func @kernel(%arg0: i32, %arg1: memref<1x18x18x4xbf16, #tpu.memory_space<vmem>>, %arg2: memref<36x128xbf16, #tpu.memory_space<vmem>>, %arg3: memref<8x128xf32, #tpu.memory_space<vmem>>, %arg4: memref<1x18x18x128xbf16, #tpu.memory_space<vmem>>) attributes {dimension_semantics = [#tpu.dimension_semantics<parallel>], iteration_bounds = array<i64: 2>, scalar_prefetch = 0 : i64, scratch_operands = 0 : i64, tpu.core_type = #tpu.core_type<tc>, window_params = [{transform_indices = @transform_0, window_bounds = array<i64: 1, 18, 18, 4>}, {pipeline_mode = #tpu.pipeline_mode<synchronous>, transform_indices = @transform_1, window_bounds = array<i64: 36, 128>}, {pipeline_mode = #tpu.pipeline_mode<synchronous>, transform_indices = @transform_2, window_bounds = array<i64: 8, 128>}, {transform_indices = @transform_3, window_bounds = array<i64: 1, 18, 18, 128>}]} {
    %c0 = arith.constant 0 : index
    %c0_0 = arith.constant 0 : index
    %c0_1 = arith.constant 0 : index
    %c0_2 = arith.constant 0 : index
    %0 = vector.load %arg1[%c0, %c0_0, %c0_1, %c0_2] : memref<1x18x18x4xbf16, #tpu.memory_space<vmem>>, vector<1x16x16x4xbf16>
    %1 = vector.shape_cast %0 : vector<1x16x16x4xbf16> to vector<16x16x4xbf16>
    %c0_3 = arith.constant 0 : index
    %c0_4 = arith.constant 0 : index
    %c1 = arith.constant 1 : index
    %c0_5 = arith.constant 0 : index
    %2 = vector.load %arg1[%c0_3, %c0_4, %c1, %c0_5] : memref<1x18x18x4xbf16, #tpu.memory_space<vmem>>, vector<1x16x16x4xbf16>
    %3 = vector.shape_cast %2 : vector<1x16x16x4xbf16> to vector<16x16x4xbf16>
    %c0_6 = arith.constant 0 : index
    %c0_7 = arith.constant 0 : index
    %c2 = arith.constant 2 : index
    %c0_8 = arith.constant 0 : index
    %4 = vector.load %arg1[%c0_6, %c0_7, %c2, %c0_8] : memref<1x18x18x4xbf16, #tpu.memory_space<vmem>>, vector<1x16x16x4xbf16>
    %5 = vector.shape_cast %4 : vector<1x16x16x4xbf16> to vector<16x16x4xbf16>
    %c0_9 = arith.constant 0 : index
    %c1_10 = arith.constant 1 : index
    %c0_11 = arith.constant 0 : index
    %c0_12 = arith.constant 0 : index
    %6 = vector.load %arg1[%c0_9, %c1_10, %c0_11, %c0_12] : memref<1x18x18x4xbf16, #tpu.memory_space<vmem>>, vector<1x16x16x4xbf16>
    %7 = vector.shape_cast %6 : vector<1x16x16x4xbf16> to vector<16x16x4xbf16>
    %c0_13 = arith.constant 0 : index
    %c1_14 = arith.constant 1 : index
    %c1_15 = arith.constant 1 : index
    %c0_16 = arith.constant 0 : index
    %8 = vector.load %arg1[%c0_13, %c1_14, %c1_15, %c0_16] : memref<1x18x18x4xbf16, #tpu.memory_space<vmem>>, vector<1x16x16x4xbf16>
    %9 = vector.shape_cast %8 : vector<1x16x16x4xbf16> to vector<16x16x4xbf16>
    %c0_17 = arith.constant 0 : index
    %c1_18 = arith.constant 1 : index
    %c2_19 = arith.constant 2 : index
    %c0_20 = arith.constant 0 : index
    %10 = vector.load %arg1[%c0_17, %c1_18, %c2_19, %c0_20] : memref<1x18x18x4xbf16, #tpu.memory_space<vmem>>, vector<1x16x16x4xbf16>
    %11 = vector.shape_cast %10 : vector<1x16x16x4xbf16> to vector<16x16x4xbf16>
    %c0_21 = arith.constant 0 : index
    %c2_22 = arith.constant 2 : index
    %c0_23 = arith.constant 0 : index
    %c0_24 = arith.constant 0 : index
    %12 = vector.load %arg1[%c0_21, %c2_22, %c0_23, %c0_24] : memref<1x18x18x4xbf16, #tpu.memory_space<vmem>>, vector<1x16x16x4xbf16>
    %13 = vector.shape_cast %12 : vector<1x16x16x4xbf16> to vector<16x16x4xbf16>
    %c0_25 = arith.constant 0 : index
    %c2_26 = arith.constant 2 : index
    %c1_27 = arith.constant 1 : index
    %c0_28 = arith.constant 0 : index
    %14 = vector.load %arg1[%c0_25, %c2_26, %c1_27, %c0_28] : memref<1x18x18x4xbf16, #tpu.memory_space<vmem>>, vector<1x16x16x4xbf16>
    %15 = vector.shape_cast %14 : vector<1x16x16x4xbf16> to vector<16x16x4xbf16>
    %c0_29 = arith.constant 0 : index
    %c2_30 = arith.constant 2 : index
    %c2_31 = arith.constant 2 : index
    %c0_32 = arith.constant 0 : index
    %16 = vector.load %arg1[%c0_29, %c2_30, %c2_31, %c0_32] : memref<1x18x18x4xbf16, #tpu.memory_space<vmem>>, vector<1x16x16x4xbf16>
    %17 = vector.shape_cast %16 : vector<1x16x16x4xbf16> to vector<16x16x4xbf16>
    %18 = tpu.concatenate %1, %3, %5, %7, %9, %11, %13, %15, %17 in 2 : vector<16x16x4xbf16>, vector<16x16x4xbf16>, vector<16x16x4xbf16>, vector<16x16x4xbf16>, vector<16x16x4xbf16>, vector<16x16x4xbf16>, vector<16x16x4xbf16>, vector<16x16x4xbf16>, vector<16x16x4xbf16> -> vector<16x16x36xbf16>
    %19 = vector.shape_cast %18 : vector<16x16x36xbf16> to vector<256x36xbf16>
    %c0_33 = arith.constant 0 : index
    %c0_34 = arith.constant 0 : index
    %20 = vector.load %arg2[%c0_33, %c0_34] : memref<36x128xbf16, #tpu.memory_space<vmem>>, vector<36x128xbf16>
    %cst = arith.constant dense<0.000000e+00> : vector<256x128xf32>
    %21 = tpu.matmul %19, %20, %cst {dimension_numbers = #tpu.dot_dimension_numbers<[1], [0], [0], [1], [0, 0, 1, 1], [], []>} : vector<256x36xbf16>, vector<36x128xbf16>, vector<256x128xf32> -> vector<256x128xf32>
    %22 = vector.shape_cast %21 : vector<256x128xf32> to vector<16x16x128xf32>
    %23 = tpu.iota {dimensions = array<i32: 0>} : vector<16x16x1xi32>
    %24 = tpu.iota {dimensions = array<i32: 1>} : vector<16x16x1xi32>
    %c16_i32 = arith.constant 16 : i32
    %25 = vector.broadcast %c16_i32 : i32 to vector<16x16x1xi32>
    %26 = arith.cmpi slt, %23, %25 : vector<16x16x1xi32>
    %c16_i32_35 = arith.constant 16 : i32
    %27 = vector.broadcast %c16_i32_35 : i32 to vector<16x16x1xi32>
    %28 = arith.cmpi slt, %24, %27 : vector<16x16x1xi32>
    %29 = arith.andi %26, %28 : vector<16x16x1xi1>
    %cst_36 = arith.constant 0.000000e+00 : f32
    %30 = vector.shape_cast %29 : vector<16x16x1xi1> to vector<16x16x1xi1>
    %31 = vector.broadcast %30 : vector<16x16x1xi1> to vector<16x16x128xi1>
    %32 = vector.broadcast %cst_36 : f32 to vector<16x16x128xf32>
    %33 = arith.select %31, %22, %32 : vector<16x16x128xi1>, vector<16x16x128xf32>
    %34 = vector.shape_cast %33 : vector<16x16x128xf32> to vector<256x128xf32>
    %cst_37 = arith.constant dense<0.000000e+00> : vector<128xf32>
    %35 = vector.multi_reduction <add>, %34, %cst_37 [0] : vector<256x128xf32> to vector<128xf32>
    %36 = vector.shape_cast %35 : vector<128xf32> to vector<1x128xf32>
    %cst_38 = arith.constant 3.906250e-03 : f32
    %37 = vector.broadcast %cst_38 : f32 to vector<1x128xf32>
    %38 = arith.mulf %36, %37 : vector<1x128xf32>
    %39 = arith.mulf %34, %34 : vector<256x128xf32>
    %cst_39 = arith.constant dense<0.000000e+00> : vector<128xf32>
    %40 = vector.multi_reduction <add>, %39, %cst_39 [0] : vector<256x128xf32> to vector<128xf32>
    %41 = vector.shape_cast %40 : vector<128xf32> to vector<1x128xf32>
    %cst_40 = arith.constant 3.906250e-03 : f32
    %42 = vector.broadcast %cst_40 : f32 to vector<1x128xf32>
    %43 = arith.mulf %41, %42 : vector<1x128xf32>
    %44 = arith.mulf %38, %38 : vector<1x128xf32>
    %45 = arith.subf %43, %44 : vector<1x128xf32>
    %cst_41 = arith.constant 9.99999974E-6 : f32
    %46 = vector.broadcast %cst_41 : f32 to vector<1x128xf32>
    %47 = arith.addf %45, %46 : vector<1x128xf32>
    %48 = math.rsqrt %47 : vector<1x128xf32>
    %c0_42 = arith.constant 0 : index
    %c0_43 = arith.constant 0 : index
    %49 = vector.load %arg3[%c0_42, %c0_43] : memref<8x128xf32, #tpu.memory_space<vmem>>, vector<1x128xf32>
    %c1_44 = arith.constant 1 : index
    %c0_45 = arith.constant 0 : index
    %50 = vector.load %arg3[%c1_44, %c0_45] : memref<8x128xf32, #tpu.memory_space<vmem>>, vector<1x128xf32>
    %51 = arith.mulf %49, %48 : vector<1x128xf32>
    %52 = vector.shape_cast %51 : vector<1x128xf32> to vector<1x1x128xf32>
    %53 = arith.mulf %38, %49 : vector<1x128xf32>
    %54 = arith.mulf %53, %48 : vector<1x128xf32>
    %55 = arith.subf %50, %54 : vector<1x128xf32>
    %56 = vector.shape_cast %55 : vector<1x128xf32> to vector<1x1x128xf32>
    %57 = vector.broadcast %52 : vector<1x1x128xf32> to vector<16x16x128xf32>
    %58 = arith.mulf %22, %57 : vector<16x16x128xf32>
    %59 = vector.broadcast %56 : vector<1x1x128xf32> to vector<16x16x128xf32>
    %60 = arith.addf %58, %59 : vector<16x16x128xf32>
    %cst_46 = arith.constant 0.000000e+00 : f32
    %61 = vector.broadcast %cst_46 : f32 to vector<16x16x128xf32>
    %62 = arith.cmpf oge, %60, %61 : vector<16x16x128xf32>
    %cst_47 = arith.constant 0.00999999977 : f32
    %63 = vector.broadcast %cst_47 : f32 to vector<16x16x128xf32>
    %64 = arith.mulf %63, %60 : vector<16x16x128xf32>
    %65 = arith.select %62, %60, %64 : vector<16x16x128xi1>, vector<16x16x128xf32>
    %cst_48 = arith.constant 0.000000e+00 : f32
    %66 = vector.shape_cast %29 : vector<16x16x1xi1> to vector<16x16x1xi1>
    %67 = vector.broadcast %66 : vector<16x16x1xi1> to vector<16x16x128xi1>
    %68 = vector.broadcast %cst_48 : f32 to vector<16x16x128xf32>
    %69 = arith.select %67, %65, %68 : vector<16x16x128xi1>, vector<16x16x128xf32>
    %70 = arith.truncf %69 : vector<16x16x128xf32> to vector<16x16x128xbf16>
    %cst_49 = arith.constant 0.000000e+00 : bf16
    %71 = vector.broadcast %cst_49 : bf16 to vector<1x18x18x128xbf16>
    %c0_50 = arith.constant 0 : index
    %c0_51 = arith.constant 0 : index
    %c0_52 = arith.constant 0 : index
    %c0_53 = arith.constant 0 : index
    %72 = vector.load %arg4[%c0_50, %c0_51, %c0_52, %c0_53] : memref<1x18x18x128xbf16, #tpu.memory_space<vmem>>, vector<1x18x18x128xbf16>
    tpu.vector_store %arg4[%c0_50, %c0_51, %c0_52, %c0_53], %71 {strides = array<i32>} : memref<1x18x18x128xbf16, #tpu.memory_space<vmem>>, vector<1x18x18x128xbf16>,
    %c0_54 = arith.constant 0 : index
    %c1_55 = arith.constant 1 : index
    %c1_56 = arith.constant 1 : index
    %c0_57 = arith.constant 0 : index
    %73 = vector.load %arg4[%c0_54, %c1_55, %c1_56, %c0_57] : memref<1x18x18x128xbf16, #tpu.memory_space<vmem>>, vector<1x16x16x128xbf16>
    %74 = vector.shape_cast %73 : vector<1x16x16x128xbf16> to vector<16x16x128xbf16>
    %75 = vector.shape_cast %70 : vector<16x16x128xbf16> to vector<1x16x16x128xbf16>
    tpu.vector_store %arg4[%c0_54, %c1_55, %c1_56, %c0_57], %75 {strides = array<i32>} : memref<1x18x18x128xbf16, #tpu.memory_space<vmem>>, vector<1x16x16x128xbf16>,
    return
  }
  func.func @transform_0(%arg0: i32) -> (i32, i32, i32, i32) {
    %c0_i32 = arith.constant 0 : i32
    %c0_i32_0 = arith.constant 0 : i32
    %c0_i32_1 = arith.constant 0 : i32
    %c0_i32_2 = arith.constant 0 : i32
    return %arg0, %c0_i32, %c0_i32_0, %c0_i32_1 : i32, i32, i32, i32
  }
  func.func @transform_1(%arg0: i32) -> (i32, i32) {
    %c0_i32 = arith.constant 0 : i32
    %c0_i32_0 = arith.constant 0 : i32
    %c0_i32_1 = arith.constant 0 : i32
    return %c0_i32, %c0_i32_0 : i32, i32
  }
  func.func @transform_2(%arg0: i32) -> (i32, i32) {
    %c0_i32 = arith.constant 0 : i32
    %c0_i32_0 = arith.constant 0 : i32
    %c0_i32_1 = arith.constant 0 : i32
    return %c0_i32, %c0_i32_0 : i32, i32
  }
  func.func @transform_3(%arg0: i32) -> (i32, i32, i32, i32) {
    %c0_i32 = arith.constant 0 : i32
    %c0_i32_0 = arith.constant 0 : i32
    %c0_i32_1 = arith.constant 0 : i32
    %c0_i32_2 = arith.constant 0 : i32
    return %arg0, %c0_i32, %c0_i32_0, %c0_i32_1 : i32, i32, i32, i32
  }
}

module attributes {stable_mosaic.version = 11 : i64} {
  func.func @kernel(%arg0: i32, %arg1: memref<4x9x9x128xbf16, #tpu.memory_space<vmem>>, %arg2: memref<72x128xbf16, #tpu.memory_space<vmem>>, %arg3: memref<8x128xf32, #tpu.memory_space<vmem>>, %arg4: memref<1x10x10x128xbf16, #tpu.memory_space<vmem>>) attributes {dimension_semantics = [#tpu.dimension_semantics<parallel>], iteration_bounds = array<i64: 2>, scalar_prefetch = 0 : i64, scratch_operands = 0 : i64, tpu.core_type = #tpu.core_type<tc>, window_params = [{transform_indices = @transform_0, window_bounds = array<i64: 4, 9, 9, 128>}, {pipeline_mode = #tpu.pipeline_mode<synchronous>, transform_indices = @transform_1, window_bounds = array<i64: 72, 128>}, {pipeline_mode = #tpu.pipeline_mode<synchronous>, transform_indices = @transform_2, window_bounds = array<i64: 8, 128>}, {transform_indices = @transform_3, window_bounds = array<i64: 1, 10, 10, 128>}]} {
    %c0 = arith.constant 0 : index
    %c0_0 = arith.constant 0 : index
    %c0_1 = arith.constant 0 : index
    %c0_2 = arith.constant 0 : index
    %0 = vector.load %arg1[%c0, %c0_0, %c0_1, %c0_2] : memref<4x9x9x128xbf16, #tpu.memory_space<vmem>>, vector<1x8x8x8xbf16>
    %1 = vector.shape_cast %0 : vector<1x8x8x8xbf16> to vector<8x8x8xbf16>
    %c1 = arith.constant 1 : index
    %c0_3 = arith.constant 0 : index
    %c0_4 = arith.constant 0 : index
    %c0_5 = arith.constant 0 : index
    %2 = vector.load %arg1[%c1, %c0_3, %c0_4, %c0_5] : memref<4x9x9x128xbf16, #tpu.memory_space<vmem>>, vector<1x8x8x8xbf16>
    %3 = vector.shape_cast %2 : vector<1x8x8x8xbf16> to vector<8x8x8xbf16>
    %c0_6 = arith.constant 0 : index
    %c0_7 = arith.constant 0 : index
    %c1_8 = arith.constant 1 : index
    %c0_9 = arith.constant 0 : index
    %4 = vector.load %arg1[%c0_6, %c0_7, %c1_8, %c0_9] : memref<4x9x9x128xbf16, #tpu.memory_space<vmem>>, vector<1x8x8x8xbf16>
    %5 = vector.shape_cast %4 : vector<1x8x8x8xbf16> to vector<8x8x8xbf16>
    %c2 = arith.constant 2 : index
    %c0_10 = arith.constant 0 : index
    %c0_11 = arith.constant 0 : index
    %c0_12 = arith.constant 0 : index
    %6 = vector.load %arg1[%c2, %c0_10, %c0_11, %c0_12] : memref<4x9x9x128xbf16, #tpu.memory_space<vmem>>, vector<1x8x8x8xbf16>
    %7 = vector.shape_cast %6 : vector<1x8x8x8xbf16> to vector<8x8x8xbf16>
    %c3 = arith.constant 3 : index
    %c0_13 = arith.constant 0 : index
    %c0_14 = arith.constant 0 : index
    %c0_15 = arith.constant 0 : index
    %8 = vector.load %arg1[%c3, %c0_13, %c0_14, %c0_15] : memref<4x9x9x128xbf16, #tpu.memory_space<vmem>>, vector<1x8x8x8xbf16>
    %9 = vector.shape_cast %8 : vector<1x8x8x8xbf16> to vector<8x8x8xbf16>
    %c2_16 = arith.constant 2 : index
    %c0_17 = arith.constant 0 : index
    %c1_18 = arith.constant 1 : index
    %c0_19 = arith.constant 0 : index
    %10 = vector.load %arg1[%c2_16, %c0_17, %c1_18, %c0_19] : memref<4x9x9x128xbf16, #tpu.memory_space<vmem>>, vector<1x8x8x8xbf16>
    %11 = vector.shape_cast %10 : vector<1x8x8x8xbf16> to vector<8x8x8xbf16>
    %c0_20 = arith.constant 0 : index
    %c1_21 = arith.constant 1 : index
    %c0_22 = arith.constant 0 : index
    %c0_23 = arith.constant 0 : index
    %12 = vector.load %arg1[%c0_20, %c1_21, %c0_22, %c0_23] : memref<4x9x9x128xbf16, #tpu.memory_space<vmem>>, vector<1x8x8x8xbf16>
    %13 = vector.shape_cast %12 : vector<1x8x8x8xbf16> to vector<8x8x8xbf16>
    %c1_24 = arith.constant 1 : index
    %c1_25 = arith.constant 1 : index
    %c0_26 = arith.constant 0 : index
    %c0_27 = arith.constant 0 : index
    %14 = vector.load %arg1[%c1_24, %c1_25, %c0_26, %c0_27] : memref<4x9x9x128xbf16, #tpu.memory_space<vmem>>, vector<1x8x8x8xbf16>
    %15 = vector.shape_cast %14 : vector<1x8x8x8xbf16> to vector<8x8x8xbf16>
    %c0_28 = arith.constant 0 : index
    %c1_29 = arith.constant 1 : index
    %c1_30 = arith.constant 1 : index
    %c0_31 = arith.constant 0 : index
    %16 = vector.load %arg1[%c0_28, %c1_29, %c1_30, %c0_31] : memref<4x9x9x128xbf16, #tpu.memory_space<vmem>>, vector<1x8x8x8xbf16>
    %17 = vector.shape_cast %16 : vector<1x8x8x8xbf16> to vector<8x8x8xbf16>
    %18 = tpu.concatenate %1, %3, %5, %7, %9, %11, %13, %15, %17 in 2 : vector<8x8x8xbf16>, vector<8x8x8xbf16>, vector<8x8x8xbf16>, vector<8x8x8xbf16>, vector<8x8x8xbf16>, vector<8x8x8xbf16>, vector<8x8x8xbf16>, vector<8x8x8xbf16>, vector<8x8x8xbf16> -> vector<8x8x72xbf16>
    %19 = vector.shape_cast %18 : vector<8x8x72xbf16> to vector<64x72xbf16>
    %c0_32 = arith.constant 0 : index
    %c0_33 = arith.constant 0 : index
    %20 = vector.load %arg2[%c0_32, %c0_33] : memref<72x128xbf16, #tpu.memory_space<vmem>>, vector<72x128xbf16>
    %cst = arith.constant dense<0.000000e+00> : vector<64x128xf32>
    %21 = tpu.matmul %19, %20, %cst {dimension_numbers = #tpu.dot_dimension_numbers<[1], [0], [0], [1], [0, 0, 1, 1], [], []>} : vector<64x72xbf16>, vector<72x128xbf16>, vector<64x128xf32> -> vector<64x128xf32>
    %22 = vector.shape_cast %21 : vector<64x128xf32> to vector<8x8x128xf32>
    %23 = tpu.iota {dimensions = array<i32: 0>} : vector<8x8x1xi32>
    %24 = tpu.iota {dimensions = array<i32: 1>} : vector<8x8x1xi32>
    %c8_i32 = arith.constant 8 : i32
    %25 = vector.broadcast %c8_i32 : i32 to vector<8x8x1xi32>
    %26 = arith.cmpi slt, %23, %25 : vector<8x8x1xi32>
    %c8_i32_34 = arith.constant 8 : i32
    %27 = vector.broadcast %c8_i32_34 : i32 to vector<8x8x1xi32>
    %28 = arith.cmpi slt, %24, %27 : vector<8x8x1xi32>
    %29 = arith.andi %26, %28 : vector<8x8x1xi1>
    %cst_35 = arith.constant 0.000000e+00 : f32
    %30 = vector.shape_cast %29 : vector<8x8x1xi1> to vector<8x8x1xi1>
    %31 = vector.broadcast %30 : vector<8x8x1xi1> to vector<8x8x128xi1>
    %32 = vector.broadcast %cst_35 : f32 to vector<8x8x128xf32>
    %33 = arith.select %31, %22, %32 : vector<8x8x128xi1>, vector<8x8x128xf32>
    %34 = vector.shape_cast %33 : vector<8x8x128xf32> to vector<64x128xf32>
    %cst_36 = arith.constant dense<0.000000e+00> : vector<128xf32>
    %35 = vector.multi_reduction <add>, %34, %cst_36 [0] : vector<64x128xf32> to vector<128xf32>
    %36 = vector.shape_cast %35 : vector<128xf32> to vector<1x128xf32>
    %cst_37 = arith.constant 1.562500e-02 : f32
    %37 = vector.broadcast %cst_37 : f32 to vector<1x128xf32>
    %38 = arith.mulf %36, %37 : vector<1x128xf32>
    %39 = arith.mulf %34, %34 : vector<64x128xf32>
    %cst_38 = arith.constant dense<0.000000e+00> : vector<128xf32>
    %40 = vector.multi_reduction <add>, %39, %cst_38 [0] : vector<64x128xf32> to vector<128xf32>
    %41 = vector.shape_cast %40 : vector<128xf32> to vector<1x128xf32>
    %cst_39 = arith.constant 1.562500e-02 : f32
    %42 = vector.broadcast %cst_39 : f32 to vector<1x128xf32>
    %43 = arith.mulf %41, %42 : vector<1x128xf32>
    %44 = arith.mulf %38, %38 : vector<1x128xf32>
    %45 = arith.subf %43, %44 : vector<1x128xf32>
    %cst_40 = arith.constant 9.99999974E-6 : f32
    %46 = vector.broadcast %cst_40 : f32 to vector<1x128xf32>
    %47 = arith.addf %45, %46 : vector<1x128xf32>
    %48 = math.rsqrt %47 : vector<1x128xf32>
    %c0_41 = arith.constant 0 : index
    %c0_42 = arith.constant 0 : index
    %49 = vector.load %arg3[%c0_41, %c0_42] : memref<8x128xf32, #tpu.memory_space<vmem>>, vector<1x128xf32>
    %c1_43 = arith.constant 1 : index
    %c0_44 = arith.constant 0 : index
    %50 = vector.load %arg3[%c1_43, %c0_44] : memref<8x128xf32, #tpu.memory_space<vmem>>, vector<1x128xf32>
    %51 = arith.mulf %49, %48 : vector<1x128xf32>
    %52 = vector.shape_cast %51 : vector<1x128xf32> to vector<1x1x128xf32>
    %53 = arith.mulf %38, %49 : vector<1x128xf32>
    %54 = arith.mulf %53, %48 : vector<1x128xf32>
    %55 = arith.subf %50, %54 : vector<1x128xf32>
    %56 = vector.shape_cast %55 : vector<1x128xf32> to vector<1x1x128xf32>
    %57 = vector.broadcast %52 : vector<1x1x128xf32> to vector<8x8x128xf32>
    %58 = arith.mulf %22, %57 : vector<8x8x128xf32>
    %59 = vector.broadcast %56 : vector<1x1x128xf32> to vector<8x8x128xf32>
    %60 = arith.addf %58, %59 : vector<8x8x128xf32>
    %cst_45 = arith.constant 0.000000e+00 : f32
    %61 = vector.broadcast %cst_45 : f32 to vector<8x8x128xf32>
    %62 = arith.cmpf oge, %60, %61 : vector<8x8x128xf32>
    %cst_46 = arith.constant 0.00999999977 : f32
    %63 = vector.broadcast %cst_46 : f32 to vector<8x8x128xf32>
    %64 = arith.mulf %63, %60 : vector<8x8x128xf32>
    %65 = arith.select %62, %60, %64 : vector<8x8x128xi1>, vector<8x8x128xf32>
    %cst_47 = arith.constant 0.000000e+00 : f32
    %66 = vector.shape_cast %29 : vector<8x8x1xi1> to vector<8x8x1xi1>
    %67 = vector.broadcast %66 : vector<8x8x1xi1> to vector<8x8x128xi1>
    %68 = vector.broadcast %cst_47 : f32 to vector<8x8x128xf32>
    %69 = arith.select %67, %65, %68 : vector<8x8x128xi1>, vector<8x8x128xf32>
    %70 = arith.truncf %69 : vector<8x8x128xf32> to vector<8x8x128xbf16>
    %cst_48 = arith.constant 0.000000e+00 : bf16
    %71 = vector.broadcast %cst_48 : bf16 to vector<1x10x10x128xbf16>
    %c0_49 = arith.constant 0 : index
    %c0_50 = arith.constant 0 : index
    %c0_51 = arith.constant 0 : index
    %c0_52 = arith.constant 0 : index
    %72 = vector.load %arg4[%c0_49, %c0_50, %c0_51, %c0_52] : memref<1x10x10x128xbf16, #tpu.memory_space<vmem>>, vector<1x10x10x128xbf16>
    tpu.vector_store %arg4[%c0_49, %c0_50, %c0_51, %c0_52], %71 {strides = array<i32>} : memref<1x10x10x128xbf16, #tpu.memory_space<vmem>>, vector<1x10x10x128xbf16>,
    %c0_53 = arith.constant 0 : index
    %c1_54 = arith.constant 1 : index
    %c1_55 = arith.constant 1 : index
    %c0_56 = arith.constant 0 : index
    %73 = vector.load %arg4[%c0_53, %c1_54, %c1_55, %c0_56] : memref<1x10x10x128xbf16, #tpu.memory_space<vmem>>, vector<1x8x8x128xbf16>
    %74 = vector.shape_cast %73 : vector<1x8x8x128xbf16> to vector<8x8x128xbf16>
    %75 = vector.shape_cast %70 : vector<8x8x128xbf16> to vector<1x8x8x128xbf16>
    tpu.vector_store %arg4[%c0_53, %c1_54, %c1_55, %c0_56], %75 {strides = array<i32>} : memref<1x10x10x128xbf16, #tpu.memory_space<vmem>>, vector<1x8x8x128xbf16>,
    return
  }
  func.func @transform_0(%arg0: i32) -> (i32, i32, i32, i32) {
    %c0_i32 = arith.constant 0 : i32
    %c0_i32_0 = arith.constant 0 : i32
    %c0_i32_1 = arith.constant 0 : i32
    %c0_i32_2 = arith.constant 0 : i32
    return %arg0, %c0_i32, %c0_i32_0, %c0_i32_1 : i32, i32, i32, i32
  }
  func.func @transform_1(%arg0: i32) -> (i32, i32) {
    %c0_i32 = arith.constant 0 : i32
    %c0_i32_0 = arith.constant 0 : i32
    %c0_i32_1 = arith.constant 0 : i32
    return %c0_i32, %c0_i32_0 : i32, i32
  }
  func.func @transform_2(%arg0: i32) -> (i32, i32) {
    %c0_i32 = arith.constant 0 : i32
    %c0_i32_0 = arith.constant 0 : i32
    %c0_i32_1 = arith.constant 0 : i32
    return %c0_i32, %c0_i32_0 : i32, i32
  }
  func.func @transform_3(%arg0: i32) -> (i32, i32, i32, i32) {
    %c0_i32 = arith.constant 0 : i32
    %c0_i32_0 = arith.constant 0 : i32
    %c0_i32_1 = arith.constant 0 : i32
    %c0_i32_2 = arith.constant 0 : i32
    return %arg0, %c0_i32, %c0_i32_0, %c0_i32_1 : i32, i32, i32, i32
  }
}

module attributes {stable_mosaic.version = 11 : i64} {
  func.func @kernel(%arg0: i32, %arg1: memref<1x10x10x128xbf16, #tpu.memory_space<vmem>>, %arg2: memref<144x128xbf16, #tpu.memory_space<vmem>>, %arg3: memref<8x128xf32, #tpu.memory_space<vmem>>, %arg4: memref<1x10x10x128xbf16, #tpu.memory_space<vmem>>) attributes {dimension_semantics = [#tpu.dimension_semantics<parallel>], iteration_bounds = array<i64: 2>, scalar_prefetch = 0 : i64, scratch_operands = 0 : i64, tpu.core_type = #tpu.core_type<tc>, window_params = [{transform_indices = @transform_0, window_bounds = array<i64: 1, 10, 10, 128>}, {pipeline_mode = #tpu.pipeline_mode<synchronous>, transform_indices = @transform_1, window_bounds = array<i64: 144, 128>}, {pipeline_mode = #tpu.pipeline_mode<synchronous>, transform_indices = @transform_2, window_bounds = array<i64: 8, 128>}, {transform_indices = @transform_3, window_bounds = array<i64: 1, 10, 10, 128>}]} {
    %c0 = arith.constant 0 : index
    %c0_0 = arith.constant 0 : index
    %c0_1 = arith.constant 0 : index
    %c0_2 = arith.constant 0 : index
    %0 = vector.load %arg1[%c0, %c0_0, %c0_1, %c0_2] : memref<1x10x10x128xbf16, #tpu.memory_space<vmem>>, vector<1x8x8x16xbf16>
    %1 = vector.shape_cast %0 : vector<1x8x8x16xbf16> to vector<8x8x16xbf16>
    %c0_3 = arith.constant 0 : index
    %c0_4 = arith.constant 0 : index
    %c1 = arith.constant 1 : index
    %c0_5 = arith.constant 0 : index
    %2 = vector.load %arg1[%c0_3, %c0_4, %c1, %c0_5] : memref<1x10x10x128xbf16, #tpu.memory_space<vmem>>, vector<1x8x8x16xbf16>
    %3 = vector.shape_cast %2 : vector<1x8x8x16xbf16> to vector<8x8x16xbf16>
    %c0_6 = arith.constant 0 : index
    %c0_7 = arith.constant 0 : index
    %c2 = arith.constant 2 : index
    %c0_8 = arith.constant 0 : index
    %4 = vector.load %arg1[%c0_6, %c0_7, %c2, %c0_8] : memref<1x10x10x128xbf16, #tpu.memory_space<vmem>>, vector<1x8x8x16xbf16>
    %5 = vector.shape_cast %4 : vector<1x8x8x16xbf16> to vector<8x8x16xbf16>
    %c0_9 = arith.constant 0 : index
    %c1_10 = arith.constant 1 : index
    %c0_11 = arith.constant 0 : index
    %c0_12 = arith.constant 0 : index
    %6 = vector.load %arg1[%c0_9, %c1_10, %c0_11, %c0_12] : memref<1x10x10x128xbf16, #tpu.memory_space<vmem>>, vector<1x8x8x16xbf16>
    %7 = vector.shape_cast %6 : vector<1x8x8x16xbf16> to vector<8x8x16xbf16>
    %c0_13 = arith.constant 0 : index
    %c1_14 = arith.constant 1 : index
    %c1_15 = arith.constant 1 : index
    %c0_16 = arith.constant 0 : index
    %8 = vector.load %arg1[%c0_13, %c1_14, %c1_15, %c0_16] : memref<1x10x10x128xbf16, #tpu.memory_space<vmem>>, vector<1x8x8x16xbf16>
    %9 = vector.shape_cast %8 : vector<1x8x8x16xbf16> to vector<8x8x16xbf16>
    %c0_17 = arith.constant 0 : index
    %c1_18 = arith.constant 1 : index
    %c2_19 = arith.constant 2 : index
    %c0_20 = arith.constant 0 : index
    %10 = vector.load %arg1[%c0_17, %c1_18, %c2_19, %c0_20] : memref<1x10x10x128xbf16, #tpu.memory_space<vmem>>, vector<1x8x8x16xbf16>
    %11 = vector.shape_cast %10 : vector<1x8x8x16xbf16> to vector<8x8x16xbf16>
    %c0_21 = arith.constant 0 : index
    %c2_22 = arith.constant 2 : index
    %c0_23 = arith.constant 0 : index
    %c0_24 = arith.constant 0 : index
    %12 = vector.load %arg1[%c0_21, %c2_22, %c0_23, %c0_24] : memref<1x10x10x128xbf16, #tpu.memory_space<vmem>>, vector<1x8x8x16xbf16>
    %13 = vector.shape_cast %12 : vector<1x8x8x16xbf16> to vector<8x8x16xbf16>
    %c0_25 = arith.constant 0 : index
    %c2_26 = arith.constant 2 : index
    %c1_27 = arith.constant 1 : index
    %c0_28 = arith.constant 0 : index
    %14 = vector.load %arg1[%c0_25, %c2_26, %c1_27, %c0_28] : memref<1x10x10x128xbf16, #tpu.memory_space<vmem>>, vector<1x8x8x16xbf16>
    %15 = vector.shape_cast %14 : vector<1x8x8x16xbf16> to vector<8x8x16xbf16>
    %c0_29 = arith.constant 0 : index
    %c2_30 = arith.constant 2 : index
    %c2_31 = arith.constant 2 : index
    %c0_32 = arith.constant 0 : index
    %16 = vector.load %arg1[%c0_29, %c2_30, %c2_31, %c0_32] : memref<1x10x10x128xbf16, #tpu.memory_space<vmem>>, vector<1x8x8x16xbf16>
    %17 = vector.shape_cast %16 : vector<1x8x8x16xbf16> to vector<8x8x16xbf16>
    %18 = tpu.concatenate %1, %3, %5, %7, %9, %11, %13, %15, %17 in 2 : vector<8x8x16xbf16>, vector<8x8x16xbf16>, vector<8x8x16xbf16>, vector<8x8x16xbf16>, vector<8x8x16xbf16>, vector<8x8x16xbf16>, vector<8x8x16xbf16>, vector<8x8x16xbf16>, vector<8x8x16xbf16> -> vector<8x8x144xbf16>
    %19 = vector.shape_cast %18 : vector<8x8x144xbf16> to vector<64x144xbf16>
    %c0_33 = arith.constant 0 : index
    %c0_34 = arith.constant 0 : index
    %20 = vector.load %arg2[%c0_33, %c0_34] : memref<144x128xbf16, #tpu.memory_space<vmem>>, vector<144x128xbf16>
    %cst = arith.constant dense<0.000000e+00> : vector<64x128xf32>
    %21 = tpu.matmul %19, %20, %cst {dimension_numbers = #tpu.dot_dimension_numbers<[1], [0], [0], [1], [0, 0, 1, 1], [], []>} : vector<64x144xbf16>, vector<144x128xbf16>, vector<64x128xf32> -> vector<64x128xf32>
    %22 = vector.shape_cast %21 : vector<64x128xf32> to vector<8x8x128xf32>
    %23 = tpu.iota {dimensions = array<i32: 0>} : vector<8x8x1xi32>
    %24 = tpu.iota {dimensions = array<i32: 1>} : vector<8x8x1xi32>
    %c8_i32 = arith.constant 8 : i32
    %25 = vector.broadcast %c8_i32 : i32 to vector<8x8x1xi32>
    %26 = arith.cmpi slt, %23, %25 : vector<8x8x1xi32>
    %c8_i32_35 = arith.constant 8 : i32
    %27 = vector.broadcast %c8_i32_35 : i32 to vector<8x8x1xi32>
    %28 = arith.cmpi slt, %24, %27 : vector<8x8x1xi32>
    %29 = arith.andi %26, %28 : vector<8x8x1xi1>
    %cst_36 = arith.constant 0.000000e+00 : f32
    %30 = vector.shape_cast %29 : vector<8x8x1xi1> to vector<8x8x1xi1>
    %31 = vector.broadcast %30 : vector<8x8x1xi1> to vector<8x8x128xi1>
    %32 = vector.broadcast %cst_36 : f32 to vector<8x8x128xf32>
    %33 = arith.select %31, %22, %32 : vector<8x8x128xi1>, vector<8x8x128xf32>
    %34 = vector.shape_cast %33 : vector<8x8x128xf32> to vector<64x128xf32>
    %cst_37 = arith.constant dense<0.000000e+00> : vector<128xf32>
    %35 = vector.multi_reduction <add>, %34, %cst_37 [0] : vector<64x128xf32> to vector<128xf32>
    %36 = vector.shape_cast %35 : vector<128xf32> to vector<1x128xf32>
    %cst_38 = arith.constant 1.562500e-02 : f32
    %37 = vector.broadcast %cst_38 : f32 to vector<1x128xf32>
    %38 = arith.mulf %36, %37 : vector<1x128xf32>
    %39 = arith.mulf %34, %34 : vector<64x128xf32>
    %cst_39 = arith.constant dense<0.000000e+00> : vector<128xf32>
    %40 = vector.multi_reduction <add>, %39, %cst_39 [0] : vector<64x128xf32> to vector<128xf32>
    %41 = vector.shape_cast %40 : vector<128xf32> to vector<1x128xf32>
    %cst_40 = arith.constant 1.562500e-02 : f32
    %42 = vector.broadcast %cst_40 : f32 to vector<1x128xf32>
    %43 = arith.mulf %41, %42 : vector<1x128xf32>
    %44 = arith.mulf %38, %38 : vector<1x128xf32>
    %45 = arith.subf %43, %44 : vector<1x128xf32>
    %cst_41 = arith.constant 9.99999974E-6 : f32
    %46 = vector.broadcast %cst_41 : f32 to vector<1x128xf32>
    %47 = arith.addf %45, %46 : vector<1x128xf32>
    %48 = math.rsqrt %47 : vector<1x128xf32>
    %c0_42 = arith.constant 0 : index
    %c0_43 = arith.constant 0 : index
    %49 = vector.load %arg3[%c0_42, %c0_43] : memref<8x128xf32, #tpu.memory_space<vmem>>, vector<1x128xf32>
    %c1_44 = arith.constant 1 : index
    %c0_45 = arith.constant 0 : index
    %50 = vector.load %arg3[%c1_44, %c0_45] : memref<8x128xf32, #tpu.memory_space<vmem>>, vector<1x128xf32>
    %51 = arith.mulf %49, %48 : vector<1x128xf32>
    %52 = vector.shape_cast %51 : vector<1x128xf32> to vector<1x1x128xf32>
    %53 = arith.mulf %38, %49 : vector<1x128xf32>
    %54 = arith.mulf %53, %48 : vector<1x128xf32>
    %55 = arith.subf %50, %54 : vector<1x128xf32>
    %56 = vector.shape_cast %55 : vector<1x128xf32> to vector<1x1x128xf32>
    %57 = vector.broadcast %52 : vector<1x1x128xf32> to vector<8x8x128xf32>
    %58 = arith.mulf %22, %57 : vector<8x8x128xf32>
    %59 = vector.broadcast %56 : vector<1x1x128xf32> to vector<8x8x128xf32>
    %60 = arith.addf %58, %59 : vector<8x8x128xf32>
    %cst_46 = arith.constant 0.000000e+00 : f32
    %61 = vector.broadcast %cst_46 : f32 to vector<8x8x128xf32>
    %62 = arith.cmpf oge, %60, %61 : vector<8x8x128xf32>
    %cst_47 = arith.constant 0.00999999977 : f32
    %63 = vector.broadcast %cst_47 : f32 to vector<8x8x128xf32>
    %64 = arith.mulf %63, %60 : vector<8x8x128xf32>
    %65 = arith.select %62, %60, %64 : vector<8x8x128xi1>, vector<8x8x128xf32>
    %cst_48 = arith.constant 0.000000e+00 : f32
    %66 = vector.shape_cast %29 : vector<8x8x1xi1> to vector<8x8x1xi1>
    %67 = vector.broadcast %66 : vector<8x8x1xi1> to vector<8x8x128xi1>
    %68 = vector.broadcast %cst_48 : f32 to vector<8x8x128xf32>
    %69 = arith.select %67, %65, %68 : vector<8x8x128xi1>, vector<8x8x128xf32>
    %70 = arith.truncf %69 : vector<8x8x128xf32> to vector<8x8x128xbf16>
    %cst_49 = arith.constant 0.000000e+00 : bf16
    %71 = vector.broadcast %cst_49 : bf16 to vector<1x10x10x128xbf16>
    %c0_50 = arith.constant 0 : index
    %c0_51 = arith.constant 0 : index
    %c0_52 = arith.constant 0 : index
    %c0_53 = arith.constant 0 : index
    %72 = vector.load %arg4[%c0_50, %c0_51, %c0_52, %c0_53] : memref<1x10x10x128xbf16, #tpu.memory_space<vmem>>, vector<1x10x10x128xbf16>
    tpu.vector_store %arg4[%c0_50, %c0_51, %c0_52, %c0_53], %71 {strides = array<i32>} : memref<1x10x10x128xbf16, #tpu.memory_space<vmem>>, vector<1x10x10x128xbf16>,
    %c0_54 = arith.constant 0 : index
    %c1_55 = arith.constant 1 : index
    %c1_56 = arith.constant 1 : index
    %c0_57 = arith.constant 0 : index
    %73 = vector.load %arg4[%c0_54, %c1_55, %c1_56, %c0_57] : memref<1x10x10x128xbf16, #tpu.memory_space<vmem>>, vector<1x8x8x128xbf16>
    %74 = vector.shape_cast %73 : vector<1x8x8x128xbf16> to vector<8x8x128xbf16>
    %75 = vector.shape_cast %70 : vector<8x8x128xbf16> to vector<1x8x8x128xbf16>
    tpu.vector_store %arg4[%c0_54, %c1_55, %c1_56, %c0_57], %75 {strides = array<i32>} : memref<1x10x10x128xbf16, #tpu.memory_space<vmem>>, vector<1x8x8x128xbf16>,
    return
  }
  func.func @transform_0(%arg0: i32) -> (i32, i32, i32, i32) {
    %c0_i32 = arith.constant 0 : i32
    %c0_i32_0 = arith.constant 0 : i32
    %c0_i32_1 = arith.constant 0 : i32
    %c0_i32_2 = arith.constant 0 : i32
    return %arg0, %c0_i32, %c0_i32_0, %c0_i32_1 : i32, i32, i32, i32
  }
  func.func @transform_1(%arg0: i32) -> (i32, i32) {
    %c0_i32 = arith.constant 0 : i32
    %c0_i32_0 = arith.constant 0 : i32
    %c0_i32_1 = arith.constant 0 : i32
    return %c0_i32, %c0_i32_0 : i32, i32
  }
  func.func @transform_2(%arg0: i32) -> (i32, i32) {
    %c0_i32 = arith.constant 0 : i32
    %c0_i32_0 = arith.constant 0 : i32
    %c0_i32_1 = arith.constant 0 : i32
    return %c0_i32, %c0_i32_0 : i32, i32
  }
  func.func @transform_3(%arg0: i32) -> (i32, i32, i32, i32) {
    %c0_i32 = arith.constant 0 : i32
    %c0_i32_0 = arith.constant 0 : i32
    %c0_i32_1 = arith.constant 0 : i32
    %c0_i32_2 = arith.constant 0 : i32
    return %arg0, %c0_i32, %c0_i32_0, %c0_i32_1 : i32, i32, i32, i32
  }
}

module attributes {stable_mosaic.version = 11 : i64} {
  func.func @kernel(%arg0: i32, %arg1: memref<4x5x9x128xbf16, #tpu.memory_space<vmem>>, %arg2: memref<144x128xbf16, #tpu.memory_space<vmem>>, %arg3: memref<8x128xf32, #tpu.memory_space<vmem>>, %arg4: memref<1x6x10x128xbf16, #tpu.memory_space<vmem>>) attributes {dimension_semantics = [#tpu.dimension_semantics<parallel>], iteration_bounds = array<i64: 2>, scalar_prefetch = 0 : i64, scratch_operands = 0 : i64, tpu.core_type = #tpu.core_type<tc>, window_params = [{transform_indices = @transform_0, window_bounds = array<i64: 4, 5, 9, 128>}, {pipeline_mode = #tpu.pipeline_mode<synchronous>, transform_indices = @transform_1, window_bounds = array<i64: 144, 128>}, {pipeline_mode = #tpu.pipeline_mode<synchronous>, transform_indices = @transform_2, window_bounds = array<i64: 8, 128>}, {transform_indices = @transform_3, window_bounds = array<i64: 1, 6, 10, 128>}]} {
    %c0 = arith.constant 0 : index
    %c0_0 = arith.constant 0 : index
    %c0_1 = arith.constant 0 : index
    %c0_2 = arith.constant 0 : index
    %0 = vector.load %arg1[%c0, %c0_0, %c0_1, %c0_2] : memref<4x5x9x128xbf16, #tpu.memory_space<vmem>>, vector<1x4x8x16xbf16>
    %1 = vector.shape_cast %0 : vector<1x4x8x16xbf16> to vector<4x8x16xbf16>
    %c1 = arith.constant 1 : index
    %c0_3 = arith.constant 0 : index
    %c0_4 = arith.constant 0 : index
    %c0_5 = arith.constant 0 : index
    %2 = vector.load %arg1[%c1, %c0_3, %c0_4, %c0_5] : memref<4x5x9x128xbf16, #tpu.memory_space<vmem>>, vector<1x4x8x16xbf16>
    %3 = vector.shape_cast %2 : vector<1x4x8x16xbf16> to vector<4x8x16xbf16>
    %c0_6 = arith.constant 0 : index
    %c0_7 = arith.constant 0 : index
    %c1_8 = arith.constant 1 : index
    %c0_9 = arith.constant 0 : index
    %4 = vector.load %arg1[%c0_6, %c0_7, %c1_8, %c0_9] : memref<4x5x9x128xbf16, #tpu.memory_space<vmem>>, vector<1x4x8x16xbf16>
    %5 = vector.shape_cast %4 : vector<1x4x8x16xbf16> to vector<4x8x16xbf16>
    %c2 = arith.constant 2 : index
    %c0_10 = arith.constant 0 : index
    %c0_11 = arith.constant 0 : index
    %c0_12 = arith.constant 0 : index
    %6 = vector.load %arg1[%c2, %c0_10, %c0_11, %c0_12] : memref<4x5x9x128xbf16, #tpu.memory_space<vmem>>, vector<1x4x8x16xbf16>
    %7 = vector.shape_cast %6 : vector<1x4x8x16xbf16> to vector<4x8x16xbf16>
    %c3 = arith.constant 3 : index
    %c0_13 = arith.constant 0 : index
    %c0_14 = arith.constant 0 : index
    %c0_15 = arith.constant 0 : index
    %8 = vector.load %arg1[%c3, %c0_13, %c0_14, %c0_15] : memref<4x5x9x128xbf16, #tpu.memory_space<vmem>>, vector<1x4x8x16xbf16>
    %9 = vector.shape_cast %8 : vector<1x4x8x16xbf16> to vector<4x8x16xbf16>
    %c2_16 = arith.constant 2 : index
    %c0_17 = arith.constant 0 : index
    %c1_18 = arith.constant 1 : index
    %c0_19 = arith.constant 0 : index
    %10 = vector.load %arg1[%c2_16, %c0_17, %c1_18, %c0_19] : memref<4x5x9x128xbf16, #tpu.memory_space<vmem>>, vector<1x4x8x16xbf16>
    %11 = vector.shape_cast %10 : vector<1x4x8x16xbf16> to vector<4x8x16xbf16>
    %c0_20 = arith.constant 0 : index
    %c1_21 = arith.constant 1 : index
    %c0_22 = arith.constant 0 : index
    %c0_23 = arith.constant 0 : index
    %12 = vector.load %arg1[%c0_20, %c1_21, %c0_22, %c0_23] : memref<4x5x9x128xbf16, #tpu.memory_space<vmem>>, vector<1x4x8x16xbf16>
    %13 = vector.shape_cast %12 : vector<1x4x8x16xbf16> to vector<4x8x16xbf16>
    %c1_24 = arith.constant 1 : index
    %c1_25 = arith.constant 1 : index
    %c0_26 = arith.constant 0 : index
    %c0_27 = arith.constant 0 : index
    %14 = vector.load %arg1[%c1_24, %c1_25, %c0_26, %c0_27] : memref<4x5x9x128xbf16, #tpu.memory_space<vmem>>, vector<1x4x8x16xbf16>
    %15 = vector.shape_cast %14 : vector<1x4x8x16xbf16> to vector<4x8x16xbf16>
    %c0_28 = arith.constant 0 : index
    %c1_29 = arith.constant 1 : index
    %c1_30 = arith.constant 1 : index
    %c0_31 = arith.constant 0 : index
    %16 = vector.load %arg1[%c0_28, %c1_29, %c1_30, %c0_31] : memref<4x5x9x128xbf16, #tpu.memory_space<vmem>>, vector<1x4x8x16xbf16>
    %17 = vector.shape_cast %16 : vector<1x4x8x16xbf16> to vector<4x8x16xbf16>
    %18 = tpu.concatenate %1, %3, %5, %7, %9, %11, %13, %15, %17 in 2 : vector<4x8x16xbf16>, vector<4x8x16xbf16>, vector<4x8x16xbf16>, vector<4x8x16xbf16>, vector<4x8x16xbf16>, vector<4x8x16xbf16>, vector<4x8x16xbf16>, vector<4x8x16xbf16>, vector<4x8x16xbf16> -> vector<4x8x144xbf16>
    %19 = vector.shape_cast %18 : vector<4x8x144xbf16> to vector<32x144xbf16>
    %c0_32 = arith.constant 0 : index
    %c0_33 = arith.constant 0 : index
    %20 = vector.load %arg2[%c0_32, %c0_33] : memref<144x128xbf16, #tpu.memory_space<vmem>>, vector<144x128xbf16>
    %cst = arith.constant dense<0.000000e+00> : vector<32x128xf32>
    %21 = tpu.matmul %19, %20, %cst {dimension_numbers = #tpu.dot_dimension_numbers<[1], [0], [0], [1], [0, 0, 1, 1], [], []>} : vector<32x144xbf16>, vector<144x128xbf16>, vector<32x128xf32> -> vector<32x128xf32>
    %22 = vector.shape_cast %21 : vector<32x128xf32> to vector<4x8x128xf32>
    %23 = tpu.iota {dimensions = array<i32: 0>} : vector<4x8x1xi32>
    %24 = tpu.iota {dimensions = array<i32: 1>} : vector<4x8x1xi32>
    %c4_i32 = arith.constant 4 : i32
    %25 = vector.broadcast %c4_i32 : i32 to vector<4x8x1xi32>
    %26 = arith.cmpi slt, %23, %25 : vector<4x8x1xi32>
    %c4_i32_34 = arith.constant 4 : i32
    %27 = vector.broadcast %c4_i32_34 : i32 to vector<4x8x1xi32>
    %28 = arith.cmpi slt, %24, %27 : vector<4x8x1xi32>
    %29 = arith.andi %26, %28 : vector<4x8x1xi1>
    %cst_35 = arith.constant 0.000000e+00 : f32
    %30 = vector.shape_cast %29 : vector<4x8x1xi1> to vector<4x8x1xi1>
    %31 = vector.broadcast %30 : vector<4x8x1xi1> to vector<4x8x128xi1>
    %32 = vector.broadcast %cst_35 : f32 to vector<4x8x128xf32>
    %33 = arith.select %31, %22, %32 : vector<4x8x128xi1>, vector<4x8x128xf32>
    %34 = vector.shape_cast %33 : vector<4x8x128xf32> to vector<32x128xf32>
    %cst_36 = arith.constant dense<0.000000e+00> : vector<128xf32>
    %35 = vector.multi_reduction <add>, %34, %cst_36 [0] : vector<32x128xf32> to vector<128xf32>
    %36 = vector.shape_cast %35 : vector<128xf32> to vector<1x128xf32>
    %cst_37 = arith.constant 6.250000e-02 : f32
    %37 = vector.broadcast %cst_37 : f32 to vector<1x128xf32>
    %38 = arith.mulf %36, %37 : vector<1x128xf32>
    %39 = arith.mulf %34, %34 : vector<32x128xf32>
    %cst_38 = arith.constant dense<0.000000e+00> : vector<128xf32>
    %40 = vector.multi_reduction <add>, %39, %cst_38 [0] : vector<32x128xf32> to vector<128xf32>
    %41 = vector.shape_cast %40 : vector<128xf32> to vector<1x128xf32>
    %cst_39 = arith.constant 6.250000e-02 : f32
    %42 = vector.broadcast %cst_39 : f32 to vector<1x128xf32>
    %43 = arith.mulf %41, %42 : vector<1x128xf32>
    %44 = arith.mulf %38, %38 : vector<1x128xf32>
    %45 = arith.subf %43, %44 : vector<1x128xf32>
    %cst_40 = arith.constant 9.99999974E-6 : f32
    %46 = vector.broadcast %cst_40 : f32 to vector<1x128xf32>
    %47 = arith.addf %45, %46 : vector<1x128xf32>
    %48 = math.rsqrt %47 : vector<1x128xf32>
    %c0_41 = arith.constant 0 : index
    %c0_42 = arith.constant 0 : index
    %49 = vector.load %arg3[%c0_41, %c0_42] : memref<8x128xf32, #tpu.memory_space<vmem>>, vector<1x128xf32>
    %c1_43 = arith.constant 1 : index
    %c0_44 = arith.constant 0 : index
    %50 = vector.load %arg3[%c1_43, %c0_44] : memref<8x128xf32, #tpu.memory_space<vmem>>, vector<1x128xf32>
    %51 = arith.mulf %49, %48 : vector<1x128xf32>
    %52 = vector.shape_cast %51 : vector<1x128xf32> to vector<1x1x128xf32>
    %53 = arith.mulf %38, %49 : vector<1x128xf32>
    %54 = arith.mulf %53, %48 : vector<1x128xf32>
    %55 = arith.subf %50, %54 : vector<1x128xf32>
    %56 = vector.shape_cast %55 : vector<1x128xf32> to vector<1x1x128xf32>
    %57 = vector.broadcast %52 : vector<1x1x128xf32> to vector<4x8x128xf32>
    %58 = arith.mulf %22, %57 : vector<4x8x128xf32>
    %59 = vector.broadcast %56 : vector<1x1x128xf32> to vector<4x8x128xf32>
    %60 = arith.addf %58, %59 : vector<4x8x128xf32>
    %cst_45 = arith.constant 0.000000e+00 : f32
    %61 = vector.broadcast %cst_45 : f32 to vector<4x8x128xf32>
    %62 = arith.cmpf oge, %60, %61 : vector<4x8x128xf32>
    %cst_46 = arith.constant 0.00999999977 : f32
    %63 = vector.broadcast %cst_46 : f32 to vector<4x8x128xf32>
    %64 = arith.mulf %63, %60 : vector<4x8x128xf32>
    %65 = arith.select %62, %60, %64 : vector<4x8x128xi1>, vector<4x8x128xf32>
    %cst_47 = arith.constant 0.000000e+00 : f32
    %66 = vector.shape_cast %29 : vector<4x8x1xi1> to vector<4x8x1xi1>
    %67 = vector.broadcast %66 : vector<4x8x1xi1> to vector<4x8x128xi1>
    %68 = vector.broadcast %cst_47 : f32 to vector<4x8x128xf32>
    %69 = arith.select %67, %65, %68 : vector<4x8x128xi1>, vector<4x8x128xf32>
    %70 = arith.truncf %69 : vector<4x8x128xf32> to vector<4x8x128xbf16>
    %cst_48 = arith.constant 0.000000e+00 : bf16
    %71 = vector.broadcast %cst_48 : bf16 to vector<1x6x10x128xbf16>
    %c0_49 = arith.constant 0 : index
    %c0_50 = arith.constant 0 : index
    %c0_51 = arith.constant 0 : index
    %c0_52 = arith.constant 0 : index
    %72 = vector.load %arg4[%c0_49, %c0_50, %c0_51, %c0_52] : memref<1x6x10x128xbf16, #tpu.memory_space<vmem>>, vector<1x6x10x128xbf16>
    tpu.vector_store %arg4[%c0_49, %c0_50, %c0_51, %c0_52], %71 {strides = array<i32>} : memref<1x6x10x128xbf16, #tpu.memory_space<vmem>>, vector<1x6x10x128xbf16>,
    %c0_53 = arith.constant 0 : index
    %c1_54 = arith.constant 1 : index
    %c1_55 = arith.constant 1 : index
    %c0_56 = arith.constant 0 : index
    %73 = vector.load %arg4[%c0_53, %c1_54, %c1_55, %c0_56] : memref<1x6x10x128xbf16, #tpu.memory_space<vmem>>, vector<1x4x8x128xbf16>
    %74 = vector.shape_cast %73 : vector<1x4x8x128xbf16> to vector<4x8x128xbf16>
    %75 = vector.shape_cast %70 : vector<4x8x128xbf16> to vector<1x4x8x128xbf16>
    tpu.vector_store %arg4[%c0_53, %c1_54, %c1_55, %c0_56], %75 {strides = array<i32>} : memref<1x6x10x128xbf16, #tpu.memory_space<vmem>>, vector<1x4x8x128xbf16>,
    return
  }
  func.func @transform_0(%arg0: i32) -> (i32, i32, i32, i32) {
    %c0_i32 = arith.constant 0 : i32
    %c0_i32_0 = arith.constant 0 : i32
    %c0_i32_1 = arith.constant 0 : i32
    %c0_i32_2 = arith.constant 0 : i32
    return %arg0, %c0_i32, %c0_i32_0, %c0_i32_1 : i32, i32, i32, i32
  }
  func.func @transform_1(%arg0: i32) -> (i32, i32) {
    %c0_i32 = arith.constant 0 : i32
    %c0_i32_0 = arith.constant 0 : i32
    %c0_i32_1 = arith.constant 0 : i32
    return %c0_i32, %c0_i32_0 : i32, i32
  }
  func.func @transform_2(%arg0: i32) -> (i32, i32) {
    %c0_i32 = arith.constant 0 : i32
    %c0_i32_0 = arith.constant 0 : i32
    %c0_i32_1 = arith.constant 0 : i32
    return %c0_i32, %c0_i32_0 : i32, i32
  }
  func.func @transform_3(%arg0: i32) -> (i32, i32, i32, i32) {
    %c0_i32 = arith.constant 0 : i32
    %c0_i32_0 = arith.constant 0 : i32
    %c0_i32_1 = arith.constant 0 : i32
    %c0_i32_2 = arith.constant 0 : i32
    return %arg0, %c0_i32, %c0_i32_0, %c0_i32_1 : i32, i32, i32, i32
  }
}

module attributes {stable_mosaic.version = 11 : i64} {
  func.func @kernel(%arg0: i32, %arg1: memref<1x6x10x128xbf16, #tpu.memory_space<vmem>>, %arg2: memref<288x128xbf16, #tpu.memory_space<vmem>>, %arg3: memref<8x128xf32, #tpu.memory_space<vmem>>, %arg4: memref<1x4x8x128xbf16, #tpu.memory_space<vmem>>) attributes {dimension_semantics = [#tpu.dimension_semantics<parallel>], iteration_bounds = array<i64: 2>, scalar_prefetch = 0 : i64, scratch_operands = 0 : i64, tpu.core_type = #tpu.core_type<tc>, window_params = [{transform_indices = @transform_0, window_bounds = array<i64: 1, 6, 10, 128>}, {pipeline_mode = #tpu.pipeline_mode<synchronous>, transform_indices = @transform_1, window_bounds = array<i64: 288, 128>}, {pipeline_mode = #tpu.pipeline_mode<synchronous>, transform_indices = @transform_2, window_bounds = array<i64: 8, 128>}, {transform_indices = @transform_3, window_bounds = array<i64: 1, 4, 8, 128>}]} {
    %c0 = arith.constant 0 : index
    %c0_0 = arith.constant 0 : index
    %c0_1 = arith.constant 0 : index
    %c0_2 = arith.constant 0 : index
    %0 = vector.load %arg1[%c0, %c0_0, %c0_1, %c0_2] : memref<1x6x10x128xbf16, #tpu.memory_space<vmem>>, vector<1x4x8x32xbf16>
    %1 = vector.shape_cast %0 : vector<1x4x8x32xbf16> to vector<4x8x32xbf16>
    %c0_3 = arith.constant 0 : index
    %c0_4 = arith.constant 0 : index
    %c1 = arith.constant 1 : index
    %c0_5 = arith.constant 0 : index
    %2 = vector.load %arg1[%c0_3, %c0_4, %c1, %c0_5] : memref<1x6x10x128xbf16, #tpu.memory_space<vmem>>, vector<1x4x8x32xbf16>
    %3 = vector.shape_cast %2 : vector<1x4x8x32xbf16> to vector<4x8x32xbf16>
    %c0_6 = arith.constant 0 : index
    %c0_7 = arith.constant 0 : index
    %c2 = arith.constant 2 : index
    %c0_8 = arith.constant 0 : index
    %4 = vector.load %arg1[%c0_6, %c0_7, %c2, %c0_8] : memref<1x6x10x128xbf16, #tpu.memory_space<vmem>>, vector<1x4x8x32xbf16>
    %5 = vector.shape_cast %4 : vector<1x4x8x32xbf16> to vector<4x8x32xbf16>
    %c0_9 = arith.constant 0 : index
    %c1_10 = arith.constant 1 : index
    %c0_11 = arith.constant 0 : index
    %c0_12 = arith.constant 0 : index
    %6 = vector.load %arg1[%c0_9, %c1_10, %c0_11, %c0_12] : memref<1x6x10x128xbf16, #tpu.memory_space<vmem>>, vector<1x4x8x32xbf16>
    %7 = vector.shape_cast %6 : vector<1x4x8x32xbf16> to vector<4x8x32xbf16>
    %c0_13 = arith.constant 0 : index
    %c1_14 = arith.constant 1 : index
    %c1_15 = arith.constant 1 : index
    %c0_16 = arith.constant 0 : index
    %8 = vector.load %arg1[%c0_13, %c1_14, %c1_15, %c0_16] : memref<1x6x10x128xbf16, #tpu.memory_space<vmem>>, vector<1x4x8x32xbf16>
    %9 = vector.shape_cast %8 : vector<1x4x8x32xbf16> to vector<4x8x32xbf16>
    %c0_17 = arith.constant 0 : index
    %c1_18 = arith.constant 1 : index
    %c2_19 = arith.constant 2 : index
    %c0_20 = arith.constant 0 : index
    %10 = vector.load %arg1[%c0_17, %c1_18, %c2_19, %c0_20] : memref<1x6x10x128xbf16, #tpu.memory_space<vmem>>, vector<1x4x8x32xbf16>
    %11 = vector.shape_cast %10 : vector<1x4x8x32xbf16> to vector<4x8x32xbf16>
    %c0_21 = arith.constant 0 : index
    %c2_22 = arith.constant 2 : index
    %c0_23 = arith.constant 0 : index
    %c0_24 = arith.constant 0 : index
    %12 = vector.load %arg1[%c0_21, %c2_22, %c0_23, %c0_24] : memref<1x6x10x128xbf16, #tpu.memory_space<vmem>>, vector<1x4x8x32xbf16>
    %13 = vector.shape_cast %12 : vector<1x4x8x32xbf16> to vector<4x8x32xbf16>
    %c0_25 = arith.constant 0 : index
    %c2_26 = arith.constant 2 : index
    %c1_27 = arith.constant 1 : index
    %c0_28 = arith.constant 0 : index
    %14 = vector.load %arg1[%c0_25, %c2_26, %c1_27, %c0_28] : memref<1x6x10x128xbf16, #tpu.memory_space<vmem>>, vector<1x4x8x32xbf16>
    %15 = vector.shape_cast %14 : vector<1x4x8x32xbf16> to vector<4x8x32xbf16>
    %c0_29 = arith.constant 0 : index
    %c2_30 = arith.constant 2 : index
    %c2_31 = arith.constant 2 : index
    %c0_32 = arith.constant 0 : index
    %16 = vector.load %arg1[%c0_29, %c2_30, %c2_31, %c0_32] : memref<1x6x10x128xbf16, #tpu.memory_space<vmem>>, vector<1x4x8x32xbf16>
    %17 = vector.shape_cast %16 : vector<1x4x8x32xbf16> to vector<4x8x32xbf16>
    %18 = tpu.concatenate %1, %3, %5, %7, %9, %11, %13, %15, %17 in 2 : vector<4x8x32xbf16>, vector<4x8x32xbf16>, vector<4x8x32xbf16>, vector<4x8x32xbf16>, vector<4x8x32xbf16>, vector<4x8x32xbf16>, vector<4x8x32xbf16>, vector<4x8x32xbf16>, vector<4x8x32xbf16> -> vector<4x8x288xbf16>
    %19 = vector.shape_cast %18 : vector<4x8x288xbf16> to vector<32x288xbf16>
    %c0_33 = arith.constant 0 : index
    %c0_34 = arith.constant 0 : index
    %20 = vector.load %arg2[%c0_33, %c0_34] : memref<288x128xbf16, #tpu.memory_space<vmem>>, vector<288x128xbf16>
    %cst = arith.constant dense<0.000000e+00> : vector<32x128xf32>
    %21 = tpu.matmul %19, %20, %cst {dimension_numbers = #tpu.dot_dimension_numbers<[1], [0], [0], [1], [0, 0, 1, 1], [], []>} : vector<32x288xbf16>, vector<288x128xbf16>, vector<32x128xf32> -> vector<32x128xf32>
    %22 = vector.shape_cast %21 : vector<32x128xf32> to vector<4x8x128xf32>
    %23 = tpu.iota {dimensions = array<i32: 0>} : vector<4x8x1xi32>
    %24 = tpu.iota {dimensions = array<i32: 1>} : vector<4x8x1xi32>
    %c4_i32 = arith.constant 4 : i32
    %25 = vector.broadcast %c4_i32 : i32 to vector<4x8x1xi32>
    %26 = arith.cmpi slt, %23, %25 : vector<4x8x1xi32>
    %c4_i32_35 = arith.constant 4 : i32
    %27 = vector.broadcast %c4_i32_35 : i32 to vector<4x8x1xi32>
    %28 = arith.cmpi slt, %24, %27 : vector<4x8x1xi32>
    %29 = arith.andi %26, %28 : vector<4x8x1xi1>
    %cst_36 = arith.constant 0.000000e+00 : f32
    %30 = vector.shape_cast %29 : vector<4x8x1xi1> to vector<4x8x1xi1>
    %31 = vector.broadcast %30 : vector<4x8x1xi1> to vector<4x8x128xi1>
    %32 = vector.broadcast %cst_36 : f32 to vector<4x8x128xf32>
    %33 = arith.select %31, %22, %32 : vector<4x8x128xi1>, vector<4x8x128xf32>
    %34 = vector.shape_cast %33 : vector<4x8x128xf32> to vector<32x128xf32>
    %cst_37 = arith.constant dense<0.000000e+00> : vector<128xf32>
    %35 = vector.multi_reduction <add>, %34, %cst_37 [0] : vector<32x128xf32> to vector<128xf32>
    %36 = vector.shape_cast %35 : vector<128xf32> to vector<1x128xf32>
    %cst_38 = arith.constant 6.250000e-02 : f32
    %37 = vector.broadcast %cst_38 : f32 to vector<1x128xf32>
    %38 = arith.mulf %36, %37 : vector<1x128xf32>
    %39 = arith.mulf %34, %34 : vector<32x128xf32>
    %cst_39 = arith.constant dense<0.000000e+00> : vector<128xf32>
    %40 = vector.multi_reduction <add>, %39, %cst_39 [0] : vector<32x128xf32> to vector<128xf32>
    %41 = vector.shape_cast %40 : vector<128xf32> to vector<1x128xf32>
    %cst_40 = arith.constant 6.250000e-02 : f32
    %42 = vector.broadcast %cst_40 : f32 to vector<1x128xf32>
    %43 = arith.mulf %41, %42 : vector<1x128xf32>
    %44 = arith.mulf %38, %38 : vector<1x128xf32>
    %45 = arith.subf %43, %44 : vector<1x128xf32>
    %cst_41 = arith.constant 9.99999974E-6 : f32
    %46 = vector.broadcast %cst_41 : f32 to vector<1x128xf32>
    %47 = arith.addf %45, %46 : vector<1x128xf32>
    %48 = math.rsqrt %47 : vector<1x128xf32>
    %c0_42 = arith.constant 0 : index
    %c0_43 = arith.constant 0 : index
    %49 = vector.load %arg3[%c0_42, %c0_43] : memref<8x128xf32, #tpu.memory_space<vmem>>, vector<1x128xf32>
    %c1_44 = arith.constant 1 : index
    %c0_45 = arith.constant 0 : index
    %50 = vector.load %arg3[%c1_44, %c0_45] : memref<8x128xf32, #tpu.memory_space<vmem>>, vector<1x128xf32>
    %51 = arith.mulf %49, %48 : vector<1x128xf32>
    %52 = vector.shape_cast %51 : vector<1x128xf32> to vector<1x1x128xf32>
    %53 = arith.mulf %38, %49 : vector<1x128xf32>
    %54 = arith.mulf %53, %48 : vector<1x128xf32>
    %55 = arith.subf %50, %54 : vector<1x128xf32>
    %56 = vector.shape_cast %55 : vector<1x128xf32> to vector<1x1x128xf32>
    %57 = vector.broadcast %52 : vector<1x1x128xf32> to vector<4x8x128xf32>
    %58 = arith.mulf %22, %57 : vector<4x8x128xf32>
    %59 = vector.broadcast %56 : vector<1x1x128xf32> to vector<4x8x128xf32>
    %60 = arith.addf %58, %59 : vector<4x8x128xf32>
    %cst_46 = arith.constant 0.000000e+00 : f32
    %61 = vector.broadcast %cst_46 : f32 to vector<4x8x128xf32>
    %62 = arith.cmpf oge, %60, %61 : vector<4x8x128xf32>
    %cst_47 = arith.constant 0.00999999977 : f32
    %63 = vector.broadcast %cst_47 : f32 to vector<4x8x128xf32>
    %64 = arith.mulf %63, %60 : vector<4x8x128xf32>
    %65 = arith.select %62, %60, %64 : vector<4x8x128xi1>, vector<4x8x128xf32>
    %cst_48 = arith.constant 0.000000e+00 : f32
    %66 = vector.shape_cast %29 : vector<4x8x1xi1> to vector<4x8x1xi1>
    %67 = vector.broadcast %66 : vector<4x8x1xi1> to vector<4x8x128xi1>
    %68 = vector.broadcast %cst_48 : f32 to vector<4x8x128xf32>
    %69 = arith.select %67, %65, %68 : vector<4x8x128xi1>, vector<4x8x128xf32>
    %70 = arith.truncf %69 : vector<4x8x128xf32> to vector<4x8x128xbf16>
    %c0_49 = arith.constant 0 : index
    %c0_50 = arith.constant 0 : index
    %c0_51 = arith.constant 0 : index
    %c0_52 = arith.constant 0 : index
    %71 = vector.load %arg4[%c0_49, %c0_50, %c0_51, %c0_52] : memref<1x4x8x128xbf16, #tpu.memory_space<vmem>>, vector<1x4x8x128xbf16>
    %72 = vector.shape_cast %71 : vector<1x4x8x128xbf16> to vector<4x8x128xbf16>
    %73 = vector.shape_cast %70 : vector<4x8x128xbf16> to vector<1x4x8x128xbf16>
    tpu.vector_store %arg4[%c0_49, %c0_50, %c0_51, %c0_52], %73 {strides = array<i32>} : memref<1x4x8x128xbf16, #tpu.memory_space<vmem>>, vector<1x4x8x128xbf16>,
    return
  }
  func.func @transform_0(%arg0: i32) -> (i32, i32, i32, i32) {
    %c0_i32 = arith.constant 0 : i32
    %c0_i32_0 = arith.constant 0 : i32
    %c0_i32_1 = arith.constant 0 : i32
    %c0_i32_2 = arith.constant 0 : i32
    return %arg0, %c0_i32, %c0_i32_0, %c0_i32_1 : i32, i32, i32, i32
  }
  func.func @transform_1(%arg0: i32) -> (i32, i32) {
    %c0_i32 = arith.constant 0 : i32
    %c0_i32_0 = arith.constant 0 : i32
    %c0_i32_1 = arith.constant 0 : i32
    return %c0_i32, %c0_i32_0 : i32, i32
  }
  func.func @transform_2(%arg0: i32) -> (i32, i32) {
    %c0_i32 = arith.constant 0 : i32
    %c0_i32_0 = arith.constant 0 : i32
    %c0_i32_1 = arith.constant 0 : i32
    return %c0_i32, %c0_i32_0 : i32, i32
  }
  func.func @transform_3(%arg0: i32) -> (i32, i32, i32, i32) {
    %c0_i32 = arith.constant 0 : i32
    %c0_i32_0 = arith.constant 0 : i32
    %c0_i32_1 = arith.constant 0 : i32
    %c0_i32_2 = arith.constant 0 : i32
    return %arg0, %c0_i32, %c0_i32_0, %c0_i32_1 : i32, i32, i32, i32
  }
}

</mosaic_0001>

<bundles_post_ra>
// kernel: _lambda_.8
= control target key start
LH: loop header
LB: loop body
LE: loop exit
PB: predicated region body
PF: predicated region fallthrough
CT: control target
= control target key end

     0   :  { %s1755_s12 = smov 0   ;;  %s2156_s0 = inlined_call_operand.vmem [shape: bf16[8,9,9,128], index: 0, kind: input, shape index: {}]   ;;  %s2157_s1 = inlined_call_operand.vmem [shape: bf16[72,128], index: 1, kind: input, shape index: {}]   ;;  %s2158_s2 = inlined_call_operand.vmem [shape: f32[8,128], index: 2, kind: input, shape index: {}]   ;;  %s2159_s3 = inlined_call_operand.vmem [shape: bf16[2,10,10,128], index: 3, kind: output, shape index: {}]  }
   0x1 LB: > { %s1761_s13 = sadd.s32 4294967295, %s1724_s12   ;;  %p1402_p0 = scmp.ge.s32.totalorder %s1724_s12, 1  ;;  %s1724_s12 = sphi %s1755_s12, %s13_s12  }
   0x2   : > { %p139_p1 = scmp.lt.s32.totalorder %s1724_s12, 3 }
   0x4   : > { %p140_p2 = pnand %p1402_p0, %p139_p1 }
   0x5   : > { %s1403_s14 = sshll.u32 (!%p140_p2), %s1761_s13, 2  ;;  %s1726_s19 = smov (!%p140_p2), 8   ;;  %vm971_vm0 = vcmask (!%p140_p2), 1043456   ;;  %vm758_vm1 = vcmask (!%p140_p2), 64512   ;;  %vm783_vm2 = vcmask (!%p140_p2), 130048   ;;  %vm800_vm3 = vcmask (!%p140_p2), 195584  }
   0x6   : > { %143 = sbr.rel (%p140_p2) target bundleno = 548 (0x224), region = 32  ;;  %p165_p3 = scmp.lt.s32.totalorder (!%p140_p2), %s1403_s14, 7  ;;  %vm817_vm4 = vcmask (!%p140_p2), 261120   ;;  %vm834_vm5 = vcmask (!%p140_p2), 326656   ;;  %vm851_vm6 = vcmask (!%p140_p2), 392192   ;;  %vm868_vm7 = vcmask (!%p140_p2), 457728  }
   0x7   : > { %s1727_s20 = smov (!%p140_p2), 24   ;;  %s1728_s21 = smov (!%p140_p2), 16   ;;  %vm885_vm8 = vcmask (!%p140_p2), 523264   ;;  %vm958_vm9 = vcmask (!%p140_p2), 588800   ;;  %vm1290_vm14 = vsmask.f32 (!%p140_p2), 7938 }
   0x8   : > { %s1729_s22 = smov (!%p140_p2), 32   ;;  %s1730_s23 = smov (!%p140_p2), 40  }
   0x9   : > { %s1731_s28 = smov (!%p140_p2), 48   ;;  %s1732_s6 = smov (!%p140_p2), 56  }
   0xa   : > { %s1733_s9 = smov (!%p140_p2), 64   ;;  %p171_p4 = scmp.lt.s32.totalorder (!%p140_p2), %s1761_s13, 1 }
   0xd   : > { %s2165_s14 = smov (!%p165_p3, %s1403_s14), 7  ;;  %s2167_s13 = smov (!%p171_p4, %s1761_s13), 1 }
   0xe   : > { %s1628_s15 = smul.u32 72, %s2165_s14 }
   0xf   : > { %s1629_s10 = smul.u32 80, %s2167_s13 }
  0x10   : > { %s1769_s18 = scalar_lea.vmem %s2156_s0, %s1628_s15 }
  0x11   : > { %v1647_v0 = vld [vmem:[%s1769_s18 + $0x58] ss:$0 sps:$4 sm:$0xff]   ;;  %v1648_v1 = vld [vmem:[%s1769_s18 + $0x48] ss:$0 sps:$4 sm:$0xff]   ;;  %v1649_v2 = vld [vmem:[%s1769_s18 + $0x60] ss:$0 sps:$4 sm:$0xff]   ;;  %s2033_s15 = scalar_lea.vmem %s2159_s3, %s1629_s10 }
  0x12   : > { %282 = vrot.lane.b32.xlu1 %v1647_v0, %s1726_s19  ;;  %278 = vrot.lane.b32.xlu0 %v1648_v1, %s1726_s19  ;;  %v1650_v3 = vld [vmem:[%s1769_s18 + $0x50] ss:$0 sps:$4 sm:$0xff]   ;;  %v1415_v4 = vld [vmem:[%s1769_s18 + $0x98] sm:$0xf] }
  0x13   : > { %v1414_v5 = vld [vmem:[%s1769_s18 + $0x90] sm:$0xf]  ;;  %v1780_v6 = vld [vmem:[%s1769_s18 + $0x8] sm:$0xf]  ;;  %v195_v7 = vld [vmem:[%s1769_s18 + $0xc] sm:$0x1]  ;;  %v1479_v13 = vcombine.low %v1415_v4, %v1415_v4 }
  0x14   : > { %v1784_v8 = vld [vmem:[%s1769_s18] sm:$0xf]  ;;  %v1471_v9 = vcombine.low %v1780_v6, %v195_v7  ;;  %v194_v10 = vld [vmem:[%s1769_s18 + $0x4] sm:$0x1]  ;;  %v1789_v11 = vld [vmem:[%s1769_s18 + $0x18] sm:$0xf]  ;;  %v1478_v18 = vcombine.low %v1414_v5, %v1414_v5 }
  0x15   : > { %v197_v12 = vld [vmem:[%s1769_s18 + $0x1c] sm:$0x1]  ;;  %v1470_v14 = vcombine.low %v1784_v8, %v194_v10  ;;  %v1796_v16 = vld [vmem:[%s1769_s18 + $0x10] sm:$0xf]  ;;  %v196_v17 = vld [vmem:[%s1769_s18 + $0x14] sm:$0x1] }
  0x16   : > { %284 = vrot.lane.b32.xlu1 %v1649_v2, %s1726_s19  ;;  %v1473_v15 = vcombine.low %v1789_v11, %v197_v12  ;;  %280 = vrot.lane.b32.xlu0 %v1650_v3, %s1726_s19  ;;  %v342_v19 = vshrl.u32 %v1471_v9, 16  ;;  %v344_v20 = vshll.u32 %v1471_v9, 16  ;;  %v1472_v21 = vcombine.low %v1796_v16, %v196_v17  ;;  %v1431_v35 = vld [vmem:[%s1769_s18 + $0x9c] sm:$0x1]  ;;  %v1417_v37 = vld [vmem:[%s1769_s18 + $0xa8] sm:$0xf] }
  0x17   : > { %v335_v22 = vshrl.u32 %v1470_v14, 16  ;;  %v337_v23 = vshll.u32 %v1470_v14, 16  ;;  %v1430_v38 = vld [vmem:[%s1769_s18 + $0x94] sm:$0x1]  ;;  %v1416_v39 = vld [vmem:[%s1769_s18 + $0xa0] sm:$0xf]  ;;  %v1495_v40 = vcombine.low %v1415_v4, %v1431_v35  ;;  %v1481_v41 = vcombine.low %v1417_v37, %v1417_v37 }
  0x18   : > { %v358_v24 = vshll.u32 %v1473_v15, 16  ;;  %v346_v25 = vrot.slane %v344_v20, 1  ;;  %v351_v26 = vshll.u32 %v1472_v21, 16  ;;  %v356_v28 = vshrl.u32 %v1473_v15, 16  ;;  %v1433_v43 = vld [vmem:[%s1769_s18 + $0xac] sm:$0x1] }
  0x19   : > { %v339_v27 = vrot.slane %v337_v23, 1  ;;  %v349_v31 = vshrl.u32 %v1472_v21, 16  ;;  %v1494_v42 = vcombine.low %v1414_v5, %v1430_v38  ;;  %v1480_v44 = vcombine.low %v1416_v39, %v1416_v39  ;;  %v1432_v45 = vld [vmem:[%s1769_s18 + $0xa4] sm:$0x1]  ;;  %v1663_v47 = vld [vmem:[%s1769_s18 + $0xe0] ss:$0 sps:$4 sm:$0xff]  }
  0x1a   : > { %432 = vrot.lane.b32.xlu1 %v1479_v13, %s1727_s20  ;;  %v360_v29 = vrot.slane %v358_v24, 1  ;;  %430 = vrot.lane.b32.xlu0 %v1478_v18, %s1727_s20  ;;  %v347_v30 = vor.u32 %v346_v25, %v342_v19  ;;  %v353_v32 = vrot.slane %v351_v26, 1  ;;  %v1497_v46 = vcombine.low %v1417_v37, %v1433_v43  ;;  %v1664_v50 = vld [vmem:[%s1769_s18 + $0xd8] ss:$0 sps:$4 sm:$0xff]   ;;  %v1665_v52 = vld [vmem:[%s1769_s18 + $0xf0] ss:$0 sps:$4 sm:$0xff]  }
  0x1b   : > { %v340_v33 = vor.u32 %v339_v27, %v335_v22  ;;  %v520_v48 = vshll.u32 %v1495_v40, 16  ;;  %v1496_v49 = vcombine.low %v1416_v39, %v1432_v45  ;;  %v513_v51 = vshll.u32 %v1494_v42, 16  ;;  %v1666_v56 = vld [vmem:[%s1769_s18 + $0xe8] ss:$0 sps:$4 sm:$0xff]   ;;  %v1439_v4 = vld [vmem:[%s1769_s18 + $0x10] sm:$0xf] }
  0x1c   : > { %v361_v34 = vor.u32 %v360_v29, %v356_v28  ;;  %v354_v36 = vor.u32 %v353_v32, %v349_v31  ;;  %v518_v53 = vshrl.u32 %v1495_v40, 16  ;;  %v534_v55 = vshll.u32 %v1497_v46, 16  ;;  %v1438_v5 = vld [vmem:[%s1769_s18 + $0x8] sm:$0xf]  ;;  %v1711_v7 = vld [vmem:[%s2157_s1] sm:$0xff]   ;;  %v1713_v22 = vld [vmem:[%s2157_s1 + $0x10] sm:$0xff]  }
  0x1d   : > { %v522_v54 = vrot.slane %v520_v48, 1  ;;  %v511_v57 = vshrl.u32 %v1494_v42, 16  ;;  %v515_v58 = vrot.slane %v513_v51, 1  ;;  %v527_v59 = vshll.u32 %v1496_v49, 16  ;;  %v1455_v10 = vld [vmem:[%s1769_s18 + $0x14] sm:$0x1]  ;;  %1598 = vmatprep.subr.bf16.mxu0 %v1711_v7  ;;  %1616 = vmatprep.subr.bf16.mxu1 %v1711_v7 }
  0x1e   : > { %392 = vrot.lane.b32.xlu1 %v347_v30, %s1728_s21  ;;  %390 = vrot.lane.b32.xlu0 %v340_v33, %s1728_s21  ;;  %v532_v61 = vshrl.u32 %v1497_v46, 16  ;;  %v536_v62 = vrot.slane %v534_v55, 1  ;;  %v525_v0 = vshrl.u32 %v1496_v49, 16  ;;  %v1503_v9 = vcombine.low %v1439_v4, %v1439_v4  ;;  %v1441_v13 = vld [vmem:[%s1769_s18 + $0x20] sm:$0xf]  ;;  %v1712_v14 = vld [vmem:[%s2157_s1 + $0x8] sm:$0xff]  }
  0x1f   : > { %v523_v60 = vor.u32 %v522_v54, %v518_v53  ;;  %v516_v63 = vor.u32 %v515_v58, %v511_v57  ;;  %v529_v1 = vrot.slane %v527_v59, 1  ;;  %v1502_v12 = vcombine.low %v1438_v5, %v1438_v5  ;;  %v1454_v15 = vld [vmem:[%s1769_s18 + $0xc] sm:$0x1]  ;;  %v1440_v17 = vld [vmem:[%s1769_s18 + $0x18] sm:$0xf]  ;;  %1599 = vmatpush3.bf16.msra.mxu0 %v1711_v7  ;;  %1621 = vmatpush3.bf16.msra.mxu1 %v1711_v7 }
  0x20   : > { %v537_v2 = vor.u32 %v536_v62, %v532_v61  ;;  %1600 = vmatprep.subr.bf16.mxu0 %v1712_v14  ;;  %v1519_v18 = vcombine.low %v1439_v4, %v1455_v10  ;;  %v1505_v19 = vcombine.low %v1441_v13, %v1441_v13  ;;  %v1518_v20 = vcombine.low %v1438_v5, %v1454_v15  ;;  %v1675_v23 = vld [vmem:[%s1769_s18 + $0x58] ss:$0 sps:$4 sm:$0xff]   ;;  %v1457_v26 = vld [vmem:[%s1769_s18 + $0x24] sm:$0x1]  ;;  %v1676_v27 = vld [vmem:[%s1769_s18 + $0x50] ss:$0 sps:$4 sm:$0xff]  }
  0x21   : > { %v530_v3 = vor.u32 %v529_v1, %v525_v0  ;;  %v1504_v21 = vcombine.low %v1440_v17, %v1440_v17  ;;  %1617 = vmatprep.subr.bf16.mxu1 %v1712_v14  ;;  %v1714_v25 = vld [vmem:[%s2157_s1 + $0x18] sm:$0xff]   ;;  %v1677_v30 = vld [vmem:[%s1769_s18 + $0x68] ss:$0 sps:$4 sm:$0xff]   ;;  %v1521_v31 = vcombine.low %v1441_v13, %v1457_v26  ;;  %v199_v45 = vld [vmem:[%s1769_s18 + $0x2c] sm:$0x1] }
  0x22   : > { %396 = vrot.lane.b32.xlu1 %v361_v34, %s1728_s21  ;;  %394 = vrot.lane.b32.xlu0 %v354_v36, %s1728_s21  ;;  %v696_v24 = vshll.u32 %v1519_v18, 16  ;;  %v689_v28 = vshll.u32 %v1518_v20, 16  ;;  %v1456_v29 = vld [vmem:[%s1769_s18 + $0x1c] sm:$0x1]  ;;  %v694_v32 = vshrl.u32 %v1519_v18, 16  ;;  %v687_v37 = vshrl.u32 %v1518_v20, 16 }
  0x23   : > { %1601 = vmatpush3.bf16.msra.mxu0 %v1712_v14  ;;  %1622 = vmatpush3.bf16.msra.mxu1 %v1712_v14  ;;  %v1715_v34 = vld [vmem:[%s2157_s1 + $0x20] ss:$0 sps:$4 sm:$0xff]   ;;  %v1520_v35 = vcombine.low %v1440_v17, %v1456_v29  ;;  %v1679_v48 = vld [vmem:[%s1769_s18 + $0x70] ss:$0 sps:$4 sm:$0xff]   ;;  %v1680_v49 = vld [vmem:[%s1769_s18 + $0x68] ss:$0 sps:$4 sm:$0xff]  }
  0x24   : > { %1602 = vmatprep.subr.bf16.mxu0 %v1713_v22  ;;  %1618 = vmatprep.subr.bf16.mxu1 %v1713_v22  ;;  %v698_v33 = vrot.slane %v696_v24, 1  ;;  %v1678_v36 = vld [vmem:[%s1769_s18 + $0x60] ss:$0 sps:$4 sm:$0xff]   ;;  %v691_v38 = vrot.slane %v689_v28, 1  ;;  %v973_v39 = vsel %vm971_vm0, %v1715_v34, 0 }
  0x25   : > { %v703_v43 = vshll.u32 %v1520_v35, 16  ;;  %v1869_v46 = vld [vmem:[%s1769_s18 + $0x20] sm:$0xf]  ;;  %v701_v53 = vshrl.u32 %v1520_v35, 16  ;;  %v201_v57 = vld [vmem:[%s1769_s18 + $0x3c] sm:$0x1] }
  0x26   : > { %436 = vrot.lane.b32.xlu1 %v1481_v41, %s1727_s20  ;;  %434 = vrot.lane.b32.xlu0 %v1480_v44, %s1727_s20  ;;  %v699_v40 = vor.u32 %v698_v33, %v694_v32  ;;  %v710_v41 = vshll.u32 %v1521_v31, 16  ;;  %v692_v42 = vor.u32 %v691_v38, %v687_v37  ;;  %v1865_v44 = vld [vmem:[%s1769_s18 + $0x28] sm:$0xf]  ;;  %v1884_v58 = vld [vmem:[%s1769_s18 + $0x30] sm:$0xf] }
  0x27   : > { %1603 = vmatpush3.bf16.msra.mxu0 %v1713_v22  ;;  %1623 = vmatpush3.bf16.msra.mxu1 %v1713_v22  ;;  %v705_v54 = vrot.slane %v703_v43, 1  ;;  %v200_v59 = vld [vmem:[%s1769_s18 + $0x34] sm:$0x1]  ;;  %v1682_v7 = vld [vmem:[%s1769_s18 + $0x78] ss:$0 sps:$4 sm:$0xff]  }
  0x28   : > { %1604 = vmatprep.subr.bf16.mxu0 %v1714_v25  ;;  %1619 = vmatprep.subr.bf16.mxu1 %v1714_v25  ;;  %v712_v51 = vrot.slane %v710_v41, 1  ;;  %v1476_v1 = vcombine.low %v1884_v58, %v200_v59  ;;  %v1419_v22 = vld [vmem:[%s1769_s18 + $0xb8] sm:$0xf]  ;;  %v1434_v28 = vld [vmem:[%s1769_s18 + $0xb4] sm:$0x1] }
  0x29   : > { %v1483_v24 = vcombine.low %v1419_v22, %v1419_v22  ;;  %v1420_v29 = vld [vmem:[%s1769_s18 + $0xc0] sm:$0xf]  ;;  %v1437_v33 = vld [vmem:[%s1769_s18 + $0xcc] sm:$0x1]  ;;  %v1436_v35 = vld [vmem:[%s1769_s18 + $0xc4] sm:$0x1] }
  0x2a   : > { %472 = vrot.lane.b32.xlu1 %v1663_v47, %s1729_s22  ;;  %470 = vrot.lane.b32.xlu0 %v1664_v50, %s1729_s22  ;;  %v198_v47 = vld [vmem:[%s1769_s18 + $0x24] sm:$0x1]  ;;  %v708_v50 = vshrl.u32 %v1521_v31, 16  ;;  %v377_v18 = vshrl.u32 %v1476_v1, 16  ;;  %v1695_v37 = vld [vmem:[%s1769_s18 + $0x100] ss:$0 sps:$4 sm:$0xff]  }
  0x2b   : > { %1605 = vmatpush3.bf16.msra.mxu0 %v1714_v25  ;;  %1624 = vmatpush3.bf16.msra.mxu1 %v1714_v25  ;;  %v1474_v55 = vcombine.low %v1869_v46, %v198_v47  ;;  %v1435_v25 = vld [vmem:[%s1769_s18 + $0xbc] sm:$0x1] }
  0x2c   : > { %1626 = vmatprep.subr.msk.bf16.mxu0 %vm971_vm0, %v1715_v34  ;;  %1627 = vmatprep.subr.msk.bf16.mxu1 %vm971_vm0, %v1715_v34  ;;  %v1484_v34 = vcombine.low %v1420_v29, %v1420_v29 }
  0x2d   : > { %v365_v0 = vshll.u32 %v1474_v55, 16 }
  0x2e   : > { %476 = vrot.lane.b32.xlu1 %v1665_v52, %s1729_s22  ;;  %474 = vrot.lane.b32.xlu0 %v1666_v56, %s1729_s22  ;;  %v1475_v52 = vcombine.low %v1865_v44, %v199_v45  ;;  %v1880_v56 = vld [vmem:[%s1769_s18 + $0x38] sm:$0xf] }
  0x2f   : > { %1607 = vmatpush3.bf16.msra.mxu0 %v973_v39  ;;  %1625 = vmatpush3.bf16.msra.mxu1 %v973_v39  ;;  %v1477_v62 = vcombine.low %v1880_v56, %v201_v57  ;;  %v367_v10 = vrot.slane %v365_v0, 1  ;;  %v1500_v39 = vcombine.low %v1420_v29, %v1436_v35 }
  0x30   : > { %v372_v61 = vshll.u32 %v1475_v52, 16 }
  0x31   : > { %v386_v5 = vshll.u32 %v1477_v62, 16  ;;  %v384_v14 = vshrl.u32 %v1477_v62, 16  ;;  %v553_v57 = vshrl.u32 %v1500_v39, 16  ;;  %v1443_v62 = vld [vmem:[%s1769_s18 + $0x30] sm:$0xf] }
  0x32   : > { %568 = vrot.lane.b32.xlu1 %v523_v60, %s1730_s23  ;;  %566 = vrot.lane.b32.xlu0 %v516_v63, %s1730_s23  ;;  %v713_v60 = vor.u32 %v712_v51, %v708_v50  ;;  %v706_v63 = vor.u32 %v705_v54, %v701_v53  ;;  %v374_v4 = vrot.slane %v372_v61, 1  ;;  %v555_v51 = vshll.u32 %v1500_v39, 16 }
  0x33   : > { %v388_v15 = vrot.slane %v386_v5, 1  ;;  %v1507_v0 = vcombine.low %v1443_v62, %v1443_v62  ;;  %v1444_v5 = vld [vmem:[%s1769_s18 + $0x38] sm:$0xf] }
  0x34   : > { %v557_v59 = vrot.slane %v555_v51, 1 }
  0x35   : > { %v389_v20 = vor.u32 %v388_v15, %v384_v14  ;;  %v1460_v14 = vld [vmem:[%s1769_s18 + $0x3c] sm:$0x1] }
  0x36   : > { %572 = vrot.lane.b32.xlu1 %v537_v2, %s1730_s23  ;;  %570 = vrot.lane.b32.xlu0 %v530_v3, %s1730_s23  ;;  %v1681_v2 = vld [vmem:[%s1769_s18 + $0x80] ss:$0 sps:$4 sm:$0xff]   ;;  %v370_v3 = vshrl.u32 %v1475_v52, 16  ;;  %v558_v61 = vor.u32 %v557_v59, %v553_v57 }
  0x38   : > { %v375_v13 = vor.u32 %v374_v4, %v370_v3  ;;  %v1445_v3 = vld [vmem:[%s1769_s18 + $0x40] sm:$0xf]  ;;  %v1458_v4 = vld [vmem:[%s1769_s18 + $0x2c] sm:$0x1] }
  0x3a   : > { %608 = vrot.lane.b32.xlu1 %v1503_v9, %s1731_s28  ;;  %606 = vrot.lane.b32.xlu0 %v1502_v12, %s1731_s28  ;;  %v363_v9 = vshrl.u32 %v1474_v55, 16  ;;  %v379_v12 = vshll.u32 %v1476_v1, 16  ;;  %v1459_v1 = vld [vmem:[%s1769_s18 + $0x34] sm:$0x1] }
  0x3c   : > { %v368_v17 = vor.u32 %v367_v10, %v363_v9  ;;  %v1509_v9 = vcombine.low %v1445_v3, %v1445_v3 }
  0x3e   : > { %612 = vrot.lane.b32.xlu1 %v1505_v19, %s1731_s28  ;;  %610 = vrot.lane.b32.xlu0 %v1504_v21, %s1731_s28  ;;  %v381_v19 = vrot.slane %v379_v12, 1  ;;  %v1461_v12 = vld [vmem:[%s1769_s18 + $0x44] sm:$0x1] }
  0x3f   : > { %v1525_v15 = vcombine.low %v1445_v3, %v1461_v12 }
  0x40   : > { %v382_v21 = vor.u32 %v381_v19, %v377_v18  ;;  %v1524_v19 = vcombine.low %v1444_v5, %v1460_v14 }
  0x42   : > { %648 = vrot.lane.b32.xlu1 %v1675_v23, %s1732_s6  ;;  %646 = vrot.lane.b32.xlu0 %v1676_v27, %s1732_s6  ;;  %v1418_v23 = vld [vmem:[%s1769_s18 + $0xb0] sm:$0xf]  ;;  %v1421_v27 = vld [vmem:[%s1769_s18 + $0xc8] sm:$0xf]  ;;  %v731_v29 = vshll.u32 %v1524_v19, 16 }
  0x43   : > { %v1482_v26 = vcombine.low %v1418_v23, %v1418_v23  ;;  %v1485_v31 = vcombine.low %v1421_v27, %v1421_v27  ;;  %v1498_v32 = vcombine.low %v1418_v23, %v1434_v28 }
  0x45   : > { %v541_v41 = vshll.u32 %v1498_v32, 16 }
  0x46   : > { %652 = vrot.lane.b32.xlu1 %v1677_v30, %s1732_s6  ;;  %650 = vrot.lane.b32.xlu0 %v1678_v36, %s1732_s6  ;;  %v1499_v30 = vcombine.low %v1419_v22, %v1435_v25  ;;  %v1501_v36 = vcombine.low %v1421_v27, %v1437_v33  ;;  %v1709_v22 = vld [vmem:[%s1769_s18 + $0x88] ss:$0 sps:$4 sm:$0xff]   ;;  %v738_v25 = vshll.u32 %v1525_v15, 16  ;;  %v736_v33 = vshrl.u32 %v1525_v15, 16 }
  0x47   : > { %v543_v50 = vrot.slane %v541_v41, 1 }
  0x48   : > { %v548_v38 = vshll.u32 %v1499_v30, 16  ;;  %v546_v43 = vshrl.u32 %v1499_v30, 16  ;;  %v562_v47 = vshll.u32 %v1501_v36, 16  ;;  %v560_v53 = vshrl.u32 %v1501_v36, 16 }
  0x49   : > { %v729_v36 = vshrl.u32 %v1524_v19, 16 }
  0x4a   : > { %744 = vrot.lane.b32.xlu1 %v699_v40, %s1733_s9  ;;  %742 = vrot.lane.b32.xlu0 %v692_v42, %s1733_s9  ;;  %v1696_v40 = vld [vmem:[%s1769_s18 + $0xf8] ss:$0 sps:$4 sm:$0xff]   ;;  %v1697_v42 = vld [vmem:[%s1769_s18 + $0x110] ss:$0 sps:$4 sm:$0xff]   ;;  %v550_v45 = vrot.slane %v548_v38, 1  ;;  %v564_v54 = vrot.slane %v562_v47, 1 }
  0x4c   : > { %v551_v52 = vor.u32 %v550_v45, %v546_v43 }
  0x4e   : > { %288 = vrot.lane.b32.xlu1 %v1679_v48, %s1726_s19  ;;  %286 = vrot.lane.b32.xlu0 %v1680_v49, %s1726_s19  ;;  %v1698_v48 = vld [vmem:[%s1769_s18 + $0x108] ss:$0 sps:$4 sm:$0xff]   ;;  %v539_v49 = vshrl.u32 %v1498_v32, 16 }
  0x50   : > { %v544_v55 = vor.u32 %v543_v50, %v539_v49 }
  0x52   : > { %748 = vrot.lane.b32.xlu1 %v713_v60, %s1733_s9  ;;  %746 = vrot.lane.b32.xlu0 %v706_v63, %s1733_s9  ;;  %v565_v60 = vor.u32 %v564_v54, %v560_v53  ;;  %v1442_v63 = vld [vmem:[%s1769_s18 + $0x28] sm:$0xf] }
  0x53   : > { %v1522_v10 = vcombine.low %v1442_v63, %v1458_v4 }
  0x55   : > { %v715_v27 = vshrl.u32 %v1522_v10, 16 }
  0x56   : > { %292 = vrot.lane.b32.xlu1 %v1681_v2, %s1726_s19  ;;  %290 = vrot.lane.b32.xlu0 %v1682_v7, %s1726_s19  ;;  %v1506_v2 = vcombine.low %v1442_v63, %v1442_v63  ;;  %v1523_v7 = vcombine.low %v1443_v62, %v1459_v1 }
  0x58   : > { %v724_v18 = vshll.u32 %v1523_v7, 16  ;;  %v722_v23 = vshrl.u32 %v1523_v7, 16 }
  0x5a   : > { %400 = vrot.lane.b32.xlu1 %v375_v13, %s1728_s21  ;;  %398 = vrot.lane.b32.xlu0 %v368_v17, %s1728_s21  ;;  %v1508_v13 = vcombine.low %v1444_v5, %v1444_v5  ;;  %v1707_v17 = vld [vmem:[%s1769_s18 + $0x78] ss:$0 sps:$4 sm:$0xff]  }
  0x5e   : > { %404 = vrot.lane.b32.xlu1 %v389_v20, %s1728_s21  ;;  %402 = vrot.lane.b32.xlu0 %v382_v21, %s1728_s21  ;;  %v1708_v20 = vld [vmem:[%s1769_s18 + $0x70] ss:$0 sps:$4 sm:$0xff]   ;;  %v717_v21 = vshll.u32 %v1522_v10, 16 }
  0x60   : > { %v719_v28 = vrot.slane %v717_v21, 1 }
  0x62   : > { %440 = vrot.lane.b32.xlu1 %v1483_v24, %s1727_s20  ;;  %438 = vrot.lane.b32.xlu0 %v1482_v26, %s1727_s20  ;;  %v726_v24 = vrot.slane %v724_v18, 1  ;;  %v1710_v26 = vld [vmem:[%s1769_s18 + $0x80] ss:$0 sps:$4 sm:$0xff]   ;;  %v720_v35 = vor.u32 %v719_v28, %v715_v27 }
  0x64   : > { %v727_v32 = vor.u32 %v726_v24, %v722_v23 }
  0x66   : > { %444 = vrot.lane.b32.xlu1 %v1485_v31, %s1727_s20  ;;  %442 = vrot.lane.b32.xlu0 %v1484_v34, %s1727_s20  ;;  %v740_v34 = vrot.slane %v738_v25, 1 }
  0x6a   : > { %480 = vrot.lane.b32.xlu1 %v1695_v37, %s1729_s22  ;;  %478 = vrot.lane.b32.xlu0 %v1696_v40, %s1729_s22  ;;  %v733_v37 = vrot.slane %v731_v29, 1  ;;  %v741_v40 = vor.u32 %v740_v34, %v736_v33 }
  0x6c   : > { %v734_v41 = vor.u32 %v733_v37, %v729_v36 }
  0x6e   : > { %484 = vrot.lane.b32.xlu1 %v1697_v42, %s1729_s22  ;;  %482 = vrot.lane.b32.xlu0 %v1698_v48, %s1729_s22 }
  0x72   : > { %576 = vrot.lane.b32.xlu1 %v551_v52, %s1730_s23  ;;  %574 = vrot.lane.b32.xlu0 %v544_v55, %s1730_s23 }
  0x76   : > { %580 = vrot.lane.b32.xlu1 %v565_v60, %s1730_s23  ;;  %578 = vrot.lane.b32.xlu0 %v558_v61, %s1730_s23 }
  0x7a   : > { %616 = vrot.lane.b32.xlu1 %v1507_v0, %s1731_s28  ;;  %614 = vrot.lane.b32.xlu0 %v1506_v2, %s1731_s28 }
  0x7e   : > { %620 = vrot.lane.b32.xlu1 %v1509_v9, %s1731_s28  ;;  %618 = vrot.lane.b32.xlu0 %v1508_v13, %s1731_s28 }
  0x82   : > { %656 = vrot.lane.b32.xlu1 %v1707_v17, %s1732_s6  ;;  %654 = vrot.lane.b32.xlu0 %v1708_v20, %s1732_s6 }
  0x84   : > { %v1943_v30 = vpop.permute.xlu1 %282  ;;  %v279_v31 = vpop.permute.xlu0 %278 }
  0x85   : > { %v761_v4 = vsel %vm758_vm1, %v1784_v8, %v279_v31  ;;  %v767_v27 = vsel %vm758_vm1, %v1796_v16, %v1943_v30 }
  0x86   : > { %660 = vrot.lane.b32.xlu1 %v1709_v22, %s1732_s6  ;;  %658 = vrot.lane.b32.xlu0 %v1710_v26, %s1732_s6 }
  0x88   : > { %v285_v38 = vpop.permute.xlu1 %284  ;;  %v281_v39 = vpop.permute.xlu0 %280 }
  0x89   : > { %v764_v2 = vsel %vm758_vm1, %v1780_v6, %v281_v39  ;;  %v770_v25 = vsel %vm758_vm1, %v1789_v11, %v285_v38 }
  0x8a   : > { %752 = vrot.lane.b32.xlu1 %v727_v32, %s1733_s9  ;;  %750 = vrot.lane.b32.xlu0 %v720_v35, %s1733_s9 }
  0x8c   : > { %v433_v42 = vpop.permute.xlu1 %432  ;;  %v431_v43 = vpop.permute.xlu0 %430 }
  0x8e   : > { %756 = vrot.lane.b32.xlu1 %v741_v40, %s1733_s9  ;;  %754 = vrot.lane.b32.xlu0 %v734_v41, %s1733_s9 }
  0x90   : > { %v393_v45 = vpop.permute.xlu1 %392  ;;  %v391_v47 = vpop.permute.xlu0 %390 }
  0x91   : > { %v787_v5 = vsel %vm783_vm2, %v764_v2, %v393_v45  ;;  %v785_v9 = vsel %vm783_vm2, %v761_v4, %v391_v47 }
  0x92   : > { %v804_v10 = vsel %vm800_vm3, %v787_v5, %v433_v42  ;;  %v802_v6 = vsel %vm800_vm3, %v785_v9, %v431_v43 }
  0x94   : > { %v397_v48 = vpop.permute.xlu1 %396  ;;  %v395_v49 = vpop.permute.xlu0 %394 }
  0x95   : > { %v791_v28 = vsel %vm783_vm2, %v770_v25, %v397_v48  ;;  %v789_v31 = vsel %vm783_vm2, %v767_v27, %v395_v49 }
  0x98   : > { %v437_v50 = vpop.permute.xlu1 %436  ;;  %v435_v51 = vpop.permute.xlu0 %434 }
  0x99   : > { %v808_v32 = vsel %vm800_vm3, %v791_v28, %v437_v50  ;;  %v806_v34 = vsel %vm800_vm3, %v789_v31, %v435_v51 }
  0x9c   : > { %v473_v52 = vpop.permute.xlu1 %472  ;;  %v471_v53 = vpop.permute.xlu0 %470 }
  0x9d   : > { %v821_v13 = vsel %vm817_vm4, %v804_v10, %v473_v52  ;;  %v819_v8 = vsel %vm817_vm4, %v802_v6, %v471_v53 }
  0xa0   : > { %v477_v54 = vpop.permute.xlu1 %476  ;;  %v475_v55 = vpop.permute.xlu0 %474 }
  0xa1   : > { %v825_v35 = vsel %vm817_vm4, %v808_v32, %v477_v54  ;;  %v823_v36 = vsel %vm817_vm4, %v806_v34, %v475_v55 }
  0xa4   : > { %v569_v57 = vpop.permute.xlu1 %568  ;;  %v567_v59 = vpop.permute.xlu0 %566 }
  0xa5   : > { %v838_v15 = vsel %vm834_vm5, %v821_v13, %v569_v57  ;;  %v836_v17 = vsel %vm834_vm5, %v819_v8, %v567_v59 }
  0xa8   : > { %v573_v60 = vpop.permute.xlu1 %572  ;;  %v571_v61 = vpop.permute.xlu0 %570 }
  0xa9   : > { %v842_v37 = vsel %vm834_vm5, %v825_v35, %v573_v60  ;;  %v840_v16 = vsel %vm834_vm5, %v823_v36, %v571_v61 }
  0xac   : > { %v609_v62 = vpop.permute.xlu1 %608  ;;  %v607_v63 = vpop.permute.xlu0 %606 }
  0xad   : > { %v855_v18 = vsel %vm851_vm6, %v838_v15, %v609_v62  ;;  %v853_v19 = vsel %vm851_vm6, %v836_v17, %v607_v63 }
  0xb0   : > { %v613_v0 = vpop.permute.xlu1 %612  ;;  %v611_v1 = vpop.permute.xlu0 %610 }
  0xb1   : > { %v859_v30 = vsel %vm851_vm6, %v842_v37, %v613_v0  ;;  %v857_v38 = vsel %vm851_vm6, %v840_v16, %v611_v1 }
  0xb4   : > { %v649_v3 = vpop.permute.xlu1 %648  ;;  %v647_v7 = vpop.permute.xlu0 %646 }
  0xb5   : > { %v872_v20 = vsel %vm868_vm7, %v855_v18, %v649_v3  ;;  %v870_v22 = vsel %vm868_vm7, %v853_v19, %v647_v7 }
  0xb8   : > { %v653_v12 = vpop.permute.xlu1 %652  ;;  %v651_v14 = vpop.permute.xlu0 %650 }
  0xb9   : > { %v876_v39 = vsel %vm868_vm7, %v859_v30, %v653_v12  ;;  %v874_v41 = vsel %vm868_vm7, %v857_v38, %v651_v14 }
  0xbc   : > { %v745_v21 = vpop.permute.xlu1 %744  ;;  %v743_v24 = vpop.permute.xlu0 %742 }
  0xbd   : > { %v889_v23 = vsel %vm885_vm8, %v872_v20, %v745_v21  ;;  %v887_v26 = vsel %vm885_vm8, %v870_v22, %v743_v24 }
  0xbe   : > { %v1526_v29 = vcombine.low %v887_v26, %v889_v23 }
  0xc0   : > { %v289_v33 = vpop.permute.xlu1 %288  ;;  %1608 = vmatprep.mubr.msk.bf16.mxu0 %vm958_vm9, %v1526_v29  ;;  %v287_v11 = vpop.permute.xlu0 %286 }
  0xc1   : > { %v776_v13 = vsel %vm758_vm1, %v1865_v44, %v289_v33  ;;  %v773_v6 = vsel %vm758_vm1, %v1869_v46, %v287_v11 }
  0xc4   : > { %v749_v40 = vpop.permute.xlu1 %748  ;;  %v747_v43 = vpop.permute.xlu0 %746 }
  0xc5   : > { %v893_v42 = vsel %vm885_vm8, %v876_v39, %v749_v40  ;;  %v891_v45 = vsel %vm885_vm8, %v874_v41, %v747_v43 }
  0xc6   : > { %v1527_v47 = vcombine.low %v891_v45, %v893_v42 }
  0xc8   : > { %v293_v48 = vpop.permute.xlu1 %292  ;;  %1609 = vmatmul.mubr.msk.bf16.vlgmr.msra.gmra.mrb[0].mxu0 %vm958_vm9, %v1527_v47  ;;  %v291_v49 = vpop.permute.xlu0 %290 }
  0xc9   : > { %v782_v21 = vsel %vm758_vm1, %v1880_v56, %v293_v48  ;;  %v779_v46 = vsel %vm758_vm1, %v1884_v58, %v291_v49  ;;  %v1734_v48 = vmov 0  }
  0xca   : > { %1166 = vst [vmem:[%s2033_s15 + $0x8] sm:$0xf] %v1734_v48  ;;  %1167 = vst [vmem:[%s2033_s15 + $0xc] sm:$0x1] %v1734_v48 }
  0xcb   : > { %1168 = vst [vmem:[%s2033_s15 + $0x10] sm:$0xf] %v1734_v48  ;;  %1169 = vst [vmem:[%s2033_s15 + $0x14] sm:$0x1] %v1734_v48 }
  0xcc   : > { %v401_v50 = vpop.permute.xlu1 %400  ;;  %v399_v51 = vpop.permute.xlu0 %398  ;;  %1170 = vst [vmem:[%s2033_s15 + $0x18] sm:$0xf] %v1734_v48  ;;  %1171 = vst [vmem:[%s2033_s15 + $0x1c] sm:$0x1] %v1734_v48 }
  0xcd   : > { %v795_v14 = vsel %vm783_vm2, %v776_v13, %v401_v50  ;;  %v793_v8 = vsel %vm783_vm2, %v773_v6, %v399_v51  ;;  %1172 = vst [vmem:[%s2033_s15 + $0x20] sm:$0xf] %v1734_v48  ;;  %1173 = vst [vmem:[%s2033_s15 + $0x24] sm:$0x1] %v1734_v48 }
  0xce   : > { %1174 = vst [vmem:[%s2033_s15 + $0x28] sm:$0xf] %v1734_v48  ;;  %1175 = vst [vmem:[%s2033_s15 + $0x2c] sm:$0x1] %v1734_v48 }
  0xcf   : > { %1176 = vst [vmem:[%s2033_s15 + $0x30] sm:$0xf] %v1734_v48  ;;  %1177 = vst [vmem:[%s2033_s15 + $0x34] sm:$0x1] %v1734_v48 }
  0xd0   : > { %v405_v52 = vpop.permute.xlu1 %404  ;;  %v403_v53 = vpop.permute.xlu0 %402  ;;  %1178 = vst [vmem:[%s2033_s15 + $0x38] sm:$0xf] %v1734_v48  ;;  %1179 = vst [vmem:[%s2033_s15 + $0x3c] sm:$0x1] %v1734_v48 }
  0xd1   : > { %v799_v23 = vsel %vm783_vm2, %v782_v21, %v405_v52  ;;  %v797_v26 = vsel %vm783_vm2, %v779_v46, %v403_v53  ;;  %1180 = vst [vmem:[%s2033_s15 + $0x40] sm:$0xf] %v1734_v48  ;;  %1181 = vst [vmem:[%s2033_s15 + $0x44] sm:$0x1] %v1734_v48 }
  0xd2   : > { %1164 = vst [vmem:[%s2033_s15] sm:$0xf] %v1734_v48  ;;  %1165 = vst [vmem:[%s2033_s15 + $0x4] sm:$0x1] %v1734_v48 }
  0xd3   : > { %1182 = vst [vmem:[%s2033_s15 + $0x48] sm:$0xf] %v1734_v48  ;;  %1183 = vst [vmem:[%s2033_s15 + $0x4c] sm:$0x1] %v1734_v48 }
  0xd4   : > { %v441_v54 = vpop.permute.xlu1 %440  ;;  %v439_v55 = vpop.permute.xlu0 %438 }
  0xd5   : > { %v812_v15 = vsel %vm800_vm3, %v795_v14, %v441_v54  ;;  %v810_v18 = vsel %vm800_vm3, %v793_v8, %v439_v55 }
  0xd8   : > { %v445_v57 = vpop.permute.xlu1 %444  ;;  %v443_v59 = vpop.permute.xlu0 %442 }
  0xd9   : > { %v816_v27 = vsel %vm800_vm3, %v799_v23, %v445_v57  ;;  %v814_v31 = vsel %vm800_vm3, %v797_v26, %v443_v59 }
  0xdc   : > { %v481_v60 = vpop.permute.xlu1 %480  ;;  %v479_v61 = vpop.permute.xlu0 %478 }
  0xdd   : > { %v829_v19 = vsel %vm817_vm4, %v812_v15, %v481_v60  ;;  %v827_v44 = vsel %vm817_vm4, %v810_v18, %v479_v61 }
  0xe0   : > { %v485_v62 = vpop.permute.xlu1 %484  ;;  %v483_v63 = vpop.permute.xlu0 %482 }
  0xe1   : > { %v833_v32 = vsel %vm817_vm4, %v816_v27, %v485_v62  ;;  %v831_v35 = vsel %vm817_vm4, %v814_v31, %v483_v63  ;;  %vm1295_vm4 = vcmask 1040384  }
  0xe4   : > { %v577_v0 = vpop.permute.xlu1 %576  ;;  %v575_v1 = vpop.permute.xlu0 %574 }
  0xe5   : > { %v846_v22 = vsel %vm834_vm5, %v829_v19, %v577_v0  ;;  %v844_v24 = vsel %vm834_vm5, %v827_v44, %v575_v1 }
  0xe8   : > { %v581_v2 = vpop.permute.xlu1 %580  ;;  %v579_v3 = vpop.permute.xlu0 %578 }
  0xe9   : > { %v850_v11 = vsel %vm834_vm5, %v833_v32, %v581_v2  ;;  %v848_v37 = vsel %vm834_vm5, %v831_v35, %v579_v3  ;;  %v1094_v35 = vld [vmem:[%s2158_s2] sm:$0x1]  ;;  %vm1296_vm5 = vsmask.f32 256 }
  0xec   : > { %v617_v4 = vpop.permute.xlu1 %616  ;;  %v615_v5 = vpop.permute.xlu0 %614 }
  0xed   : > { %v863_v25 = vsel %vm851_vm6, %v846_v22, %v617_v4  ;;  %v861_v28 = vsel %vm851_vm6, %v844_v24, %v615_v5 }
  0xf0   : > { %v621_v7 = vpop.permute.xlu1 %620  ;;  %v619_v9 = vpop.permute.xlu0 %618 }
  0xf1   : > { %v867_v16 = vsel %vm851_vm6, %v850_v11, %v621_v7  ;;  %v865_v38 = vsel %vm851_vm6, %v848_v37, %v619_v9  ;;  %vm2077_vm6 = vmand %vm971_vm0, %vm1290_vm14 }
  0xf4   : > { %v657_v10 = vpop.permute.xlu1 %656  ;;  %v655_v12 = vpop.permute.xlu0 %654 }
  0xf5   : > { %v880_v56 = vsel %vm868_vm7, %v863_v25, %v657_v10  ;;  %v878_v58 = vsel %vm868_vm7, %v861_v28, %v655_v12 }
  0xf8   : > { %v661_v17 = vpop.permute.xlu1 %660  ;;  %v659_v20 = vpop.permute.xlu0 %658 }
  0xf9   : > { %v884_v39 = vsel %vm868_vm7, %v867_v16, %v661_v17  ;;  %v882_v41 = vsel %vm868_vm7, %v865_v38, %v659_v20  ;;  %v1095_v16 = vld [vmem:[%s2158_s2 + $0x1] sm:$0x1]  ;;  %vm2084_vm7 = vmand %vm1295_vm4, %vm1296_vm5 }
  0xfc   : > { %v753_v29 = vpop.permute.xlu1 %752  ;;  %v751_v34 = vpop.permute.xlu0 %750 }
  0xfd   : > { %v897_v33 = vsel %vm885_vm8, %v880_v56, %v753_v29  ;;  %v895_v36 = vsel %vm885_vm8, %v878_v58, %v751_v34 }
  0xfe   : > { %v1528_v30 = vcombine.low %v895_v36, %v897_v33  ;;  %v1100_v33 = vlaneseq }
 0x100   : > { %v757_v40 = vpop.permute.xlu1 %756  ;;  %1612 = vmatprep.mubr.msk.bf16.mxu1 %vm958_vm9, %v1528_v30  ;;  %v755_v43 = vpop.permute.xlu0 %754  ;;  %v1101_v34 = vshrl.u32 %v1100_v33, 7 }
 0x101   : > { %v901_v42 = vsel %vm885_vm8, %v884_v39, %v757_v40  ;;  %v899_v45 = vsel %vm885_vm8, %v882_v41, %v755_v43 }
 0x102   : > { %v1529_v47 = vcombine.low %v899_v45, %v901_v42  ;;  %v1102_v36 = vsub.s32 0, %v1101_v34 }
 0x104   : > { %1613 = vmatmul.mubr.msk.bf16.vlgmr.msra.gmra.mrb[0].mxu1 %vm958_vm9, %v1529_v47 }
 0x19b   : > { %v1610_v49 = vpop.f32.mrb[0].mxu0 }
 0x19c   : > { %v1009_v50 = vpop.f32.mrb[1].mxu0  ;;  %v1070_v57 = vmul.f32 %v1610_v49, %v1610_v49 }
 0x19d   : > { %v1611_v51 = vpop.f32.mrb[2].mxu0  ;;  %v1068_v53 = vmul.f32 %v1009_v50, %v1009_v50 }
 0x19e   : > { %v1012_v52 = vpop.f32.mrb[3].mxu0  ;;  %v1071_v61 = vmul.f32 %v1611_v51, %v1611_v51 }
 0x19f   : > { %v1054_v54 = vadd.f32 %v1012_v52, %v1009_v50  ;;  %v1069_v55 = vmul.f32 %v1012_v52, %v1012_v52 }
 0x1a1   : > { %v1055_v59 = vadd.f32 %v1610_v49, %v1054_v54  ;;  %v1076_v60 = vadd.f32 %v1069_v55, %v1068_v53 }
 0x1a3   : > { %v1077_v62 = vadd.f32 %v1076_v60, %v1070_v57  ;;  %v1056_v63 = vadd.f32 %v1611_v51, %v1055_v59 }
 0x1a5   : > { %v1078_v0 = vadd.f32 %v1077_v62, %v1071_v61 }
 0x1d7   : > { %v1614_v1 = vpop.f32.mrb[0].mxu1 }
 0x1d8   : > { %v1025_v2 = vpop.f32.mrb[1].mxu1  ;;  %v1074_v13 = vmul.f32 %v1614_v1, %v1614_v1 }
 0x1d9   : > { %v1057_v3 = vadd.f32 %v1056_v63, %v1025_v2  ;;  %v1072_v4 = vmul.f32 %v1025_v2, %v1025_v2  ;;  %v1615_v5 = vpop.f32.mrb[2].mxu1 }
 0x1da   : > { %v1028_v7 = vpop.f32.mrb[3].mxu1  ;;  %v1075_v8 = vmul.f32 %v1615_v5, %v1615_v5 }
 0x1db   : > { %v1079_v9 = vadd.f32 %v1078_v0, %v1072_v4  ;;  %v1058_v10 = vadd.f32 %v1057_v3, %v1028_v7  ;;  %v1073_v12 = vmul.f32 %v1028_v7, %v1028_v7 }
 0x1dd   : > { %v1059_v6 = vadd.f32 %v1614_v1, %v1058_v10  ;;  %v1080_v14 = vadd.f32 %v1079_v9, %v1073_v12 }
 0x1df   : > { %v1060_v15 = vadd.f32 %v1615_v5, %v1059_v6  ;;  %v1081_v17 = vadd.f32 %v1080_v14, %v1074_v13 }
 0x1e1   : > { %v1061_v18 = vrot.slane %v1060_v15, 4  ;;  %v1082_v19 = vadd.f32 %v1081_v17, %v1075_v8 }
 0x1e3   : > { %v1062_v20 = vadd.f32 %v1061_v18, %v1060_v15  ;;  %v1083_v21 = vrot.slane %v1082_v19, 4 }
 0x1e5   : > { %v1063_v44 = vrot.slane %v1062_v20, 2  ;;  %v1084_v22 = vadd.f32 %v1083_v21, %v1082_v19 }
 0x1e7   : > { %v1064_v46 = vadd.f32 %v1063_v44, %v1062_v20  ;;  %v1085_v23 = vrot.slane %v1084_v22, 2 }
 0x1e9   : > { %v1065_v24 = vrot.slane %v1064_v46, 1  ;;  %v1086_v25 = vadd.f32 %v1085_v23, %v1084_v22 }
 0x1eb   : > { %v1066_v26 = vadd.f32 %v1065_v24, %v1064_v46  ;;  %v1087_v27 = vrot.slane %v1086_v25, 1 }
 0x1ed   : > { %v1067_v28 = vmul.f32 0.015625, %v1066_v26  ;;  %v1088_v56 = vadd.f32 %v1087_v27, %v1086_v25 }
 0x1ef   : > { %v1089_v29 = vmul.f32 0.015625, %v1088_v56  ;;  %v1090_v31 = vmul.f32 %v1067_v28, %v1067_v28  ;;  %v1097_v11 = vmul.f32 %v1094_v35, %v1067_v28 }
 0x1f1   : > { %v1091_v32 = vsub.f32 %v1089_v29, %v1090_v31 }
 0x1f3   : > { %v1092_v58 = vadd.f32 1e-05, %v1091_v32 }
 0x1f5   : > { %1716 = vrsqrt.f32 %v1092_v58 }
 0x1ff   : > { %v1717_v37 = vpop.eup %1716 }
 0x200   : > { %v1096_v30 = vmul.f32 %v1717_v37, %v1094_v35  ;;  %v1098_v38 = vmul.f32 %v1717_v37, %v1097_v11  ;;  %v1547_v35 = vld [vmem:[%s2033_s15 + $0x8] sm:$0xf]  ;;  %v1549_v11 = vld [vmem:[%s2033_s15 + $0xc] sm:$0x1] }
 0x202   : > { %v1099_v39 = vsub.f32 %v1095_v16, %v1098_v38  ;;  %v1103_v40 = vrot.slane %v1096_v30, %v1102_v36 }
 0x204   : > { %v1104_v41 = vmul.f32 %v1103_v40, %v1009_v50  ;;  %v1105_v42 = vmul.f32 %v1103_v40, %v1012_v52  ;;  %v1106_v43 = vmul.f32 %v1610_v49, %v1103_v40  ;;  %v1107_v45 = vmul.f32 %v1611_v51, %v1103_v40 }
 0x205   : > { %v1108_v47 = vmul.f32 %v1103_v40, %v1025_v2  ;;  %v1109_v48 = vmul.f32 %v1103_v40, %v1028_v7  ;;  %v1110_v53 = vmul.f32 %v1614_v1, %v1103_v40  ;;  %v1111_v54 = vmul.f32 %v1615_v5, %v1103_v40 }
 0x206   : > { %v1115_v55 = vrot.slane %v1099_v39, %v1102_v36  ;;  %v1551_v39 = vld [vmem:[%s2033_s15 + $0x10] sm:$0xf] }
 0x208   : > { %v1116_v57 = vadd.f32 %v1115_v55, %v1104_v41  ;;  %v1117_v59 = vadd.f32 %v1115_v55, %v1105_v42  ;;  %v1118_v60 = vadd.f32 %v1115_v55, %v1106_v43  ;;  %v1119_v61 = vadd.f32 %v1115_v55, %v1107_v45 }
 0x209   : > { %v1120_v62 = vadd.f32 %v1115_v55, %v1108_v47  ;;  %v1121_v63 = vadd.f32 %v1115_v55, %v1109_v48  ;;  %v1122_v0 = vadd.f32 %v1115_v55, %v1110_v53  ;;  %v1123_v3 = vadd.f32 %v1115_v55, %v1111_v54  ;;  %v1553_v47 = vld [vmem:[%s2033_s15 + $0x14] sm:$0x1]  ;;  %v1555_v48 = vld [vmem:[%s2033_s15 + $0x18] sm:$0xf] }
 0x20a   : > { %vm1124_vm10 = vcmp.ge.f32.partialorder %v1116_v57, 0.0  ;;  %vm1125_vm11 = vcmp.ge.f32.partialorder %v1117_v59, 0.0  ;;  %vm1126_vm12 = vcmp.ge.f32.partialorder %v1118_v60, 0.0  ;;  %vm1127_vm13 = vcmp.ge.f32.partialorder %v1119_v61, 0.0 }
 0x20b   : > { %vm1128_vm15 = vcmp.ge.f32.partialorder %v1120_v62, 0.0  ;;  %vm1129_vm1 = vcmp.ge.f32.partialorder %v1121_v63, 0.0  ;;  %vm1130_vm2 = vcmp.ge.f32.partialorder %v1122_v0, 0.0  ;;  %vm1131_vm3 = vcmp.ge.f32.partialorder %v1123_v3, 0.0 }
 0x20c   : > { %v1132_v49 = vmul.f32 0.01, %v1116_v57  ;;  %v1133_v50 = vmul.f32 0.01, %v1117_v59  ;;  %v1134_v51 = vmul.f32 0.01, %v1118_v60 }
 0x20d   : > { %v1135_v52 = vmul.f32 0.01, %v1119_v61  ;;  %v1136_v1 = vmul.f32 0.01, %v1120_v62  ;;  %v1137_v2 = vmul.f32 0.01, %v1121_v63 }
 0x20e   : > { %v1138_v4 = vmul.f32 0.01, %v1122_v0  ;;  %v1139_v5 = vmul.f32 0.01, %v1123_v3  ;;  %v1140_v7 = vsel %vm1124_vm10, %v1116_v57, %v1132_v49  ;;  %v1141_v9 = vsel %vm1125_vm11, %v1117_v59, %v1133_v50  ;;  %v1557_v59 = vld [vmem:[%s2033_s15 + $0x1c] sm:$0x1] }
 0x20f   : > { %v1142_v10 = vsel %vm1126_vm12, %v1118_v60, %v1134_v51  ;;  %v1143_v12 = vsel %vm1127_vm13, %v1119_v61, %v1135_v52  ;;  %v1144_v13 = vsel %vm1128_vm15, %v1120_v62, %v1136_v1  ;;  %v1145_v6 = vsel %vm1129_vm1, %v1121_v63, %v1137_v2  ;;  %v1559_v60 = vld [vmem:[%s2033_s15 + $0x20] sm:$0xf]  ;;  %v1563_v1 = vld [vmem:[%s2033_s15 + $0x28] sm:$0xf]  ;;  %v1565_v2 = vld [vmem:[%s2033_s15 + $0x2c] sm:$0x1] }
 0x210   : > { %v1146_v14 = vsel %vm1130_vm2, %v1122_v0, %v1138_v4  ;;  %v1147_v8 = vsel %vm1131_vm3, %v1123_v3, %v1139_v5  ;;  %v1581_v15 = vpack.c.bf16 %v1140_v7, %v1140_v7  ;;  %v1582_v17 = vpack.c.bf16 %v1141_v9, %v1141_v9  ;;  %v1561_v3 = vld [vmem:[%s2033_s15 + $0x24] sm:$0x1] }
 0x211   : > { %v1583_v18 = vpack.c.bf16 %v1142_v10, %v1142_v10  ;;  %v1584_v19 = vpack.c.bf16 %v1143_v12, %v1143_v12  ;;  %v1585_v20 = vpack.c.bf16 %v1144_v13, %v1144_v13  ;;  %v1586_v21 = vpack.c.bf16 %v1145_v6, %v1145_v6  ;;  %v1567_v10 = vld [vmem:[%s2033_s15 + $0x30] sm:$0xf]  ;;  %v1569_v12 = vld [vmem:[%s2033_s15 + $0x34] sm:$0x1] }
 0x212   : > { %v2069_v44 = vpack.c.bf16 %v1146_v14, %v1146_v14  ;;  %v2071_v22 = vpack.c.bf16 %v1147_v8, %v1147_v8  ;;  %v1209_v46 = vshrl.u32 %v1581_v15, 16  ;;  %v1212_v23 = vshll.u32 %v1581_v15, 16  ;;  %v1571_v15 = vld [vmem:[%s2033_s15 + $0x38] sm:$0xf] }
 0x213   : > { %v1217_v24 = vshrl.u32 %v1582_v17, 16  ;;  %v1220_v25 = vshll.u32 %v1582_v17, 16  ;;  %v1225_v26 = vshrl.u32 %v1583_v18, 16  ;;  %v1228_v27 = vshll.u32 %v1583_v18, 16  ;;  %v1573_v17 = vld [vmem:[%s2033_s15 + $0x3c] sm:$0x1] }
 0x214   : > { %v1211_v28 = vrot.slane %v1209_v46, 7  ;;  %v1233_v56 = vshrl.u32 %v1584_v19, 16  ;;  %v1236_v29 = vshll.u32 %v1584_v19, 16  ;;  %v1241_v31 = vshrl.u32 %v1585_v20, 16 }
 0x215   : > { %v1219_v32 = vrot.slane %v1217_v24, 7  ;;  %v1227_v58 = vrot.slane %v1225_v26, 7  ;;  %v1244_v33 = vshll.u32 %v1585_v20, 16  ;;  %v1249_v34 = vshrl.u32 %v1586_v21, 16 }
 0x216   : > { %v1214_v37 = vor.u32 %v1212_v23, %v1211_v28  ;;  %v1215_v16 = vrot.slane %v1211_v28, 4  ;;  %v1235_v30 = vrot.slane %v1233_v56, 7  ;;  %v1243_v38 = vrot.slane %v1241_v31, 7 }
 0x217   : > { %v1222_v40 = vor.u32 %v1220_v25, %v1219_v32  ;;  %v1223_v41 = vrot.slane %v1219_v32, 4  ;;  %v1230_v42 = vor.u32 %v1228_v27, %v1227_v58  ;;  %v1231_v43 = vrot.slane %v1227_v58, 4 }
 0x218   : > { %v1238_v53 = vor.u32 %v1236_v29, %v1235_v30  ;;  %v1239_v54 = vrot.slane %v1235_v30, 4  ;;  %v1246_v55 = vor.u32 %v1244_v33, %v1243_v38  ;;  %v1247_v57 = vrot.slane %v1243_v38, 4 }
 0x219   : > { %v1251_v61 = vrot.slane %v1249_v34, 7  ;;  %v1252_v62 = vshll.u32 %v1586_v21, 16  ;;  %v1257_v63 = vshrl.u32 %v2069_v44, 16  ;;  %v1260_v0 = vshll.u32 %v2069_v44, 16  ;;  %v1575_v44 = vld [vmem:[%s2033_s15 + $0x40] sm:$0xf] }
 0x21a   : > { %v1265_v49 = vshrl.u32 %v2071_v22, 16  ;;  %v1268_v50 = vshll.u32 %v2071_v22, 16  ;;  %v1293_v51 = vsel %vm2077_vm6, %v1214_v37, %v1547_v35  ;;  %v1299_v52 = vsel %vm2084_vm7, %v1215_v16, %v1549_v11  ;;  %v1577_v22 = vld [vmem:[%s2033_s15 + $0x44] sm:$0x1] }
 0x21b   : > { %v1254_v4 = vor.u32 %v1252_v62, %v1251_v61  ;;  %v1255_v5 = vrot.slane %v1251_v61, 4  ;;  %v1259_v7 = vrot.slane %v1257_v63, 7  ;;  %1548 = vst [vmem:[%s2033_s15 + $0x8] sm:$0xf] %v1293_v51  ;;  %1550 = vst [vmem:[%s2033_s15 + $0xc] sm:$0x1] %v1299_v52  ;;  %v1302_v9 = vsel %vm2077_vm6, %v1222_v40, %v1551_v39 }
 0x21c   : > { %v1267_v13 = vrot.slane %v1265_v49, 7  ;;  %1552 = vst [vmem:[%s2033_s15 + $0x10] sm:$0xf] %v1302_v9  ;;  %v1305_v6 = vsel %vm2084_vm7, %v1223_v41, %v1553_v47  ;;  %v1308_v14 = vsel %vm2077_vm6, %v1230_v42, %v1555_v48  ;;  %v1311_v8 = vsel %vm2084_vm7, %v1231_v43, %v1557_v59 }
 0x21d   : > { %v1262_v18 = vor.u32 %v1260_v0, %v1259_v7  ;;  %v1263_v19 = vrot.slane %v1259_v7, 4  ;;  %1554 = vst [vmem:[%s2033_s15 + $0x14] sm:$0x1] %v1305_v6  ;;  %1556 = vst [vmem:[%s2033_s15 + $0x18] sm:$0xf] %v1308_v14  ;;  %v1314_v20 = vsel %vm2077_vm6, %v1238_v53, %v1559_v60  ;;  %v1317_v21 = vsel %vm2084_vm7, %v1239_v54, %v1561_v3 }
 0x21e   : > { %1558 = vst [vmem:[%s2033_s15 + $0x1c] sm:$0x1] %v1311_v8  ;;  %v1270_v46 = vor.u32 %v1268_v50, %v1267_v13  ;;  %v1271_v23 = vrot.slane %v1267_v13, 4  ;;  %1560 = vst [vmem:[%s2033_s15 + $0x20] sm:$0xf] %v1314_v20  ;;  %v1320_v24 = vsel %vm2077_vm6, %v1246_v55, %v1563_v1  ;;  %v1323_v25 = vsel %vm2084_vm7, %v1247_v57, %v1565_v2 }
 0x21f   : > { %1562 = vst [vmem:[%s2033_s15 + $0x24] sm:$0x1] %v1317_v21  ;;  %1564 = vst [vmem:[%s2033_s15 + $0x28] sm:$0xf] %v1320_v24  ;;  %v1326_v26 = vsel %vm2077_vm6, %v1254_v4, %v1567_v10  ;;  %v1329_v27 = vsel %vm2084_vm7, %v1255_v5, %v1569_v12  ;;  %v1332_v28 = vsel %vm2077_vm6, %v1262_v18, %v1571_v15 }
 0x220   : > { %1566 = vst [vmem:[%s2033_s15 + $0x2c] sm:$0x1] %v1323_v25  ;;  %v1335_v56 = vsel %vm2084_vm7, %v1263_v19, %v1573_v17  ;;  %1568 = vst [vmem:[%s2033_s15 + $0x30] sm:$0xf] %v1326_v26  ;;  %v1338_v29 = vsel %vm2077_vm6, %v1270_v46, %v1575_v44  ;;  %v1341_v31 = vsel %vm2084_vm7, %v1271_v23, %v1577_v22 }
 0x221   : > { %1570 = vst [vmem:[%s2033_s15 + $0x34] sm:$0x1] %v1329_v27  ;;  %1572 = vst [vmem:[%s2033_s15 + $0x38] sm:$0xf] %v1332_v28 }
 0x222   : > { %1574 = vst [vmem:[%s2033_s15 + $0x3c] sm:$0x1] %v1335_v56  ;;  %1576 = vst [vmem:[%s2033_s15 + $0x40] sm:$0xf] %v1338_v29 }
 0x223   : > { %1578 = vst [vmem:[%s2033_s15 + $0x44] sm:$0x1] %v1341_v31 }
 0x224 PF: > { %s13_s12 = sadd.s32 1, %s1724_s12  }
 0x225   : > { %p10_p5 = scmp.ge.s32.totalorder %s13_s12, 4  }
 0x227   :  { %12 = sbr.rel (!%p10_p5) target bundleno = 1 (0x1), region = 68 }

// kernel: _lambda_.9
= control target key start
LH: loop header
LB: loop body
LE: loop exit
PB: predicated region body
PF: predicated region fallthrough
CT: control target
= control target key end

     0   :  { %s1764_s12 = smov 0   ;;  %s2287_s0 = inlined_call_operand.vmem [shape: bf16[2,10,10,128], index: 0, kind: input, shape index: {}]   ;;  %s2288_s1 = inlined_call_operand.vmem [shape: bf16[144,128], index: 1, kind: input, shape index: {}]   ;;  %s2289_s2 = inlined_call_operand.vmem [shape: f32[8,128], index: 2, kind: input, shape index: {}]   ;;  %s2290_s3 = inlined_call_operand.vmem [shape: bf16[2,10,10,128], index: 3, kind: output, shape index: {}]  }
   0x1 LB: > { %s1428_s13 = sadd.s32 4294967295, %s1734_s12   ;;  %p1432_p0 = scmp.ge.s32.totalorder %s1734_s12, 1  ;;  %s1734_s12 = sphi %s1764_s12, %s13_s12  }
   0x2   : > { %p137_p1 = scmp.lt.s32.totalorder %s1734_s12, 3 }
   0x4   : > { %p138_p2 = pnand %p1432_p0, %p137_p1 }
   0x5   : > { %p161_p3 = scmp.lt.s32.totalorder (!%p138_p2), %s1428_s13, 1  ;;  %v1713_v0 = vld [vmem:[%s2288_s1] sm:$0xff] (!%p138_p2)   ;;  %v1736_v1 = vmov (!%p138_p2), 0   ;;  %v1714_v2 = vld [vmem:[%s2288_s1 + $0x8] sm:$0xff] (!%p138_p2)   ;;  %v1715_v3 = vld [vmem:[%s2288_s1 + $0x10] sm:$0xff] (!%p138_p2)   ;;  %s1737_s24 = smov (!%p138_p2), 48  }
   0x6   : > { %141 = sbr.rel (%p138_p2) target bundleno = 530 (0x212), region = 32  ;;  %1005 = vmatprep.subr.bf16.mxu0 (!%p138_p2), %v1736_v1  ;;  %1618 = vmatprep.subr.bf16.mxu1 (!%p138_p2), %v1736_v1  ;;  %v1716_v25 = vld [vmem:[%s2288_s1 + $0x18] sm:$0xff] (!%p138_p2)   ;;  %s1738_s27 = smov (!%p138_p2), 80   ;;  %v1717_v41 = vld [vmem:[%s2288_s1 + $0x20] sm:$0xff] (!%p138_p2)   ;;  %v1718_v56 = vld [vmem:[%s2288_s1 + $0x28] sm:$0xff] (!%p138_p2)   ;;  %vm758_vm0 = vcmask (!%p138_p2), 130048  }
   0x7   : > { %1006 = vmatpush1.bf16.msra.mxu0 (!%p138_p2), %v1713_v0  ;;  %1627 = vmatpush1.bf16.msra.mxu1 (!%p138_p2), %v1713_v0  ;;  %s1739_s28 = smov (!%p138_p2), 32   ;;  %s1740_s4 = smov (!%p138_p2), 16   ;;  %v1719_v0 = vld [vmem:[%s2288_s1 + $0x30] sm:$0xff] (!%p138_p2)   ;;  %vm783_vm1 = vcmask (!%p138_p2), 261120   ;;  %vm800_vm2 = vcmask (!%p138_p2), 392192   ;;  %vm817_vm3 = vcmask (!%p138_p2), 523264  }
   0x8   : > { %1007 = vmatprep.subr.bf16.mxu0 (!%p138_p2), %v1736_v1  ;;  %1619 = vmatprep.subr.bf16.mxu1 (!%p138_p2), %v1736_v1  ;;  %s1741_s9 = smov (!%p138_p2), 64   ;;  %s1742_s14 = smov (!%p138_p2), 96   ;;  %vm834_vm4 = vcmask (!%p138_p2), 654336   ;;  %vm851_vm5 = vcmask (!%p138_p2), 785408   ;;  %vm868_vm6 = vcmask (!%p138_p2), 916480   ;;  %vm1319_vm15 = vcmask (!%p138_p2), 1043456  }
   0x9   : > { %s1743_s17 = smov (!%p138_p2), 112  }
   0xb   : > { %1008 = vmatpush1.bf16.msra.mxu0 (!%p138_p2), %v1714_v2  ;;  %1628 = vmatpush1.bf16.msra.mxu1 (!%p138_p2), %v1714_v2 }
   0xc   : > { %1009 = vmatprep.subr.bf16.mxu0 (!%p138_p2), %v1736_v1  ;;  %1620 = vmatprep.subr.bf16.mxu1 (!%p138_p2), %v1736_v1 }
   0xd   : > { %s2296_s13 = smov (!%p161_p3, %s1428_s13), 1 }
   0xe   : > { %s1636_s18 = smul.u32 80, %s2296_s13 }
   0xf   : > { %1010 = vmatpush1.bf16.msra.mxu0 %v1715_v3  ;;  %1629 = vmatpush1.bf16.msra.mxu1 %v1715_v3 }
  0x10   : > { %s1793_s23 = scalar_lea.vmem %s2287_s0, %s1636_s18  ;;  %1011 = vmatprep.subr.bf16.mxu0 %v1736_v1  ;;  %1621 = vmatprep.subr.bf16.mxu1 %v1736_v1  ;;  %s2132_s21 = scalar_lea.vmem %s2290_s3, %s1636_s18 }
  0x11   : > { %v1436_v4 = vld [vmem:[%s1793_s23 + $0x10] sm:$0xf]  ;;  %v1797_v5 = vld [vmem:[%s1793_s23 + $0x14] sm:$0x1]  ;;  %v1435_v6 = vld [vmem:[%s1793_s23 + $0x8] sm:$0xf] }
  0x12   : > { %v1500_v7 = vcombine.low %v1436_v4, %v1436_v4  ;;  %v1443_v8 = vld [vmem:[%s1793_s23 + $0xc] sm:$0x1]  ;;  %v1499_v9 = vcombine.low %v1435_v6, %v1435_v6  ;;  %v1451_v10 = vld [vmem:[%s1793_s23 + $0x8] sm:$0xe]  ;;  %v180_v11 = vld [vmem:[%s1793_s23 + $0x4] sm:$0x1]  ;;  %v1806_v12 = vcombine.low %v1436_v4, %v1797_v5 }
  0x13   : > { %v1808_v13 = vcombine.low %v1435_v6, %v1443_v8  ;;  %v1515_v14 = vcombine.low %v1451_v10, %v1443_v8  ;;  %v188_v15 = vld [vmem:[%s1793_s23] sm:$0xe]  ;;  %v181_v17 = vld [vmem:[%s1793_s23 + $0xc] sm:$0x1]  ;;  %v189_v20 = vld [vmem:[%s1793_s23 + $0x8] sm:$0xe]  ;;  %1012 = vmatpush1.bf16.msra.mxu0 %v1716_v25  ;;  %1630 = vmatpush1.bf16.msra.mxu1 %v1716_v25 }
  0x14   : > { %v1812_v16 = vld [vmem:[%s1793_s23] sm:$0xf]  ;;  %432 = vrot.lane.b32.xlu1 %v1500_v7, %s1737_s24  ;;  %430 = vrot.lane.b32.xlu0 %v1499_v9, %s1737_s24  ;;  %v1491_v18 = vcombine.low %v188_v15, %v180_v11  ;;  %v1820_v21 = vld [vmem:[%s1793_s23 + $0x8] sm:$0xf]  ;;  %v1492_v23 = vcombine.low %v189_v20, %v181_v17  ;;  %v480_v30 = vshll.u32 %v1806_v12, 16  ;;  %v478_v44 = vshrl.u32 %v1806_v12, 16 }
  0x15   : > { %v1483_v19 = vcombine.low %v1812_v16, %v180_v11  ;;  %v566_v22 = vrot.slane %v1515_v14, 1  ;;  %v1452_v24 = vld [vmem:[%s1793_s23 + $0x10] sm:$0xe]  ;;  %v1484_v27 = vcombine.low %v1820_v21, %v181_v17  ;;  %v473_v31 = vshll.u32 %v1808_v13, 16  ;;  %v1832_v33 = vld [vmem:[%s1793_s23 + $0x18] sm:$0xf]  ;;  %1013 = vmatprep.subr.bf16.mxu0 %v1736_v1  ;;  %1622 = vmatprep.subr.bf16.mxu1 %v1736_v1 }
  0x16   : > { %v382_v26 = vrot.slane %v1491_v18, 1  ;;  %v383_v32 = vrot.slane %v1492_v23, 1  ;;  %v1516_v35 = vcombine.low %v1452_v24, %v1797_v5  ;;  %v1838_v38 = vld [vmem:[%s1793_s23 + $0x1c] sm:$0x1]  ;;  %v1841_v39 = vld [vmem:[%s1793_s23 + $0x10] sm:$0xf]  ;;  %v1524_v5 = vcombine.low %v1832_v33, %v1832_v33 }
  0x17   : > { %v287_v28 = vshrl.u32 %v1483_v19, 16  ;;  %v289_v29 = vshll.u32 %v1483_v19, 16  ;;  %v294_v36 = vshrl.u32 %v1484_v27, 16  ;;  %v296_v37 = vshll.u32 %v1484_v27, 16  ;;  %v1844_v40 = vld [vmem:[%s1793_s23 + $0x14] sm:$0x1]  ;;  %1014 = vmatpush1.bf16.msra.mxu0 %v1717_v41  ;;  %1631 = vmatpush1.bf16.msra.mxu1 %v1717_v41 }
  0x18   : > { %574 = vrot.lane.b32.xlu0 %v566_v22, %s1738_s27  ;;  %390 = vrot.lane.b32.xlu1 %v382_v26, %s1739_s28  ;;  %v471_v45 = vshrl.u32 %v1808_v13, 16  ;;  %v482_v46 = vrot.slane %v480_v30, 1  ;;  %v1532_v47 = vcombine.low %v1832_v33, %v1838_v38  ;;  %v567_v48 = vrot.slane %v1516_v35, 1  ;;  %v1860_v52 = vld [vmem:[%s1793_s23 + $0x18] sm:$0xf]  ;;  %v1721_v26 = vld [vmem:[%s2288_s1 + $0x40] sm:$0xff]  }
  0x19   : > { %v291_v34 = vrot.slane %v289_v29, 1  ;;  %v298_v43 = vrot.slane %v296_v37, 1  ;;  %v475_v50 = vrot.slane %v473_v31, 1  ;;  %v1531_v51 = vcombine.low %v1841_v39, %v1844_v40  ;;  %v1863_v53 = vld [vmem:[%s1793_s23 + $0x1c] sm:$0x1]  ;;  %1015 = vmatprep.subr.bf16.mxu0 %v1736_v1  ;;  %1623 = vmatprep.subr.bf16.mxu1 %v1736_v1  ;;  %1194 = vst [vmem:[%s2132_s21] sm:$0xf] %v1736_v1 }
  0x1a   : > { %v1866_v54 = vld [vmem:[%s1793_s23 + $0x10] sm:$0xf]  ;;  %v1869_v55 = vld [vmem:[%s1793_s23 + $0x14] sm:$0x1]  ;;  %v664_v57 = vshll.u32 %v1532_v47, 16  ;;  %v1486_v58 = vcombine.low %v1860_v52, %v1863_v53  ;;  %v483_v59 = vor.u32 %v482_v46, %v478_v44  ;;  %v1523_v6 = vcombine.low %v1841_v39, %v1841_v39  ;;  %v1720_v15 = vld [vmem:[%s2288_s1 + $0x38] sm:$0xff]  }
  0x1b   : > { %v292_v42 = vor.u32 %v291_v34, %v287_v28  ;;  %v299_v49 = vor.u32 %v298_v43, %v294_v36  ;;  %v476_v60 = vor.u32 %v475_v50, %v471_v45  ;;  %v657_v61 = vshll.u32 %v1531_v51, 16  ;;  %v1883_v63 = vld [vmem:[%s1793_s23 + $0x28] sm:$0xf]  ;;  %v1889_v2 = vld [vmem:[%s1793_s23 + $0x2c] sm:$0x1]  ;;  %1016 = vmatpush1.bf16.msra.mxu0 %v1718_v56  ;;  %1632 = vmatpush1.bf16.msra.mxu1 %v1718_v56 }
  0x1c   : > { %392 = vrot.lane.b32.xlu1 %v383_v32, %s1739_s28  ;;  %v1485_v62 = vcombine.low %v1866_v54, %v1869_v55  ;;  %v1892_v3 = vld [vmem:[%s1793_s23 + $0x20] sm:$0xf]  ;;  %v1895_v4 = vld [vmem:[%s1793_s23 + $0x24] sm:$0x1]  ;;  %1017 = vmatprep.subr.bf16.mxu0 %v1736_v1  ;;  %v662_v7 = vshrl.u32 %v1532_v47, 16  ;;  %v666_v8 = vrot.slane %v664_v57, 1  ;;  %v1488_v13 = vcombine.low %v1883_v63, %v1889_v2 }
  0x1d   : > { %342 = vrot.lane.b32.xlu0 %v292_v42, %s1740_s4  ;;  %1624 = vmatprep.subr.bf16.mxu1 %v1736_v1  ;;  %v655_v9 = vshrl.u32 %v1531_v51, 16  ;;  %v310_v10 = vshll.u32 %v1486_v58, 16  ;;  %v659_v11 = vrot.slane %v657_v61, 1  ;;  %v1487_v14 = vcombine.low %v1892_v3, %v1895_v4  ;;  %v191_v33 = vld [vmem:[%s1793_s23 + $0x18] sm:$0xe] }
  0x1e   : > { %v303_v12 = vshll.u32 %v1485_v62, 16  ;;  %v667_v17 = vor.u32 %v666_v8, %v662_v7  ;;  %v308_v18 = vshrl.u32 %v1486_v58, 16  ;;  %v301_v20 = vshrl.u32 %v1485_v62, 16  ;;  %v190_v34 = vld [vmem:[%s1793_s23 + $0x10] sm:$0xe] }
  0x1f   : > { %1018 = vmatpush1.bf16.msra.mxu0 %v1719_v0  ;;  %1633 = vmatpush1.bf16.msra.mxu1 %v1719_v0  ;;  %v312_v19 = vrot.slane %v310_v10, 1  ;;  %v660_v22 = vor.u32 %v659_v11, %v655_v9  ;;  %v324_v24 = vshll.u32 %v1488_v13, 16  ;;  %v317_v25 = vshll.u32 %v1487_v14, 16  ;;  %v193_v41 = vld [vmem:[%s1793_s23 + $0x28] sm:$0xe] }
  0x20   : > { %576 = vrot.lane.b32.xlu1 %v567_v48, %s1738_s27  ;;  %1019 = vmatprep.subr.bf16.mxu0 %v1736_v1  ;;  %v305_v23 = vrot.slane %v303_v12, 1  ;;  %v322_v27 = vshrl.u32 %v1488_v13, 16  ;;  %v315_v28 = vshrl.u32 %v1487_v14, 16  ;;  %v1494_v35 = vcombine.low %v191_v33, %v1863_v53  ;;  %v192_v42 = vld [vmem:[%s1793_s23 + $0x20] sm:$0xe] }
  0x21   : > { %344 = vrot.lane.b32.xlu0 %v299_v49, %s1740_s4  ;;  %1625 = vmatprep.subr.bf16.mxu1 %v1736_v1  ;;  %v313_v29 = vor.u32 %v312_v19, %v308_v18  ;;  %v326_v31 = vrot.slane %v324_v24, 1  ;;  %v319_v32 = vrot.slane %v317_v25, 1  ;;  %v1493_v39 = vcombine.low %v190_v34, %v1869_v55  ;;  %v1936_v47 = vld [vmem:[%s1793_s23 + $0x24] sm:$0x1]  ;;  %v1939_v48 = vld [vmem:[%s1793_s23 + $0x1c] sm:$0x1] }
  0x22   : > { %v306_v30 = vor.u32 %v305_v23, %v301_v20  ;;  %v385_v43 = vrot.slane %v1494_v35, 1  ;;  %v1496_v45 = vcombine.low %v193_v41, %v1889_v2  ;;  %v1495_v46 = vcombine.low %v192_v42, %v1895_v4  ;;  %v1438_v49 = vld [vmem:[%s1793_s23 + $0x20] sm:$0xf]  ;;  %v1437_v50 = vld [vmem:[%s1793_s23 + $0x18] sm:$0xf] }
  0x23   : > { %1020 = vmatpush1.bf16.msra.mxu0 %v1720_v15  ;;  %1634 = vmatpush1.bf16.msra.mxu1 %v1720_v15  ;;  %v327_v36 = vor.u32 %v326_v31, %v322_v27  ;;  %v320_v37 = vor.u32 %v319_v32, %v315_v28  ;;  %v384_v44 = vrot.slane %v1493_v39, 1  ;;  %v1944_v51 = vld [vmem:[%s1793_s23 + $0x34] sm:$0x1]  ;;  %v1510_v56 = vcombine.low %v1438_v49, %v1936_v47  ;;  %v1951_v58 = vld [vmem:[%s1793_s23 + $0x2c] sm:$0x1] }
  0x24   : > { %528 = vrot.lane.b32.xlu1 %v483_v59, %s1741_s9  ;;  %1021 = vmatprep.subr.bf16.mxu0 %v1736_v1  ;;  %v387_v53 = vrot.slane %v1496_v45, 1  ;;  %v386_v55 = vrot.slane %v1495_v46, 1  ;;  %v1509_v57 = vcombine.low %v1437_v50, %v1939_v48  ;;  %v1440_v59 = vld [vmem:[%s1793_s23 + $0x30] sm:$0xf]  ;;  %v1439_v62 = vld [vmem:[%s1793_s23 + $0x28] sm:$0xf]  ;;  %v1501_v0 = vcombine.low %v1437_v50, %v1437_v50 }
  0x25   : > { %526 = vrot.lane.b32.xlu0 %v476_v60, %s1741_s9  ;;  %1626 = vmatprep.subr.bf16.mxu1 %v1736_v1  ;;  %v1502_v60 = vcombine.low %v1438_v49, %v1438_v49  ;;  %v1512_v61 = vcombine.low %v1440_v59, %v1944_v51  ;;  %v1511_v2 = vcombine.low %v1439_v62, %v1951_v58  ;;  %v494_v4 = vshll.u32 %v1510_v56, 16  ;;  %v1476_v7 = vld [vmem:[%s1793_s23 + $0x18] sm:$0xe]  ;;  %v1454_v27 = vld [vmem:[%s1793_s23 + $0x20] sm:$0xe] }
  0x26   : > { %v1504_v8 = vcombine.low %v1440_v59, %v1440_v59  ;;  %v1503_v9 = vcombine.low %v1439_v62, %v1439_v62  ;;  %v492_v10 = vshrl.u32 %v1510_v56, 16  ;;  %v485_v11 = vshrl.u32 %v1509_v57, 16  ;;  %v1453_v28 = vld [vmem:[%s1793_s23 + $0x18] sm:$0xe]  ;;  %v1478_v33 = vld [vmem:[%s1793_s23 + $0x28] sm:$0xe] }
  0x27   : > { %1022 = vmatpush1.bf16.msra.mxu0 %v1721_v26  ;;  %1635 = vmatpush1.bf16.msra.mxu1 %v1721_v26  ;;  %v508_v12 = vshll.u32 %v1512_v61, 16  ;;  %v496_v14 = vrot.slane %v494_v4, 1  ;;  %v1540_v18 = vcombine.low %v1476_v7, %v1838_v38  ;;  %v499_v24 = vshrl.u32 %v1511_v2, 16  ;;  %v1477_v34 = vld [vmem:[%s1793_s23 + $0x20] sm:$0xe] }
  0x28   : > { %616 = vrot.lane.b32.xlu1 %v1524_v5, %s1742_s14  ;;  %v487_v5 = vshll.u32 %v1509_v57, 16  ;;  %v1517_v32 = vcombine.low %v1453_v28, %v1939_v48  ;;  %v1456_v35 = vld [vmem:[%s1793_s23 + $0x30] sm:$0xe]  ;;  %v1469_v39 = vld [vmem:[%s1793_s23 + $0x24] sm:$0x1] }
  0x29   : > { %614 = vrot.lane.b32.xlu0 %v1523_v6, %s1742_s14  ;;  %v1475_v6 = vld [vmem:[%s1793_s23 + $0x10] sm:$0xe]  ;;  %v751_v20 = vrot.slane %v1540_v18, 1  ;;  %v510_v23 = vrot.slane %v508_v12, 1  ;;  %v1541_v42 = vcombine.low %v1477_v34, %v1469_v39  ;;  %v1520_v45 = vcombine.low %v1456_v35, %v1944_v51  ;;  %v1461_v50 = vld [vmem:[%s1793_s23 + $0x20] sm:$0xf] }
  0x2a   : > { %v1539_v13 = vcombine.low %v1475_v6, %v1844_v40  ;;  %v489_v15 = vrot.slane %v487_v5, 1  ;;  %v497_v40 = vor.u32 %v496_v14, %v492_v10  ;;  %v1533_v51 = vcombine.low %v1461_v50, %v1469_v39  ;;  %v1464_v59 = vld [vmem:[%s1793_s23 + $0x38] sm:$0xf]  ;;  %v187_v12 = vld [vmem:[%s1793_s23 + $0x3c] sm:$0x1] }
  0x2b   : > { %v571_v56 = vrot.slane %v1520_v45, 1  ;;  %v1480_v62 = vld [vmem:[%s1793_s23 + $0x38] sm:$0xe]  ;;  %v186_v14 = vld [vmem:[%s1793_s23 + $0x34] sm:$0x1]  ;;  %v1528_v18 = vcombine.low %v1464_v59, %v1464_v59 }
  0x2c   : > { %712 = vrot.lane.b32.xlu1 %v667_v17, %s1743_s17  ;;  %v501_v17 = vshll.u32 %v1511_v2, 16  ;;  %v750_v19 = vrot.slane %v1539_v13, 1  ;;  %v490_v25 = vor.u32 %v489_v15, %v485_v11  ;;  %v671_v10 = vshll.u32 %v1533_v51, 16  ;;  %v2003_v11 = vld [vmem:[%s1793_s23 + $0x38] sm:$0xf] }
  0x2d   : > { %710 = vrot.lane.b32.xlu0 %v660_v22, %s1743_s17  ;;  %v506_v22 = vshrl.u32 %v1512_v61, 16  ;;  %v1479_v61 = vld [vmem:[%s1793_s23 + $0x30] sm:$0xe]  ;;  %1196 = vst [vmem:[%s2132_s21 + $0x8] sm:$0xf] %v1736_v1 }
  0x2e   : > { %v503_v26 = vrot.slane %v501_v17, 1  ;;  %v1548_v38 = vcombine.low %v750_v19, %v751_v20  ;;  %v2007_v13 = vld [vmem:[%s1793_s23 + $0x30] sm:$0xf]  ;;  %1197 = vst [vmem:[%s2132_s21 + $0xc] sm:$0x1] %v1736_v1 }
  0x2f   : > { %1198 = vst [vmem:[%s2132_s21 + $0x10] sm:$0xf] %v1736_v1  ;;  %1199 = vst [vmem:[%s2132_s21 + $0x14] sm:$0x1] %v1736_v1 }
  0x30   : > { %348 = vrot.lane.b32.xlu1 %v313_v29, %s1740_s4  ;;  %1564 = vmatprep.mubr.msk.bf16.mxu0 %vm758_vm0, %v1548_v38  ;;  %v1518_v29 = vcombine.low %v1454_v27, %v1936_v47  ;;  %v504_v31 = vor.u32 %v503_v26, %v499_v24  ;;  %v1462_v47 = vld [vmem:[%s1793_s23 + $0x28] sm:$0xf]  ;;  %v1490_v27 = vcombine.low %v2003_v11, %v187_v12 }
  0x31   : > { %346 = vrot.lane.b32.xlu0 %v306_v30, %s1740_s4  ;;  %v511_v30 = vor.u32 %v510_v23, %v506_v22  ;;  %v1526_v7 = vcombine.low %v1462_v47, %v1462_v47  ;;  %v669_v23 = vshrl.u32 %v1533_v51, 16  ;;  %v1489_v38 = vcombine.low %v2007_v13, %v186_v14  ;;  %1200 = vst [vmem:[%s2132_s21 + $0x18] sm:$0xf] %v1736_v1 }
  0x32   : > { %v338_v34 = vshll.u32 %v1490_v27, 16  ;;  %v336_v39 = vshrl.u32 %v1490_v27, 16  ;;  %1201 = vst [vmem:[%s2132_s21 + $0x1c] sm:$0x1] %v1736_v1  ;;  %1202 = vst [vmem:[%s2132_s21 + $0x20] sm:$0xf] %v1736_v1 }
  0x33   : > { %v331_v35 = vshll.u32 %v1489_v38, 16  ;;  %v329_v45 = vshrl.u32 %v1489_v38, 16  ;;  %1203 = vst [vmem:[%s2132_s21 + $0x24] sm:$0x1] %v1736_v1  ;;  %1204 = vst [vmem:[%s2132_s21 + $0x28] sm:$0xf] %v1736_v1 }
  0x34   : > { %352 = vrot.lane.b32.xlu1 %v327_v36, %s1740_s4  ;;  %v1455_v36 = vld [vmem:[%s1793_s23 + $0x28] sm:$0xe]  ;;  %1205 = vst [vmem:[%s2132_s21 + $0x2c] sm:$0x1] %v1736_v1  ;;  %1206 = vst [vmem:[%s2132_s21 + $0x30] sm:$0xf] %v1736_v1 }
  0x35   : > { %350 = vrot.lane.b32.xlu0 %v320_v37, %s1740_s4  ;;  %v1470_v37 = vld [vmem:[%s1793_s23 + $0x2c] sm:$0x1]  ;;  %v1519_v46 = vcombine.low %v1455_v36, %v1951_v58  ;;  %v1471_v58 = vld [vmem:[%s1793_s23 + $0x34] sm:$0x1]  ;;  %v195_v36 = vld [vmem:[%s1793_s23 + $0x38] sm:$0xe] }
  0x36   : > { %v1542_v41 = vcombine.low %v1478_v33, %v1470_v37  ;;  %v1534_v48 = vcombine.low %v1462_v47, %v1470_v37  ;;  %v1543_v5 = vcombine.low %v1479_v61, %v1471_v58  ;;  %v1450_v47 = vld [vmem:[%s1793_s23 + $0x44] sm:$0x1]  ;;  %1207 = vst [vmem:[%s2132_s21 + $0x34] sm:$0x1] %v1736_v1  ;;  %1208 = vst [vmem:[%s2132_s21 + $0x38] sm:$0xf] %v1736_v1 }
  0x37   : > { %v570_v57 = vrot.slane %v1519_v46, 1  ;;  %v333_v46 = vrot.slane %v331_v35, 1  ;;  %1209 = vst [vmem:[%s2132_s21 + $0x3c] sm:$0x1] %v1736_v1  ;;  %1210 = vst [vmem:[%s2132_s21 + $0x40] sm:$0xf] %v1736_v1 }
  0x38   : > { %396 = vrot.lane.b32.xlu1 %v385_v43, %s1739_s28  ;;  %v569_v43 = vrot.slane %v1518_v29, 1  ;;  %v1985_v49 = vrot.slane %v1542_v41, 1  ;;  %v678_v2 = vshll.u32 %v1534_v48, 16  ;;  %v754_v15 = vrot.slane %v1543_v5, 1  ;;  %v194_v41 = vld [vmem:[%s1793_s23 + $0x30] sm:$0xe] }
  0x39   : > { %394 = vrot.lane.b32.xlu0 %v384_v44, %s1739_s28  ;;  %v568_v44 = vrot.slane %v1517_v32, 1  ;;  %v676_v20 = vshrl.u32 %v1534_v48, 16  ;;  %v1441_v48 = vld [vmem:[%s1793_s23 + $0x38] sm:$0xf]  ;;  %v1481_v5 = vld [vmem:[%s1793_s23 + $0x40] sm:$0xe] }
  0x3a   : > { %v680_v22 = vrot.slane %v678_v2, 1  ;;  %1211 = vst [vmem:[%s2132_s21 + $0x44] sm:$0x1] %v1736_v1  ;;  %1195 = vst [vmem:[%s2132_s21 + $0x4] sm:$0x1] %v1736_v1 }
  0x3b   : > { %1212 = vst [vmem:[%s2132_s21 + $0x48] sm:$0xf] %v1736_v1  ;;  %1213 = vst [vmem:[%s2132_s21 + $0x4c] sm:$0x1] %v1736_v1 }
  0x3c   : > { %400 = vrot.lane.b32.xlu1 %v387_v53, %s1739_s28  ;;  %v1988_v53 = vrot.slane %v1541_v42, 1  ;;  %v681_v28 = vor.u32 %v680_v22, %v676_v20  ;;  %v1442_v42 = vld [vmem:[%s1793_s23 + $0x40] sm:$0xf]  ;;  %v1466_v22 = vld [vmem:[%s1793_s23 + $0x48] sm:$0xf] }
  0x3d   : > { %398 = vrot.lane.b32.xlu0 %v386_v55, %s1739_s28  ;;  %v1472_v55 = vld [vmem:[%s1793_s23 + $0x3c] sm:$0x1]  ;;  %v1530_v35 = vcombine.low %v1466_v22, %v1466_v22 }
  0x3e   : > { %v1550_v4 = vcombine.low %v1988_v53, %v1985_v49  ;;  %v1544_v6 = vcombine.low %v1480_v62, %v1472_v55 }
  0x40   : > { %436 = vrot.lane.b32.xlu1 %v1502_v60, %s1737_s24  ;;  %v1536_v60 = vcombine.low %v1464_v59, %v1472_v55  ;;  %v755_v17 = vrot.slane %v1544_v6, 1  ;;  %v1498_v55 = vcombine.low %v195_v36, %v187_v12  ;;  %v334_v59 = vor.u32 %v333_v46, %v329_v45  ;;  %v1474_v6 = vld [vmem:[%s1793_s23 + $0x4c] sm:$0x1]  ;;  %v1457_v12 = vld [vmem:[%s1793_s23 + $0x38] sm:$0xe] }
  0x41   : > { %434 = vrot.lane.b32.xlu0 %v1501_v0, %s1737_s24  ;;  %v1463_v0 = vld [vmem:[%s1793_s23 + $0x30] sm:$0xf] }
  0x42   : > { %v1527_v19 = vcombine.low %v1463_v0, %v1463_v0  ;;  %v692_v24 = vshll.u32 %v1536_v60, 16  ;;  %v690_v29 = vshrl.u32 %v1536_v60, 16  ;;  %v1482_v60 = vld [vmem:[%s1793_s23 + $0x48] sm:$0xe]  ;;  %v389_v61 = vrot.slane %v1498_v55, 1 }
  0x44   : > { %440 = vrot.lane.b32.xlu1 %v1504_v8, %s1737_s24  ;;  %v1525_v8 = vcombine.low %v1461_v50, %v1461_v50  ;;  %v1449_v50 = vld [vmem:[%s1793_s23 + $0x3c] sm:$0x1] }
  0x45   : > { %438 = vrot.lane.b32.xlu0 %v1503_v9, %s1737_s24  ;;  %v1535_v9 = vcombine.low %v1463_v0, %v1471_v58  ;;  %v1513_v58 = vcombine.low %v1441_v48, %v1449_v50 }
  0x47   : > { %v685_v26 = vshll.u32 %v1535_v9, 16  ;;  %v515_v2 = vshll.u32 %v1513_v58, 16 }
  0x48   : > { %532 = vrot.lane.b32.xlu1 %v497_v40, %s1741_s9  ;;  %v1552_v40 = vcombine.low %v754_v15, %v755_v17 }
  0x49   : > { %530 = vrot.lane.b32.xlu0 %v490_v25, %s1741_s9  ;;  %v673_v25 = vrot.slane %v671_v10, 1  ;;  %v687_v33 = vrot.slane %v685_v26, 1  ;;  %v1458_v10 = vld [vmem:[%s1793_s23 + $0x40] sm:$0xe]  ;;  %v517_v20 = vrot.slane %v515_v2, 1 }
  0x4a   : > { %1566 = vmatprep.mubr.msk.bf16.mxu1 %vm758_vm0, %v1552_v40  ;;  %v1521_v40 = vcombine.low %v1457_v12, %v1449_v50 }
  0x4b   : > { %v674_v32 = vor.u32 %v673_v25, %v669_v23  ;;  %v1465_v23 = vld [vmem:[%s1793_s23 + $0x40] sm:$0xf]  ;;  %v1538_v25 = vcombine.low %v1466_v22, %v1474_v6 }
  0x4c   : > { %536 = vrot.lane.b32.xlu1 %v511_v30, %s1741_s9  ;;  %v694_v30 = vrot.slane %v692_v24, 1  ;;  %v1522_v24 = vcombine.low %v1458_v10, %v1450_v47  ;;  %v1529_v36 = vcombine.low %v1465_v23, %v1465_v23 }
  0x4d   : > { %534 = vrot.lane.b32.xlu0 %v504_v31, %s1741_s9  ;;  %v683_v31 = vshrl.u32 %v1535_v9, 16  ;;  %v1505_v9 = vcombine.low %v1441_v48, %v1441_v48 }
  0x4e   : > { %v695_v37 = vor.u32 %v694_v30, %v690_v29 }
  0x50   : > { %580 = vrot.lane.b32.xlu1 %v569_v43, %s1738_s27  ;;  %v688_v43 = vor.u32 %v687_v33, %v683_v31  ;;  %v573_v31 = vrot.slane %v1522_v24, 1  ;;  %v706_v33 = vshll.u32 %v1538_v25, 16 }
  0x51   : > { %578 = vrot.lane.b32.xlu0 %v568_v44, %s1738_s27  ;;  %v340_v44 = vrot.slane %v338_v34, 1 }
  0x53   : > { %v341_v51 = vor.u32 %v340_v44, %v336_v39  ;;  %v708_v39 = vrot.slane %v706_v33, 1 }
  0x54   : > { %584 = vrot.lane.b32.xlu1 %v571_v56, %s1738_s27  ;;  %v1497_v56 = vcombine.low %v194_v41, %v186_v14  ;;  %v1546_v14 = vcombine.low %v1482_v60, %v1474_v6 }
  0x55   : > { %582 = vrot.lane.b32.xlu0 %v570_v57, %s1738_s27  ;;  %v1514_v57 = vcombine.low %v1442_v42, %v1450_v47 }
  0x56   : > { %v388_v62 = vrot.slane %v1497_v56, 1  ;;  %v2039_v26 = vrot.slane %v1546_v14, 1 }
  0x57   : > { %v522_v0 = vshll.u32 %v1514_v57, 16  ;;  %v520_v17 = vshrl.u32 %v1514_v57, 16 }
  0x58   : > { %620 = vrot.lane.b32.xlu1 %v1526_v7, %s1742_s14  ;;  %v1473_v7 = vld [vmem:[%s1793_s23 + $0x44] sm:$0x1] }
  0x59   : > { %618 = vrot.lane.b32.xlu0 %v1525_v8, %s1742_s14  ;;  %v1506_v8 = vcombine.low %v1442_v42, %v1442_v42  ;;  %v1545_v15 = vcombine.low %v1481_v5, %v1473_v7  ;;  %v1537_v29 = vcombine.low %v1465_v23, %v1473_v7 }
  0x5b   : > { %v2041_v27 = vrot.slane %v1545_v15, 1  ;;  %v699_v34 = vshll.u32 %v1537_v29, 16  ;;  %v697_v41 = vshrl.u32 %v1537_v29, 16 }
  0x5c   : > { %624 = vrot.lane.b32.xlu1 %v1528_v18, %s1742_s14  ;;  %v524_v18 = vrot.slane %v522_v0, 1 }
  0x5d   : > { %622 = vrot.lane.b32.xlu0 %v1527_v19, %s1742_s14  ;;  %v513_v19 = vshrl.u32 %v1513_v58, 16  ;;  %v1554_v30 = vcombine.low %v2041_v27, %v2039_v26  ;;  %v701_v42 = vrot.slane %v699_v34, 1 }
  0x5e   : > { %v525_v38 = vor.u32 %v524_v18, %v520_v17 }
  0x5f   : > { %v702_v44 = vor.u32 %v701_v42, %v697_v41 }
  0x60   : > { %716 = vrot.lane.b32.xlu1 %v681_v28, %s1743_s17  ;;  %v518_v28 = vor.u32 %v517_v20, %v513_v19 }
  0x61   : > { %714 = vrot.lane.b32.xlu0 %v674_v32, %s1743_s17  ;;  %v572_v32 = vrot.slane %v1521_v40, 1 }
  0x64   : > { %720 = vrot.lane.b32.xlu1 %v695_v37, %s1743_s17  ;;  %v704_v37 = vshrl.u32 %v1538_v25, 16 }
  0x65   : > { %718 = vrot.lane.b32.xlu0 %v688_v43, %s1743_s17 }
  0x66   : > { %v709_v43 = vor.u32 %v708_v39, %v704_v37 }
  0x68   : > { %356 = vrot.lane.b32.xlu1 %v341_v51, %s1740_s4 }
  0x69   : > { %354 = vrot.lane.b32.xlu0 %v334_v59, %s1740_s4 }
  0x6c   : > { %404 = vrot.lane.b32.xlu1 %v389_v61, %s1739_s28 }
  0x6d   : > { %402 = vrot.lane.b32.xlu0 %v388_v62, %s1739_s28 }
  0x70   : > { %444 = vrot.lane.b32.xlu1 %v1506_v8, %s1737_s24 }
  0x71   : > { %442 = vrot.lane.b32.xlu0 %v1505_v9, %s1737_s24 }
  0x74   : > { %540 = vrot.lane.b32.xlu1 %v525_v38, %s1741_s9 }
  0x75   : > { %538 = vrot.lane.b32.xlu0 %v518_v28, %s1741_s9 }
  0x78   : > { %588 = vrot.lane.b32.xlu1 %v573_v31, %s1738_s27 }
  0x79   : > { %586 = vrot.lane.b32.xlu0 %v572_v32, %s1738_s27 }
  0x7c   : > { %628 = vrot.lane.b32.xlu1 %v1530_v35, %s1742_s14 }
  0x7d   : > { %626 = vrot.lane.b32.xlu0 %v1529_v36, %s1742_s14 }
  0x80   : > { %724 = vrot.lane.b32.xlu1 %v709_v43, %s1743_s17 }
  0x81   : > { %722 = vrot.lane.b32.xlu0 %v702_v44, %s1743_s17 }
  0x86   : > { %v433_v45 = vpop.permute.xlu1 %432  ;;  %v431_v46 = vpop.permute.xlu0 %430 }
  0x8a   : > { %v575_v47 = vpop.permute.xlu0 %574  ;;  %v391_v48 = vpop.permute.xlu1 %390 }
  0x8e   : > { %v393_v50 = vpop.permute.xlu1 %392 }
  0x8f   : > { %v343_v55 = vpop.permute.xlu0 %342 }
  0x90   : > { %v761_v51 = vsel %vm758_vm0, %v1812_v16, %v343_v55 }
  0x91   : > { %v785_v60 = vsel %vm783_vm1, %v761_v51, %v391_v48 }
  0x92   : > { %v577_v56 = vpop.permute.xlu1 %576  ;;  %v802_v2 = vsel %vm800_vm2, %v785_v60, %v431_v46 }
  0x93   : > { %v345_v57 = vpop.permute.xlu0 %344 }
  0x94   : > { %v764_v59 = vsel %vm758_vm0, %v1820_v21, %v345_v57 }
  0x95   : > { %v787_v58 = vsel %vm783_vm1, %v764_v59, %v393_v50 }
  0x96   : > { %v529_v61 = vpop.permute.xlu1 %528  ;;  %v804_v0 = vsel %vm800_vm2, %v787_v58, %v433_v45 }
  0x97   : > { %v527_v62 = vpop.permute.xlu0 %526  ;;  %v821_v5 = vsel %vm817_vm3, %v804_v0, %v529_v61 }
  0x98   : > { %v819_v6 = vsel %vm817_vm3, %v802_v2, %v527_v62  ;;  %v838_v21 = vsel %vm834_vm4, %v821_v5, %v577_v56 }
  0x99   : > { %v836_v8 = vsel %vm834_vm4, %v819_v6, %v575_v47 }
  0x9a   : > { %v617_v16 = vpop.permute.xlu1 %616 }
  0x9b   : > { %v615_v7 = vpop.permute.xlu0 %614  ;;  %v855_v9 = vsel %vm851_vm5, %v838_v21, %v617_v16 }
  0x9c   : > { %v853_v10 = vsel %vm851_vm5, %v836_v8, %v615_v7 }
  0x9e   : > { %v713_v12 = vpop.permute.xlu1 %712 }
  0x9f   : > { %v711_v14 = vpop.permute.xlu0 %710  ;;  %v872_v15 = vsel %vm868_vm6, %v855_v9, %v713_v12 }
  0xa0   : > { %v870_v17 = vsel %vm868_vm6, %v853_v10, %v711_v14 }
  0xa1   : > { %v1547_v18 = vcombine.low %v870_v17, %v872_v15 }
  0xa2   : > { %v349_v19 = vpop.permute.xlu1 %348 }
  0xa3   : > { %1038 = vmatmul.mubr.bf16.vlgmr.msra.gmra.mrb[0].mxu0 %v1547_v18  ;;  %v347_v20 = vpop.permute.xlu0 %346  ;;  %v770_v42 = vsel %vm758_vm0, %v1860_v52, %v349_v19 }
  0xa4   : > { %1565 = vmatprep.mubr.msk.bf16.mxu0 %vm758_vm0, %v1550_v4  ;;  %v767_v43 = vsel %vm758_vm0, %v1866_v54, %v347_v20 }
  0xa6   : > { %v353_v22 = vpop.permute.xlu1 %352 }
  0xa7   : > { %v351_v23 = vpop.permute.xlu0 %350  ;;  %v776_v52 = vsel %vm758_vm0, %v1883_v63, %v353_v22 }
  0xa8   : > { %v773_v54 = vsel %vm758_vm0, %v1892_v3, %v351_v23 }
  0xaa   : > { %v397_v24 = vpop.permute.xlu1 %396 }
  0xab   : > { %v395_v40 = vpop.permute.xlu0 %394  ;;  %v791_v44 = vsel %vm783_vm1, %v770_v42, %v397_v24 }
  0xac   : > { %v789_v45 = vsel %vm783_vm1, %v767_v43, %v395_v40 }
  0xae   : > { %v401_v25 = vpop.permute.xlu1 %400 }
  0xaf   : > { %v399_v38 = vpop.permute.xlu0 %398  ;;  %v795_v59 = vsel %vm783_vm1, %v776_v52, %v401_v25 }
  0xb0   : > { %v793_v58 = vsel %vm783_vm1, %v773_v54, %v399_v38 }
  0xb2   : > { %v437_v28 = vpop.permute.xlu1 %436 }
  0xb3   : > { %v435_v29 = vpop.permute.xlu0 %434  ;;  %v808_v48 = vsel %vm800_vm2, %v791_v44, %v437_v28 }
  0xb4   : > { %v806_v50 = vsel %vm800_vm2, %v789_v45, %v435_v29 }
  0xb6   : > { %v441_v31 = vpop.permute.xlu1 %440 }
  0xb7   : > { %v439_v32 = vpop.permute.xlu0 %438  ;;  %v812_v2 = vsel %vm800_vm2, %v795_v59, %v441_v31 }
  0xb8   : > { %v810_v63 = vsel %vm800_vm2, %v793_v58, %v439_v32 }
  0xba   : > { %v533_v33 = vpop.permute.xlu1 %532 }
  0xbb   : > { %v531_v34 = vpop.permute.xlu0 %530  ;;  %v825_v55 = vsel %vm817_vm3, %v808_v48, %v533_v33 }
  0xbc   : > { %v823_v56 = vsel %vm817_vm3, %v806_v50, %v531_v34 }
  0xbe   : > { %v537_v35 = vpop.permute.xlu1 %536 }
  0xbf   : > { %v535_v36 = vpop.permute.xlu0 %534  ;;  %v829_v6 = vsel %vm817_vm3, %v812_v2, %v537_v35 }
  0xc0   : > { %v827_v16 = vsel %vm817_vm3, %v810_v63, %v535_v36 }
  0xc2   : > { %v581_v37 = vpop.permute.xlu1 %580 }
  0xc3   : > { %v579_v39 = vpop.permute.xlu0 %578  ;;  %v842_v57 = vsel %vm834_vm4, %v825_v55, %v581_v37 }
  0xc4   : > { %v840_v51 = vsel %vm834_vm4, %v823_v56, %v579_v39 }
  0xc6   : > { %v585_v41 = vpop.permute.xlu1 %584 }
  0xc7   : > { %v583_v49 = vpop.permute.xlu0 %582  ;;  %v846_v21 = vsel %vm834_vm4, %v829_v6, %v585_v41 }
  0xc8   : > { %v844_v8 = vsel %vm834_vm4, %v827_v16, %v583_v49 }
  0xca   : > { %v621_v53 = vpop.permute.xlu1 %620 }
  0xcb   : > { %v619_v4 = vpop.permute.xlu0 %618  ;;  %v859_v60 = vsel %vm851_vm5, %v842_v57, %v621_v53 }
  0xcc   : > { %v857_v61 = vsel %vm851_vm5, %v840_v51, %v619_v4 }
  0xce   : > { %v625_v46 = vpop.permute.xlu1 %624 }
  0xcf   : > { %v623_v47 = vpop.permute.xlu0 %622  ;;  %v863_v9 = vsel %vm851_vm5, %v846_v21, %v625_v46 }
  0xd0   : > { %v861_v10 = vsel %vm851_vm5, %v844_v8, %v623_v47 }
  0xd2   : > { %v717_v62 = vpop.permute.xlu1 %716 }
  0xd3   : > { %v715_v0 = vpop.permute.xlu0 %714  ;;  %v876_v3 = vsel %vm868_vm6, %v859_v60, %v717_v62 }
  0xd4   : > { %v874_v5 = vsel %vm868_vm6, %v857_v61, %v715_v0 }
  0xd5   : > { %v1549_v7 = vcombine.low %v874_v5, %v876_v3 }
  0xd6   : > { %v721_v12 = vpop.permute.xlu1 %720 }
  0xd7   : > { %1046 = vmatmul.mubr.bf16.gmra.mrb[4].mxu0 %v1549_v7  ;;  %v719_v14 = vpop.permute.xlu0 %718  ;;  %v880_v15 = vsel %vm868_vm6, %v863_v9, %v721_v12 }
  0xd8   : > { %v878_v17 = vsel %vm868_vm6, %v861_v10, %v719_v14 }
  0xd9   : > { %v1551_v18 = vcombine.low %v878_v17, %v880_v15 }
  0xda   : > { %v357_v19 = vpop.permute.xlu1 %356 }
  0xdb   : > { %1054 = vmatmul.mubr.bf16.vlgmr.msra.gmra.mrb[0].mxu1 %v1551_v18  ;;  %v355_v20 = vpop.permute.xlu0 %354  ;;  %v782_v31 = vsel %vm758_vm0, %v2003_v11, %v357_v19 }
  0xdc   : > { %1567 = vmatprep.mubr.msk.bf16.mxu1 %vm758_vm0, %v1554_v30  ;;  %v779_v32 = vsel %vm758_vm0, %v2007_v13, %v355_v20  ;;  %vm1320_vm0 = vsmask.f32 7938 }
  0xde   : > { %v405_v22 = vpop.permute.xlu1 %404 }
  0xdf   : > { %v403_v23 = vpop.permute.xlu0 %402  ;;  %v799_v33 = vsel %vm783_vm1, %v782_v31, %v405_v22 }
  0xe0   : > { %v797_v26 = vsel %vm783_vm1, %v779_v32, %v403_v23  ;;  %vm1325_vm1 = vcmask 1040384  }
  0xe2   : > { %v445_v24 = vpop.permute.xlu1 %444 }
  0xe3   : > { %v443_v40 = vpop.permute.xlu0 %442  ;;  %v816_v34 = vsel %vm800_vm2, %v799_v33, %v445_v24 }
  0xe4   : > { %v814_v35 = vsel %vm800_vm2, %v797_v26, %v443_v40  ;;  %vm1326_vm2 = vsmask.f32 256 }
  0xe6   : > { %v541_v25 = vpop.permute.xlu1 %540 }
  0xe7   : > { %v539_v38 = vpop.permute.xlu0 %538  ;;  %v833_v36 = vsel %vm817_vm3, %v816_v34, %v541_v25 }
  0xe8   : > { %v831_v37 = vsel %vm817_vm3, %v814_v35, %v539_v38  ;;  %vm2208_vm3 = vmand %vm1319_vm15, %vm1320_vm0 }
  0xea   : > { %v589_v28 = vpop.permute.xlu1 %588 }
  0xeb   : > { %v587_v29 = vpop.permute.xlu0 %586  ;;  %v850_v11 = vsel %vm834_vm4, %v833_v36, %v589_v28 }
  0xec   : > { %v848_v39 = vsel %vm834_vm4, %v831_v37, %v587_v29  ;;  %vm2215_vm4 = vmand %vm1325_vm1, %vm1326_vm2 }
  0xee   : > { %v629_v27 = vpop.permute.xlu1 %628 }
  0xef   : > { %v627_v30 = vpop.permute.xlu0 %626  ;;  %v867_v13 = vsel %vm851_vm5, %v850_v11, %v629_v27  ;;  %v1130_v11 = vlaneseq }
  0xf0   : > { %v865_v41 = vsel %vm851_vm5, %v848_v39, %v627_v30 }
  0xf1   : > { %v1131_v39 = vshrl.u32 %v1130_v11, 7 }
  0xf2   : > { %v725_v49 = vpop.permute.xlu1 %724 }
  0xf3   : > { %v723_v53 = vpop.permute.xlu0 %722  ;;  %v884_v4 = vsel %vm868_vm6, %v867_v13, %v725_v49  ;;  %v1124_v13 = vld [vmem:[%s2289_s2] sm:$0x1]  ;;  %v1132_v49 = vsub.s32 0, %v1131_v39 }
  0xf4   : > { %v882_v42 = vsel %vm868_vm6, %v865_v41, %v723_v53 }
  0xf5   : > { %v1553_v43 = vcombine.low %v882_v42, %v884_v4  ;;  %v1125_v4 = vld [vmem:[%s2289_s2 + $0x1] sm:$0x1] }
  0xf7   : > { %1062 = vmatmul.mubr.bf16.gmra.mrb[4].mxu1 %v1553_v43 }
 0x176   : > { %v2174_v44 = vpop.f32.mrb[0].mxu0 }
 0x177   : > { %v1041_v45 = vpop.f32.mrb[1].mxu0  ;;  %v1098_v47 = vmul.f32 %v2174_v44, %v2174_v44 }
 0x178   : > { %v2176_v46 = vpop.f32.mrb[2].mxu0 }
 0x179   : > { %v1084_v48 = vadd.f32 %v2176_v46, %v2174_v44  ;;  %v1099_v50 = vmul.f32 %v2176_v46, %v2176_v46  ;;  %v1044_v55 = vpop.f32.mrb[3].mxu0 }
 0x17b   : > { %v1106_v56 = vadd.f32 %v1099_v50, %v1098_v47 }
 0x1aa   : > { %v1047_v52 = vpop.f32.mrb[4].mxu0 }
 0x1ab   : > { %v1085_v54 = vadd.f32 %v1084_v48, %v1047_v52  ;;  %v1100_v57 = vmul.f32 %v1047_v52, %v1047_v52  ;;  %v1049_v1 = vpop.f32.mrb[5].mxu0 }
 0x1ac   : > { %v1050_v51 = vpop.f32.mrb[6].mxu0 }
 0x1ad   : > { %v1107_v59 = vadd.f32 %v1106_v56, %v1100_v57  ;;  %v1086_v58 = vadd.f32 %v1085_v54, %v1050_v51  ;;  %v1101_v60 = vmul.f32 %v1050_v51, %v1050_v51  ;;  %v1052_v61 = vpop.f32.mrb[7].mxu0 }
 0x1ae   : > { %v1055_v62 = vpop.f32.mrb[0].mxu1 }
 0x1af   : > { %v1108_v0 = vadd.f32 %v1107_v59, %v1101_v60  ;;  %v1087_v2 = vadd.f32 %v1086_v58, %v1055_v62  ;;  %v1102_v63 = vmul.f32 %v1055_v62, %v1055_v62  ;;  %v1057_v3 = vpop.f32.mrb[1].mxu1 }
 0x1b0   : > { %v1058_v5 = vpop.f32.mrb[2].mxu1 }
 0x1b1   : > { %v1109_v6 = vadd.f32 %v1108_v0, %v1102_v63  ;;  %v1088_v16 = vadd.f32 %v1087_v2, %v1058_v5  ;;  %v1103_v7 = vmul.f32 %v1058_v5, %v1058_v5  ;;  %v1060_v21 = vpop.f32.mrb[3].mxu1 }
 0x1b3   : > { %v1110_v8 = vadd.f32 %v1109_v6, %v1103_v7 }
 0x1ca   : > { %v1063_v9 = vpop.f32.mrb[4].mxu1 }
 0x1cb   : > { %v1089_v10 = vadd.f32 %v1088_v16, %v1063_v9  ;;  %v1104_v12 = vmul.f32 %v1063_v9, %v1063_v9  ;;  %v1065_v14 = vpop.f32.mrb[5].mxu1 }
 0x1cc   : > { %v1066_v15 = vpop.f32.mrb[6].mxu1 }
 0x1cd   : > { %v1111_v17 = vadd.f32 %v1110_v8, %v1104_v12  ;;  %v1090_v18 = vadd.f32 %v1089_v10, %v1066_v15  ;;  %v1105_v19 = vmul.f32 %v1066_v15, %v1066_v15  ;;  %v1068_v20 = vpop.f32.mrb[7].mxu1 }
 0x1cf   : > { %v1091_v22 = vrot.slane %v1090_v18, 4  ;;  %v1112_v23 = vadd.f32 %v1111_v17, %v1105_v19 }
 0x1d1   : > { %v1092_v24 = vadd.f32 %v1091_v22, %v1090_v18  ;;  %v1113_v40 = vrot.slane %v1112_v23, 4 }
 0x1d3   : > { %v1093_v25 = vrot.slane %v1092_v24, 2  ;;  %v1114_v38 = vadd.f32 %v1113_v40, %v1112_v23 }
 0x1d5   : > { %v1094_v28 = vadd.f32 %v1093_v25, %v1092_v24  ;;  %v1115_v29 = vrot.slane %v1114_v38, 2 }
 0x1d7   : > { %v1095_v31 = vrot.slane %v1094_v28, 1  ;;  %v1116_v32 = vadd.f32 %v1115_v29, %v1114_v38 }
 0x1d9   : > { %v1096_v33 = vadd.f32 %v1095_v31, %v1094_v28  ;;  %v1117_v26 = vrot.slane %v1116_v32, 1 }
 0x1db   : > { %v1097_v27 = vmul.f32 0.015625, %v1096_v33  ;;  %v1118_v30 = vadd.f32 %v1117_v26, %v1116_v32 }
 0x1dd   : > { %v1119_v34 = vmul.f32 0.015625, %v1118_v30  ;;  %v1120_v35 = vmul.f32 %v1097_v27, %v1097_v27  ;;  %v1127_v41 = vmul.f32 %v1124_v13, %v1097_v27 }
 0x1df   : > { %v1121_v36 = vsub.f32 %v1119_v34, %v1120_v35 }
 0x1e1   : > { %v1122_v37 = vadd.f32 1e-05, %v1121_v36 }
 0x1e3   : > { %1726 = vrsqrt.f32 %v1122_v37 }
 0x1ed   : > { %v1727_v53 = vpop.eup %1726 }
 0x1ee   : > { %v1126_v42 = vmul.f32 %v1727_v53, %v1124_v13  ;;  %v1128_v43 = vmul.f32 %v1727_v53, %v1127_v41  ;;  %v1576_v13 = vld [vmem:[%s2132_s21 + $0x8] sm:$0xf]  ;;  %v1578_v41 = vld [vmem:[%s2132_s21 + $0xc] sm:$0x1] }
 0x1f0   : > { %v1129_v45 = vsub.f32 %v1125_v4, %v1128_v43  ;;  %v1133_v47 = vrot.slane %v1126_v42, %v1132_v49 }
 0x1f2   : > { %v1134_v48 = vmul.f32 %v1133_v47, %v2174_v44  ;;  %v1135_v50 = vmul.f32 %v1133_v47, %v2176_v46  ;;  %v1136_v55 = vmul.f32 %v1133_v47, %v1047_v52  ;;  %v1137_v56 = vmul.f32 %v1133_v47, %v1050_v51 }
 0x1f3   : > { %v1138_v54 = vmul.f32 %v1133_v47, %v1055_v62  ;;  %v1139_v57 = vmul.f32 %v1133_v47, %v1058_v5  ;;  %v1140_v1 = vmul.f32 %v1133_v47, %v1063_v9  ;;  %v1141_v59 = vmul.f32 %v1133_v47, %v1066_v15 }
 0x1f4   : > { %v1145_v58 = vrot.slane %v1129_v45, %v1132_v49  ;;  %v1580_v45 = vld [vmem:[%s2132_s21 + $0x10] sm:$0xf] }
 0x1f6   : > { %v1146_v60 = vadd.f32 %v1145_v58, %v1134_v48  ;;  %v1147_v61 = vadd.f32 %v1145_v58, %v1135_v50  ;;  %v1148_v0 = vadd.f32 %v1145_v58, %v1136_v55  ;;  %v1149_v2 = vadd.f32 %v1145_v58, %v1137_v56 }
 0x1f7   : > { %v1150_v63 = vadd.f32 %v1145_v58, %v1138_v54  ;;  %v1151_v3 = vadd.f32 %v1145_v58, %v1139_v57  ;;  %v1152_v6 = vadd.f32 %v1145_v58, %v1140_v1  ;;  %v1153_v16 = vadd.f32 %v1145_v58, %v1141_v59  ;;  %v1582_v54 = vld [vmem:[%s2132_s21 + $0x14] sm:$0x1]  ;;  %v1584_v57 = vld [vmem:[%s2132_s21 + $0x18] sm:$0xf] }
 0x1f8   : > { %vm1154_vm7 = vcmp.ge.f32.partialorder %v1146_v60, 0.0  ;;  %vm1155_vm8 = vcmp.ge.f32.partialorder %v1147_v61, 0.0  ;;  %vm1156_vm9 = vcmp.ge.f32.partialorder %v1148_v0, 0.0  ;;  %vm1157_vm10 = vcmp.ge.f32.partialorder %v1149_v2, 0.0 }
 0x1f9   : > { %vm1158_vm11 = vcmp.ge.f32.partialorder %v1150_v63, 0.0  ;;  %vm1159_vm12 = vcmp.ge.f32.partialorder %v1151_v3, 0.0  ;;  %vm1160_vm13 = vcmp.ge.f32.partialorder %v1152_v6, 0.0  ;;  %vm1161_vm14 = vcmp.ge.f32.partialorder %v1153_v16, 0.0 }
 0x1fa   : > { %v1162_v44 = vmul.f32 0.01, %v1146_v60  ;;  %v1163_v46 = vmul.f32 0.01, %v1147_v61  ;;  %v1164_v52 = vmul.f32 0.01, %v1148_v0 }
 0x1fb   : > { %v1165_v51 = vmul.f32 0.01, %v1149_v2  ;;  %v1166_v62 = vmul.f32 0.01, %v1150_v63  ;;  %v1167_v5 = vmul.f32 0.01, %v1151_v3 }
 0x1fc   : > { %v1168_v7 = vmul.f32 0.01, %v1152_v6  ;;  %v1169_v21 = vmul.f32 0.01, %v1153_v16  ;;  %v1170_v8 = vsel %vm1154_vm7, %v1146_v60, %v1162_v44  ;;  %v1171_v9 = vsel %vm1155_vm8, %v1147_v61, %v1163_v46  ;;  %v1586_v61 = vld [vmem:[%s2132_s21 + $0x1c] sm:$0x1] }
 0x1fd   : > { %v1172_v10 = vsel %vm1156_vm9, %v1148_v0, %v1164_v52  ;;  %v1173_v12 = vsel %vm1157_vm10, %v1149_v2, %v1165_v51  ;;  %v1174_v14 = vsel %vm1158_vm11, %v1150_v63, %v1166_v62  ;;  %v1175_v15 = vsel %vm1159_vm12, %v1151_v3, %v1167_v5  ;;  %v1588_v0 = vld [vmem:[%s2132_s21 + $0x20] sm:$0xf]  ;;  %v1592_v62 = vld [vmem:[%s2132_s21 + $0x28] sm:$0xf]  ;;  %v1594_v5 = vld [vmem:[%s2132_s21 + $0x2c] sm:$0x1] }
 0x1fe   : > { %v1176_v17 = vsel %vm1160_vm13, %v1152_v6, %v1168_v7  ;;  %v1177_v18 = vsel %vm1161_vm14, %v1153_v16, %v1169_v21  ;;  %v1610_v19 = vpack.c.bf16 %v1170_v8, %v1170_v8  ;;  %v1611_v20 = vpack.c.bf16 %v1171_v9, %v1171_v9  ;;  %v1590_v16 = vld [vmem:[%s2132_s21 + $0x24] sm:$0x1] }
 0x1ff   : > { %v1612_v22 = vpack.c.bf16 %v1172_v10, %v1172_v10  ;;  %v1613_v23 = vpack.c.bf16 %v1173_v12, %v1173_v12  ;;  %v1614_v24 = vpack.c.bf16 %v1174_v14, %v1174_v14  ;;  %v1615_v40 = vpack.c.bf16 %v1175_v15, %v1175_v15  ;;  %v1596_v10 = vld [vmem:[%s2132_s21 + $0x30] sm:$0xf]  ;;  %v1598_v12 = vld [vmem:[%s2132_s21 + $0x34] sm:$0x1] }
 0x200   : > { %v2200_v25 = vpack.c.bf16 %v1176_v17, %v1176_v17  ;;  %v2202_v38 = vpack.c.bf16 %v1177_v18, %v1177_v18  ;;  %v1239_v28 = vshrl.u32 %v1610_v19, 16  ;;  %v1242_v29 = vshll.u32 %v1610_v19, 16  ;;  %v1600_v19 = vld [vmem:[%s2132_s21 + $0x38] sm:$0xf] }
 0x201   : > { %v1247_v31 = vshrl.u32 %v1611_v20, 16  ;;  %v1250_v32 = vshll.u32 %v1611_v20, 16  ;;  %v1255_v33 = vshrl.u32 %v1612_v22, 16  ;;  %v1258_v26 = vshll.u32 %v1612_v22, 16  ;;  %v1602_v20 = vld [vmem:[%s2132_s21 + $0x3c] sm:$0x1] }
 0x202   : > { %v1241_v27 = vrot.slane %v1239_v28, 7  ;;  %v1263_v30 = vshrl.u32 %v1613_v23, 16  ;;  %v1266_v34 = vshll.u32 %v1613_v23, 16  ;;  %v1271_v35 = vshrl.u32 %v1614_v24, 16 }
 0x203   : > { %v1249_v36 = vrot.slane %v1247_v31, 7  ;;  %v1257_v37 = vrot.slane %v1255_v33, 7  ;;  %v1274_v11 = vshll.u32 %v1614_v24, 16  ;;  %v1279_v39 = vshrl.u32 %v1615_v40, 16 }
 0x204   : > { %v1244_v49 = vor.u32 %v1242_v29, %v1241_v27  ;;  %v1245_v53 = vrot.slane %v1241_v27, 4  ;;  %v1265_v4 = vrot.slane %v1263_v30, 7  ;;  %v1273_v42 = vrot.slane %v1271_v35, 7 }
 0x205   : > { %v1252_v47 = vor.u32 %v1250_v32, %v1249_v36  ;;  %v1253_v48 = vrot.slane %v1249_v36, 4  ;;  %v1260_v50 = vor.u32 %v1258_v26, %v1257_v37  ;;  %v1261_v55 = vrot.slane %v1257_v37, 4 }
 0x206   : > { %v1268_v1 = vor.u32 %v1266_v34, %v1265_v4  ;;  %v1269_v59 = vrot.slane %v1265_v4, 4  ;;  %v1276_v58 = vor.u32 %v1274_v11, %v1273_v42  ;;  %v1277_v60 = vrot.slane %v1273_v42, 4 }
 0x207   : > { %v1281_v2 = vrot.slane %v1279_v39, 7  ;;  %v1282_v63 = vshll.u32 %v1615_v40, 16  ;;  %v1287_v3 = vshrl.u32 %v2200_v25, 16  ;;  %v1290_v6 = vshll.u32 %v2200_v25, 16  ;;  %v1604_v25 = vld [vmem:[%s2132_s21 + $0x40] sm:$0xf] }
 0x208   : > { %v1295_v44 = vshrl.u32 %v2202_v38, 16  ;;  %v1298_v46 = vshll.u32 %v2202_v38, 16  ;;  %v1323_v52 = vsel %vm2208_vm3, %v1244_v49, %v1576_v13  ;;  %v1329_v51 = vsel %vm2215_vm4, %v1245_v53, %v1578_v41  ;;  %v1606_v38 = vld [vmem:[%s2132_s21 + $0x44] sm:$0x1] }
 0x209   : > { %v1284_v7 = vor.u32 %v1282_v63, %v1281_v2  ;;  %v1285_v21 = vrot.slane %v1281_v2, 4  ;;  %v1289_v8 = vrot.slane %v1287_v3, 7  ;;  %1577 = vst [vmem:[%s2132_s21 + $0x8] sm:$0xf] %v1323_v52  ;;  %1579 = vst [vmem:[%s2132_s21 + $0xc] sm:$0x1] %v1329_v51  ;;  %v1332_v9 = vsel %vm2208_vm3, %v1252_v47, %v1580_v45 }
 0x20a   : > { %v1297_v14 = vrot.slane %v1295_v44, 7  ;;  %1581 = vst [vmem:[%s2132_s21 + $0x10] sm:$0xf] %v1332_v9  ;;  %v1335_v15 = vsel %vm2215_vm4, %v1253_v48, %v1582_v54  ;;  %v1338_v17 = vsel %vm2208_vm3, %v1260_v50, %v1584_v57  ;;  %v1341_v18 = vsel %vm2215_vm4, %v1261_v55, %v1586_v61 }
 0x20b   : > { %v1292_v22 = vor.u32 %v1290_v6, %v1289_v8  ;;  %v1293_v23 = vrot.slane %v1289_v8, 4  ;;  %1583 = vst [vmem:[%s2132_s21 + $0x14] sm:$0x1] %v1335_v15  ;;  %1585 = vst [vmem:[%s2132_s21 + $0x18] sm:$0xf] %v1338_v17  ;;  %v1344_v24 = vsel %vm2208_vm3, %v1268_v1, %v1588_v0  ;;  %v1347_v40 = vsel %vm2215_vm4, %v1269_v59, %v1590_v16 }
 0x20c   : > { %1587 = vst [vmem:[%s2132_s21 + $0x1c] sm:$0x1] %v1341_v18  ;;  %v1300_v28 = vor.u32 %v1298_v46, %v1297_v14  ;;  %v1301_v29 = vrot.slane %v1297_v14, 4  ;;  %1589 = vst [vmem:[%s2132_s21 + $0x20] sm:$0xf] %v1344_v24  ;;  %v1350_v31 = vsel %vm2208_vm3, %v1276_v58, %v1592_v62  ;;  %v1353_v32 = vsel %vm2215_vm4, %v1277_v60, %v1594_v5 }
 0x20d   : > { %1591 = vst [vmem:[%s2132_s21 + $0x24] sm:$0x1] %v1347_v40  ;;  %1593 = vst [vmem:[%s2132_s21 + $0x28] sm:$0xf] %v1350_v31  ;;  %v1356_v33 = vsel %vm2208_vm3, %v1284_v7, %v1596_v10  ;;  %v1359_v26 = vsel %vm2215_vm4, %v1285_v21, %v1598_v12  ;;  %v1362_v27 = vsel %vm2208_vm3, %v1292_v22, %v1600_v19 }
 0x20e   : > { %1595 = vst [vmem:[%s2132_s21 + $0x2c] sm:$0x1] %v1353_v32  ;;  %v1365_v30 = vsel %vm2215_vm4, %v1293_v23, %v1602_v20  ;;  %1597 = vst [vmem:[%s2132_s21 + $0x30] sm:$0xf] %v1356_v33  ;;  %v1368_v34 = vsel %vm2208_vm3, %v1300_v28, %v1604_v25  ;;  %v1371_v35 = vsel %vm2215_vm4, %v1301_v29, %v1606_v38 }
 0x20f   : > { %1599 = vst [vmem:[%s2132_s21 + $0x34] sm:$0x1] %v1359_v26  ;;  %1601 = vst [vmem:[%s2132_s21 + $0x38] sm:$0xf] %v1362_v27 }
 0x210   : > { %1603 = vst [vmem:[%s2132_s21 + $0x3c] sm:$0x1] %v1365_v30  ;;  %1605 = vst [vmem:[%s2132_s21 + $0x40] sm:$0xf] %v1368_v34 }
 0x211   : > { %1607 = vst [vmem:[%s2132_s21 + $0x44] sm:$0x1] %v1371_v35 }
 0x212 PF: > { %s13_s12 = sadd.s32 1, %s1734_s12  }
 0x213   : > { %p10_p4 = scmp.ge.s32.totalorder %s13_s12, 4  }
 0x215   :  { %12 = sbr.rel (!%p10_p4) target bundleno = 1 (0x1), region = 65 }

// kernel: _lambda_.7
= control target key start
LH: loop header
LB: loop body
LE: loop exit
PB: predicated region body
PF: predicated region fallthrough
CT: control target
= control target key end

     0   :  { %s4104_s12 = smov 0   ;;  %s6144_s0 = inlined_call_operand.vmem [shape: bf16[2,18,18,128], index: 0, kind: input, shape index: {}]   ;;  %s6145_s1 = inlined_call_operand.vmem [shape: bf16[72,128], index: 1, kind: input, shape index: {}]   ;;  %s6146_s2 = inlined_call_operand.vmem [shape: f32[8,128], index: 2, kind: input, shape index: {}]   ;;  %s6147_s3 = inlined_call_operand.vmem [shape: bf16[2,18,18,128], index: 3, kind: output, shape index: {}]  }
   0x1 LB: > { %s3377_s13 = sadd.s32 4294967295, %s4073_s12   ;;  %p3381_p0 = scmp.ge.s32.totalorder %s4073_s12, 1  ;;  %s4073_s12 = sphi %s4104_s12, %s13_s12  }
   0x2   : > { %p137_p1 = scmp.lt.s32.totalorder %s4073_s12, 3 }
   0x4   : > { %p138_p2 = pnand %p3381_p0, %p137_p1 }
   0x5   : > { %p161_p3 = scmp.lt.s32.totalorder (!%p138_p2), %s3377_s13, 1  ;;  %vm767_vm0 = vcmask (!%p138_p2), 1046528   ;;  %s4075_s18 = smov (!%p138_p2), 24   ;;  %vm494_vm1 = vsmask.f32 (!%p138_p2), 7424  ;;  %v3990_v31 = vld [vmem:[%s6145_s1] sm:$0xff] (!%p138_p2)  }
   0x6   : > { %141 = sbr.rel (%p138_p2) target bundleno = 763 (0x2fb), region = 32  ;;  %s4076_s21 = smov (!%p138_p2), 40   ;;  %3844 = vmatprep.subr.bf16.mxu0 (!%p138_p2), %v3990_v31  ;;  %3886 = vmatprep.subr.bf16.mxu1 (!%p138_p2), %v3990_v31  ;;  %v3993_v58 = vld [vmem:[%s6145_s1 + $0x8] sm:$0xff] (!%p138_p2)   ;;  %v3996_v63 = vld [vmem:[%s6145_s1 + $0x10] sm:$0xff] (!%p138_p2)   ;;  %vm6148_vm2 = vcmask (!%p138_p2), 1043456   ;;  %vm1872_vm3 = vcmask (!%p138_p2), 64512  }
   0x7   : > { %s4077_s22 = smov (!%p138_p2), 16   ;;  %3845 = vmatpush3.bf16.msra.mxu0 (!%p138_p2), %v3990_v31  ;;  %3891 = vmatpush3.bf16.msra.mxu1 (!%p138_p2), %v3990_v31  ;;  %s4078_s27 = smov (!%p138_p2), 8   ;;  %vm1905_vm4 = vcmask (!%p138_p2), 130048   ;;  %vm1938_vm5 = vcmask (!%p138_p2), 195584   ;;  %vm1971_vm6 = vcmask (!%p138_p2), 261120   ;;  %vm2004_vm7 = vcmask (!%p138_p2), 326656  }
   0x8   : > { %3846 = vmatprep.subr.bf16.mxu0 (!%p138_p2), %v3993_v58  ;;  %3887 = vmatprep.subr.bf16.mxu1 (!%p138_p2), %v3993_v58  ;;  %s4079_s30 = smov (!%p138_p2), 32   ;;  %s4080_s4 = smov (!%p138_p2), 48   ;;  %vm2037_vm8 = vcmask (!%p138_p2), 392192   ;;  %vm2070_vm9 = vcmask (!%p138_p2), 457728   ;;  %vm2103_vm10 = vcmask (!%p138_p2), 523264   ;;  %vm2172_vm11 = vcmask (!%p138_p2), 588800  }
   0x9   : > { %s4081_s5 = smov (!%p138_p2), 56   ;;  %s4082_s6 = smov (!%p138_p2), 64  }
   0xb   : > { %3847 = vmatpush3.bf16.msra.mxu0 (!%p138_p2), %v3993_v58  ;;  %3892 = vmatpush3.bf16.msra.mxu1 (!%p138_p2), %v3993_v58 }
   0xc   : > { %3848 = vmatprep.subr.bf16.mxu0 (!%p138_p2), %v3996_v63  ;;  %3888 = vmatprep.subr.bf16.mxu1 (!%p138_p2), %v3996_v63 }
   0xd   : > { %s6180_s13 = smov (!%p161_p3, %s3377_s13), 1 }
   0xe   : > { %s3898_s14 = smul.u32 216, %s6180_s13 }
   0xf   : > { %3849 = vmatpush3.bf16.msra.mxu0 %v3996_v63  ;;  %3893 = vmatpush3.bf16.msra.mxu1 %v3996_v63 }
  0x10   : > { %s4120_s17 = scalar_lea.vmem %s6144_s0, %s3898_s14  ;;  %s5332_s11 = scalar_lea.vmem %s6147_s3, %s3898_s14 }
  0x11   : > { %v3386_v0 = vld [vmem:[%s4120_s17 + $0x18] sm:$0xf]  ;;  %v3387_v1 = vld [vmem:[%s4120_s17 + $0x1c] sm:$0xf]  ;;  %v3384_v5 = vld [vmem:[%s4120_s17 + $0xc] sm:$0xf] }
  0x12   : > { %v3433_v2 = vld [vmem:[%s4120_s17 + $0x18] sm:$0xe]  ;;  %v4125_v3 = vcombine.low %v3386_v0, %v3387_v1  ;;  %v3385_v6 = vld [vmem:[%s4120_s17 + $0x10] sm:$0xf]  ;;  %v3432_v7 = vld [vmem:[%s4120_s17 + $0xc] sm:$0xe] }
  0x13   : > { %v3593_v4 = vcombine.low %v3433_v2, %v3387_v1  ;;  %v4130_v8 = vcombine.low %v3384_v5, %v3385_v6  ;;  %v3592_v9 = vcombine.low %v3432_v7, %v3385_v6  ;;  %v4133_v10 = vld [vmem:[%s4120_s17 + $0x14] ss:$0 sps:$4 sm:$0x11]   ;;  %v173_v12 = vld [vmem:[%s4120_s17 + $0x4] sm:$0xf] }
  0x14   : > { %930 = vrot.lane.b32.xlu1 %v4125_v3, %s4075_s18  ;;  %v1023_v11 = vshll.u32 %v4125_v3, 16  ;;  %v1281_v15 = vrot.slane %v4133_v10, 1  ;;  %v220_v16 = vld [vmem:[%s4120_s17] sm:$0xe]  ;;  %v1021_v21 = vshrl.u32 %v4125_v3, 16  ;;  %v1016_v61 = vshll.u32 %v4133_v10, 16 }
  0x15   : > { %928 = vrot.lane.b32.xlu0 %v4130_v8, %s4075_s18  ;;  %v1011_v13 = vshll.u32 %v4130_v8, 16  ;;  %v1280_v14 = vrot.slane %v3592_v9, 1  ;;  %v1283_v17 = vrot.slane %v3593_v4, 1  ;;  %v3921_v18 = vld [vmem:[%s4120_s17 + $0x8] ss:$0 sps:$4 sm:$0x11]   ;;  %v3544_v19 = vcombine.low %v220_v16, %v173_v12 }
  0x16   : > { %v172_v20 = vld [vmem:[%s4120_s17] sm:$0xf]  ;;  %v174_v24 = vld [vmem:[%s4120_s17 + $0xc] sm:$0xf]  ;;  %v175_v25 = vld [vmem:[%s4120_s17 + $0x10] sm:$0xf] }
  0x17   : > { %v1282_v22 = vsel %vm767_vm0, %v1280_v14, %v1281_v15  ;;  %v4148_v23 = vcombine.low %v172_v20, %v173_v12  ;;  %v768_v26 = vrot.slane %v3544_v19, 1  ;;  %v769_v27 = vrot.slane %v3921_v18, 1  ;;  %v221_v28 = vld [vmem:[%s4120_s17 + $0xc] sm:$0xe]  ;;  %v3450_v44 = vld [vmem:[%s4120_s17 + $0x24] sm:$0xf] }
  0x18   : > { %v4153_v29 = vcombine.low %v174_v24, %v175_v25  ;;  %v503_v30 = vshll.u32 %v3921_v18, 16  ;;  %v3925_v32 = vld [vmem:[%s4120_s17 + $0x14] ss:$0 sps:$4 sm:$0x11]   ;;  %v3545_v33 = vcombine.low %v221_v28, %v175_v25  ;;  %v1025_v36 = vrot.slane %v1023_v11, 1 }
  0x19   : > { %1328 = vrot.lane.b32.xlu0 %v1282_v22, %s4076_s21  ;;  %v496_v34 = vshrl.u32 %v4148_v23, 16  ;;  %v498_v35 = vshll.u32 %v4148_v23, 16  ;;  %v770_v37 = vsel %vm767_vm0, %v768_v26, %v769_v27  ;;  %v3927_v39 = vld [vmem:[%s4120_s17 + $0x20] ss:$0 sps:$4 sm:$0x11]   ;;  %v772_v41 = vrot.slane %v3925_v32, 1 }
  0x1a   : > { %v505_v38 = vrot.slane %v503_v30, 1  ;;  %816 = vrot.lane.b32.xlu1 %v770_v37, %s4077_s22  ;;  %v771_v40 = vrot.slane %v3545_v33, 1  ;;  %v508_v43 = vshrl.u32 %v4153_v29, 16  ;;  %v1284_v45 = vrot.slane %v3927_v39, 1  ;;  %v4169_v49 = vld [vmem:[%s4120_s17 + $0x28] sm:$0xf] }
  0x1b   : > { %v500_v42 = vrot.slane %v498_v35, 1  ;;  %v510_v46 = vshll.u32 %v4153_v29, 16  ;;  %v515_v47 = vshll.u32 %v3925_v32, 16  ;;  %v1028_v48 = vshll.u32 %v3927_v39, 16  ;;  %v3448_v54 = vld [vmem:[%s4120_s17 + $0x18] sm:$0xf] }
  0x1c   : > { %v773_v50 = vsel %vm767_vm0, %v771_v40, %v772_v41  ;;  %v1009_v52 = vshrl.u32 %v4130_v8, 16  ;;  %v1013_v53 = vrot.slane %v1011_v13, 1  ;;  %v4175_v57 = vld [vmem:[%s4120_s17 + $0x1c] sm:$0xf]  ;;  %v1026_v60 = vor.u32 %v1025_v36, %v1021_v21  ;;  %v3496_v8 = vld [vmem:[%s4120_s17 + $0x18] sm:$0xe] }
  0x1d   : > { %v501_v51 = vor.u32 %v500_v42, %v496_v34  ;;  %v512_v55 = vrot.slane %v510_v46, 1  ;;  %v517_v56 = vrot.slane %v515_v47, 1  ;;  %v3609_v62 = vcombine.low %v3450_v44, %v4169_v49  ;;  %v4191_v4 = vld [vmem:[%s4120_s17 + $0x2c] ss:$0 sps:$4 sm:$0x11]  }
  0x1e   : > { %818 = vrot.lane.b32.xlu1 %v773_v50, %s4077_s22  ;;  %v1285_v0 = vsel %vm767_vm0, %v1283_v17, %v1284_v45  ;;  %v1030_v2 = vrot.slane %v1028_v48, 1  ;;  %v3608_v3 = vcombine.low %v3448_v54, %v4175_v57  ;;  %v1014_v5 = vor.u32 %v1013_v53, %v1009_v52  ;;  %v4195_v9 = vld [vmem:[%s4120_s17 + $0x20] ss:$0 sps:$4 sm:$0x11]   ;;  %v176_v14 = vld [vmem:[%s4120_s17 + $0x18] sm:$0xf] }
  0x1f   : > { %v506_v59 = vsel %vm494_vm1, %v501_v51, %v505_v38  ;;  %v513_v1 = vor.u32 %v512_v55, %v508_v43  ;;  %v1018_v6 = vrot.slane %v1016_v61, 1  ;;  %v1535_v7 = vshll.u32 %v3609_v62, 16  ;;  %v4202_v16 = vld [vmem:[%s4120_s17 + $0x1c] sm:$0xf]  ;;  %v178_v26 = vld [vmem:[%s4120_s17 + $0x24] sm:$0xf] }
  0x20   : > { %687 = vrot.lane.b32.xlu0 %v506_v59, %s4078_s27  ;;  %v1523_v11 = vshll.u32 %v3608_v3, 16  ;;  %v1533_v12 = vshrl.u32 %v3609_v62, 16  ;;  %v1540_v13 = vshll.u32 %v4191_v4, 16  ;;  %v4001_v17 = vld [vmem:[%s6145_s1 + $0x18] sm:$0xff]   ;;  %v1031_v18 = vsel %vm494_vm1, %v1026_v60, %v1030_v2  ;;  %v179_v27 = vld [vmem:[%s4120_s17 + $0x28] sm:$0xf] }
  0x21   : > { %v518_v10 = vsel %vm494_vm1, %v513_v1, %v517_v56  ;;  %v1537_v15 = vrot.slane %v1535_v7, 1  ;;  %v1521_v19 = vshrl.u32 %v3608_v3, 16  ;;  %v4210_v20 = vcombine.low %v176_v14, %v4202_v16  ;;  %v4213_v21 = vld [vmem:[%s4120_s17 + $0x20] ss:$0 sps:$4 sm:$0x11]   ;;  %3850 = vmatprep.subr.bf16.mxu0 %v4001_v17  ;;  %3889 = vmatprep.subr.bf16.mxu1 %v4001_v17 }
  0x22   : > { %1330 = vrot.lane.b32.xlu1 %v1285_v0, %s4076_s21  ;;  %v1019_v22 = vsel %vm494_vm1, %v1014_v5, %v1018_v6  ;;  %v1525_v24 = vrot.slane %v1523_v11, 1  ;;  %v1528_v25 = vshll.u32 %v4195_v9, 16  ;;  %v3640_v28 = vcombine.low %v3496_v8, %v4175_v57  ;;  %v3937_v37 = vld [vmem:[%s4120_s17 + $0x2c] ss:$0 sps:$4 sm:$0x11]   ;;  %3851 = vmatpush3.bf16.msra.mxu0 %v4001_v17 }
  0x23   : > { %v522_v30 = vshll.u32 %v4210_v20, 16  ;;  %v1538_v31 = vor.u32 %v1537_v15, %v1533_v12  ;;  %v1542_v32 = vrot.slane %v1540_v13, 1  ;;  %v527_v33 = vshll.u32 %v4213_v21, 16  ;;  %v3497_v41 = vld [vmem:[%s4120_s17 + $0x24] sm:$0xe]  ;;  %3894 = vmatpush3.bf16.msra.mxu1 %v4001_v17 }
  0x24   : > { %689 = vrot.lane.b32.xlu0 %v518_v10, %s4078_s27  ;;  %v4223_v34 = vcombine.low %v178_v26, %v179_v27  ;;  %v520_v35 = vshrl.u32 %v4210_v20, 16  ;;  %v1526_v38 = vor.u32 %v1525_v24, %v1521_v19  ;;  %v1530_v39 = vrot.slane %v1528_v25, 1  ;;  %v223_v46 = vld [vmem:[%s4120_s17 + $0x24] sm:$0xe]  ;;  %v222_v52 = vld [vmem:[%s4120_s17 + $0x18] sm:$0xe] }
  0x25   : > { %v524_v36 = vrot.slane %v522_v30, 1  ;;  %v1543_v42 = vsel %vm494_vm1, %v1538_v31, %v1542_v32  ;;  %v529_v43 = vrot.slane %v527_v33, 1  ;;  %v1792_v44 = vrot.slane %v3640_v28, 1  ;;  %v3390_v55 = vld [vmem:[%s4120_s17 + $0x30] sm:$0xf] }
  0x26   : > { %1202 = vrot.lane.b32.xlu1 %v1031_v18, %s4079_s30  ;;  %v534_v40 = vshll.u32 %v4223_v34, 16  ;;  %v1793_v45 = vrot.slane %v4195_v9, 1  ;;  %v532_v48 = vshrl.u32 %v4223_v34, 16  ;;  %v539_v51 = vshll.u32 %v3937_v37, 16  ;;  %v3391_v56 = vld [vmem:[%s4120_s17 + $0x34] sm:$0xf] }
  0x27   : > { %v525_v47 = vor.u32 %v524_v36, %v520_v35  ;;  %v3641_v53 = vcombine.low %v3497_v41, %v4169_v49  ;;  %v1531_v54 = vsel %vm494_vm1, %v1526_v38, %v1530_v39  ;;  %v3388_v57 = vld [vmem:[%s4120_s17 + $0x24] sm:$0xf]  ;;  %v3389_v58 = vld [vmem:[%s4120_s17 + $0x28] sm:$0xf]  ;;  %v3547_v60 = vcombine.low %v223_v46, %v179_v27  ;;  %v3435_v14 = vld [vmem:[%s4120_s17 + $0x30] sm:$0xe] }
  0x28   : > { %1200 = vrot.lane.b32.xlu0 %v1019_v22, %s4079_s30  ;;  %v536_v50 = vrot.slane %v534_v40, 1  ;;  %v1794_v59 = vsel %vm767_vm0, %v1792_v44, %v1793_v45  ;;  %v541_v63 = vrot.slane %v539_v51, 1  ;;  %v3563_v49 = vcombine.low %v3390_v55, %v3391_v56  ;;  %v4251_v5 = vld [vmem:[%s4120_s17 + $0x38] ss:$0 sps:$4 sm:$0x11]  }
  0x29   : > { %v530_v61 = vsel %vm494_vm1, %v525_v47, %v529_v43  ;;  %v1795_v0 = vrot.slane %v3641_v53, 1  ;;  %v1796_v1 = vrot.slane %v4191_v4, 1  ;;  %v3546_v2 = vcombine.low %v222_v52, %v4202_v16  ;;  %v3945_v13 = vld [vmem:[%s4120_s17 + $0x2c] ss:$0 sps:$4 sm:$0x11]  }
  0x2a   : > { %1442 = vrot.lane.b32.xlu1 %v3609_v62, %s4080_s4  ;;  %v537_v62 = vor.u32 %v536_v50, %v532_v48  ;;  %v777_v7 = vrot.slane %v3547_v60, 1  ;;  %v778_v8 = vrot.slane %v3937_v37, 1  ;;  %v1047_v9 = vshll.u32 %v3563_v49, 16  ;;  %v3434_v15 = vld [vmem:[%s4120_s17 + $0x24] sm:$0xe] }
  0x2b   : > { %v1797_v4 = vsel %vm767_vm0, %v1795_v0, %v1796_v1  ;;  %v774_v10 = vrot.slane %v3546_v2, 1  ;;  %v775_v11 = vrot.slane %v4213_v21, 1  ;;  %v1045_v16 = vshrl.u32 %v3563_v49, 16  ;;  %v3454_v24 = vld [vmem:[%s4120_s17 + $0x3c] sm:$0xf] }
  0x2c   : > { %1440 = vrot.lane.b32.xlu0 %v3608_v3, %s4080_s4  ;;  %v3562_v3 = vcombine.low %v3388_v57, %v3389_v58  ;;  %v542_v6 = vsel %vm494_vm1, %v537_v62, %v541_v63  ;;  %v1052_v17 = vshll.u32 %v4251_v5, 16  ;;  %v779_v18 = vsel %vm767_vm0, %v777_v7, %v778_v8  ;;  %v4266_v25 = vld [vmem:[%s4120_s17 + $0x40] sm:$0xf]  ;;  %v3452_v28 = vld [vmem:[%s4120_s17 + $0x30] sm:$0xf] }
  0x2d   : > { %v1049_v19 = vrot.slane %v1047_v9, 1  ;;  %v776_v21 = vsel %vm767_vm0, %v774_v10, %v775_v11  ;;  %v1040_v27 = vshll.u32 %v3945_v13, 16  ;;  %v3453_v30 = vld [vmem:[%s4120_s17 + $0x34] sm:$0xf]  ;;  %v3595_v31 = vcombine.low %v3435_v14, %v3391_v56  ;;  %v180_v40 = vld [vmem:[%s4120_s17 + $0x30] sm:$0xf] }
  0x2e   : > { %1714 = vrot.lane.b32.xlu1 %v1543_v42, %s4081_s5  ;;  %v1035_v12 = vshll.u32 %v3562_v3, 16  ;;  %v1033_v22 = vshrl.u32 %v3562_v3, 16  ;;  %v3594_v32 = vcombine.low %v3434_v15, %v3389_v58  ;;  %v3611_v33 = vcombine.low %v3454_v24, %v4266_v25  ;;  %v4276_v41 = vld [vmem:[%s4120_s17 + $0x34] sm:$0xf]  ;;  %v183_v55 = vld [vmem:[%s4120_s17 + $0x40] sm:$0xf] }
  0x2f   : > { %v1050_v35 = vor.u32 %v1049_v19, %v1045_v16  ;;  %v1054_v36 = vrot.slane %v1052_v17, 1  ;;  %v3610_v37 = vcombine.low %v3452_v28, %v3453_v30  ;;  %v1042_v39 = vrot.slane %v1040_v27, 1  ;;  %v4281_v47 = vld [vmem:[%s4120_s17 + $0x44] ss:$0 sps:$4 sm:$0x11]  }
  0x30   : > { %1712 = vrot.lane.b32.xlu0 %v1531_v54, %s4081_s5  ;;  %v1037_v26 = vrot.slane %v1035_v12, 1  ;;  %v1289_v42 = vrot.slane %v3595_v31, 1  ;;  %v1290_v43 = vrot.slane %v4251_v5, 1  ;;  %v1286_v44 = vrot.slane %v3594_v32, 1  ;;  %v182_v54 = vld [vmem:[%s4120_s17 + $0x3c] sm:$0xf] }
  0x31   : > { %v1287_v45 = vrot.slane %v3945_v13, 1  ;;  %v1559_v46 = vshll.u32 %v3611_v33, 16  ;;  %v1055_v48 = vsel %vm494_vm1, %v1050_v35, %v1054_v36  ;;  %v1547_v50 = vshll.u32 %v3610_v37, 16  ;;  %v3951_v51 = vld [vmem:[%s4120_s17 + $0x38] ss:$0 sps:$4 sm:$0x11]  }
  0x32   : > { %691 = vrot.lane.b32.xlu1 %v530_v61, %s4078_s27  ;;  %v1038_v38 = vor.u32 %v1037_v26, %v1033_v22  ;;  %v4287_v52 = vcombine.low %v180_v40, %v4276_v41  ;;  %v1557_v56 = vshrl.u32 %v3611_v33, 16  ;;  %v1564_v58 = vshll.u32 %v4281_v47, 16  ;;  %v3498_v61 = vld [vmem:[%s4120_s17 + $0x30] sm:$0xe]  ;;  %v225_v26 = vld [vmem:[%s4120_s17 + $0x3c] sm:$0xe] }
  0x33   : > { %v1561_v57 = vrot.slane %v1559_v46, 1  ;;  %v1291_v60 = vsel %vm767_vm0, %v1289_v42, %v1290_v43  ;;  %v4301_v63 = vcombine.low %v182_v54, %v183_v55  ;;  %v1545_v0 = vshrl.u32 %v3610_v37, 16  ;;  %v3955_v10 = vld [vmem:[%s4120_s17 + $0x44] ss:$0 sps:$4 sm:$0x11]  }
  0x34   : > { %1840 = vrot.lane.b32.xlu0 %v1794_v59, %s4082_s6  ;;  %v1043_v53 = vsel %vm494_vm1, %v1038_v38, %v1042_v39  ;;  %v4295_v59 = vld [vmem:[%s4120_s17 + $0x38] ss:$0 sps:$4 sm:$0x11]   ;;  %v546_v62 = vshll.u32 %v4287_v52, 16  ;;  %v1549_v1 = vrot.slane %v1547_v50, 1  ;;  %v1552_v2 = vshll.u32 %v3951_v51, 16 }
  0x35   : > { %v3642_v5 = vcombine.low %v3498_v61, %v3453_v30  ;;  %v1566_v7 = vrot.slane %v1564_v58, 1  ;;  %v551_v8 = vshll.u32 %v4295_v59, 16  ;;  %v544_v9 = vshrl.u32 %v4287_v52, 16  ;;  %v3395_v28 = vld [vmem:[%s4120_s17 + $0x4c] sm:$0xf] }
  0x36   : > { %693 = vrot.lane.b32.xlu1 %v542_v6, %s4078_s27  ;;  %v1562_v6 = vor.u32 %v1561_v57, %v1557_v56  ;;  %v558_v11 = vshll.u32 %v4301_v63, 16  ;;  %v1550_v12 = vor.u32 %v1549_v1, %v1545_v0  ;;  %v1554_v13 = vrot.slane %v1552_v2, 1  ;;  %v224_v30 = vld [vmem:[%s4120_s17 + $0x30] sm:$0xe]  ;;  %v3392_v31 = vld [vmem:[%s4120_s17 + $0x3c] sm:$0xf] }
  0x37   : > { %v553_v16 = vrot.slane %v551_v8, 1  ;;  %v1798_v17 = vrot.slane %v3642_v5, 1  ;;  %v556_v22 = vshrl.u32 %v4301_v63, 16  ;;  %v3393_v32 = vld [vmem:[%s4120_s17 + $0x40] sm:$0xf]  ;;  %v3549_v35 = vcombine.low %v225_v26, %v183_v55 }
  0x38   : > { %1842 = vrot.lane.b32.xlu0 %v1797_v4, %s4082_s6  ;;  %v548_v4 = vrot.slane %v546_v62, 1  ;;  %v1567_v15 = vsel %vm494_vm1, %v1562_v6, %v1566_v7  ;;  %v560_v24 = vrot.slane %v558_v11, 1  ;;  %v1555_v27 = vsel %vm494_vm1, %v1550_v12, %v1554_v13  ;;  %v3963_v55 = vld [vmem:[%s4120_s17 + $0x44] ss:$0 sps:$4 sm:$0x11]  }
  0x39   : > { %v1802_v42 = vrot.slane %v4281_v47, 1  ;;  %v3548_v43 = vcombine.low %v224_v30, %v4276_v41  ;;  %v783_v46 = vrot.slane %v3549_v35, 1  ;;  %v781_v54 = vrot.slane %v4295_v59, 1  ;;  %v3458_v56 = vld [vmem:[%s4120_s17 + $0x54] sm:$0xf] }
  0x3a   : > { %822 = vrot.lane.b32.xlu1 %v779_v18, %s4077_s22  ;;  %v1799_v18 = vrot.slane %v3951_v51, 1  ;;  %v549_v19 = vor.u32 %v548_v4, %v544_v9  ;;  %v3962_v51 = vld [vmem:[%s4120_s17 + $0x50] ss:$0 sps:$4 sm:$0x11]   ;;  %v4339_v57 = vld [vmem:[%s4120_s17 + $0x58] sm:$0xf] }
  0x3b   : > { %v780_v47 = vrot.slane %v3548_v43, 1  ;;  %v3436_v0 = vld [vmem:[%s4120_s17 + $0x3c] sm:$0xe]  ;;  %v3613_v5 = vcombine.low %v3458_v56, %v4339_v57  ;;  %v3456_v6 = vld [vmem:[%s4120_s17 + $0x48] sm:$0xf] }
  0x3c   : > { %820 = vrot.lane.b32.xlu0 %v776_v21, %s4077_s22  ;;  %v563_v21 = vshll.u32 %v3955_v10, 16  ;;  %v554_v36 = vsel %vm494_vm1, %v549_v19, %v553_v16  ;;  %v1800_v40 = vsel %vm767_vm0, %v1798_v17, %v1799_v18  ;;  %v4349_v7 = vld [vmem:[%s4120_s17 + $0x4c] sm:$0xf]  ;;  %v3596_v9 = vcombine.low %v3436_v0, %v3393_v32  ;;  %v184_v11 = vld [vmem:[%s4120_s17 + $0x48] sm:$0xf] }
  0x3d   : > { %v782_v59 = vsel %vm767_vm0, %v780_v47, %v781_v54  ;;  %v4355_v12 = vld [vmem:[%s4120_s17 + $0x4c] sm:$0xf]  ;;  %v1583_v16 = vshll.u32 %v3613_v5, 16  ;;  %v1296_v18 = vrot.slane %v3962_v51, 1  ;;  %v186_v30 = vld [vmem:[%s4120_s17 + $0x54] sm:$0xf] }
  0x3e   : > { %934 = vrot.lane.b32.xlu1 %v3563_v49, %s4075_s18  ;;  %v1288_v49 = vsel %vm767_vm0, %v1286_v44, %v1287_v45  ;;  %v565_v38 = vrot.slane %v563_v21, 1  ;;  %v3564_v44 = vcombine.low %v3392_v31, %v3393_v32  ;;  %v4360_v19 = vld [vmem:[%s4120_s17 + $0x5c] ss:$0 sps:$4 sm:$0x11]   ;;  %v1292_v21 = vrot.slane %v3596_v9, 1 }
  0x3f   : > { %v4368_v26 = vld [vmem:[%s4120_s17 + $0x50] ss:$0 sps:$4 sm:$0x11]   ;;  %v4373_v31 = vld [vmem:[%s4120_s17 + $0x58] sm:$0xf]  ;;  %v1581_v32 = vshrl.u32 %v3613_v5, 16 }
  0x40   : > { %932 = vrot.lane.b32.xlu0 %v3562_v3, %s4075_s18  ;;  %v3499_v3 = vld [vmem:[%s4120_s17 + $0x3c] sm:$0xe]  ;;  %v1059_v41 = vshll.u32 %v3564_v44, 16  ;;  %v1057_v1 = vshrl.u32 %v3564_v44, 16  ;;  %v1588_v35 = vshll.u32 %v4360_v19, 16 }
  0x41   : > { %v3643_v14 = vcombine.low %v3499_v3, %v4266_v25  ;;  %v3394_v25 = vld [vmem:[%s4120_s17 + $0x48] sm:$0xf]  ;;  %v1064_v3 = vshll.u32 %v3963_v55, 16  ;;  %v3973_v54 = vld [vmem:[%s4120_s17 + $0x5c] ss:$0 sps:$4 sm:$0x11]  }
  0x42   : > { %1206 = vrot.lane.b32.xlu1 %v1055_v48, %s4079_s30  ;;  %v3565_v39 = vcombine.low %v3394_v25, %v3395_v28  ;;  %v784_v48 = vrot.slane %v3955_v10, 1  ;;  %v1061_v2 = vrot.slane %v1059_v41, 1  ;;  %v1293_v25 = vrot.slane %v3963_v55, 1  ;;  %v3398_v0 = vld [vmem:[%s4120_s17 + $0x60] sm:$0xf] }
  0x43   : > { %v226_v9 = vld [vmem:[%s4120_s17 + $0x48] sm:$0xe] }
  0x44   : > { %1204 = vrot.lane.b32.xlu0 %v1043_v53, %s4079_s30  ;;  %v1071_v50 = vshll.u32 %v3565_v39, 16  ;;  %v785_v58 = vsel %vm767_vm0, %v783_v46, %v784_v48  ;;  %v1069_v61 = vshrl.u32 %v3565_v39, 16  ;;  %v1062_v13 = vor.u32 %v1061_v2, %v1057_v1  ;;  %v3500_v46 = vld [vmem:[%s4120_s17 + $0x48] sm:$0xe] }
  0x45   : > { %v3644_v55 = vcombine.low %v3500_v46, %v4349_v7 }
  0x46   : > { %1334 = vrot.lane.b32.xlu1 %v1291_v60, %s4076_s21  ;;  %v3437_v60 = vld [vmem:[%s4120_s17 + $0x48] sm:$0xe]  ;;  %v1073_v62 = vrot.slane %v1071_v50, 1  ;;  %v1590_v50 = vrot.slane %v1588_v35, 1 }
  0x47   : > { %v3597_v8 = vcombine.low %v3437_v60, %v3395_v28  ;;  %v4004_v60 = vld [vmem:[%s6145_s1 + $0x20] ss:$0 sps:$4 sm:$0xff]  }
  0x48   : > { %1332 = vrot.lane.b32.xlu0 %v1288_v49, %s4076_s21  ;;  %v1076_v49 = vshll.u32 %v3962_v51, 16  ;;  %v1074_v4 = vor.u32 %v1073_v62, %v1069_v61  ;;  %3896 = vmatprep.subr.msk.bf16.mxu0 %vm6148_vm2, %v4004_v60 }
  0x49   : > { %v1295_v17 = vrot.slane %v3597_v8, 1  ;;  %v1805_v8 = vrot.slane %v4368_v26, 1  ;;  %3897 = vmatprep.subr.msk.bf16.mxu1 %vm6148_vm2, %v4004_v60 }
  0x4a   : > { %1446 = vrot.lane.b32.xlu1 %v3611_v33, %s4080_s4  ;;  %v1801_v33 = vrot.slane %v3643_v14, 1  ;;  %v1078_v10 = vrot.slane %v1076_v49, 1  ;;  %v1066_v14 = vrot.slane %v1064_v3, 1 }
  0x4c   : > { %1444 = vrot.lane.b32.xlu0 %v3610_v37, %s4080_s4  ;;  %v561_v37 = vor.u32 %v560_v24, %v556_v22  ;;  %v1803_v53 = vsel %vm767_vm0, %v1801_v33, %v1802_v42  ;;  %v4363_v22 = vcombine.low %v184_v11, %v4355_v12  ;;  %v1079_v24 = vsel %vm494_vm1, %v1074_v4, %v1078_v10  ;;  %v3396_v4 = vld [vmem:[%s4120_s17 + $0x54] sm:$0xf]  ;;  %v4417_v10 = vld [vmem:[%s4120_s17 + $0x58] sm:$0xf] }
  0x4d   : > { %v1585_v33 = vrot.slane %v1583_v16, 1  ;;  %v2207_v11 = vsel %vm6148_vm2, %v4004_v60, 0 }
  0x4e   : > { %1718 = vrot.lane.b32.xlu1 %v1567_v15, %s4081_s5  ;;  %v566_v45 = vsel %vm494_vm1, %v561_v37, %v565_v38  ;;  %v3612_v15 = vcombine.low %v3456_v6, %v4349_v7  ;;  %v570_v37 = vshll.u32 %v4363_v22, 16  ;;  %v1297_v38 = vsel %vm767_vm0, %v1295_v17, %v1296_v18  ;;  %v4408_v7 = vld [vmem:[%s4120_s17 + $0x64] sm:$0xf]  ;;  %3853 = vmatpush3.bf16.msra.mxu0 %v2207_v11 }
  0x4f   : > { %v1586_v48 = vor.u32 %v1585_v33, %v1581_v32  ;;  %v568_v51 = vshrl.u32 %v4363_v22, 16  ;;  %v587_v6 = vshll.u32 %v3973_v54, 16  ;;  %3895 = vmatpush3.bf16.msra.mxu1 %v2207_v11  ;;  %v3980_v32 = vld [vmem:[%s4120_s17 + $0x68] ss:$0 sps:$4 sm:$0x11]  }
  0x50   : > { %1716 = vrot.lane.b32.xlu0 %v1555_v27, %s4081_s5  ;;  %v1067_v27 = vsel %vm494_vm1, %v1062_v13, %v1066_v14  ;;  %v1571_v28 = vshll.u32 %v3612_v15, 16  ;;  %v1569_v42 = vshrl.u32 %v3612_v15, 16  ;;  %v3567_v14 = vcombine.low %v3398_v0, %v4408_v7  ;;  %v3981_v33 = vld [vmem:[%s4120_s17 + $0x5c] ss:$0 sps:$4 sm:$0x11]  }
  0x51   : > { %v1591_v62 = vsel %vm494_vm1, %v1586_v48, %v1590_v50  ;;  %v589_v17 = vrot.slane %v587_v6, 1  ;;  %v1088_v46 = vshll.u32 %v3981_v33, 16  ;;  %v4458_v0 = vld [vmem:[%s4120_s17 + $0x64] sm:$0xf]  ;;  %v190_v11 = vld [vmem:[%s4120_s17 + $0x6c] sm:$0xf] }
  0x52   : > { %695 = vrot.lane.b32.xlu1 %v554_v36, %s4078_s27  ;;  %v4378_v36 = vld [vmem:[%s4120_s17 + $0x50] ss:$0 sps:$4 sm:$0x11]   ;;  %v1573_v43 = vrot.slane %v1571_v28, 1  ;;  %v790_v28 = vrot.slane %v3973_v54, 1 }
  0x53   : > { %v575_v47 = vshll.u32 %v4378_v36, 16  ;;  %v787_v35 = vrot.slane %v4378_v36, 1  ;;  %v4448_v54 = vld [vmem:[%s4120_s17 + $0x64] sm:$0xf]  ;;  %v1090_v60 = vrot.slane %v1088_v46, 1 }
  0x54   : > { %1844 = vrot.lane.b32.xlu0 %v1800_v40, %s4082_s6  ;;  %v1294_v40 = vsel %vm767_vm0, %v1292_v21, %v1293_v25  ;;  %v1574_v56 = vor.u32 %v1573_v43, %v1569_v42  ;;  %v1808_v21 = vrot.slane %v4360_v19, 1  ;;  %v3438_v42 = vld [vmem:[%s4120_s17 + $0x54] sm:$0xe]  ;;  %v1093_v43 = vshrl.u32 %v3567_v14, 16 }
  0x55   : > { %v577_v49 = vrot.slane %v575_v47, 1  ;;  %v3460_v47 = vld [vmem:[%s4120_s17 + $0x60] sm:$0xf] }
  0x56   : > { %697 = vrot.lane.b32.xlu1 %v566_v45, %s4078_s27  ;;  %v3501_v45 = vld [vmem:[%s4120_s17 + $0x54] sm:$0xe] }
  0x57   : > { %v3645_v61 = vcombine.low %v3501_v45, %v4339_v57  ;;  %v1100_v45 = vshll.u32 %v3980_v32, 16 }
  0x58   : > { %1846 = vrot.lane.b32.xlu0 %v1803_v53, %s4082_s6  ;;  %v572_v53 = vrot.slane %v570_v37, 1 }
  0x59   : > { %v1807_v18 = vrot.slane %v3645_v61, 1 }
  0x5a   : > { %826 = vrot.lane.b32.xlu1 %v785_v58, %s4077_s22  ;;  %v573_v1 = vor.u32 %v572_v53, %v568_v51  ;;  %v3462_v51 = vld [vmem:[%s4120_s17 + $0x6c] sm:$0xf]  ;;  %v4444_v53 = vld [vmem:[%s4120_s17 + $0x70] sm:$0xf] }
  0x5b   : > { %v1809_v19 = vsel %vm767_vm0, %v1807_v18, %v1808_v21  ;;  %v3615_v61 = vcombine.low %v3462_v51, %v4444_v53 }
  0x5c   : > { %824 = vrot.lane.b32.xlu0 %v782_v59, %s4077_s22  ;;  %v227_v59 = vld [vmem:[%s4120_s17 + $0x54] sm:$0xe] }
  0x5d   : > { %v3551_v13 = vcombine.low %v227_v59, %v4373_v31  ;;  %v188_v59 = vld [vmem:[%s4120_s17 + $0x60] sm:$0xf] }
  0x5e   : > { %938 = vrot.lane.b32.xlu1 %v3565_v39, %s4075_s18  ;;  %v4384_v39 = vcombine.low %v186_v30, %v4373_v31  ;;  %v1095_v30 = vshll.u32 %v3567_v14, 16 }
  0x5f   : > { %v789_v25 = vrot.slane %v3551_v13, 1  ;;  %v4475_v13 = vld [vmem:[%s4120_s17 + $0x70] sm:$0xf] }
  0x60   : > { %936 = vrot.lane.b32.xlu0 %v3564_v44, %s4075_s18  ;;  %v1576_v44 = vshll.u32 %v4368_v26, 16  ;;  %v582_v41 = vshll.u32 %v4384_v39, 16  ;;  %v580_v2 = vshrl.u32 %v4384_v39, 16  ;;  %v3550_v26 = vcombine.low %v226_v9, %v4355_v12 }
  0x61   : > { %v4486_v21 = vcombine.low %v190_v11, %v4475_v13 }
  0x62   : > { %1210 = vrot.lane.b32.xlu1 %v1079_v24, %s4079_s30  ;;  %v1578_v58 = vrot.slane %v1576_v44, 1  ;;  %v584_v3 = vrot.slane %v582_v41, 1  ;;  %v786_v12 = vrot.slane %v3550_v26, 1  ;;  %v1097_v44 = vrot.slane %v1095_v30, 1  ;;  %v3502_v30 = vld [vmem:[%s4120_s17 + $0x60] sm:$0xe] }
  0x64   : > { %1208 = vrot.lane.b32.xlu0 %v1067_v27, %s4079_s30  ;;  %v1579_v57 = vsel %vm494_vm1, %v1574_v56, %v1578_v58  ;;  %v585_v16 = vor.u32 %v584_v3, %v580_v2  ;;  %v3566_v27 = vcombine.low %v3396_v4, %v4417_v10  ;;  %v788_v48 = vsel %vm767_vm0, %v786_v12, %v787_v35  ;;  %v4462_v3 = vld [vmem:[%s4120_s17 + $0x74] ss:$0 sps:$4 sm:$0x11]  }
  0x65   : > { %v1098_v56 = vor.u32 %v1097_v44, %v1093_v43  ;;  %v1102_v58 = vrot.slane %v1100_v45, 1  ;;  %v1302_v2 = vrot.slane %v3980_v32, 1  ;;  %v1299_v4 = vrot.slane %v3981_v33, 1  ;;  %v3503_v45 = vld [vmem:[%s4120_s17 + $0x6c] sm:$0xe] }
  0x66   : > { %1338 = vrot.lane.b32.xlu1 %v1297_v38, %s4076_s21  ;;  %v590_v31 = vsel %vm494_vm1, %v585_v16, %v589_v17  ;;  %v1083_v37 = vshll.u32 %v3566_v27, 16  ;;  %v791_v38 = vsel %vm767_vm0, %v789_v25, %v790_v28  ;;  %v1081_v50 = vshrl.u32 %v3566_v27, 16 }
  0x67   : > { %v1103_v6 = vsel %vm494_vm1, %v1098_v56, %v1102_v58  ;;  %v1612_v16 = vshll.u32 %v4462_v3, 16  ;;  %v1605_v17 = vshrl.u32 %v3615_v61, 16  ;;  %v4515_v56 = vld [vmem:[%s4120_s17 + $0x7c] sm:$0xf]  ;;  %v3647_v58 = vcombine.low %v3503_v45, %v4444_v53  ;;  %v3466_v45 = vld [vmem:[%s4120_s17 + $0x84] sm:$0xf] }
  0x68   : > { %1336 = vrot.lane.b32.xlu0 %v1294_v40, %s4076_s21  ;;  %v3439_v40 = vld [vmem:[%s4120_s17 + $0x60] sm:$0xe]  ;;  %v1085_v36 = vrot.slane %v1083_v37, 1 }
  0x69   : > { %v3599_v41 = vcombine.low %v3439_v40, %v4408_v7  ;;  %v1614_v33 = vrot.slane %v1612_v16, 1  ;;  %v606_v40 = vshll.u32 %v4486_v21, 16  ;;  %v1813_v11 = vrot.slane %v3647_v58, 1 }
  0x6a   : > { %1450 = vrot.lane.b32.xlu1 %v3613_v5, %s4080_s4  ;;  %v1804_v5 = vrot.slane %v3644_v55, 1  ;;  %v3598_v55 = vcombine.low %v3438_v42, %v4417_v10  ;;  %v3646_v42 = vcombine.low %v3502_v30, %v4448_v54 }
  0x6c   : > { %1448 = vrot.lane.b32.xlu0 %v3612_v15, %s4080_s4  ;;  %v578_v15 = vsel %vm494_vm1, %v573_v1, %v577_v49  ;;  %v1806_v24 = vsel %vm767_vm0, %v1804_v5, %v1805_v8  ;;  %v3614_v49 = vcombine.low %v3460_v47, %v4448_v54  ;;  %v1301_v1 = vrot.slane %v3599_v41, 1  ;;  %v4467_v5 = vld [vmem:[%s4120_s17 + $0x68] ss:$0 sps:$4 sm:$0x11]  }
  0x6d   : > { %v1298_v7 = vrot.slane %v3598_v55, 1  ;;  %v4470_v8 = vcombine.low %v188_v59, %v4458_v0  ;;  %v1600_v28 = vshll.u32 %v4467_v5, 16  ;;  %v608_v54 = vrot.slane %v606_v40, 1  ;;  %v3402_v55 = vld [vmem:[%s4120_s17 + $0x78] sm:$0xf] }
  0x6e   : > { %1722 = vrot.lane.b32.xlu1 %v1591_v62, %s4081_s5  ;;  %v1086_v62 = vor.u32 %v1085_v36, %v1081_v50  ;;  %v1595_v10 = vshll.u32 %v3614_v49, 16  ;;  %v229_v50 = vld [vmem:[%s4120_s17 + $0x6c] sm:$0xe] }
  0x6f   : > { %v1300_v26 = vsel %vm767_vm0, %v1298_v7, %v1299_v4  ;;  %v592_v35 = vshrl.u32 %v4470_v8, 16  ;;  %v1602_v44 = vrot.slane %v1600_v28, 1  ;;  %v3400_v59 = vld [vmem:[%s4120_s17 + $0x6c] sm:$0xf]  ;;  %v4530_v7 = vcombine.low %v3402_v55, %v4515_v56 }
  0x70   : > { %1720 = vrot.lane.b32.xlu0 %v1579_v57, %s4081_s5  ;;  %v1607_v57 = vshll.u32 %v3615_v61, 16  ;;  %v1091_v9 = vsel %vm494_vm1, %v1086_v62, %v1090_v60  ;;  %v1597_v25 = vrot.slane %v1595_v10, 1  ;;  %v1810_v62 = vrot.slane %v3646_v42, 1 }
  0x72   : > { %699 = vrot.lane.b32.xlu1 %v578_v15, %s4078_s27  ;;  %v1303_v15 = vsel %vm767_vm0, %v1301_v1, %v1302_v2  ;;  %v1609_v18 = vrot.slane %v1607_v57, 1  ;;  %v4524_v1 = vld [vmem:[%s4120_s17 + $0x70] sm:$0xf]  ;;  %v228_v2 = vld [vmem:[%s4120_s17 + $0x60] sm:$0xe] }
  0x74   : > { %1848 = vrot.lane.b32.xlu0 %v1806_v24, %s4082_s6  ;;  %v594_v24 = vshll.u32 %v4470_v8, 16  ;;  %v1610_v12 = vor.u32 %v1609_v18, %v1605_v17  ;;  %v1119_v17 = vshll.u32 %v4530_v7, 16  ;;  %v4545_v18 = vld [vmem:[%s4120_s17 + $0x80] ss:$0 sps:$4 sm:$0x11]  }
  0x75   : > { %v1124_v40 = vshll.u32 %v4545_v18, 16 }
  0x76   : > { %701 = vrot.lane.b32.xlu1 %v590_v31, %s4078_s27  ;;  %v596_v37 = vrot.slane %v594_v24, 1  ;;  %v1615_v51 = vsel %vm494_vm1, %v1610_v12, %v1614_v33  ;;  %v3441_v12 = vld [vmem:[%s4120_s17 + $0x78] sm:$0xe] }
  0x77   : > { %v3601_v55 = vcombine.low %v3441_v12, %v4515_v56  ;;  %v1126_v56 = vrot.slane %v1124_v40, 1 }
  0x78   : > { %1850 = vrot.lane.b32.xlu0 %v1809_v19, %s4082_s6  ;;  %v597_v47 = vor.u32 %v596_v37, %v592_v35  ;;  %v3440_v35 = vld [vmem:[%s4120_s17 + $0x6c] sm:$0xe]  ;;  %v1117_v37 = vshrl.u32 %v4530_v7, 16 }
  0x79   : > { %v3600_v58 = vcombine.low %v3440_v35, %v4524_v1 }
  0x7a   : > { %830 = vrot.lane.b32.xlu1 %v791_v38, %s4077_s22  ;;  %v4500_v38 = vld [vmem:[%s4120_s17 + $0x74] ss:$0 sps:$4 sm:$0x11]  }
  0x7b   : > { %v611_v41 = vshll.u32 %v4500_v38, 16 }
  0x7c   : > { %828 = vrot.lane.b32.xlu0 %v788_v48, %s4077_s22  ;;  %v604_v48 = vshrl.u32 %v4486_v21, 16 }
  0x7e   : > { %942 = vrot.lane.b32.xlu1 %v3567_v14, %s4075_s18  ;;  %v4478_v14 = vld [vmem:[%s4120_s17 + $0x68] ss:$0 sps:$4 sm:$0x11]   ;;  %v609_v57 = vor.u32 %v608_v54, %v604_v48 }
  0x7f   : > { %v599_v19 = vshll.u32 %v4478_v14, 16  ;;  %v793_v33 = vrot.slane %v4478_v14, 1 }
  0x80   : > { %940 = vrot.lane.b32.xlu0 %v3566_v27, %s4075_s18  ;;  %v1593_v27 = vshrl.u32 %v3614_v49, 16 }
  0x81   : > { %v601_v46 = vrot.slane %v599_v19, 1 }
  0x82   : > { %1214 = vrot.lane.b32.xlu1 %v1103_v6, %s4079_s30  ;;  %v1598_v43 = vor.u32 %v1597_v25, %v1593_v27  ;;  %v3553_v6 = vcombine.low %v229_v50, %v4475_v13  ;;  %v1814_v13 = vrot.slane %v4462_v3, 1  ;;  %v796_v27 = vrot.slane %v4500_v38, 1  ;;  %v4552_v25 = vld [vmem:[%s4120_s17 + $0x74] ss:$0 sps:$4 sm:$0x11]  }
  0x83   : > { %v602_v53 = vsel %vm494_vm1, %v597_v47, %v601_v46  ;;  %v1121_v38 = vrot.slane %v1119_v17, 1  ;;  %v4569_v46 = vld [vmem:[%s4120_s17 + $0x88] sm:$0xf]  ;;  %v4576_v47 = vld [vmem:[%s4120_s17 + $0x7c] sm:$0xf] }
  0x84   : > { %1212 = vrot.lane.b32.xlu0 %v1091_v9, %s4079_s30  ;;  %v613_v9 = vrot.slane %v611_v41, 1  ;;  %v1815_v28 = vsel %vm767_vm0, %v1813_v11, %v1814_v13  ;;  %v1304_v11 = vrot.slane %v3600_v58, 1  ;;  %v4602_v13 = vld [vmem:[%s4120_s17 + $0x8c] ss:$0 sps:$4 sm:$0x11]  }
  0x86   : > { %1342 = vrot.lane.b32.xlu1 %v1303_v15, %s4076_s21  ;;  %v4492_v31 = vpop.permute.xlu1 %930  ;;  %v3552_v15 = vcombine.low %v228_v2, %v4458_v0  ;;  %v614_v24 = vsel %vm494_vm1, %v609_v57, %v613_v9  ;;  %v4598_v57 = vld [vmem:[%s4120_s17 + $0x7c] sm:$0xf]  ;;  %v1307_v9 = vrot.slane %v3601_v55, 1 }
  0x87   : > { %v4494_v32 = vpop.permute.xlu0 %928 }
  0x88   : > { %1340 = vrot.lane.b32.xlu0 %v1300_v26, %s4076_s21  ;;  %v795_v26 = vrot.slane %v3553_v6, 1  ;;  %v792_v30 = vrot.slane %v3552_v15, 1  ;;  %v1305_v15 = vrot.slane %v4552_v25, 1 }
  0x8a   : > { %1454 = vrot.lane.b32.xlu1 %v3615_v61, %s4080_s4  ;;  %v1603_v61 = vsel %vm494_vm1, %v1598_v43, %v1602_v44  ;;  %v797_v14 = vsel %vm767_vm0, %v795_v26, %v796_v27  ;;  %v1112_v44 = vshll.u32 %v4552_v25, 16  ;;  %v794_v50 = vsel %vm767_vm0, %v792_v30, %v793_v33  ;;  %v4617_v26 = vld [vmem:[%s4120_s17 + $0x80] ss:$0 sps:$4 sm:$0x11]   ;;  %v194_v25 = vld [vmem:[%s4120_s17 + $0x84] sm:$0xf] }
  0x8b   : > { %v4509_v36 = vpop.permute.xlu0 %1328  ;;  %v1636_v33 = vshll.u32 %v4602_v13, 16  ;;  %v1306_v12 = vsel %vm767_vm0, %v1304_v11, %v1305_v15 }
  0x8c   : > { %1452 = vrot.lane.b32.xlu0 %v3614_v49, %s4080_s4  ;;  %v4518_v60 = vpop.permute.xlu1 %816  ;;  %v1811_v49 = vrot.slane %v4467_v5, 1  ;;  %v4535_v5 = vcombine.low %v3400_v59, %v4524_v1  ;;  %v1114_v6 = vrot.slane %v1112_v44, 1 }
  0x8d   : > { %v1638_v55 = vrot.slane %v1636_v33, 1  ;;  %v3404_v33 = vld [vmem:[%s4120_s17 + $0x84] sm:$0xf] }
  0x8e   : > { %1726 = vrot.lane.b32.xlu1 %v1615_v51, %s4081_s5  ;;  %v1812_v10 = vsel %vm767_vm0, %v1810_v62, %v1811_v49  ;;  %v1107_v3 = vshll.u32 %v4535_v5, 16  ;;  %v1105_v42 = vshrl.u32 %v4535_v5, 16  ;;  %v3464_v51 = vld [vmem:[%s4120_s17 + $0x78] sm:$0xf] }
  0x8f   : > { %v4590_v49 = vcombine.low %v3464_v51, %v4576_v47 }
  0x90   : > { %1724 = vrot.lane.b32.xlu0 %v1603_v61, %s4081_s5  ;;  %v4537_v4 = vpop.permute.xlu1 %818  ;;  %v1109_v43 = vrot.slane %v1107_v3, 1  ;;  %v4584_v61 = vcombine.low %v3466_v45, %v4569_v46 }
  0x92   : > { %v688_v16 = vpop.permute.xlu0 %687  ;;  %703 = vrot.lane.b32.xlu1 %v602_v53, %s4078_s27  ;;  %v1110_v2 = vor.u32 %v1109_v43, %v1105_v42  ;;  %v192_v53 = vld [vmem:[%s4120_s17 + $0x78] sm:$0xf]  ;;  %v1629_v30 = vshrl.u32 %v4584_v61, 16 }
  0x93   : > { %v1874_v54 = vsel %vm1872_vm3, %v4148_v23, %v688_v16  ;;  %v1122_v23 = vor.u32 %v1121_v38, %v1117_v37  ;;  %v1631_v16 = vshll.u32 %v4584_v61, 16  ;;  %v4636_v37 = vld [vmem:[%s4120_s17 + $0x80] ss:$0 sps:$4 sm:$0x11]   ;;  %v1617_v38 = vshrl.u32 %v4590_v49, 16 }
  0x94   : > { %1852 = vrot.lane.b32.xlu0 %v1812_v10, %s4082_s6  ;;  %v4554_v0 = vpop.permute.xlu1 %1330  ;;  %v1907_v59 = vsel %vm1905_vm4, %v1874_v54, %v4518_v60  ;;  %v1308_v10 = vrot.slane %v4545_v18, 1  ;;  %v1115_v3 = vsel %vm494_vm1, %v1110_v2, %v1114_v6  ;;  %v3505_v54 = vld [vmem:[%s4120_s17 + $0x84] sm:$0xe] }
  0x95   : > { %v1940_v17 = vsel %vm1938_vm5, %v1907_v59, %v4494_v32  ;;  %v1127_v18 = vsel %vm494_vm1, %v1122_v23, %v1126_v56  ;;  %v4626_v32 = vld [vmem:[%s4120_s17 + $0x88] sm:$0xf]  ;;  %v1633_v35 = vrot.slane %v1631_v16, 1  ;;  %v623_v23 = vshll.u32 %v4636_v37, 16 }
  0x96   : > { %v690_v19 = vpop.permute.xlu0 %689  ;;  %705 = vrot.lane.b32.xlu1 %v614_v24, %s4078_s27  ;;  %v1619_v24 = vshll.u32 %v4590_v49, 16  ;;  %v4644_v42 = vcombine.low %v194_v25, %v4626_v32  ;;  %v4660_v56 = vld [vmem:[%s4120_s17 + $0x8c] ss:$0 sps:$4 sm:$0x11]   ;;  %v3649_v16 = vcombine.low %v3505_v54, %v4569_v46  ;;  %v1817_v25 = vrot.slane %v4617_v26, 1 }
  0x97   : > { %v1876_v62 = vsel %vm1872_vm3, %v4153_v29, %v690_v19  ;;  %v1309_v19 = vsel %vm767_vm0, %v1307_v9, %v1308_v10  ;;  %v635_v46 = vshll.u32 %v4660_v56, 16 }
  0x98   : > { %1854 = vrot.lane.b32.xlu0 %v1815_v28, %s4082_s6  ;;  %v4571_v48 = vpop.permute.xlu1 %1202  ;;  %v1909_v60 = vsel %vm1905_vm4, %v1876_v62, %v4537_v4  ;;  %v1621_v45 = vrot.slane %v1619_v24, 1  ;;  %v1634_v62 = vor.u32 %v1633_v35, %v1629_v30  ;;  %v630_v6 = vshll.u32 %v4644_v42, 16  ;;  %v230_v30 = vld [vmem:[%s4120_s17 + $0x78] sm:$0xe] }
  0x9a   : > { %v1201_v41 = vpop.permute.xlu0 %1200  ;;  %834 = vrot.lane.b32.xlu1 %v797_v14, %s4077_s22  ;;  %v1622_v10 = vor.u32 %v1621_v45, %v1617_v38  ;;  %v632_v24 = vrot.slane %v630_v6, 1  ;;  %v637_v38 = vrot.slane %v635_v46, 1  ;;  %v1820_v45 = vrot.slane %v4602_v13, 1  ;;  %v3443_v6 = vld [vmem:[%s4120_s17 + $0x90] sm:$0xe] }
  0x9b   : > { %v1973_v4 = vsel %vm1971_vm6, %v1940_v17, %v1201_v41  ;;  %v3504_v41 = vld [vmem:[%s4120_s17 + $0x78] sm:$0xe]  ;;  %v625_v17 = vrot.slane %v623_v23, 1  ;;  %v3468_v46 = vld [vmem:[%s4120_s17 + $0x90] sm:$0xf] }
  0x9c   : > { %832 = vrot.lane.b32.xlu0 %v794_v50, %s4077_s22  ;;  %v4594_v1 = vpop.permute.xlu1 %1442  ;;  %v3648_v9 = vcombine.low %v3504_v41, %v4576_v47  ;;  %v802_v41 = vrot.slane %v4660_v56, 1 }
  0x9e   : > { %v1441_v29 = vpop.permute.xlu0 %1440  ;;  %946 = vrot.lane.b32.xlu1 %v4530_v7, %s4075_s18  ;;  %v4620_v7 = vcombine.low %v192_v53, %v4598_v57 }
  0xa0   : > { %944 = vrot.lane.b32.xlu0 %v4535_v5, %s4075_s18  ;;  %v1715_v27 = vpop.permute.xlu1 %1714  ;;  %v1942_v5 = vsel %vm1938_vm5, %v1909_v60, %v4492_v31  ;;  %v2006_v31 = vsel %vm2004_vm7, %v1973_v4, %v4509_v36  ;;  %v618_v40 = vshll.u32 %v4620_v7, 16  ;;  %v1624_v36 = vshll.u32 %v4617_v26, 16  ;;  %v231_v4 = vld [vmem:[%s4120_s17 + $0x84] sm:$0xe] }
  0xa1   : > { %v1975_v14 = vsel %vm1971_vm6, %v1942_v5, %v4571_v48  ;;  %v2039_v43 = vsel %vm2037_vm8, %v2006_v31, %v1441_v29  ;;  %v616_v48 = vshrl.u32 %v4620_v7, 16  ;;  %v3406_v5 = vld [vmem:[%s4120_s17 + $0x90] sm:$0xf]  ;;  %v3555_v35 = vcombine.low %v231_v4, %v4626_v32  ;;  %v4740_v4 = vld [vmem:[%s4120_s17 + $0x94] sm:$0xf] }
  0xa2   : > { %v1713_v28 = vpop.permute.xlu0 %1712  ;;  %1218 = vrot.lane.b32.xlu1 %v1127_v18, %s4079_s30  ;;  %v2008_v59 = vsel %vm2004_vm7, %v1975_v14, %v4554_v0  ;;  %v620_v2 = vrot.slane %v618_v40, 1  ;;  %v1626_v11 = vrot.slane %v1624_v36, 1  ;;  %v628_v18 = vshrl.u32 %v4644_v42, 16 }
  0xa3   : > { %v2072_v50 = vsel %vm2070_vm9, %v2039_v43, %v1713_v28  ;;  %v2041_v53 = vsel %vm2037_vm8, %v2008_v59, %v4594_v1  ;;  %v1639_v1 = vsel %vm494_vm1, %v1634_v62, %v1638_v55  ;;  %v4690_v28 = vld [vmem:[%s4120_s17 + $0x94] sm:$0xf]  ;;  %v3554_v36 = vcombine.low %v230_v30, %v4598_v57  ;;  %v4021_v55 = vld [vmem:[%s4120_s17 + $0x98] ss:$0 sps:$4 sm:$0x11]  }
  0xa4   : > { %1216 = vrot.lane.b32.xlu0 %v1115_v3, %s4079_s30  ;;  %v4649_v44 = vpop.permute.xlu1 %691  ;;  %v2074_v60 = vsel %vm2070_vm9, %v2041_v53, %v1715_v27  ;;  %v621_v47 = vor.u32 %v620_v2, %v616_v48  ;;  %v1816_v3 = vrot.slane %v3648_v9, 1  ;;  %v633_v26 = vor.u32 %v632_v24, %v628_v18  ;;  %v4022_v59 = vld [vmem:[%s4120_s17 + $0x8c] ss:$0 sps:$4 sm:$0x11]   ;;  %v3470_v53 = vld [vmem:[%s4120_s17 + $0x9c] sm:$0xf] }
  0xa5   : > { %v3571_v40 = vcombine.low %v3406_v5, %v4690_v28  ;;  %v801_v54 = vrot.slane %v3555_v35, 1  ;;  %v798_v62 = vrot.slane %v3554_v36, 1  ;;  %v799_v48 = vrot.slane %v4636_v37, 1  ;;  %v4726_v9 = vld [vmem:[%s4120_s17 + $0xa0] sm:$0xf] }
  0xa6   : > { %v1841_v51 = vpop.permute.xlu0 %1840  ;;  %1346 = vrot.lane.b32.xlu1 %v1309_v19, %s4076_s21  ;;  %v4697_v19 = vld [vmem:[%s4120_s17 + $0x88] sm:$0xf]  ;;  %v626_v31 = vsel %vm494_vm1, %v621_v47, %v625_v17  ;;  %v1818_v43 = vsel %vm767_vm0, %v1816_v3, %v1817_v25  ;;  %v1136_v17 = vshll.u32 %v4022_v59, 16  ;;  %v3603_v18 = vcombine.low %v3443_v6, %v4690_v28  ;;  %v4752_v35 = vld [vmem:[%s4120_s17 + $0x94] sm:$0xf] }
  0xa7   : > { %v2105_v58 = vsel %vm2103_vm10, %v2072_v50, %v1841_v51  ;;  %v3570_v32 = vcombine.low %v3404_v33, %v4697_v19  ;;  %v638_v51 = vsel %vm494_vm1, %v633_v26, %v637_v38  ;;  %v1143_v13 = vshll.u32 %v3571_v40, 16  ;;  %v4757_v36 = vld [vmem:[%s4120_s17 + $0xa4] ss:$0 sps:$4 sm:$0x11]  }
  0xa8   : > { %1344 = vrot.lane.b32.xlu0 %v1306_v12, %s4076_s21  ;;  %3854 = vmatprep.mubr.msk.bf16.mxu0 %vm2172_vm11, %v2105_v58  ;;  %v4669_v29 = vpop.permute.xlu1 %693  ;;  %v1819_v12 = vrot.slane %v3649_v16, 1  ;;  %v803_v56 = vsel %vm767_vm0, %v801_v54, %v802_v41  ;;  %v4736_v24 = vcombine.low %v3470_v53, %v4726_v9  ;;  %v1138_v28 = vrot.slane %v1136_v17, 1  ;;  %v4765_v41 = vld [vmem:[%s4120_s17 + $0x98] ss:$0 sps:$4 sm:$0x11]  }
  0xa9   : > { %v1131_v23 = vshll.u32 %v3570_v32, 16  ;;  %v1129_v16 = vshrl.u32 %v3570_v32, 16  ;;  %v4748_v33 = vcombine.low %v3468_v46, %v4740_v4  ;;  %v1313_v26 = vrot.slane %v3603_v18, 1  ;;  %v3506_v46 = vld [vmem:[%s4120_s17 + $0x90] sm:$0xe] }
  0xaa   : > { %v1843_v0 = vpop.permute.xlu0 %1842  ;;  %1458 = vrot.lane.b32.xlu1 %v4584_v61, %s4080_s4  ;;  %v1627_v61 = vsel %vm494_vm1, %v1622_v10, %v1626_v11  ;;  %v1821_v58 = vsel %vm767_vm0, %v1819_v12, %v1820_v45  ;;  %v3442_v10 = vld [vmem:[%s4120_s17 + $0x84] sm:$0xe]  ;;  %v1141_v11 = vshrl.u32 %v3571_v40, 16  ;;  %v196_v12 = vld [vmem:[%s4120_s17 + $0x90] sm:$0xf]  ;;  %v1655_v38 = vshll.u32 %v4736_v24, 16 }
  0xab   : > { %v2107_v15 = vsel %vm2103_vm10, %v2074_v60, %v1843_v0  ;;  %v1145_v60 = vrot.slane %v1143_v13, 1  ;;  %v1148_v0 = vshll.u32 %v4021_v55, 16  ;;  %v1311_v45 = vrot.slane %v4022_v59, 1 }
  0xac   : > { %1456 = vrot.lane.b32.xlu0 %v4590_v49, %s4080_s4  ;;  %3855 = vmatmul.mubr.msk.bf16.vlgmr.msra.gmra.mrb[0].mxu0 %vm2172_vm11, %v2107_v15  ;;  %v4684_v27 = vpop.permute.xlu1 %822  ;;  %v800_v15 = vsel %vm767_vm0, %v798_v62, %v799_v48  ;;  %v4768_v13 = vcombine.low %v196_v12, %v4752_v35  ;;  %v1643_v62 = vshll.u32 %v4748_v33, 16  ;;  %v198_v48 = vld [vmem:[%s4120_s17 + $0x9c] sm:$0xf]  ;;  %v1653_v59 = vshrl.u32 %v4736_v24, 16 }
  0xad   : > { %v1146_v3 = vor.u32 %v1145_v60, %v1141_v11  ;;  %v1150_v25 = vrot.slane %v1148_v0, 1  ;;  %v1657_v6 = vrot.slane %v1655_v38, 1  ;;  %v4788_v11 = vld [vmem:[%s4120_s17 + $0x98] ss:$0 sps:$4 sm:$0x11]  }
  0xae   : > { %v4692_v49 = vpop.permute.xlu0 %820  ;;  %1730 = vrot.lane.b32.xlu1 %v1639_v1, %s4081_s5  ;;  %v1133_v1 = vrot.slane %v1131_v23, 1  ;;  %v1645_v17 = vrot.slane %v1643_v62, 1  ;;  %v640_v12 = vshrl.u32 %v4768_v13, 16 }
  0xaf   : > { %v1151_v54 = vsel %vm494_vm1, %v1146_v3, %v1150_v25  ;;  %v3507_v25 = vld [vmem:[%s4120_s17 + $0x9c] sm:$0xe] }
  0xb0   : > { %1728 = vrot.lane.b32.xlu0 %v1627_v61, %s4081_s5  ;;  %v4704_v14 = vpop.permute.xlu1 %934  ;;  %v3602_v61 = vcombine.low %v3442_v10, %v4697_v19  ;;  %v1134_v30 = vor.u32 %v1133_v1, %v1129_v16  ;;  %v1314_v19 = vrot.slane %v4021_v55, 1  ;;  %v1641_v10 = vshrl.u32 %v4748_v33, 16 }
  0xb2   : > { %v4710_v50 = vpop.permute.xlu0 %932  ;;  %707 = vrot.lane.b32.xlu1 %v626_v31, %s4078_s27  ;;  %v1315_v23 = vsel %vm767_vm0, %v1313_v26, %v1314_v19  ;;  %v4821_v26 = vld [vmem:[%s4120_s17 + $0xa4] ss:$0 sps:$4 sm:$0x11]  }
  0xb4   : > { %1856 = vrot.lane.b32.xlu0 %v1818_v43, %s4082_s6  ;;  %v4717_v57 = vpop.permute.xlu1 %1206  ;;  %v1310_v43 = vrot.slane %v3602_v61, 1  ;;  %v1658_v61 = vor.u32 %v1657_v6, %v1653_v59  ;;  %v1823_v59 = vrot.slane %v4765_v41, 1  ;;  %v3410_v6 = vld [vmem:[%s4120_s17 + $0xa8] sm:$0xf] }
  0xb6   : > { %v1205_v2 = vpop.permute.xlu0 %1204  ;;  %709 = vrot.lane.b32.xlu1 %v638_v51, %s4078_s27  ;;  %v1878_v51 = vsel %vm1872_vm3, %v4210_v20, %v4649_v44  ;;  %v4776_v20 = vld [vmem:[%s4120_s17 + $0xa0] sm:$0xf]  ;;  %v1312_v53 = vsel %vm767_vm0, %v1310_v43, %v1311_v45  ;;  %v3650_v43 = vcombine.low %v3506_v46, %v4740_v4 }
  0xb7   : > { %v4797_v0 = vcombine.low %v198_v48, %v4776_v20 }
  0xb8   : > { %1858 = vrot.lane.b32.xlu0 %v1821_v58, %s4082_s6  ;;  %v4731_v37 = vpop.permute.xlu1 %1334  ;;  %v1139_v58 = vsel %vm494_vm1, %v1134_v30, %v1138_v28  ;;  %v647_v28 = vshll.u32 %v4788_v11, 16 }
  0xba   : > { %v1333_v47 = vpop.permute.xlu0 %1332  ;;  %838 = vrot.lane.b32.xlu1 %v803_v56, %s4077_s22  ;;  %v1660_v56 = vshll.u32 %v4757_v36, 16  ;;  %v649_v62 = vrot.slane %v647_v28, 1  ;;  %v805_v28 = vrot.slane %v4788_v11, 1  ;;  %v3445_v11 = vld [vmem:[%s4120_s17 + $0xa8] sm:$0xe] }
  0xbc   : > { %836 = vrot.lane.b32.xlu0 %v800_v15, %s4077_s22  ;;  %v4745_v5 = vpop.permute.xlu1 %1446  ;;  %v1662_v30 = vrot.slane %v1660_v56, 1  ;;  %v3408_v56 = vld [vmem:[%s4120_s17 + $0x9c] sm:$0xf] }
  0xbe   : > { %v1445_v31 = vpop.permute.xlu0 %1444  ;;  %950 = vrot.lane.b32.xlu1 %v3571_v40, %s4075_s18  ;;  %v1911_v40 = vsel %vm1905_vm4, %v1878_v51, %v4692_v49 }
  0xbf   : > { %v1944_v44 = vsel %vm1938_vm5, %v1911_v40, %v4710_v50  ;;  %v1880_v50 = vsel %vm1872_vm3, %v4223_v34, %v4669_v29  ;;  %v1648_v34 = vshll.u32 %v4765_v41, 16 }
  0xc0   : > { %948 = vrot.lane.b32.xlu0 %v3570_v32, %s4075_s18  ;;  %v1719_v55 = vpop.permute.xlu1 %1718  ;;  %v1977_v49 = vsel %vm1971_vm6, %v1944_v44, %v1205_v2  ;;  %v642_v2 = vshll.u32 %v4768_v13, 16  ;;  %v1913_v15 = vsel %vm1905_vm4, %v1880_v50, %v4684_v27  ;;  %v233_v44 = vld [vmem:[%s4120_s17 + $0x9c] sm:$0xe] }
  0xc1   : > { %v2010_v60 = vsel %vm2004_vm7, %v1977_v49, %v1333_v47  ;;  %v1946_v29 = vsel %vm1938_vm5, %v1913_v15, %v4704_v14  ;;  %v1650_v45 = vrot.slane %v1648_v34, 1  ;;  %v4847_v49 = vld [vmem:[%s4120_s17 + $0xac] sm:$0xf] }
  0xc2   : > { %v1717_v32 = vpop.permute.xlu0 %1716  ;;  %1222 = vrot.lane.b32.xlu1 %v1151_v54, %s4079_s30  ;;  %v2043_v16 = vsel %vm2037_vm8, %v2010_v60, %v1445_v31  ;;  %v1979_v3 = vsel %vm1971_vm6, %v1946_v29, %v4717_v57  ;;  %v644_v31 = vrot.slane %v642_v2, 1  ;;  %v654_v57 = vshll.u32 %v4797_v0, 16 }
  0xc3   : > { %v2076_v47 = vsel %vm2070_vm9, %v2043_v16, %v1717_v32  ;;  %v2012_v14 = vsel %vm2004_vm7, %v1979_v3, %v4731_v37  ;;  %v1646_v37 = vor.u32 %v1645_v17, %v1641_v10  ;;  %v4854_v10 = vld [vmem:[%s4120_s17 + $0xa0] sm:$0xf]  ;;  %v3557_v60 = vcombine.low %v233_v44, %v4776_v20 }
  0xc4   : > { %1220 = vrot.lane.b32.xlu0 %v1139_v58, %s4079_s30  ;;  %v4802_v1 = vpop.permute.xlu1 %695  ;;  %v2045_v19 = vsel %vm2037_vm8, %v2012_v14, %v4745_v5  ;;  %v3651_v58 = vcombine.low %v3507_v25, %v4726_v9  ;;  %v1663_v5 = vsel %vm494_vm1, %v1658_v61, %v1662_v30  ;;  %v645_v4 = vor.u32 %v644_v31, %v640_v12  ;;  %v4881_v14 = vld [vmem:[%s4120_s17 + $0xa4] ss:$0 sps:$4 sm:$0x11]  }
  0xc5   : > { %v2078_v51 = vsel %vm2070_vm9, %v2045_v19, %v1719_v55  ;;  %v652_v55 = vshrl.u32 %v4797_v0, 16  ;;  %v656_v48 = vrot.slane %v654_v57, 1  ;;  %v659_v9 = vshll.u32 %v4821_v26, 16  ;;  %v4886_v19 = vld [vmem:[%s4120_s17 + $0xb8] sm:$0xf] }
  0xc6   : > { %v1845_v18 = vpop.permute.xlu0 %1844  ;;  %1350 = vrot.lane.b32.xlu1 %v1315_v23, %s4076_s21  ;;  %v1822_v23 = vrot.slane %v3650_v43, 1  ;;  %v1825_v50 = vrot.slane %v3651_v58, 1  ;;  %v650_v2 = vsel %vm494_vm1, %v645_v4, %v649_v62  ;;  %v3573_v16 = vcombine.low %v3410_v6, %v4847_v49 }
  0xc7   : > { %v2109_v27 = vsel %vm2103_vm10, %v2076_v47, %v1845_v18  ;;  %v657_v41 = vor.u32 %v656_v48, %v652_v55  ;;  %v661_v15 = vrot.slane %v659_v9, 1  ;;  %v1826_v29 = vrot.slane %v4757_v36, 1  ;;  %v3472_v48 = vld [vmem:[%s4120_s17 + $0xa8] sm:$0xf]  ;;  %v4902_v9 = vld [vmem:[%s4120_s17 + $0xac] sm:$0xf] }
  0xc8   : > { %1348 = vrot.lane.b32.xlu0 %v1312_v53, %s4076_s21  ;;  %3858 = vmatprep.mubr.msk.bf16.mxu0 %vm2172_vm11, %v2109_v27  ;;  %v4826_v38 = vpop.permute.xlu1 %697  ;;  %v232_v53 = vld [vmem:[%s4120_s17 + $0x90] sm:$0xe]  ;;  %v1824_v34 = vsel %vm767_vm0, %v1822_v23, %v1823_v59  ;;  %v3572_v20 = vcombine.low %v3408_v56, %v4854_v10  ;;  %v807_v61 = vrot.slane %v3557_v60, 1  ;;  %v808_v3 = vrot.slane %v4821_v26, 1  ;;  %v3474_v26 = vld [vmem:[%s4120_s17 + $0xb4] sm:$0xf] }
  0xc9   : > { %v3556_v47 = vcombine.low %v232_v53, %v4752_v35  ;;  %v662_v46 = vsel %vm494_vm1, %v657_v41, %v661_v15  ;;  %v4874_v27 = vld [vmem:[%s4120_s17 + $0xb0] ss:$0 sps:$4 sm:$0x11]   ;;  %v1167_v36 = vshll.u32 %v3573_v16, 16  ;;  %v1827_v25 = vsel %vm767_vm0, %v1825_v50, %v1826_v29  ;;  %v200_v60 = vld [vmem:[%s4120_s17 + $0xa8] sm:$0xf] }
  0xca   : > { %v1847_v54 = vpop.permute.xlu0 %1846  ;;  %1462 = vrot.lane.b32.xlu1 %v4736_v24, %s4080_s4  ;;  %v1651_v24 = vsel %vm494_vm1, %v1646_v37, %v1650_v45  ;;  %v1155_v12 = vshll.u32 %v3572_v20, 16  ;;  %v1165_v57 = vshrl.u32 %v3573_v16, 16  ;;  %v809_v43 = vsel %vm767_vm0, %v807_v61, %v808_v3  ;;  %v4918_v15 = vld [vmem:[%s4120_s17 + $0xbc] ss:$0 sps:$4 sm:$0x11]  }
  0xcb   : > { %v2111_v40 = vsel %vm2103_vm10, %v2078_v51, %v1847_v54  ;;  %v804_v30 = vrot.slane %v3556_v47, 1  ;;  %v1169_v37 = vrot.slane %v1167_v36, 1  ;;  %v1172_v45 = vshll.u32 %v4874_v27, 16  ;;  %v3444_v51 = vld [vmem:[%s4120_s17 + $0x9c] sm:$0xe] }
  0xcc   : > { %1460 = vrot.lane.b32.xlu0 %v4748_v33, %s4080_s4  ;;  %3859 = vmatmul.mubr.msk.bf16.gmra.mrb[4].mxu0 %vm2172_vm11, %v2111_v40  ;;  %v4841_v32 = vpop.permute.xlu1 %826  ;;  %v1153_v58 = vshrl.u32 %v3572_v20, 16  ;;  %v1160_v62 = vshll.u32 %v4881_v14, 16  ;;  %v4898_v55 = vcombine.low %v3474_v26, %v4886_v19  ;;  %v3605_v44 = vcombine.low %v3445_v11, %v4847_v49  ;;  %v4930_v3 = vld [vmem:[%s4120_s17 + $0xb0] ss:$0 sps:$4 sm:$0x11]  }
  0xcd   : > { %v806_v40 = vsel %vm767_vm0, %v804_v30, %v805_v28  ;;  %v1170_v23 = vor.u32 %v1169_v37, %v1165_v57  ;;  %v1174_v59 = vrot.slane %v1172_v45, 1  ;;  %v4911_v50 = vcombine.low %v3472_v48, %v4902_v9  ;;  %v202_v28 = vld [vmem:[%s4120_s17 + $0xb4] sm:$0xf]  ;;  %v4953_v45 = vld [vmem:[%s4120_s17 + $0xb0] ss:$0 sps:$4 sm:$0x11]  }
  0xce   : > { %v4849_v33 = vpop.permute.xlu0 %824  ;;  %1734 = vrot.lane.b32.xlu1 %v1663_v5, %s4081_s5  ;;  %v1157_v5 = vrot.slane %v1155_v12, 1  ;;  %v1162_v56 = vrot.slane %v1160_v62, 1  ;;  %v1679_v49 = vshll.u32 %v4898_v55, 16  ;;  %v1317_v47 = vrot.slane %v4881_v14, 1 }
  0xcf   : > { %v1175_v61 = vsel %vm494_vm1, %v1170_v23, %v1174_v59  ;;  %v1667_v30 = vshll.u32 %v4911_v50, 16  ;;  %v1677_v14 = vshrl.u32 %v4898_v55, 16  ;;  %v1684_v57 = vshll.u32 %v4918_v15, 16 }
  0xd0   : > { %1732 = vrot.lane.b32.xlu0 %v1651_v24, %s4081_s5  ;;  %v4861_v17 = vpop.permute.xlu1 %938  ;;  %v3604_v24 = vcombine.low %v3444_v51, %v4854_v10  ;;  %v1158_v53 = vor.u32 %v1157_v5, %v1153_v58  ;;  %v1319_v10 = vrot.slane %v3605_v44, 1  ;;  %v1681_v12 = vrot.slane %v1679_v49, 1  ;;  %v3508_v51 = vld [vmem:[%s4120_s17 + $0xa8] sm:$0xe] }
  0xd1   : > { %v1665_v37 = vshrl.u32 %v4911_v50, 16  ;;  %v1669_v48 = vrot.slane %v1667_v30, 1  ;;  %v1686_v23 = vrot.slane %v1684_v57, 1  ;;  %v1829_v30 = vrot.slane %v4930_v3, 1 }
  0xd2   : > { %v4867_v18 = vpop.permute.xlu0 %936  ;;  %711 = vrot.lane.b32.xlu1 %v650_v2, %s4078_s27  ;;  %v4915_v2 = vld [vmem:[%s4120_s17 + $0xac] sm:$0xf]  ;;  %v1316_v29 = vrot.slane %v3604_v24, 1  ;;  %v1682_v24 = vor.u32 %v1681_v12, %v1677_v14  ;;  %v235_v14 = vld [vmem:[%s4120_s17 + $0xb4] sm:$0xe] }
  0xd3   : > { %v4933_v36 = vcombine.low %v200_v60, %v4915_v2 }
  0xd4   : > { %1860 = vrot.lane.b32.xlu0 %v1824_v34, %s4082_s6  ;;  %v4876_v35 = vpop.permute.xlu1 %1210  ;;  %v1320_v34 = vrot.slane %v4874_v27, 1 }
  0xd5   : > { %v664_v60 = vshrl.u32 %v4933_v36, 16 }
  0xd6   : > { %v1209_v31 = vpop.permute.xlu0 %1208  ;;  %713 = vrot.lane.b32.xlu1 %v662_v46, %s4078_s27  ;;  %v1882_v46 = vsel %vm1872_vm3, %v4287_v52, %v4802_v1  ;;  %v4941_v52 = vld [vmem:[%s4120_s17 + $0xb8] sm:$0xf]  ;;  %v1321_v26 = vsel %vm767_vm0, %v1319_v10, %v1320_v34 }
  0xd8   : > { %1862 = vrot.lane.b32.xlu0 %v1827_v25, %s4082_s6  ;;  %v4893_v54 = vpop.permute.xlu1 %1338  ;;  %v1163_v25 = vsel %vm494_vm1, %v1158_v53, %v1162_v56  ;;  %v671_v53 = vshll.u32 %v4953_v45, 16  ;;  %v3652_v56 = vcombine.low %v3508_v51, %v4902_v9  ;;  %v1670_v9 = vor.u32 %v1669_v48, %v1665_v37  ;;  %v5019_v37 = vld [vmem:[%s4120_s17 + $0xb8] sm:$0xf] }
  0xda   : > { %v1337_v4 = vpop.permute.xlu0 %1336  ;;  %842 = vrot.lane.b32.xlu1 %v809_v43, %s4077_s22  ;;  %v1318_v43 = vsel %vm767_vm0, %v1316_v29, %v1317_v47 }
  0xdc   : > { %840 = vrot.lane.b32.xlu0 %v806_v40, %s4077_s22  ;;  %v4908_v6 = vpop.permute.xlu1 %1450  ;;  %v4963_v40 = vcombine.low %v202_v28, %v4941_v52 }
  0xde   : > { %v1449_v41 = vpop.permute.xlu0 %1448  ;;  %954 = vrot.lane.b32.xlu1 %v3573_v16, %s4075_s18  ;;  %v1915_v16 = vsel %vm1905_vm4, %v1882_v46, %v4849_v33  ;;  %v678_v49 = vshll.u32 %v4963_v40, 16  ;;  %v1687_v46 = vsel %vm494_vm1, %v1682_v24, %v1686_v23  ;;  %v676_v28 = vshrl.u32 %v4963_v40, 16 }
  0xdf   : > { %v1948_v1 = vsel %vm1938_vm5, %v1915_v16, %v4867_v18  ;;  %v1884_v18 = vsel %vm1872_vm3, %v4301_v63, %v4826_v38  ;;  %v1672_v63 = vshll.u32 %v4930_v3, 16  ;;  %v3414_v3 = vld [vmem:[%s4120_s17 + $0xc0] sm:$0xf] }
  0xe0   : > { %952 = vrot.lane.b32.xlu0 %v3572_v20, %s4075_s18  ;;  %v1723_v27 = vpop.permute.xlu1 %1722  ;;  %v1981_v33 = vsel %vm1971_vm6, %v1948_v1, %v1209_v31  ;;  %v666_v31 = vshll.u32 %v4933_v36, 16  ;;  %v1917_v58 = vsel %vm1905_vm4, %v1884_v18, %v4841_v32  ;;  %v680_v1 = vrot.slane %v678_v49, 1 }
  0xe1   : > { %v2014_v11 = vsel %vm2004_vm7, %v1981_v33, %v1337_v4  ;;  %v1950_v38 = vsel %vm1938_vm5, %v1917_v58, %v4861_v17  ;;  %v1674_v29 = vrot.slane %v1672_v63, 1  ;;  %v5012_v33 = vld [vmem:[%s4120_s17 + $0xc4] sm:$0xf]  ;;  %v1832_v63 = vrot.slane %v4918_v15, 1 }
  0xe2   : > { %v1721_v20 = vpop.permute.xlu0 %1720  ;;  %1226 = vrot.lane.b32.xlu1 %v1175_v61, %s4079_s30  ;;  %v2047_v5 = vsel %vm2037_vm8, %v2014_v11, %v1449_v41  ;;  %v1983_v59 = vsel %vm1971_vm6, %v1950_v38, %v4876_v35  ;;  %v668_v41 = vrot.slane %v666_v31, 1  ;;  %v4986_v35 = vld [vmem:[%s4120_s17 + $0xbc] ss:$0 sps:$4 sm:$0x11]   ;;  %v3509_v61 = vld [vmem:[%s4120_s17 + $0xb4] sm:$0xe]  ;;  %v3559_v11 = vcombine.low %v235_v14, %v4941_v52 }
  0xe3   : > { %v2080_v4 = vsel %vm2070_vm9, %v2047_v5, %v1721_v20  ;;  %v2016_v17 = vsel %vm2004_vm7, %v1983_v59, %v4893_v54  ;;  %v683_v20 = vshll.u32 %v4986_v35, 16  ;;  %v1675_v12 = vsel %vm494_vm1, %v1670_v9, %v1674_v29  ;;  %v4055_v52 = vld [vmem:[%s4120_s17 + $0xc8] ss:$0 sps:$4 sm:$0x11]  }
  0xe4   : > { %1224 = vrot.lane.b32.xlu0 %v1163_v25, %s4079_s30  ;;  %v4968_v62 = vpop.permute.xlu1 %699  ;;  %v2049_v10 = vsel %vm2037_vm8, %v2016_v17, %v4908_v6  ;;  %v673_v25 = vrot.slane %v671_v53, 1  ;;  %v1828_v6 = vrot.slane %v3652_v56, 1  ;;  %v3653_v57 = vcombine.low %v3509_v61, %v4886_v19  ;;  %v4056_v17 = vld [vmem:[%s4120_s17 + $0xbc] ss:$0 sps:$4 sm:$0x11]  }
  0xe5   : > { %v2082_v54 = vsel %vm2070_vm9, %v2049_v10, %v1723_v27  ;;  %v669_v27 = vor.u32 %v668_v41, %v664_v60  ;;  %v681_v31 = vor.u32 %v680_v1, %v676_v28  ;;  %v685_v51 = vrot.slane %v683_v20, 1  ;;  %v3447_v10 = vld [vmem:[%s4120_s17 + $0xc0] sm:$0xe]  ;;  %v5057_v1 = vld [vmem:[%s4120_s17 + $0xc4] sm:$0xf] }
  0xe6   : > { %v1849_v44 = vpop.permute.xlu0 %1848  ;;  %1354 = vrot.lane.b32.xlu1 %v1321_v26, %s4076_s21  ;;  %v1830_v18 = vsel %vm767_vm0, %v1828_v6, %v1829_v30  ;;  %v3575_v58 = vcombine.low %v3414_v3, %v5012_v33  ;;  %v1831_v48 = vrot.slane %v3653_v57, 1  ;;  %v813_v23 = vrot.slane %v3559_v11, 1  ;;  %v5052_v6 = vld [vmem:[%s4120_s17 + $0xd0] sm:$0xf]  ;;  %v3476_v28 = vld [vmem:[%s4120_s17 + $0xc0] sm:$0xf] }
  0xe7   : > { %v2113_v32 = vsel %vm2103_vm10, %v2080_v4, %v1849_v44  ;;  %v674_v19 = vsel %vm494_vm1, %v669_v27, %v673_v25  ;;  %v686_v24 = vsel %vm494_vm1, %v681_v31, %v685_v51  ;;  %v814_v59 = vrot.slane %v4986_v35, 1  ;;  %v5065_v31 = vld [vmem:[%s4120_s17 + $0xd4] ss:$0 sps:$4 sm:$0x11]  }
  0xe8   : > { %1352 = vrot.lane.b32.xlu0 %v1318_v43, %s4076_s21  ;;  %3862 = vmatprep.mubr.msk.bf16.mxu0 %vm2172_vm11, %v2113_v32  ;;  %v4991_v34 = vpop.permute.xlu1 %701  ;;  %v3412_v43 = vld [vmem:[%s4120_s17 + $0xb4] sm:$0xf]  ;;  %v1191_v32 = vshll.u32 %v3575_v58, 16  ;;  %v811_v56 = vrot.slane %v4953_v45, 1  ;;  %v1196_v49 = vshll.u32 %v4055_v52, 16  ;;  %v1189_v9 = vshrl.u32 %v3575_v58, 16 }
  0xe9   : > { %v3574_v4 = vcombine.low %v3412_v43, %v5019_v37  ;;  %v815_v35 = vsel %vm767_vm0, %v813_v23, %v814_v59  ;;  %v1184_v25 = vshll.u32 %v4056_v17, 16  ;;  %v3607_v27 = vcombine.low %v3447_v10, %v5012_v33 }
  0xea   : > { %v1851_v47 = vpop.permute.xlu0 %1850  ;;  %1466 = vrot.lane.b32.xlu1 %v4898_v55, %s4080_s4  ;;  %v1193_v29 = vrot.slane %v1191_v32, 1  ;;  %v3622_v33 = vcombine.low %v3476_v28, %v5057_v1  ;;  %v1323_v51 = vrot.slane %v4056_v17, 1 }
  0xeb   : > { %v2115_v16 = vsel %vm2103_vm10, %v2082_v54, %v1851_v47  ;;  %v1179_v60 = vshll.u32 %v3574_v4, 16  ;;  %v3446_v54 = vld [vmem:[%s4120_s17 + $0xb4] sm:$0xe]  ;;  %v3478_v47 = vld [vmem:[%s4120_s17 + $0xcc] sm:$0xf]  ;;  %v1177_v61 = vshrl.u32 %v3574_v4, 16 }
  0xec   : > { %1464 = vrot.lane.b32.xlu0 %v4911_v50, %s4080_s4  ;;  %3863 = vmatmul.mubr.msk.bf16.gmra.mrb[8].mxu0 %vm2172_vm11, %v2115_v16  ;;  %v5006_v55 = vpop.permute.xlu1 %830  ;;  %v234_v50 = vld [vmem:[%s4120_s17 + $0xa8] sm:$0xe]  ;;  %v3606_v20 = vcombine.low %v3446_v54, %v5019_v37  ;;  %v1194_v14 = vor.u32 %v1193_v29, %v1189_v9  ;;  %v3623_v57 = vcombine.low %v3478_v47, %v5052_v6  ;;  %v1186_v43 = vrot.slane %v1184_v25, 1  ;;  %v3511_v29 = vld [vmem:[%s4120_s17 + $0xcc] sm:$0xe] }
  0xed   : > { %v3558_v38 = vcombine.low %v234_v50, %v4915_v2  ;;  %v1833_v2 = vsel %vm767_vm0, %v1831_v48, %v1832_v63  ;;  %v1181_v16 = vrot.slane %v1179_v60, 1  ;;  %v1325_v11 = vrot.slane %v3607_v27, 1  ;;  %v5069_v48 = vld [vmem:[%s4120_s17 + $0xc8] ss:$0 sps:$4 sm:$0x11]  }
  0xee   : > { %v5014_v26 = vpop.permute.xlu0 %828  ;;  %1738 = vrot.lane.b32.xlu1 %v1687_v46, %s4081_s5  ;;  %v1322_v37 = vrot.slane %v3606_v20, 1  ;;  %v1886_v63 = vsel %vm1872_vm3, %v4363_v22, %v4968_v62  ;;  %v1701_v17 = vshrl.u32 %v3623_v57, 16  ;;  %v3510_v47 = vld [vmem:[%s4120_s17 + $0xc0] sm:$0xe]  ;;  %v3655_v25 = vcombine.low %v3511_v29, %v5052_v6 }
  0xef   : > { %v810_v53 = vrot.slane %v3558_v38, 1  ;;  %v1182_v50 = vor.u32 %v1181_v16, %v1177_v61  ;;  %v3654_v20 = vcombine.low %v3510_v47, %v5057_v1 }
  0xf0   : > { %1736 = vrot.lane.b32.xlu0 %v1675_v12, %s4081_s5  ;;  %v5027_v5 = vpop.permute.xlu1 %942  ;;  %v1198_v12 = vrot.slane %v1196_v49, 1  ;;  %v1324_v62 = vsel %vm767_vm0, %v1322_v37, %v1323_v51 }
  0xf1   : > { %v812_v45 = vsel %vm767_vm0, %v810_v53, %v811_v56  ;;  %v1187_v59 = vsel %vm494_vm1, %v1182_v50, %v1186_v43  ;;  %v1888_v56 = vsel %vm1872_vm3, %v4384_v39, %v4991_v34  ;;  %v1837_v50 = vrot.slane %v3655_v25, 1 }
  0xf2   : > { %v941_v44 = vpop.permute.xlu0 %940  ;;  %715 = vrot.lane.b32.xlu1 %v674_v19, %s4078_s27  ;;  %v1326_v19 = vrot.slane %v4055_v52, 1  ;;  %v1199_v38 = vsel %vm494_vm1, %v1194_v14, %v1198_v12  ;;  %v1919_v52 = vsel %vm1905_vm4, %v1886_v63, %v5014_v26  ;;  %v1696_v26 = vshll.u32 %v5069_v48, 16 }
  0xf3   : > { %v1952_v32 = vsel %vm1938_vm5, %v1919_v52, %v941_v44  ;;  %v1834_v1 = vrot.slane %v3654_v20, 1 }
  0xf4   : > { %1864 = vrot.lane.b32.xlu0 %v1830_v18, %s4082_s6  ;;  %v5037_v15 = vpop.permute.xlu1 %1214  ;;  %v1327_v53 = vsel %vm767_vm0, %v1325_v11, %v1326_v19  ;;  %v1835_v11 = vrot.slane %v5069_v48, 1 }
  0xf6   : > { %v1213_v41 = vpop.permute.xlu0 %1212  ;;  %717 = vrot.lane.b32.xlu1 %v686_v24, %s4078_s27  ;;  %v1703_v24 = vshll.u32 %v3623_v57, 16  ;;  %v1836_v37 = vsel %vm767_vm0, %v1834_v1, %v1835_v11 }
  0xf7   : > { %v1985_v22 = vsel %vm1971_vm6, %v1952_v32, %v1213_v41  ;;  %v1921_v41 = vsel %vm1905_vm4, %v1888_v56, %v5006_v55 }
  0xf8   : > { %1866 = vrot.lane.b32.xlu0 %v1833_v2, %s4082_s6  ;;  %v5048_v46 = vpop.permute.xlu1 %1342  ;;  %v1705_v60 = vrot.slane %v1703_v24, 1  ;;  %v1954_v54 = vsel %vm1938_vm5, %v1921_v41, %v5027_v5 }
  0xfa   : > { %v1341_v30 = vpop.permute.xlu0 %1340  ;;  %846 = vrot.lane.b32.xlu1 %v815_v35, %s4077_s22  ;;  %v1689_v35 = vshrl.u32 %v3622_v33, 16  ;;  %v1706_v16 = vor.u32 %v1705_v60, %v1701_v17 }
  0xfb   : > { %v2018_v44 = vsel %vm2004_vm7, %v1985_v22, %v1341_v30 }
  0xfc   : > { %844 = vrot.lane.b32.xlu0 %v812_v45, %s4077_s22  ;;  %v1455_v3 = vpop.permute.xlu1 %1454  ;;  %v1987_v45 = vsel %vm1971_vm6, %v1954_v54, %v5037_v15  ;;  %v1698_v15 = vrot.slane %v1696_v26, 1 }
  0xfd   : > { %v2020_v55 = vsel %vm2004_vm7, %v1987_v45, %v5048_v46 }
  0xfe   : > { %v1453_v18 = vpop.permute.xlu0 %1452  ;;  %958 = vrot.lane.b32.xlu1 %v3575_v58, %s4075_s18  ;;  %v1691_v58 = vshll.u32 %v3622_v33, 16  ;;  %v2053_v30 = vsel %vm2037_vm8, %v2020_v55, %v1455_v3  ;;  %v1838_v3 = vrot.slane %v5065_v31, 1 }
  0xff   : > { %v2051_v49 = vsel %vm2037_vm8, %v2018_v44, %v1453_v18 }
 0x100   : > { %956 = vrot.lane.b32.xlu0 %v3574_v4, %s4075_s18  ;;  %v1727_v23 = vpop.permute.xlu1 %1726  ;;  %v1708_v4 = vshll.u32 %v5065_v31, 16  ;;  %v1693_v9 = vrot.slane %v1691_v58, 1 }
 0x101   : > { %v2086_v14 = vsel %vm2070_vm9, %v2053_v30, %v1727_v23 }
 0x102   : > { %v1725_v2 = vpop.permute.xlu0 %1724  ;;  %1230 = vrot.lane.b32.xlu1 %v1199_v38, %s4079_s30  ;;  %v1710_v5 = vrot.slane %v1708_v4, 1  ;;  %v1694_v28 = vor.u32 %v1693_v9, %v1689_v35 }
 0x103   : > { %v2084_v39 = vsel %vm2070_vm9, %v2051_v49, %v1725_v2 }
 0x104   : > { %1228 = vrot.lane.b32.xlu0 %v1187_v59, %s4079_s30  ;;  %v704_v10 = vpop.permute.xlu1 %703  ;;  %v1711_v6 = vsel %vm494_vm1, %v1706_v16, %v1710_v5  ;;  %v1699_v18 = vsel %vm494_vm1, %v1694_v28, %v1698_v15 }
 0x105   : > { %v1890_v23 = vsel %vm1872_vm3, %v4470_v8, %v704_v10 }
 0x106   : > { %v1853_v34 = vpop.permute.xlu0 %1852  ;;  %1358 = vrot.lane.b32.xlu1 %v1327_v53, %s4076_s21 }
 0x107   : > { %v2117_v61 = vsel %vm2103_vm10, %v2084_v39, %v1853_v34 }
 0x108   : > { %1356 = vrot.lane.b32.xlu0 %v1324_v62, %s4076_s21  ;;  %3866 = vmatprep.mubr.msk.bf16.mxu0 %vm2172_vm11, %v2117_v61  ;;  %v706_v27 = vpop.permute.xlu1 %705 }
 0x109   : > { %v1892_v22 = vsel %vm1872_vm3, %v4486_v21, %v706_v27 }
 0x10a   : > { %v1855_v12 = vpop.permute.xlu0 %1854  ;;  %1470 = vrot.lane.b32.xlu1 %v3623_v57, %s4080_s4  ;;  %v1839_v57 = vsel %vm767_vm0, %v1837_v50, %v1838_v3 }
 0x10b   : > { %v2119_v46 = vsel %vm2103_vm10, %v2086_v14, %v1855_v12 }
 0x10c   : > { %1468 = vrot.lane.b32.xlu0 %v3622_v33, %s4080_s4  ;;  %3867 = vmatmul.mubr.msk.bf16.gmra.mrb[12].mxu0 %vm2172_vm11, %v2119_v46  ;;  %v835_v43 = vpop.permute.xlu1 %834 }
 0x10d   : > { %v1925_v4 = vsel %vm1905_vm4, %v1892_v22, %v835_v43 }
 0x10e   : > { %v833_v19 = vpop.permute.xlu0 %832  ;;  %1742 = vrot.lane.b32.xlu1 %v1711_v6, %s4081_s5 }
 0x10f   : > { %v1923_v59 = vsel %vm1905_vm4, %v1890_v23, %v833_v19 }
 0x110   : > { %1740 = vrot.lane.b32.xlu0 %v1699_v18, %s4081_s5  ;;  %v947_v33 = vpop.permute.xlu1 %946 }
 0x111   : > { %v1958_v8 = vsel %vm1938_vm5, %v1925_v4, %v947_v33 }
 0x112   : > { %v945_v51 = vpop.permute.xlu0 %944  ;;  %1870 = vrot.lane.b32.xlu1 %v1839_v57, %s4082_s6 }
 0x113   : > { %v1956_v32 = vsel %vm1938_vm5, %v1923_v59, %v945_v51 }
 0x114   : > { %1868 = vrot.lane.b32.xlu0 %v1836_v37, %s4082_s6  ;;  %v1219_v31 = vpop.permute.xlu1 %1218 }
 0x115   : > { %v1991_v60 = vsel %vm1971_vm6, %v1958_v8, %v1219_v31 }
 0x116   : > { %v1217_v63 = vpop.permute.xlu0 %1216 }
 0x117   : > { %v1989_v53 = vsel %vm1971_vm6, %v1956_v32, %v1217_v63 }
 0x118   : > { %v1347_v38 = vpop.permute.xlu1 %1346 }
 0x119   : > { %v2024_v49 = vsel %vm2004_vm7, %v1991_v60, %v1347_v38 }
 0x11a   : > { %v1345_v24 = vpop.permute.xlu0 %1344 }
 0x11b   : > { %v2022_v62 = vsel %vm2004_vm7, %v1989_v53, %v1345_v24 }
 0x11c   : > { %v1459_v48 = vpop.permute.xlu1 %1458 }
 0x11d   : > { %v2057_v21 = vsel %vm2037_vm8, %v2024_v49, %v1459_v48 }
 0x11e   : > { %v1457_v52 = vpop.permute.xlu0 %1456 }
 0x11f   : > { %v2055_v26 = vsel %vm2037_vm8, %v2022_v62, %v1457_v52 }
 0x120   : > { %v1731_v58 = vpop.permute.xlu1 %1730 }
 0x121   : > { %v2090_v35 = vsel %vm2070_vm9, %v2057_v21, %v1731_v58 }
 0x122   : > { %v1729_v2 = vpop.permute.xlu0 %1728 }
 0x123   : > { %v2088_v44 = vsel %vm2070_vm9, %v2055_v26, %v1729_v2 }
 0x124   : > { %v708_v56 = vpop.permute.xlu1 %707 }
 0x125   : > { %v1894_v30 = vsel %vm1872_vm3, %v4620_v7, %v708_v56 }
 0x126   : > { %v1857_v17 = vpop.permute.xlu0 %1856 }
 0x127   : > { %v2121_v41 = vsel %vm2103_vm10, %v2088_v44, %v1857_v17 }
 0x128   : > { %3870 = vmatprep.mubr.msk.bf16.mxu1 %vm2172_vm11, %v2121_v41  ;;  %v710_v10 = vpop.permute.xlu1 %709 }
 0x129   : > { %v1896_v12 = vsel %vm1872_vm3, %v4644_v42, %v710_v10 }
 0x12a   : > { %v1859_v9 = vpop.permute.xlu0 %1858 }
 0x12b   : > { %v2123_v29 = vsel %vm2103_vm10, %v2090_v35, %v1859_v9 }
 0x12c   : > { %3871 = vmatmul.mubr.msk.bf16.vlgmr.msra.gmra.mrb[0].mxu1 %vm2172_vm11, %v2123_v29  ;;  %v839_v54 = vpop.permute.xlu1 %838 }
 0x12d   : > { %v1929_v6 = vsel %vm1905_vm4, %v1896_v12, %v839_v54 }
 0x12e   : > { %v837_v39 = vpop.permute.xlu0 %836 }
 0x12f   : > { %v1927_v27 = vsel %vm1905_vm4, %v1894_v30, %v837_v39 }
 0x130   : > { %v951_v34 = vpop.permute.xlu1 %950 }
 0x131   : > { %v1962_v7 = vsel %vm1938_vm5, %v1929_v6, %v951_v34 }
 0x132   : > { %v949_v47 = vpop.permute.xlu0 %948 }
 0x133   : > { %v1960_v15 = vsel %vm1938_vm5, %v1927_v27, %v949_v47 }
 0x134   : > { %v1223_v45 = vpop.permute.xlu1 %1222 }
 0x135   : > { %v1995_v1 = vsel %vm1971_vm6, %v1962_v7, %v1223_v45 }
 0x136   : > { %v1221_v61 = vpop.permute.xlu0 %1220 }
 0x137   : > { %v1993_v14 = vsel %vm1971_vm6, %v1960_v15, %v1221_v61 }
 0x138   : > { %v1351_v55 = vpop.permute.xlu1 %1350 }
 0x139   : > { %v2028_v19 = vsel %vm2004_vm7, %v1995_v1, %v1351_v55 }
 0x13a   : > { %v1349_v16 = vpop.permute.xlu0 %1348 }
 0x13b   : > { %v2026_v46 = vsel %vm2004_vm7, %v1993_v14, %v1349_v16 }
 0x13c   : > { %v1463_v5 = vpop.permute.xlu1 %1462 }
 0x13d   : > { %v2061_v42 = vsel %vm2037_vm8, %v2028_v19, %v1463_v5 }
 0x13e   : > { %v1461_v25 = vpop.permute.xlu0 %1460 }
 0x13f   : > { %v2059_v50 = vsel %vm2037_vm8, %v2026_v46, %v1461_v25 }
 0x140   : > { %v1735_v28 = vpop.permute.xlu1 %1734 }
 0x141   : > { %v2094_v33 = vsel %vm2070_vm9, %v2061_v42, %v1735_v28 }
 0x142   : > { %v1733_v20 = vpop.permute.xlu0 %1732 }
 0x143   : > { %v2092_v43 = vsel %vm2070_vm9, %v2059_v50, %v1733_v20 }
 0x144   : > { %v712_v3 = vpop.permute.xlu1 %711 }
 0x145   : > { %v1898_v2 = vsel %vm1872_vm3, %v4768_v13, %v712_v3 }
 0x146   : > { %v1861_v18 = vpop.permute.xlu0 %1860 }
 0x147   : > { %v2125_v11 = vsel %vm2103_vm10, %v2092_v43, %v1861_v18 }
 0x148   : > { %3874 = vmatprep.mubr.msk.bf16.mxu1 %vm2172_vm11, %v2125_v11  ;;  %v714_v57 = vpop.permute.xlu1 %713 }
 0x149   : > { %v1900_v56 = vsel %vm1872_vm3, %v4797_v0, %v714_v57 }
 0x14a   : > { %v1863_v37 = vpop.permute.xlu0 %1862 }
 0x14b   : > { %v2127_v51 = vsel %vm2103_vm10, %v2094_v33, %v1863_v37 }
 0x14c   : > { %3875 = vmatmul.mubr.msk.bf16.gmra.mrb[4].mxu1 %vm2172_vm11, %v2127_v51  ;;  %v843_v31 = vpop.permute.xlu1 %842 }
 0x14d   : > { %v1933_v44 = vsel %vm1905_vm4, %v1900_v56, %v843_v31 }
 0x14e   : > { %v841_v63 = vpop.permute.xlu0 %840 }
 0x14f   : > { %v1931_v53 = vsel %vm1905_vm4, %v1898_v2, %v841_v63 }
 0x150   : > { %v955_v38 = vpop.permute.xlu1 %954 }
 0x151   : > { %v1966_v13 = vsel %vm1938_vm5, %v1933_v44, %v955_v38 }
 0x152   : > { %v953_v24 = vpop.permute.xlu0 %952 }
 0x153   : > { %v1964_v62 = vsel %vm1938_vm5, %v1931_v53, %v953_v24 }
 0x154   : > { %v1227_v48 = vpop.permute.xlu1 %1226 }
 0x155   : > { %v1999_v21 = vsel %vm1971_vm6, %v1966_v13, %v1227_v48 }
 0x156   : > { %v1225_v52 = vpop.permute.xlu0 %1224 }
 0x157   : > { %v1997_v26 = vsel %vm1971_vm6, %v1964_v62, %v1225_v52 }
 0x158   : > { %v1355_v23 = vpop.permute.xlu1 %1354 }
 0x159   : > { %v2032_v35 = vsel %vm2004_vm7, %v1999_v21, %v1355_v23 }
 0x15a   : > { %v1353_v59 = vpop.permute.xlu0 %1352 }
 0x15b   : > { %v2030_v8 = vsel %vm2004_vm7, %v1997_v26, %v1353_v59 }
 0x15c   : > { %v1467_v58 = vpop.permute.xlu1 %1466 }
 0x15d   : > { %v2065_v0 = vsel %vm2037_vm8, %v2032_v35, %v1467_v58 }
 0x15e   : > { %v1465_v32 = vpop.permute.xlu0 %1464 }
 0x15f   : > { %v2063_v17 = vsel %vm2037_vm8, %v2030_v8, %v1465_v32 }
 0x160   : > { %v1739_v22 = vpop.permute.xlu1 %1738 }
 0x161   : > { %v2098_v29 = vsel %vm2070_vm9, %v2065_v0, %v1739_v22 }
 0x162   : > { %v1737_v4 = vpop.permute.xlu0 %1736 }
 0x163   : > { %v2096_v41 = vsel %vm2070_vm9, %v2063_v17, %v1737_v4 }
 0x164   : > { %v716_v60 = vpop.permute.xlu1 %715 }
 0x165   : > { %v1902_v15 = vsel %vm1872_vm3, %v4933_v36, %v716_v60 }
 0x166   : > { %v1865_v49 = vpop.permute.xlu0 %1864 }
 0x167   : > { %v2129_v10 = vsel %vm2103_vm10, %v2096_v41, %v1865_v49 }
 0x168   : > { %3878 = vmatprep.mubr.msk.bf16.mxu1 %vm2172_vm11, %v2129_v10  ;;  %v718_v9 = vpop.permute.xlu1 %717 }
 0x169   : > { %v1904_v27 = vsel %vm1872_vm3, %v4963_v40, %v718_v9 }
 0x16a   : > { %v1867_v54 = vpop.permute.xlu0 %1866 }
 0x16b   : > { %v2131_v39 = vsel %vm2103_vm10, %v2098_v29, %v1867_v54 }
 0x16c   : > { %3879 = vmatmul.mubr.msk.bf16.gmra.mrb[8].mxu1 %vm2172_vm11, %v2131_v39  ;;  %v847_v34 = vpop.permute.xlu1 %846 }
 0x16d   : > { %v1937_v20 = vsel %vm1905_vm4, %v1904_v27, %v847_v34 }
 0x16e   : > { %v845_v47 = vpop.permute.xlu0 %844 }
 0x16f   : > { %v1935_v12 = vsel %vm1905_vm4, %v1902_v15, %v845_v47 }
 0x170   : > { %v959_v45 = vpop.permute.xlu1 %958 }
 0x171   : > { %v1970_v46 = vsel %vm1938_vm5, %v1937_v20, %v959_v45 }
 0x172   : > { %v957_v61 = vpop.permute.xlu0 %956 }
 0x173   : > { %v1968_v50 = vsel %vm1938_vm5, %v1935_v12, %v957_v61 }
 0x174   : > { %v1231_v55 = vpop.permute.xlu1 %1230 }
 0x175   : > { %v2003_v3 = vsel %vm1971_vm6, %v1970_v46, %v1231_v55 }
 0x176   : > { %v1229_v16 = vpop.permute.xlu0 %1228 }
 0x177   : > { %v2001_v43 = vsel %vm1971_vm6, %v1968_v50, %v1229_v16 }
 0x178   : > { %v1359_v5 = vpop.permute.xlu1 %1358 }
 0x179   : > { %v2036_v36 = vsel %vm2004_vm7, %v2003_v3, %v1359_v5 }
 0x17a   : > { %v1357_v25 = vpop.permute.xlu0 %1356 }
 0x17b   : > { %v2034_v11 = vsel %vm2004_vm7, %v2001_v43, %v1357_v25 }
 0x17c   : > { %v1471_v30 = vpop.permute.xlu1 %1470 }
 0x17d   : > { %v2069_v33 = vsel %vm2037_vm8, %v2036_v36, %v1471_v30 }
 0x17e   : > { %v1469_v28 = vpop.permute.xlu0 %1468 }
 0x17f   : > { %v5190_v14 = vpop.f32.mrb[0].mxu0  ;;  %v2067_v37 = vsel %vm2037_vm8, %v2034_v11, %v1469_v28 }
 0x180   : > { %v5194_v6 = vpop.f32.mrb[1].mxu0  ;;  %v1743_v40 = vpop.permute.xlu1 %1742  ;;  %v2453_v51 = vmul.f32 %v5190_v14, %v5190_v14 }
 0x181   : > { %v5198_v7 = vpop.f32.mrb[2].mxu0  ;;  %v2451_v19 = vmul.f32 %v5194_v6, %v5194_v6  ;;  %v2102_v31 = vsel %vm2070_vm9, %v2069_v33, %v1743_v40 }
 0x182   : > { %v5202_v18 = vpop.f32.mrb[3].mxu0  ;;  %v1741_v1 = vpop.permute.xlu0 %1740  ;;  %v2454_v59 = vmul.f32 %v5198_v7, %v5198_v7 }
 0x183   : > { %v2413_v42 = vadd.f32 %v5202_v18, %v5194_v6  ;;  %v2452_v57 = vmul.f32 %v5202_v18, %v5202_v18  ;;  %v2100_v48 = vsel %vm2070_vm9, %v2067_v37, %v1741_v1 }
 0x184   : > { %v1871_v24 = vpop.permute.xlu1 %1870 }
 0x185   : > { %v2414_v63 = vadd.f32 %v5190_v14, %v2413_v42  ;;  %v2483_v38 = vadd.f32 %v2452_v57, %v2451_v19  ;;  %v2135_v52 = vsel %vm2103_vm10, %v2102_v31, %v1871_v24 }
 0x186   : > { %v1869_v23 = vpop.permute.xlu0 %1868 }
 0x187   : > { %v2484_v58 = vadd.f32 %v2483_v38, %v2453_v51  ;;  %v2133_v32 = vsel %vm2103_vm10, %v2100_v48, %v1869_v23  ;;  %v2415_v2 = vadd.f32 %v5198_v7, %v2414_v63 }
 0x188   : > { %3882 = vmatprep.mubr.msk.bf16.mxu1 %vm2172_vm11, %v2133_v32 }
 0x189   : > { %3883 = vmatmul.mubr.msk.bf16.gmra.mrb[12].mxu1 %vm2172_vm11, %v2135_v52  ;;  %v2485_v53 = vadd.f32 %v2484_v58, %v2454_v59 }
 0x19f   : > { %v5225_v22 = vpop.f32.mrb[4].mxu0 }
 0x1a0   : > { %v5227_v62 = vpop.f32.mrb[5].mxu0  ;;  %v2457_v13 = vmul.f32 %v5225_v22, %v5225_v22 }
 0x1a1   : > { %v2416_v4 = vadd.f32 %v2415_v2, %v5227_v62  ;;  %v2455_v26 = vmul.f32 %v5227_v62, %v5227_v62  ;;  %v5232_v56 = vpop.f32.mrb[6].mxu0 }
 0x1a2   : > { %v5234_v8 = vpop.f32.mrb[7].mxu0  ;;  %v2458_v21 = vmul.f32 %v5232_v56, %v5232_v56 }
 0x1a3   : > { %v2486_v44 = vadd.f32 %v2485_v53, %v2455_v26  ;;  %v2417_v17 = vadd.f32 %v2416_v4, %v5234_v8  ;;  %v2456_v60 = vmul.f32 %v5234_v8, %v5234_v8 }
 0x1a5   : > { %v2418_v41 = vadd.f32 %v5225_v22, %v2417_v17  ;;  %v2487_v49 = vadd.f32 %v2486_v44, %v2456_v60 }
 0x1a7   : > { %v2488_v10 = vadd.f32 %v2487_v49, %v2457_v13  ;;  %v2419_v35 = vadd.f32 %v5232_v56, %v2418_v41 }
 0x1a9   : > { %v2489_v0 = vadd.f32 %v2488_v10, %v2458_v21 }
 0x1bf   : > { %v5245_v9 = vpop.f32.mrb[8].mxu0 }
 0x1c0   : > { %v5247_v29 = vpop.f32.mrb[9].mxu0  ;;  %v2461_v16 = vmul.f32 %v5245_v9, %v5245_v9 }
 0x1c1   : > { %v2420_v54 = vadd.f32 %v2419_v35, %v5247_v29  ;;  %v2459_v39 = vmul.f32 %v5247_v29, %v5247_v29  ;;  %v5252_v34 = vpop.f32.mrb[10].mxu0 }
 0x1c2   : > { %v5254_v47 = vpop.f32.mrb[11].mxu0  ;;  %v2462_v30 = vmul.f32 %v5252_v34, %v5252_v34 }
 0x1c3   : > { %v2490_v45 = vadd.f32 %v2489_v0, %v2459_v39  ;;  %v2421_v61 = vadd.f32 %v2420_v54, %v5254_v47  ;;  %v2460_v55 = vmul.f32 %v5254_v47, %v5254_v47 }
 0x1c5   : > { %v2422_v5 = vadd.f32 %v5245_v9, %v2421_v61  ;;  %v2491_v25 = vadd.f32 %v2490_v45, %v2460_v55 }
 0x1c7   : > { %v2492_v27 = vadd.f32 %v2491_v25, %v2461_v16  ;;  %v2423_v28 = vadd.f32 %v5252_v34, %v2422_v5 }
 0x1c9   : > { %v2493_v15 = vadd.f32 %v2492_v27, %v2462_v30  ;;  %v4083_v30 = vmov 0  }
 0x1ca   : > { %2750 = vst [vmem:[%s5332_s11 + $0xc] sm:$0xf] %v4083_v30  ;;  %2751 = vst [vmem:[%s5332_s11 + $0x10] sm:$0xf] %v4083_v30 }
 0x1cb   : > { %2752 = vst [vmem:[%s5332_s11 + $0x14] sm:$0x1] %v4083_v30  ;;  %2753 = vst [vmem:[%s5332_s11 + $0x18] sm:$0xf] %v4083_v30 }
 0x1cc   : > { %2754 = vst [vmem:[%s5332_s11 + $0x1c] sm:$0xf] %v4083_v30  ;;  %2755 = vst [vmem:[%s5332_s11 + $0x20] sm:$0x1] %v4083_v30 }
 0x1cd   : > { %2756 = vst [vmem:[%s5332_s11 + $0x24] sm:$0xf] %v4083_v30  ;;  %2757 = vst [vmem:[%s5332_s11 + $0x28] sm:$0xf] %v4083_v30 }
 0x1ce   : > { %2758 = vst [vmem:[%s5332_s11 + $0x2c] sm:$0x1] %v4083_v30  ;;  %2759 = vst [vmem:[%s5332_s11 + $0x30] sm:$0xf] %v4083_v30 }
 0x1cf   : > { %2760 = vst [vmem:[%s5332_s11 + $0x34] sm:$0xf] %v4083_v30  ;;  %2761 = vst [vmem:[%s5332_s11 + $0x38] sm:$0x1] %v4083_v30 }
 0x1d0   : > { %2762 = vst [vmem:[%s5332_s11 + $0x3c] sm:$0xf] %v4083_v30  ;;  %2763 = vst [vmem:[%s5332_s11 + $0x40] sm:$0xf] %v4083_v30 }
 0x1d1   : > { %2764 = vst [vmem:[%s5332_s11 + $0x44] sm:$0x1] %v4083_v30  ;;  %2765 = vst [vmem:[%s5332_s11 + $0x48] sm:$0xf] %v4083_v30 }
 0x1d2   : > { %2766 = vst [vmem:[%s5332_s11 + $0x4c] sm:$0xf] %v4083_v30  ;;  %2767 = vst [vmem:[%s5332_s11 + $0x50] sm:$0x1] %v4083_v30 }
 0x1d3   : > { %2768 = vst [vmem:[%s5332_s11 + $0x54] sm:$0xf] %v4083_v30  ;;  %2769 = vst [vmem:[%s5332_s11 + $0x58] sm:$0xf] %v4083_v30 }
 0x1d4   : > { %2770 = vst [vmem:[%s5332_s11 + $0x5c] sm:$0x1] %v4083_v30  ;;  %2771 = vst [vmem:[%s5332_s11 + $0x60] sm:$0xf] %v4083_v30 }
 0x1d5   : > { %2772 = vst [vmem:[%s5332_s11 + $0x64] sm:$0xf] %v4083_v30  ;;  %2773 = vst [vmem:[%s5332_s11 + $0x68] sm:$0x1] %v4083_v30 }
 0x1d6   : > { %2774 = vst [vmem:[%s5332_s11 + $0x6c] sm:$0xf] %v4083_v30  ;;  %2775 = vst [vmem:[%s5332_s11 + $0x70] sm:$0xf] %v4083_v30 }
 0x1d7   : > { %2776 = vst [vmem:[%s5332_s11 + $0x74] sm:$0x1] %v4083_v30  ;;  %2777 = vst [vmem:[%s5332_s11 + $0x78] sm:$0xf] %v4083_v30 }
 0x1d8   : > { %2778 = vst [vmem:[%s5332_s11 + $0x7c] sm:$0xf] %v4083_v30  ;;  %2779 = vst [vmem:[%s5332_s11 + $0x80] sm:$0x1] %v4083_v30 }
 0x1d9   : > { %2780 = vst [vmem:[%s5332_s11 + $0x84] sm:$0xf] %v4083_v30  ;;  %2781 = vst [vmem:[%s5332_s11 + $0x88] sm:$0xf] %v4083_v30 }
 0x1da   : > { %2782 = vst [vmem:[%s5332_s11 + $0x8c] sm:$0x1] %v4083_v30  ;;  %2783 = vst [vmem:[%s5332_s11 + $0x90] sm:$0xf] %v4083_v30 }
 0x1db   : > { %2784 = vst [vmem:[%s5332_s11 + $0x94] sm:$0xf] %v4083_v30  ;;  %2785 = vst [vmem:[%s5332_s11 + $0x98] sm:$0x1] %v4083_v30 }
 0x1dc   : > { %2786 = vst [vmem:[%s5332_s11 + $0x9c] sm:$0xf] %v4083_v30  ;;  %2787 = vst [vmem:[%s5332_s11 + $0xa0] sm:$0xf] %v4083_v30 }
 0x1dd   : > { %2788 = vst [vmem:[%s5332_s11 + $0xa4] sm:$0x1] %v4083_v30  ;;  %2789 = vst [vmem:[%s5332_s11 + $0xa8] sm:$0xf] %v4083_v30 }
 0x1de   : > { %2790 = vst [vmem:[%s5332_s11 + $0xac] sm:$0xf] %v4083_v30  ;;  %2791 = vst [vmem:[%s5332_s11 + $0xb0] sm:$0x1] %v4083_v30 }
 0x1df   : > { %v5265_v20 = vpop.f32.mrb[12].mxu0  ;;  %2792 = vst [vmem:[%s5332_s11 + $0xb4] sm:$0xf] %v4083_v30  ;;  %2793 = vst [vmem:[%s5332_s11 + $0xb8] sm:$0xf] %v4083_v30 }
 0x1e0   : > { %v5267_v12 = vpop.f32.mrb[13].mxu0  ;;  %v2465_v11 = vmul.f32 %v5265_v20, %v5265_v20  ;;  %2794 = vst [vmem:[%s5332_s11 + $0xbc] sm:$0x1] %v4083_v30  ;;  %2795 = vst [vmem:[%s5332_s11 + $0xc0] sm:$0xf] %v4083_v30 }
 0x1e1   : > { %v2424_v46 = vadd.f32 %v2423_v28, %v5267_v12  ;;  %v2463_v50 = vmul.f32 %v5267_v12, %v5267_v12  ;;  %v5272_v3 = vpop.f32.mrb[14].mxu0  ;;  %2796 = vst [vmem:[%s5332_s11 + $0xc4] sm:$0xf] %v4083_v30  ;;  %2797 = vst [vmem:[%s5332_s11 + $0xc8] sm:$0x1] %v4083_v30 }
 0x1e2   : > { %v5274_v40 = vpop.f32.mrb[15].mxu0  ;;  %v2466_v57 = vmul.f32 %v5272_v3, %v5272_v3  ;;  %2747 = vst [vmem:[%s5332_s11] sm:$0xf] %v4083_v30  ;;  %2748 = vst [vmem:[%s5332_s11 + $0x4] sm:$0xf] %v4083_v30 }
 0x1e3   : > { %v2494_v43 = vadd.f32 %v2493_v15, %v2463_v50  ;;  %v2425_v36 = vadd.f32 %v2424_v46, %v5274_v40  ;;  %v2464_v1 = vmul.f32 %v5274_v40, %v5274_v40  ;;  %2749 = vst [vmem:[%s5332_s11 + $0x8] sm:$0x1] %v4083_v30  ;;  %2798 = vst [vmem:[%s5332_s11 + $0xcc] sm:$0xf] %v4083_v30 }
 0x1e4   : > { %2799 = vst [vmem:[%s5332_s11 + $0xd0] sm:$0xf] %v4083_v30  ;;  %2800 = vst [vmem:[%s5332_s11 + $0xd4] sm:$0x1] %v4083_v30 }
 0x1e5   : > { %v2426_v19 = vadd.f32 %v5265_v20, %v2425_v36  ;;  %v2495_v42 = vadd.f32 %v2494_v43, %v2464_v1 }
 0x1e7   : > { %v2496_v33 = vadd.f32 %v2495_v42, %v2465_v11  ;;  %v2427_v37 = vadd.f32 %v5272_v3, %v2426_v19 }
 0x1e9   : > { %v2497_v51 = vadd.f32 %v2496_v33, %v2466_v57 }
 0x1ff   : > { %v5285_v31 = vpop.f32.mrb[0].mxu1 }
 0x200   : > { %v5287_v63 = vpop.f32.mrb[1].mxu1  ;;  %v2469_v32 = vmul.f32 %v5285_v31, %v5285_v31 }
 0x201   : > { %v2428_v38 = vadd.f32 %v2427_v37, %v5287_v63  ;;  %v2467_v24 = vmul.f32 %v5287_v63, %v5287_v63  ;;  %v5292_v48 = vpop.f32.mrb[2].mxu1 }
 0x202   : > { %v5294_v52 = vpop.f32.mrb[3].mxu1  ;;  %v2470_v4 = vmul.f32 %v5292_v48, %v5292_v48 }
 0x203   : > { %v2498_v23 = vadd.f32 %v2497_v51, %v2467_v24  ;;  %v2429_v59 = vadd.f32 %v2428_v38, %v5294_v52  ;;  %v2468_v58 = vmul.f32 %v5294_v52, %v5294_v52 }
 0x205   : > { %v2430_v2 = vadd.f32 %v5285_v31, %v2429_v59  ;;  %v2499_v53 = vadd.f32 %v2498_v23, %v2468_v58 }
 0x207   : > { %v2500_v26 = vadd.f32 %v2499_v53, %v2469_v32  ;;  %v2431_v44 = vadd.f32 %v5292_v48, %v2430_v2 }
 0x209   : > { %v2501_v17 = vadd.f32 %v2500_v26, %v2470_v4 }
 0x21f   : > { %v5305_v60 = vpop.f32.mrb[4].mxu1 }
 0x220   : > { %v5307_v13 = vpop.f32.mrb[5].mxu1  ;;  %v2473_v39 = vmul.f32 %v5305_v60, %v5305_v60 }
 0x221   : > { %v2432_v41 = vadd.f32 %v2431_v44, %v5307_v13  ;;  %v2471_v49 = vmul.f32 %v5307_v13, %v5307_v13  ;;  %v5312_v21 = vpop.f32.mrb[6].mxu1 }
 0x222   : > { %v5314_v10 = vpop.f32.mrb[7].mxu1  ;;  %v2474_v55 = vmul.f32 %v5312_v21, %v5312_v21 }
 0x223   : > { %v2502_v35 = vadd.f32 %v2501_v17, %v2471_v49  ;;  %v2433_v0 = vadd.f32 %v2432_v41, %v5314_v10  ;;  %v2472_v54 = vmul.f32 %v5314_v10, %v5314_v10 }
 0x225   : > { %v2434_v45 = vadd.f32 %v5305_v60, %v2433_v0  ;;  %v2503_v61 = vadd.f32 %v2502_v35, %v2472_v54 }
 0x227   : > { %v2504_v16 = vadd.f32 %v2503_v61, %v2473_v39  ;;  %v2435_v5 = vadd.f32 %v5312_v21, %v2434_v45 }
 0x229   : > { %v5325_v25 = vadd.f32 %v2504_v16, %v2474_v55 }
 0x23f   : > { %v5388_v27 = vpop.f32.mrb[8].mxu1 }
 0x240   : > { %v5390_v28 = vpop.f32.mrb[9].mxu1  ;;  %v2477_v19 = vmul.f32 %v5388_v27, %v5388_v27 }
 0x241   : > { %v2436_v15 = vadd.f32 %v2435_v5, %v5390_v28  ;;  %v2475_v46 = vmul.f32 %v5390_v28, %v5390_v28  ;;  %v5395_v50 = vpop.f32.mrb[10].mxu1 }
 0x242   : > { %v5397_v43 = vpop.f32.mrb[11].mxu1  ;;  %v2478_v33 = vmul.f32 %v5395_v50, %v5395_v50 }
 0x243   : > { %v2506_v36 = vadd.f32 %v5325_v25, %v2475_v46  ;;  %v2437_v1 = vadd.f32 %v2436_v15, %v5397_v43  ;;  %v2476_v11 = vmul.f32 %v5397_v43, %v5397_v43 }
 0x245   : > { %v2438_v42 = vadd.f32 %v5388_v27, %v2437_v1  ;;  %v2507_v57 = vadd.f32 %v2506_v36, %v2476_v11 }
 0x247   : > { %v2508_v37 = vadd.f32 %v2507_v57, %v2477_v19  ;;  %v2439_v51 = vadd.f32 %v5395_v50, %v2438_v42 }
 0x249   : > { %v2509_v38 = vadd.f32 %v2508_v37, %v2478_v33  ;;  %v2531_v37 = vlaneseq }
 0x25c   : > { %v5409_v24 = vpop.f32.mrb[12].mxu1 }
 0x25d   : > { %v5411_v23 = vpop.f32.mrb[13].mxu1  ;;  %v2481_v44 = vmul.f32 %v5409_v24, %v5409_v24 }
 0x25e   : > { %v2440_v59 = vadd.f32 %v2439_v51, %v5411_v23  ;;  %v2479_v58 = vmul.f32 %v5411_v23, %v5411_v23  ;;  %v5416_v32 = vpop.f32.mrb[14].mxu1  ;;  %v2532_v51 = vshrl.u32 %v2531_v37, 7 }
 0x25f   : > { %v5418_v2 = vpop.f32.mrb[15].mxu1  ;;  %v2482_v49 = vmul.f32 %v5416_v32, %v5416_v32 }
 0x260   : > { %v2510_v53 = vadd.f32 %v2509_v38, %v2479_v58  ;;  %v2441_v4 = vadd.f32 %v2440_v59, %v5418_v2  ;;  %v2480_v26 = vmul.f32 %v5418_v2, %v5418_v2  ;;  %v2525_v38 = vld [vmem:[%s6146_s2] sm:$0x1]  ;;  %v2533_v58 = vsub.s32 0, %v2532_v51 }
 0x262   : > { %v2442_v17 = vadd.f32 %v5409_v24, %v2441_v4  ;;  %v2511_v41 = vadd.f32 %v2510_v53, %v2480_v26  ;;  %v2526_v4 = vld [vmem:[%s6146_s2 + $0x1] sm:$0x1] }
 0x264   : > { %v2443_v35 = vadd.f32 %v5416_v32, %v2442_v17  ;;  %v2512_v0 = vadd.f32 %v2511_v41, %v2481_v44 }
 0x266   : > { %v2444_v54 = vrot.slane %v2443_v35, 4  ;;  %v2513_v39 = vadd.f32 %v2512_v0, %v2482_v49 }
 0x268   : > { %v2445_v45 = vadd.f32 %v2444_v54, %v2443_v35  ;;  %v2514_v61 = vrot.slane %v2513_v39, 4 }
 0x26a   : > { %v2446_v55 = vrot.slane %v2445_v45, 2  ;;  %v2515_v16 = vadd.f32 %v2514_v61, %v2513_v39 }
 0x26c   : > { %v2447_v5 = vadd.f32 %v2446_v55, %v2445_v45  ;;  %v2516_v25 = vrot.slane %v2515_v16, 2 }
 0x26e   : > { %v2448_v30 = vrot.slane %v2447_v5, 1  ;;  %v2517_v15 = vadd.f32 %v2516_v25, %v2515_v16 }
 0x270   : > { %v2449_v46 = vadd.f32 %v2448_v30, %v2447_v5  ;;  %v2518_v36 = vrot.slane %v2517_v15, 1 }
 0x272   : > { %v2450_v1 = vmul.f32 0.00390625, %v2449_v46  ;;  %v2519_v11 = vadd.f32 %v2518_v36, %v2517_v15 }
 0x274   : > { %v2520_v19 = vmul.f32 0.00390625, %v2519_v11  ;;  %v2521_v42 = vmul.f32 %v2450_v1, %v2450_v1  ;;  %v2528_v59 = vmul.f32 %v2525_v38, %v2450_v1 }
 0x276   : > { %v2522_v57 = vsub.f32 %v2520_v19, %v2521_v42 }
 0x278   : > { %v2523_v33 = vadd.f32 1e-05, %v2522_v57 }
 0x27a   : > { %4065 = vrsqrt.f32 %v2523_v33 }
 0x284   : > { %v4066_v53 = vpop.eup %4065 }
 0x285   : > { %v2527_v26 = vmul.f32 %v4066_v53, %v2525_v38  ;;  %v2529_v44 = vmul.f32 %v4066_v53, %v2528_v59 }
 0x287   : > { %v2534_v17 = vrot.slane %v2527_v26, %v2533_v58  ;;  %v2530_v41 = vsub.f32 %v2526_v4, %v2529_v44 }
 0x289   : > { %v2535_v49 = vmul.f32 %v2534_v17, %v5194_v6  ;;  %v2536_v35 = vmul.f32 %v2534_v17, %v5202_v18  ;;  %v2537_v0 = vmul.f32 %v5190_v14, %v2534_v17  ;;  %v2538_v54 = vmul.f32 %v5198_v7, %v2534_v17 }
 0x28a   : > { %v2539_v39 = vmul.f32 %v2534_v17, %v5227_v62  ;;  %v2540_v45 = vmul.f32 %v2534_v17, %v5234_v8  ;;  %v2541_v61 = vmul.f32 %v5225_v22, %v2534_v17  ;;  %v2542_v55 = vmul.f32 %v5232_v56, %v2534_v17 }
 0x28b   : > { %v2543_v16 = vmul.f32 %v2534_v17, %v5247_v29  ;;  %v2544_v5 = vmul.f32 %v2534_v17, %v5254_v47  ;;  %v2545_v6 = vmul.f32 %v5245_v9, %v2534_v17  ;;  %v2546_v18 = vmul.f32 %v5252_v34, %v2534_v17 }
 0x28c   : > { %v2547_v14 = vmul.f32 %v2534_v17, %v5267_v12  ;;  %v2548_v7 = vmul.f32 %v2534_v17, %v5274_v40  ;;  %v2549_v62 = vmul.f32 %v5265_v20, %v2534_v17  ;;  %v2550_v8 = vmul.f32 %v5272_v3, %v2534_v17 }
 0x28d   : > { %v2551_v22 = vmul.f32 %v2534_v17, %v5287_v63  ;;  %v2552_v56 = vmul.f32 %v2534_v17, %v5294_v52  ;;  %v2553_v29 = vmul.f32 %v5285_v31, %v2534_v17  ;;  %v2554_v47 = vmul.f32 %v5292_v48, %v2534_v17 }
 0x28e   : > { %v2555_v9 = vmul.f32 %v2534_v17, %v5307_v13  ;;  %v2556_v34 = vmul.f32 %v2534_v17, %v5314_v10  ;;  %v2557_v12 = vmul.f32 %v5305_v60, %v2534_v17  ;;  %v2558_v40 = vmul.f32 %v5312_v21, %v2534_v17 }
 0x28f   : > { %v2559_v20 = vmul.f32 %v2534_v17, %v5390_v28  ;;  %v2560_v3 = vmul.f32 %v2534_v17, %v5397_v43  ;;  %v2561_v63 = vmul.f32 %v5388_v27, %v2534_v17  ;;  %v2562_v52 = vmul.f32 %v5395_v50, %v2534_v17 }
 0x290   : > { %v2563_v31 = vmul.f32 %v2534_v17, %v5411_v23  ;;  %v2564_v48 = vmul.f32 %v2534_v17, %v5418_v2  ;;  %v2565_v13 = vmul.f32 %v5409_v24, %v2534_v17  ;;  %v2566_v10 = vmul.f32 %v5416_v32, %v2534_v17 }
 0x291   : > { %v2570_v25 = vrot.slane %v2530_v41, %v2533_v58 }
 0x293   : > { %v5467_v60 = vadd.f32 %v2570_v25, %v2535_v49  ;;  %v5469_v21 = vadd.f32 %v2570_v25, %v2536_v35  ;;  %v5471_v28 = vadd.f32 %v2570_v25, %v2537_v0  ;;  %v5473_v43 = vadd.f32 %v2570_v25, %v2538_v54 }
 0x294   : > { %v5475_v27 = vadd.f32 %v2570_v25, %v2539_v39  ;;  %v5477_v50 = vadd.f32 %v2570_v25, %v2540_v45  ;;  %v5479_v23 = vadd.f32 %v2570_v25, %v2541_v61  ;;  %v5481_v2 = vadd.f32 %v2570_v25, %v2542_v55 }
 0x295   : > { %v5483_v24 = vadd.f32 %v2570_v25, %v2543_v16  ;;  %v5485_v32 = vadd.f32 %v2570_v25, %v2544_v5  ;;  %v5487_v30 = vadd.f32 %v2570_v25, %v2545_v6  ;;  %v5489_v15 = vadd.f32 %v2570_v25, %v2546_v18 }
 0x296   : > { %v5491_v46 = vadd.f32 %v2570_v25, %v2547_v14  ;;  %v5493_v36 = vadd.f32 %v2570_v25, %v2548_v7  ;;  %v5495_v1 = vadd.f32 %v2570_v25, %v2549_v62  ;;  %v5497_v11 = vadd.f32 %v2570_v25, %v2550_v8 }
 0x297   : > { %v5499_v19 = vadd.f32 %v2570_v25, %v2551_v22  ;;  %v5501_v42 = vadd.f32 %v2570_v25, %v2552_v56  ;;  %v5503_v57 = vadd.f32 %v2570_v25, %v2553_v29  ;;  %v5505_v33 = vadd.f32 %v2570_v25, %v2554_v47 }
 0x298   : > { %v5507_v37 = vadd.f32 %v2570_v25, %v2555_v9  ;;  %v5509_v51 = vadd.f32 %v2570_v25, %v2556_v34  ;;  %v5511_v38 = vadd.f32 %v2570_v25, %v2557_v12  ;;  %v5513_v59 = vadd.f32 %v2570_v25, %v2558_v40 }
 0x299   : > { %v5515_v58 = vadd.f32 %v2570_v25, %v2559_v20  ;;  %v5517_v53 = vadd.f32 %v2570_v25, %v2560_v3  ;;  %v5519_v4 = vadd.f32 %v2570_v25, %v2561_v63  ;;  %v5521_v26 = vadd.f32 %v2570_v25, %v2562_v52 }
 0x29a   : > { %v5523_v44 = vadd.f32 %v2570_v25, %v2563_v31  ;;  %v5525_v17 = vadd.f32 %v2570_v25, %v2564_v48  ;;  %v5527_v41 = vadd.f32 %v2570_v25, %v2565_v13  ;;  %v5529_v49 = vadd.f32 %v2570_v25, %v2566_v10 }
 0x29b   : > { %vm2603_vm12 = vcmp.ge.f32.partialorder %v5467_v60, 0.0  ;;  %vm2604_vm13 = vcmp.ge.f32.partialorder %v5469_v21, 0.0  ;;  %vm2605_vm14 = vcmp.ge.f32.partialorder %v5471_v28, 0.0  ;;  %vm2606_vm15 = vcmp.ge.f32.partialorder %v5473_v43, 0.0 }
 0x29c   : > { %vm2607_vm0 = vcmp.ge.f32.partialorder %v5475_v27, 0.0  ;;  %vm2608_vm1 = vcmp.ge.f32.partialorder %v5477_v50, 0.0  ;;  %vm2609_vm3 = vcmp.ge.f32.partialorder %v5479_v23, 0.0  ;;  %vm2610_vm4 = vcmp.ge.f32.partialorder %v5481_v2, 0.0 }
 0x29d   : > { %vm2611_vm5 = vcmp.ge.f32.partialorder %v5483_v24, 0.0  ;;  %v2635_v35 = vmul.f32 0.01, %v5467_v60  ;;  %v2636_v0 = vmul.f32 0.01, %v5469_v21  ;;  %vm2618_vm2 = vcmp.ge.f32.partialorder %v5497_v11, 0.0 }
 0x29e   : > { %v2637_v54 = vmul.f32 0.01, %v5471_v28  ;;  %vm2619_vm6 = vcmp.ge.f32.partialorder %v5499_v19, 0.0  ;;  %v2638_v39 = vmul.f32 0.01, %v5473_v43  ;;  %vm2624_vm11 = vcmp.ge.f32.partialorder %v5509_v51, 0.0 }
 0x29f   : > { %v2639_v45 = vmul.f32 0.01, %v5475_v27  ;;  %v2640_v61 = vmul.f32 0.01, %v5477_v50  ;;  %v2641_v55 = vmul.f32 0.01, %v5479_v23  ;;  %v5565_v6 = vsel %vm2603_vm12, %v5467_v60, %v2635_v35 }
 0x2a0   : > { %v2642_v16 = vmul.f32 0.01, %v5481_v2  ;;  %v2643_v5 = vmul.f32 0.01, %v5483_v24  ;;  %vm2628_vm8 = vcmp.ge.f32.partialorder %v5517_v53, 0.0  ;;  %v2668_v62 = vsel %vm2604_vm13, %v5469_v21, %v2636_v0 }
 0x2a1   : > { %v2644_v18 = vmul.f32 0.01, %v5485_v32  ;;  %v2645_v14 = vmul.f32 0.01, %v5487_v30  ;;  %v2646_v7 = vmul.f32 0.01, %v5489_v15  ;;  %v2669_v29 = vsel %vm2605_vm14, %v5471_v28, %v2637_v54 }
 0x2a2   : > { %vm2630_vm7 = vcmp.ge.f32.partialorder %v5521_v26, 0.0  ;;  %vm2631_vm10 = vcmp.ge.f32.partialorder %v5523_v44, 0.0  ;;  %vm2632_vm9 = vcmp.ge.f32.partialorder %v5525_v17, 0.0  ;;  %v2647_v8 = vmul.f32 0.01, %v5491_v46 }
 0x2a3   : > { %v2648_v22 = vmul.f32 0.01, %v5493_v36  ;;  %v2649_v56 = vmul.f32 0.01, %v5495_v1  ;;  %vm2633_vm13 = vcmp.ge.f32.partialorder %v5527_v41, 0.0  ;;  %vm2634_vm12 = vcmp.ge.f32.partialorder %v5529_v49, 0.0 }
 0x2a4   : > { %v2650_v47 = vmul.f32 0.01, %v5497_v11  ;;  %v2651_v9 = vmul.f32 0.01, %v5499_v19  ;;  %v2652_v34 = vmul.f32 0.01, %v5501_v42  ;;  %v2670_v12 = vsel %vm2606_vm15, %v5473_v43, %v2638_v39 }
 0x2a5   : > { %v2653_v40 = vmul.f32 0.01, %v5503_v57  ;;  %v2654_v20 = vmul.f32 0.01, %v5505_v33  ;;  %v2655_v3 = vmul.f32 0.01, %v5507_v37  ;;  %v2671_v63 = vsel %vm2607_vm0, %v5475_v27, %v2639_v45 }
 0x2a6   : > { %v2656_v52 = vmul.f32 0.01, %v5509_v51  ;;  %v2657_v31 = vmul.f32 0.01, %v5511_v38  ;;  %v2658_v48 = vmul.f32 0.01, %v5513_v59  ;;  %v2672_v13 = vsel %vm2608_vm1, %v5477_v50, %v2640_v61 }
 0x2a7   : > { %v2659_v10 = vmul.f32 0.01, %v5515_v58  ;;  %v2660_v25 = vmul.f32 0.01, %v5517_v53  ;;  %v2661_v60 = vmul.f32 0.01, %v5519_v4  ;;  %v2673_v21 = vsel %vm2609_vm3, %v5479_v23, %v2641_v55 }
 0x2a8   : > { %v2662_v28 = vmul.f32 0.01, %v5521_v26  ;;  %v2663_v43 = vmul.f32 0.01, %v5523_v44  ;;  %v2664_v27 = vmul.f32 0.01, %v5525_v17  ;;  %v2674_v50 = vsel %vm2610_vm4, %v5481_v2, %v2642_v16 }
 0x2a9   : > { %v2665_v35 = vmul.f32 0.01, %v5527_v41  ;;  %v2666_v0 = vmul.f32 0.01, %v5529_v49  ;;  %v2675_v54 = vsel %vm2611_vm5, %v5483_v24, %v2643_v5  ;;  %vm6149_vm14 = vcmp.ge.f32.partialorder %v5485_v32, 0.0 }
 0x2aa   : > { %v2676_v23 = vsel %vm6149_vm14, %v5485_v32, %v2644_v18  ;;  %vm6150_vm15 = vcmp.ge.f32.partialorder %v5487_v30, 0.0  ;;  %vm6151_vm0 = vcmp.ge.f32.partialorder %v5489_v15, 0.0  ;;  %vm6152_vm1 = vcmp.ge.f32.partialorder %v5491_v46, 0.0 }
 0x2ab   : > { %v2677_v39 = vsel %vm6150_vm15, %v5487_v30, %v2645_v14  ;;  %v2678_v2 = vsel %vm6151_vm0, %v5489_v15, %v2646_v7  ;;  %v2679_v45 = vsel %vm6152_vm1, %v5491_v46, %v2647_v8  ;;  %vm6153_vm3 = vcmp.ge.f32.partialorder %v5493_v36, 0.0 }
 0x2ac   : > { %v2680_v24 = vsel %vm6153_vm3, %v5493_v36, %v2648_v22  ;;  %vm6154_vm4 = vcmp.ge.f32.partialorder %v5495_v1, 0.0  ;;  %v2682_v30 = vsel %vm2618_vm2, %v5497_v11, %v2650_v47  ;;  %v2683_v15 = vsel %vm2619_vm6, %v5499_v19, %v2651_v9 }
 0x2ad   : > { %v2681_v32 = vsel %vm6154_vm4, %v5495_v1, %v2649_v56  ;;  %vm6155_vm5 = vcmp.ge.f32.partialorder %v5501_v42, 0.0  ;;  %vm6156_vm14 = vcmp.ge.f32.partialorder %v5503_v57, 0.0  ;;  %vm6157_vm15 = vcmp.ge.f32.partialorder %v5505_v33, 0.0 }
 0x2ae   : > { %v2684_v46 = vsel %vm6155_vm5, %v5501_v42, %v2652_v34  ;;  %v2685_v36 = vsel %vm6156_vm14, %v5503_v57, %v2653_v40  ;;  %v2686_v1 = vsel %vm6157_vm15, %v5505_v33, %v2654_v20  ;;  %vm6158_vm0 = vcmp.ge.f32.partialorder %v5507_v37, 0.0 }
 0x2af   : > { %v2687_v11 = vsel %vm6158_vm0, %v5507_v37, %v2655_v3  ;;  %v2688_v19 = vsel %vm2624_vm11, %v5509_v51, %v2656_v52  ;;  %vm6159_vm2 = vcmp.ge.f32.partialorder %v5511_v38, 0.0  ;;  %vm6160_vm6 = vcmp.ge.f32.partialorder %v5513_v59, 0.0 }
 0x2b0   : > { %v2689_v42 = vsel %vm6159_vm2, %v5511_v38, %v2657_v31  ;;  %v2690_v57 = vsel %vm6160_vm6, %v5513_v59, %v2658_v48  ;;  %vm6161_vm1 = vcmp.ge.f32.partialorder %v5515_v58, 0.0  ;;  %v2692_v37 = vsel %vm2628_vm8, %v5517_v53, %v2660_v25 }
 0x2b1   : > { %v2691_v33 = vsel %vm6161_vm1, %v5515_v58, %v2659_v10  ;;  %vm6162_vm3 = vcmp.ge.f32.partialorder %v5519_v4, 0.0  ;;  %v2694_v38 = vsel %vm2630_vm7, %v5521_v26, %v2662_v28  ;;  %v2695_v59 = vsel %vm2631_vm10, %v5523_v44, %v2663_v43 }
 0x2b2   : > { %v2693_v51 = vsel %vm6162_vm3, %v5519_v4, %v2661_v60  ;;  %v2696_v58 = vsel %vm2632_vm9, %v5525_v17, %v2664_v27  ;;  %v2697_v53 = vsel %vm2633_vm13, %v5527_v41, %v2665_v35  ;;  %v2698_v4 = vsel %vm2634_vm12, %v5529_v49, %v2666_v0 }
 0x2b3   : > { %v3791_v61 = vpack.c.bf16 %v5565_v6, %v5565_v6  ;;  %v3792_v26 = vpack.c.bf16 %v2668_v62, %v2668_v62  ;;  %v3793_v55 = vpack.c.bf16 %v2669_v29, %v2669_v29  ;;  %v3794_v16 = vpack.c.bf16 %v2670_v12, %v2670_v12 }
 0x2b4   : > { %v3795_v5 = vpack.c.bf16 %v2671_v63, %v2671_v63  ;;  %v5695_v44 = vpack.c.bf16 %v2672_v13, %v2672_v13  ;;  %vm2881_vm7 = vsmask.f32 256  ;;  %vm2882_vm8 = vsmask.f32 4368 }
 0x2b5   : > { %v5697_v17 = vpack.c.bf16 %v2673_v21, %v2673_v21  ;;  %v5699_v18 = vpack.c.bf16 %v2674_v50, %v2674_v50  ;;  %v5701_v41 = vpack.c.bf16 %v2675_v54, %v2675_v54  ;;  %v5703_v14 = vpack.c.bf16 %v2676_v23, %v2676_v23  ;;  %vm5754_vm9 = vmor %vm2881_vm7, %vm2882_vm8 }
 0x2b6   : > { %v5705_v49 = vpack.c.bf16 %v2677_v39, %v2677_v39  ;;  %v5707_v7 = vpack.c.bf16 %v2678_v2, %v2678_v2  ;;  %v5709_v6 = vpack.c.bf16 %v2679_v45, %v2679_v45  ;;  %v5711_v62 = vpack.c.bf16 %v2680_v24, %v2680_v24 }
 0x2b7   : > { %v5713_v8 = vpack.c.bf16 %v2681_v32, %v2681_v32  ;;  %v5715_v22 = vpack.c.bf16 %v2682_v30, %v2682_v30  ;;  %v5717_v56 = vpack.c.bf16 %v2683_v15, %v2683_v15  ;;  %v5719_v29 = vpack.c.bf16 %v2684_v46, %v2684_v46 }
 0x2b8   : > { %v5721_v47 = vpack.c.bf16 %v2685_v36, %v2685_v36  ;;  %v5723_v9 = vpack.c.bf16 %v2686_v1, %v2686_v1  ;;  %v5725_v34 = vpack.c.bf16 %v2687_v11, %v2687_v11  ;;  %v5727_v12 = vpack.c.bf16 %v2688_v19, %v2688_v19 }
 0x2b9   : > { %v5729_v40 = vpack.c.bf16 %v2689_v42, %v2689_v42  ;;  %v5731_v20 = vpack.c.bf16 %v2690_v57, %v2690_v57  ;;  %v5733_v3 = vpack.c.bf16 %v2691_v33, %v2691_v33  ;;  %v5735_v63 = vpack.c.bf16 %v2692_v37, %v2692_v37 }
 0x2ba   : > { %v5737_v52 = vpack.c.bf16 %v2693_v51, %v2693_v51  ;;  %v5739_v31 = vpack.c.bf16 %v2694_v38, %v2694_v38  ;;  %v5741_v48 = vpack.c.bf16 %v2695_v59, %v2695_v59  ;;  %v5743_v13 = vpack.c.bf16 %v2696_v58, %v2696_v58 }
 0x2bb   : > { %v5745_v10 = vpack.c.bf16 %v2697_v53, %v2697_v53  ;;  %v5747_v25 = vpack.c.bf16 %v2698_v4, %v2698_v4  ;;  %v2885_v60 = vshrl.u32 %v3791_v61, 16  ;;  %v2888_v21 = vshll.u32 %v3791_v61, 16 }
 0x2bc   : > { %v2893_v28 = vshrl.u32 %v3792_v26, 16  ;;  %v2896_v43 = vshll.u32 %v3792_v26, 16  ;;  %v2902_v27 = vshrl.u32 %v3793_v55, 16  ;;  %v2905_v50 = vshll.u32 %v3793_v55, 16 }
 0x2bd   : > { %v2887_v35 = vrot.slane %v2885_v60, 7  ;;  %v2910_v0 = vshrl.u32 %v3794_v16, 16  ;;  %v2913_v54 = vshll.u32 %v3794_v16, 16  ;;  %v2919_v23 = vshrl.u32 %v3795_v5, 16 }
 0x2be   : > { %v5749_v39 = vrot.slane %v2893_v28, 7  ;;  %v2904_v2 = vrot.slane %v2902_v27, 7  ;;  %v2922_v45 = vshll.u32 %v3795_v5, 16  ;;  %v2927_v24 = vshrl.u32 %v5695_v44, 16 }
 0x2bf   : > { %v5758_v30 = vor.u32 %v2888_v21, %v2887_v35  ;;  %v2891_v15 = vrot.slane %v2887_v35, 4  ;;  %v5760_v46 = vrot.slane %v2910_v0, 7  ;;  %v2921_v36 = vrot.slane %v2919_v23, 7 }
 0x2c0   : > { %v2898_v1 = vor.u32 %v2896_v43, %v5749_v39  ;;  %v2900_v11 = vrot.slane %v5749_v39, 4  ;;  %v5764_v19 = vor.u32 %v2905_v50, %v2904_v2  ;;  %v2908_v42 = vrot.slane %v2904_v2, 4 }
 0x2c1   : > { %v2915_v57 = vor.u32 %v2913_v54, %v5760_v46  ;;  %v2917_v33 = vrot.slane %v5760_v46, 4  ;;  %v5768_v37 = vor.u32 %v2922_v45, %v2921_v36  ;;  %v2925_v51 = vrot.slane %v2921_v36, 4 }
 0x2c2   : > { %v2899_v38 = vsel %vm5754_vm9, %v2891_v15, %v2898_v1  ;;  %v5772_v59 = vrot.slane %v2927_v24, 7  ;;  %v2930_v58 = vshll.u32 %v5695_v44, 16  ;;  %v2936_v53 = vshrl.u32 %v5697_v17, 16 }
 0x2c3   : > { %v2916_v4 = vsel %vm5754_vm9, %v2908_v42, %v2915_v57  ;;  %v2939_v61 = vshll.u32 %v5697_v17, 16  ;;  %v2944_v26 = vshrl.u32 %v5699_v18, 16  ;;  %v2947_v55 = vshll.u32 %v5699_v18, 16  ;;  %3711 = vst [vmem:[%s5332_s11 + $0x10] sm:$0xf] %v2899_v38 }
 0x2c4   : > { %v2932_v16 = vor.u32 %v2930_v58, %v5772_v59  ;;  %v2934_v5 = vrot.slane %v5772_v59, 4  ;;  %v2938_v60 = vrot.slane %v2936_v53, 7  ;;  %v2953_v44 = vshrl.u32 %v5701_v41, 16  ;;  %3716 = vst [vmem:[%s5332_s11 + $0x1c] sm:$0xf] %v2916_v4 }
 0x2c5   : > { %v5786_v21 = vrot.slane %v2944_v26, 7  ;;  %v2956_v28 = vshll.u32 %v5701_v41, 16  ;;  %v2961_v17 = vshrl.u32 %v5703_v14, 16  ;;  %v2964_v43 = vshll.u32 %v5703_v14, 16 }
 0x2c6   : > { %v2933_v18 = vsel %vm5754_vm9, %v2925_v51, %v2932_v16  ;;  %v5793_v27 = vor.u32 %v2939_v61, %v2938_v60  ;;  %v2942_v50 = vrot.slane %v2938_v60, 4  ;;  %v2955_v35 = vrot.slane %v2953_v44, 7 }
 0x2c7   : > { %v2949_v0 = vor.u32 %v2947_v55, %v5786_v21  ;;  %v2951_v54 = vrot.slane %v5786_v21, 4  ;;  %v5797_v23 = vrot.slane %v2961_v17, 7  ;;  %v2970_v41 = vshrl.u32 %v5705_v49, 16  ;;  %3721 = vst [vmem:[%s5332_s11 + $0x28] sm:$0xf] %v2933_v18 }
 0x2c8   : > { %v5801_v2 = vor.u32 %v2956_v28, %v2955_v35  ;;  %v2959_v14 = vrot.slane %v2955_v35, 4  ;;  %v2973_v45 = vshll.u32 %v5705_v49, 16  ;;  %v2978_v24 = vshrl.u32 %v5707_v7, 16 }
 0x2c9   : > { %v2950_v15 = vsel %vm5754_vm9, %v2942_v50, %v2949_v0  ;;  %v2966_v36 = vor.u32 %v2964_v43, %v5797_v23  ;;  %v2968_v1 = vrot.slane %v5797_v23, 4  ;;  %v2972_v42 = vrot.slane %v2970_v41, 7 }
 0x2ca   : > { %v5809_v57 = vrot.slane %v2978_v24, 7  ;;  %v2981_v51 = vshll.u32 %v5707_v7, 16  ;;  %v2987_v38 = vshrl.u32 %v5709_v6, 16  ;;  %v2990_v58 = vshll.u32 %v5709_v6, 16  ;;  %3726 = vst [vmem:[%s5332_s11 + $0x34] sm:$0xf] %v2950_v15 }
 0x2cb   : > { %v2967_v49 = vsel %vm5754_vm9, %v2959_v14, %v2966_v36  ;;  %v5817_v53 = vor.u32 %v2973_v45, %v2972_v42  ;;  %v2976_v4 = vrot.slane %v2972_v42, 4  ;;  %v2995_v61 = vshrl.u32 %v5711_v62, 16 }
 0x2cc   : > { %v2983_v26 = vor.u32 %v2981_v51, %v5809_v57  ;;  %v2989_v16 = vrot.slane %v2987_v38, 7  ;;  %v2998_v7 = vshll.u32 %v5711_v62, 16  ;;  %3731 = vst [vmem:[%s5332_s11 + $0x40] sm:$0xf] %v2967_v49  ;;  %v3004_v6 = vshrl.u32 %v5713_v8, 16 }
 0x2cd   : > { %v5824_v60 = vrot.slane %v2995_v61, 7  ;;  %v3007_v44 = vshll.u32 %v5713_v8, 16  ;;  %v3012_v28 = vshrl.u32 %v5715_v22, 16  ;;  %v3015_v50 = vshll.u32 %v5715_v22, 16 }
 0x2ce   : > { %v2984_v17 = vsel %vm5754_vm9, %v2976_v4, %v2983_v26  ;;  %v5831_v43 = vor.u32 %v2990_v58, %v2989_v16  ;;  %v2993_v18 = vrot.slane %v2989_v16, 4  ;;  %v3006_v0 = vrot.slane %v3004_v6, 7  ;;  %v3734_v6 = vld [vmem:[%s5332_s11 + $0x48] sm:$0xf] }
 0x2cf   : > { %v3000_v35 = vor.u32 %v2998_v7, %v5824_v60  ;;  %v5836_v41 = vrot.slane %v3012_v28, 7  ;;  %3736 = vst [vmem:[%s5332_s11 + $0x4c] sm:$0xf] %v2984_v17  ;;  %v3021_v8 = vshrl.u32 %v5717_v56, 16  ;;  %v3024_v14 = vshll.u32 %v5717_v56, 16 }
 0x2d0   : > { %v3029_v45 = vshrl.u32 %v5719_v29, 16  ;;  %v3032_v24 = vshll.u32 %v5719_v29, 16  ;;  %v5845_v15 = vor.u32 %v3007_v44, %v3006_v0  ;;  %v3010_v36 = vrot.slane %v3006_v0, 4 }
 0x2d1   : > { %v3001_v22 = vsel %vm5754_vm9, %v2993_v18, %v3000_v35  ;;  %v3017_v42 = vor.u32 %v3015_v50, %v5836_v41  ;;  %v3023_v38 = vrot.slane %v3021_v8, 7  ;;  %v3038_v56 = vshrl.u32 %v5721_v47, 16 }
 0x2d2   : > { %v5849_v58 = vrot.slane %v3029_v45, 7  ;;  %3741 = vst [vmem:[%s5332_s11 + $0x58] sm:$0xf] %v3001_v22  ;;  %v3041_v49 = vshll.u32 %v5721_v47, 16  ;;  %v3046_v4 = vshrl.u32 %v5723_v9, 16  ;;  %v3049_v61 = vshll.u32 %v5723_v9, 16 }
 0x2d3   : > { %v3018_v29 = vsel %vm5754_vm9, %v3010_v36, %v3017_v42  ;;  %v5858_v26 = vor.u32 %v3024_v14, %v3023_v38  ;;  %v3027_v16 = vrot.slane %v3023_v38, 4  ;;  %v3040_v44 = vrot.slane %v3038_v56, 7  ;;  %v3732_v45 = vld [vmem:[%s5332_s11 + $0x44] sm:$0x1] }
 0x2d4   : > { %v3034_v7 = vor.u32 %v3032_v24, %v5849_v58  ;;  %3746 = vst [vmem:[%s5332_s11 + $0x64] sm:$0xf] %v3018_v29  ;;  %v5863_v28 = vrot.slane %v3046_v4, 7  ;;  %v3055_v17 = vshrl.u32 %v5725_v34, 16  ;;  %v3058_v47 = vshll.u32 %v5725_v34, 16 }
 0x2d5   : > { %v3063_v9 = vshrl.u32 %v5727_v12, 16  ;;  %v3066_v50 = vshll.u32 %v5727_v12, 16  ;;  %v3072_v35 = vshrl.u32 %v5729_v40, 16  ;;  %vm3206_vm10 = vsmask.f32 7938 }
 0x2d6   : > { %v3035_v18 = vsel %vm5754_vm9, %v3027_v16, %v3034_v7  ;;  %v5872_v0 = vor.u32 %v3041_v49, %v3040_v44  ;;  %v3044_v8 = vrot.slane %v3040_v44, 4  ;;  %v3051_v14 = vor.u32 %v3049_v61, %v5863_v28  ;;  %v3729_v61 = vld [vmem:[%s5332_s11 + $0x3c] sm:$0xf] }
 0x2d7   : > { %3751 = vst [vmem:[%s5332_s11 + $0x70] sm:$0xf] %v3035_v18  ;;  %v3057_v34 = vrot.slane %v3055_v17, 7  ;;  %v5877_v24 = vrot.slane %v3063_v9, 7  ;;  %v3074_v22 = vrot.slane %v3072_v35, 7  ;;  %v3075_v36 = vshll.u32 %v5729_v40, 16 }
 0x2d8   : > { %vm3212_vm11 = vcmask 1040384   ;;  %v3052_v12 = vsel %vm5754_vm9, %v3044_v8, %v3051_v14  ;;  %v3080_v42 = vshrl.u32 %v5731_v20, 16  ;;  %v3083_v38 = vshll.u32 %v5731_v20, 16 }
 0x2d9   : > { %v3089_v56 = vshrl.u32 %v5733_v3, 16  ;;  %v5885_v29 = vor.u32 %v3058_v47, %v3057_v34  ;;  %v3061_v49 = vrot.slane %v3057_v34, 4  ;;  %v3068_v4 = vor.u32 %v3066_v50, %v5877_v24  ;;  %3756 = vst [vmem:[%s5332_s11 + $0x7c] sm:$0xf] %v3052_v12  ;;  %vm5945_vm4 = vmand %vm3212_vm11, %vm2881_vm7 }
 0x2da   : > { %v5890_v40 = vor.u32 %v3075_v36, %v3074_v22  ;;  %v3078_v16 = vrot.slane %v3074_v22, 4  ;;  %v5892_v7 = vrot.slane %v3080_v42, 7  ;;  %v3092_v17 = vshll.u32 %v5733_v3, 16 }
 0x2db   : > { %v3091_v44 = vrot.slane %v3089_v56, 7  ;;  %v3069_v20 = vsel %vm5754_vm9, %v3061_v49, %v3068_v4  ;;  %v3097_v47 = vshrl.u32 %v5735_v63, 16  ;;  %v3100_v18 = vshll.u32 %v5735_v63, 16  ;;  %v3709_v4 = vld [vmem:[%s5332_s11 + $0xc] sm:$0xf] }
 0x2dc   : > { %v3085_v9 = vor.u32 %v3083_v38, %v5892_v7  ;;  %v3106_v8 = vshrl.u32 %v5737_v52, 16  ;;  %3761 = vst [vmem:[%s5332_s11 + $0x88] sm:$0xf] %v3069_v20  ;;  %v3109_v3 = vshll.u32 %v5737_v52, 16  ;;  %v3114_v22 = vshrl.u32 %v5739_v31, 16 }
 0x2dd   : > { %v3095_v35 = vrot.slane %v3091_v44, 4  ;;  %v5903_v14 = vor.u32 %v3092_v17, %v3091_v44  ;;  %v5905_v34 = vrot.slane %v3097_v47, 7  ;;  %v3117_v12 = vshll.u32 %v5739_v31, 16  ;;  %v3712_v17 = vld [vmem:[%s5332_s11 + $0x14] sm:$0x1] }
 0x2de   : > { %v3086_v63 = vsel %vm5754_vm9, %v3078_v16, %v3085_v9  ;;  %v3108_v36 = vrot.slane %v3106_v8, 7  ;;  %v3123_v42 = vshrl.u32 %v5741_v48, 16  ;;  %v5915_v49 = vrot.slane %v3114_v22, 7  ;;  %v3714_v47 = vld [vmem:[%s5332_s11 + $0x18] sm:$0xf] }
 0x2df   : > { %v3102_v38 = vor.u32 %v3100_v18, %v5905_v34  ;;  %v3126_v52 = vshll.u32 %v5741_v48, 16  ;;  %3766 = vst [vmem:[%s5332_s11 + $0x94] sm:$0xf] %v3086_v63  ;;  %v3131_v31 = vshrl.u32 %v5743_v13, 16  ;;  %vm6165_vm12 = vcmask 1043456  }
 0x2e0   : > { %v5920_v44 = vor.u32 %v3109_v3, %v3108_v36  ;;  %v3112_v16 = vrot.slane %v3108_v36, 4  ;;  %v3125_v20 = vrot.slane %v3123_v42, 7  ;;  %vm5927_vm13 = vmand %vm6165_vm12, %vm3206_vm10  ;;  %v3119_v9 = vor.u32 %v3117_v12, %v5915_v49  ;;  %v3717_v22 = vld [vmem:[%s5332_s11 + $0x20] sm:$0x1]  ;;  %v3719_v63 = vld [vmem:[%s5332_s11 + $0x24] sm:$0xf] }
 0x2e1   : > { %v3103_v48 = vsel %vm5754_vm9, %v3095_v35, %v3102_v38  ;;  %v3134_v3 = vshll.u32 %v5743_v13, 16  ;;  %v5940_v56 = vrot.slane %v3131_v31, 7  ;;  %v3140_v50 = vshrl.u32 %v5745_v10, 16  ;;  %v3722_v13 = vld [vmem:[%s5332_s11 + $0x2c] sm:$0x1] }
 0x2e2   : > { %v5938_v36 = vor.u32 %v3126_v52, %v3125_v20  ;;  %v3129_v42 = vrot.slane %v3125_v20, 4  ;;  %v3724_v12 = vld [vmem:[%s5332_s11 + $0x30] sm:$0xf]  ;;  %3771 = vst [vmem:[%s5332_s11 + $0xa0] sm:$0xf] %v3103_v48  ;;  %v3120_v38 = vsel %vm5754_vm9, %v3112_v16, %v3119_v9  ;;  %v3143_v52 = vshll.u32 %v5745_v10, 16 }
 0x2e3   : > { %v3148_v20 = vshrl.u32 %v5747_v25, 16  ;;  %v3151_v31 = vshll.u32 %v5747_v25, 16  ;;  %v3727_v8 = vld [vmem:[%s5332_s11 + $0x38] sm:$0x1]  ;;  %v3136_v48 = vor.u32 %v3134_v3, %v5940_v56  ;;  %v3138_v51 = vrot.slane %v5940_v56, 4 }
 0x2e4   : > { %v3142_v62 = vrot.slane %v3140_v50, 7  ;;  %v3209_v10 = vsel %vm5927_vm13, %v5758_v30, %v3709_v4  ;;  %v3737_v16 = vld [vmem:[%s5332_s11 + $0x50] sm:$0x1]  ;;  %v3739_v25 = vld [vmem:[%s5332_s11 + $0x54] sm:$0xf]  ;;  %v3215_v50 = vsel %vm5945_vm4, %v2900_v11, %v3712_v17  ;;  %v3218_v30 = vsel %vm5927_vm13, %v5764_v19, %v3714_v47 }
 0x2e5   : > { %v3742_v9 = vld [vmem:[%s5332_s11 + $0x5c] sm:$0x1]  ;;  %3776 = vst [vmem:[%s5332_s11 + $0xac] sm:$0xf] %v3120_v38  ;;  %v5970_v55 = vrot.slane %v3148_v20, 7  ;;  %v3222_v4 = vsel %vm5945_vm4, %v2917_v33, %v3717_v22  ;;  %v3137_v39 = vsel %vm5754_vm9, %v3129_v42, %v3136_v48  ;;  %v3225_v46 = vsel %vm5927_vm13, %v5768_v37, %v3719_v63 }
 0x2e6   : > { %3710 = vst [vmem:[%s5332_s11 + $0xc] sm:$0xf] %v3209_v10  ;;  %v3744_v3 = vld [vmem:[%s5332_s11 + $0x60] sm:$0xf]  ;;  %v3747_v38 = vld [vmem:[%s5332_s11 + $0x68] sm:$0x1]  ;;  %v5989_v11 = vor.u32 %v3143_v52, %v3142_v62  ;;  %v3232_v37 = vsel %vm5927_vm13, %v5793_v27, %v3724_v12  ;;  %v3236_v59 = vsel %vm5945_vm4, %v2951_v54, %v3727_v8  ;;  %v3243_v27 = vsel %vm5945_vm4, %v2968_v1, %v3732_v45 }
 0x2e7   : > { %v3749_v20 = vld [vmem:[%s5332_s11 + $0x6c] sm:$0xf]  ;;  %v3146_v17 = vrot.slane %v3142_v62, 4  ;;  %3713 = vst [vmem:[%s5332_s11 + $0x14] sm:$0x1] %v3215_v50  ;;  %v3153_v47 = vor.u32 %v3151_v31, %v5970_v55  ;;  %v3155_v22 = vrot.slane %v5970_v55, 4  ;;  %v3229_v62 = vsel %vm5945_vm4, %v2934_v5, %v3722_v13 }
 0x2e8   : > { %3715 = vst [vmem:[%s5332_s11 + $0x18] sm:$0xf] %v3218_v30  ;;  %3718 = vst [vmem:[%s5332_s11 + $0x20] sm:$0x1] %v3222_v4  ;;  %v3752_v19 = vld [vmem:[%s5332_s11 + $0x74] sm:$0x1]  ;;  %v3239_v5 = vsel %vm5927_vm13, %v5801_v2, %v3729_v61  ;;  %v3246_v21 = vsel %vm5927_vm13, %v5817_v53, %v3734_v6  ;;  %v3253_v1 = vsel %vm5927_vm13, %v5831_v43, %v3739_v25 }
 0x2e9   : > { %v3754_v33 = vld [vmem:[%s5332_s11 + $0x78] sm:$0xf]  ;;  %3720 = vst [vmem:[%s5332_s11 + $0x24] sm:$0xf] %v3225_v46  ;;  %v3757_v63 = vld [vmem:[%s5332_s11 + $0x80] sm:$0x1]  ;;  %v3154_v12 = vsel %vm5754_vm9, %v3146_v17, %v3153_v47  ;;  %v3260_v61 = vsel %vm5927_vm13, %v5845_v15, %v3744_v3  ;;  %v3267_v52 = vsel %vm5927_vm13, %v5858_v26, %v3749_v20 }
 0x2ea   : > { %v3759_v42 = vld [vmem:[%s5332_s11 + $0x84] sm:$0xf]  ;;  %3781 = vst [vmem:[%s5332_s11 + $0xb8] sm:$0xf] %v3137_v39  ;;  %3723 = vst [vmem:[%s5332_s11 + $0x2c] sm:$0x1] %v3229_v62 }
 0x2eb   : > { %3725 = vst [vmem:[%s5332_s11 + $0x30] sm:$0xf] %v3232_v37  ;;  %v3762_v13 = vld [vmem:[%s5332_s11 + $0x8c] sm:$0x1]  ;;  %v3764_v54 = vld [vmem:[%s5332_s11 + $0x90] sm:$0xf]  ;;  %v3281_v25 = vsel %vm5927_vm13, %v5885_v29, %v3759_v42 }
 0x2ec   : > { %v3767_v8 = vld [vmem:[%s5332_s11 + $0x98] sm:$0x1]  ;;  %3728 = vst [vmem:[%s5332_s11 + $0x38] sm:$0x1] %v3236_v59  ;;  %3730 = vst [vmem:[%s5332_s11 + $0x3c] sm:$0xf] %v3239_v5 }
 0x2ed   : > { %3733 = vst [vmem:[%s5332_s11 + $0x44] sm:$0x1] %v3243_v27  ;;  %3735 = vst [vmem:[%s5332_s11 + $0x48] sm:$0xf] %v3246_v21  ;;  %v6170_v23 = vrot.slane %v5809_v57, 4  ;;  %v6171_v32 = vrot.slane %v5824_v60, 4 }
 0x2ee   : > { %v3769_v6 = vld [vmem:[%s5332_s11 + $0x9c] sm:$0xf]  ;;  %v3772_v45 = vld [vmem:[%s5332_s11 + $0xa4] sm:$0x1]  ;;  %v3774_v57 = vld [vmem:[%s5332_s11 + $0xa8] sm:$0xf] }
 0x2ef   : > { %v3250_v2 = vsel %vm5945_vm4, %v6170_v23, %v3737_v16  ;;  %v3257_v53 = vsel %vm5945_vm4, %v6171_v32, %v3742_v9  ;;  %3740 = vst [vmem:[%s5332_s11 + $0x54] sm:$0xf] %v3253_v1  ;;  %v6172_v43 = vrot.slane %v5836_v41, 4  ;;  %v6173_v31 = vrot.slane %v5849_v58, 4  ;;  %v3777_v10 = vld [vmem:[%s5332_s11 + $0xb0] sm:$0x1] }
 0x2f0   : > { %3738 = vst [vmem:[%s5332_s11 + $0x50] sm:$0x1] %v3250_v2  ;;  %3743 = vst [vmem:[%s5332_s11 + $0x5c] sm:$0x1] %v3257_v53  ;;  %v3779_v15 = vld [vmem:[%s5332_s11 + $0xb4] sm:$0xf]  ;;  %v3274_v58 = vsel %vm5927_vm13, %v5872_v0, %v3754_v33  ;;  %v3295_v29 = vsel %vm5927_vm13, %v5903_v14, %v3769_v6 }
 0x2f1   : > { %v3264_v60 = vsel %vm5945_vm4, %v6172_v43, %v3747_v38  ;;  %v3271_v48 = vsel %vm5945_vm4, %v6173_v31, %v3752_v19  ;;  %v3782_v41 = vld [vmem:[%s5332_s11 + $0xbc] sm:$0x1]  ;;  %3786 = vst [vmem:[%s5332_s11 + $0xc4] sm:$0xf] %v3154_v12  ;;  %3745 = vst [vmem:[%s5332_s11 + $0x60] sm:$0xf] %v3260_v61 }
 0x2f2   : > { %3748 = vst [vmem:[%s5332_s11 + $0x68] sm:$0x1] %v3264_v60  ;;  %3750 = vst [vmem:[%s5332_s11 + $0x6c] sm:$0xf] %v3267_v52  ;;  %v6174_v26 = vrot.slane %v5863_v28, 4  ;;  %v6175_v9 = vrot.slane %v5877_v24, 4  ;;  %v3288_v28 = vsel %vm5927_vm13, %v5890_v40, %v3764_v54  ;;  %v3302_v40 = vsel %vm5927_vm13, %v5920_v44, %v3774_v57 }
 0x2f3   : > { %3753 = vst [vmem:[%s5332_s11 + $0x74] sm:$0x1] %v3271_v48  ;;  %v3784_v30 = vld [vmem:[%s5332_s11 + $0xc0] sm:$0xf]  ;;  %v3787_v4 = vld [vmem:[%s5332_s11 + $0xc8] sm:$0x1]  ;;  %v3313_v20 = vsel %vm5945_vm4, %v3138_v51, %v3782_v41 }
 0x2f4   : > { %v3278_v16 = vsel %vm5945_vm4, %v6174_v26, %v3757_v63  ;;  %v3285_v50 = vsel %vm5945_vm4, %v6175_v9, %v3762_v13  ;;  %3755 = vst [vmem:[%s5332_s11 + $0x78] sm:$0xf] %v3274_v58  ;;  %3760 = vst [vmem:[%s5332_s11 + $0x84] sm:$0xf] %v3281_v25  ;;  %v6176_v0 = vrot.slane %v5892_v7, 4  ;;  %v6177_v3 = vrot.slane %v5905_v34, 4 }
 0x2f5   : > { %3758 = vst [vmem:[%s5332_s11 + $0x80] sm:$0x1] %v3278_v16  ;;  %3763 = vst [vmem:[%s5332_s11 + $0x8c] sm:$0x1] %v3285_v50  ;;  %v6178_v7 = vrot.slane %v5915_v49, 4  ;;  %v3309_v34 = vsel %vm5927_vm13, %v5938_v36, %v3779_v15  ;;  %v3316_v49 = vsel %vm5927_vm13, %v5989_v11, %v3784_v30  ;;  %v3320_v44 = vsel %vm5945_vm4, %v3155_v22, %v3787_v4 }
 0x2f6   : > { %v3292_v24 = vsel %vm5945_vm4, %v6176_v0, %v3767_v8  ;;  %v3299_v38 = vsel %vm5945_vm4, %v6177_v3, %v3772_v45  ;;  %3765 = vst [vmem:[%s5332_s11 + $0x90] sm:$0xf] %v3288_v28  ;;  %3770 = vst [vmem:[%s5332_s11 + $0x9c] sm:$0xf] %v3295_v29 }
 0x2f7   : > { %3768 = vst [vmem:[%s5332_s11 + $0x98] sm:$0x1] %v3292_v24  ;;  %3773 = vst [vmem:[%s5332_s11 + $0xa4] sm:$0x1] %v3299_v38  ;;  %v3306_v14 = vsel %vm5945_vm4, %v6178_v7, %v3777_v10 }
 0x2f8   : > { %3775 = vst [vmem:[%s5332_s11 + $0xa8] sm:$0xf] %v3302_v40  ;;  %3778 = vst [vmem:[%s5332_s11 + $0xb0] sm:$0x1] %v3306_v14 }
 0x2f9   : > { %3780 = vst [vmem:[%s5332_s11 + $0xb4] sm:$0xf] %v3309_v34  ;;  %3783 = vst [vmem:[%s5332_s11 + $0xbc] sm:$0x1] %v3313_v20 }
 0x2fa   : > { %3785 = vst [vmem:[%s5332_s11 + $0xc0] sm:$0xf] %v3316_v49  ;;  %3788 = vst [vmem:[%s5332_s11 + $0xc8] sm:$0x1] %v3320_v44 }
 0x2fb PF: > { %s13_s12 = sadd.s32 1, %s4073_s12  }
 0x2fc   : > { %p10_p4 = scmp.ge.s32.totalorder %s13_s12, 4  }
 0x2fe   :  { %12 = sbr.rel (!%p10_p4) target bundleno = 1 (0x1), region = 65 }

// kernel: _lambda_.6
= control target key start
LH: loop header
LB: loop body
LE: loop exit
PB: predicated region body
PF: predicated region fallthrough
CT: control target
= control target key end

     0   :  { %s4074_s12 = smov 0   ;;  %s6077_s0 = inlined_call_operand.vmem [shape: bf16[2,18,18,4], index: 0, kind: input, shape index: {}]   ;;  %s6078_s1 = inlined_call_operand.vmem [shape: bf16[36,128], index: 1, kind: input, shape index: {}]   ;;  %s6079_s2 = inlined_call_operand.vmem [shape: f32[8,128], index: 2, kind: input, shape index: {}]   ;;  %s6080_s3 = inlined_call_operand.vmem [shape: bf16[2,18,18,128], index: 3, kind: output, shape index: {}]  }
   0x1 LB: > { %s3361_s13 = sadd.s32 4294967295, %s4043_s12   ;;  %p3365_p0 = scmp.ge.s32.totalorder %s4043_s12, 1  ;;  %s4043_s12 = sphi %s4074_s12, %s13_s12  }
   0x2   : > { %p137_p1 = scmp.lt.s32.totalorder %s4043_s12, 3 }
   0x4   : > { %p138_p2 = pnand %p3365_p0, %p137_p1 }
   0x5   : > { %p161_p3 = scmp.lt.s32.totalorder (!%p138_p2), %s3361_s13, 1  ;;  %vm767_vm0 = vcmask (!%p138_p2), 1046528   ;;  %s4045_s18 = smov (!%p138_p2), 12   ;;  %vm494_vm1 = vsmask.f32 (!%p138_p2), 7424  ;;  %v3966_v57 = vld [vmem:[%s6078_s1] sm:$0xff] (!%p138_p2)  }
   0x6   : > { %141 = sbr.rel (%p138_p2) target bundleno = 763 (0x2fb), region = 32  ;;  %s4046_s19 = smov (!%p138_p2), 20   ;;  %3824 = vmatprep.subr.bf16.mxu0 (!%p138_p2), %v3966_v57  ;;  %3862 = vmatprep.subr.bf16.mxu1 (!%p138_p2), %v3966_v57  ;;  %vm2189_vm2 = vcmask (!%p138_p2), 1041408   ;;  %vm1872_vm3 = vcmask (!%p138_p2), 31744   ;;  %vm1905_vm4 = vcmask (!%p138_p2), 64512   ;;  %vm1938_vm5 = vcmask (!%p138_p2), 97280  }
   0x7   : > { %s4047_s20 = smov (!%p138_p2), 8   ;;  %s4048_s23 = smov (!%p138_p2), 4   ;;  %3825 = vmatpush3.bf16.msra.mxu0 (!%p138_p2), %v3966_v57  ;;  %3865 = vmatpush3.bf16.msra.mxu1 (!%p138_p2), %v3966_v57  ;;  %vm1971_vm6 = vcmask (!%p138_p2), 130048   ;;  %vm2004_vm7 = vcmask (!%p138_p2), 162816   ;;  %vm2037_vm8 = vcmask (!%p138_p2), 195584   ;;  %vm2070_vm9 = vcmask (!%p138_p2), 228352  }
   0x8   : > { %s4049_s26 = smov (!%p138_p2), 16   ;;  %s4050_s27 = smov (!%p138_p2), 24   ;;  %vm2103_vm10 = vcmask (!%p138_p2), 261120   ;;  %vm2156_vm11 = vcmask (!%p138_p2), 293888  }
   0x9   : > { %s4051_s28 = smov (!%p138_p2), 28   ;;  %s4052_s29 = smov (!%p138_p2), 32  }
   0xd   : > { %s6111_s13 = smov (!%p161_p3, %s3361_s13), 1 }
   0xe   : > { %s3870_s14 = smul.u32 216, %s6111_s13 }
  0x10   : > { %s4090_s17 = scalar_lea.vmem %s6077_s0, %s3870_s14  ;;  %s5265_s7 = scalar_lea.vmem %s6080_s3, %s3870_s14 }
  0x11   : > { %v3370_v0 = vld [vmem:[%s4090_s17 + $0x18] sm:$0xf]  ;;  %v3371_v1 = vld [vmem:[%s4090_s17 + $0x1c] sm:$0xf]  ;;  %v3368_v5 = vld [vmem:[%s4090_s17 + $0xc] sm:$0xf] }
  0x12   : > { %v3417_v2 = vld [vmem:[%s4090_s17 + $0x18] sm:$0xe]  ;;  %v4095_v3 = vcombine.low %v3370_v0, %v3371_v1  ;;  %v3369_v6 = vld [vmem:[%s4090_s17 + $0x10] sm:$0xf]  ;;  %v3416_v7 = vld [vmem:[%s4090_s17 + $0xc] sm:$0xe] }
  0x13   : > { %v3577_v4 = vcombine.low %v3417_v2, %v3371_v1  ;;  %v4100_v8 = vcombine.low %v3368_v5, %v3369_v6  ;;  %v3576_v9 = vcombine.low %v3416_v7, %v3369_v6  ;;  %v4103_v10 = vld [vmem:[%s4090_s17 + $0x14] ss:$0 sps:$4 sm:$0x11]   ;;  %v173_v12 = vld [vmem:[%s4090_s17 + $0x4] sm:$0xf] }
  0x14   : > { %930 = vrot.lane.b32.xlu1 %v4095_v3, %s4045_s18  ;;  %v1023_v11 = vshll.u32 %v4095_v3, 16  ;;  %v1281_v15 = vrot.slane %v4103_v10, 1  ;;  %v220_v16 = vld [vmem:[%s4090_s17] sm:$0xe]  ;;  %v1021_v21 = vshrl.u32 %v4095_v3, 16  ;;  %v1016_v60 = vshll.u32 %v4103_v10, 16 }
  0x15   : > { %928 = vrot.lane.b32.xlu0 %v4100_v8, %s4045_s18  ;;  %v1011_v13 = vshll.u32 %v4100_v8, 16  ;;  %v1280_v14 = vrot.slane %v3576_v9, 1  ;;  %v1283_v17 = vrot.slane %v3577_v4, 1  ;;  %v3893_v18 = vld [vmem:[%s4090_s17 + $0x8] ss:$0 sps:$4 sm:$0x11]   ;;  %v3528_v19 = vcombine.low %v220_v16, %v173_v12 }
  0x16   : > { %v172_v20 = vld [vmem:[%s4090_s17] sm:$0xf]  ;;  %v174_v24 = vld [vmem:[%s4090_s17 + $0xc] sm:$0xf]  ;;  %v175_v25 = vld [vmem:[%s4090_s17 + $0x10] sm:$0xf] }
  0x17   : > { %v1282_v22 = vsel %vm767_vm0, %v1280_v14, %v1281_v15  ;;  %v4118_v23 = vcombine.low %v172_v20, %v173_v12  ;;  %v768_v26 = vrot.slane %v3528_v19, 1  ;;  %v769_v27 = vrot.slane %v3893_v18, 1  ;;  %v221_v28 = vld [vmem:[%s4090_s17 + $0xc] sm:$0xe]  ;;  %v3434_v43 = vld [vmem:[%s4090_s17 + $0x24] sm:$0xf] }
  0x18   : > { %v4123_v29 = vcombine.low %v174_v24, %v175_v25  ;;  %v503_v30 = vshll.u32 %v3893_v18, 16  ;;  %v3897_v31 = vld [vmem:[%s4090_s17 + $0x14] ss:$0 sps:$4 sm:$0x11]   ;;  %v3529_v32 = vcombine.low %v221_v28, %v175_v25  ;;  %v1025_v35 = vrot.slane %v1023_v11, 1  ;;  %v3971_v12 = vld [vmem:[%s6078_s1 + $0x8] sm:$0xff]  }
  0x19   : > { %1328 = vrot.lane.b32.xlu0 %v1282_v22, %s4046_s19  ;;  %v496_v33 = vshrl.u32 %v4118_v23, 16  ;;  %v498_v34 = vshll.u32 %v4118_v23, 16  ;;  %v770_v36 = vsel %vm767_vm0, %v768_v26, %v769_v27  ;;  %v3899_v38 = vld [vmem:[%s4090_s17 + $0x20] ss:$0 sps:$4 sm:$0x11]   ;;  %v772_v40 = vrot.slane %v3897_v31, 1  ;;  %3826 = vmatprep.subr.bf16.mxu0 %v3971_v12 }
  0x1a   : > { %v505_v37 = vrot.slane %v503_v30, 1  ;;  %816 = vrot.lane.b32.xlu1 %v770_v36, %s4047_s20  ;;  %v771_v39 = vrot.slane %v3529_v32, 1  ;;  %v508_v42 = vshrl.u32 %v4123_v29, 16  ;;  %v1284_v44 = vrot.slane %v3899_v38, 1  ;;  %v4136_v48 = vld [vmem:[%s4090_s17 + $0x28] sm:$0xf]  ;;  %3863 = vmatprep.subr.bf16.mxu1 %v3971_v12 }
  0x1b   : > { %v500_v41 = vrot.slane %v498_v34, 1  ;;  %v510_v45 = vshll.u32 %v4123_v29, 16  ;;  %v515_v46 = vshll.u32 %v3897_v31, 16  ;;  %v1028_v47 = vshll.u32 %v3899_v38, 16  ;;  %v3432_v53 = vld [vmem:[%s4090_s17 + $0x18] sm:$0xf]  ;;  %3827 = vmatpush3.bf16.msra.mxu0 %v3971_v12  ;;  %3866 = vmatpush3.bf16.msra.mxu1 %v3971_v12 }
  0x1c   : > { %v773_v49 = vsel %vm767_vm0, %v771_v39, %v772_v40  ;;  %v1009_v51 = vshrl.u32 %v4100_v8, 16  ;;  %v1013_v52 = vrot.slane %v1011_v13, 1  ;;  %v4142_v56 = vld [vmem:[%s4090_s17 + $0x1c] sm:$0xf]  ;;  %v1026_v59 = vor.u32 %v1025_v35, %v1021_v21  ;;  %v3480_v6 = vld [vmem:[%s4090_s17 + $0x18] sm:$0xe] }
  0x1d   : > { %v501_v50 = vor.u32 %v500_v41, %v496_v33  ;;  %v512_v54 = vrot.slane %v510_v45, 1  ;;  %v517_v55 = vrot.slane %v515_v46, 1  ;;  %v3593_v61 = vcombine.low %v3434_v43, %v4136_v48  ;;  %v4155_v2 = vld [vmem:[%s4090_s17 + $0x2c] ss:$0 sps:$4 sm:$0x11]  }
  0x1e   : > { %818 = vrot.lane.b32.xlu1 %v773_v49, %s4047_s20  ;;  %v1285_v62 = vsel %vm767_vm0, %v1283_v17, %v1284_v44  ;;  %v1030_v0 = vrot.slane %v1028_v47, 1  ;;  %v3592_v1 = vcombine.low %v3432_v53, %v4142_v56  ;;  %v1014_v3 = vor.u32 %v1013_v52, %v1009_v51  ;;  %v4159_v7 = vld [vmem:[%s4090_s17 + $0x20] ss:$0 sps:$4 sm:$0x11]   ;;  %v176_v11 = vld [vmem:[%s4090_s17 + $0x18] sm:$0xf] }
  0x1f   : > { %v506_v58 = vsel %vm494_vm1, %v501_v50, %v505_v37  ;;  %v513_v63 = vor.u32 %v512_v54, %v508_v42  ;;  %v1018_v4 = vrot.slane %v1016_v60, 1  ;;  %v1535_v5 = vshll.u32 %v3593_v61, 16  ;;  %v4169_v15 = vld [vmem:[%s4090_s17 + $0x1c] sm:$0xf]  ;;  %v178_v24 = vld [vmem:[%s4090_s17 + $0x24] sm:$0xf] }
  0x20   : > { %687 = vrot.lane.b32.xlu0 %v506_v58, %s4048_s23  ;;  %v1523_v9 = vshll.u32 %v3592_v1, 16  ;;  %v1533_v10 = vshrl.u32 %v3593_v61, 16  ;;  %v1540_v14 = vshll.u32 %v4155_v2, 16  ;;  %v1031_v16 = vsel %vm494_vm1, %v1026_v59, %v1030_v0  ;;  %v4177_v19 = vld [vmem:[%s4090_s17 + $0x20] ss:$0 sps:$4 sm:$0x11]  }
  0x21   : > { %v518_v8 = vsel %vm494_vm1, %v513_v63, %v517_v55  ;;  %v1537_v13 = vrot.slane %v1535_v5, 1  ;;  %v1521_v17 = vshrl.u32 %v3592_v1, 16  ;;  %v4174_v18 = vcombine.low %v176_v11, %v4169_v15  ;;  %v179_v25 = vld [vmem:[%s4090_s17 + $0x28] sm:$0xf]  ;;  %v3481_v39 = vld [vmem:[%s4090_s17 + $0x24] sm:$0xe] }
  0x22   : > { %1330 = vrot.lane.b32.xlu1 %v1285_v62, %s4046_s19  ;;  %v1019_v20 = vsel %vm494_vm1, %v1014_v3, %v1018_v4  ;;  %v1525_v21 = vrot.slane %v1523_v9, 1  ;;  %v1528_v22 = vshll.u32 %v4159_v7, 16  ;;  %v3624_v26 = vcombine.low %v3480_v6, %v4142_v56  ;;  %v3909_v35 = vld [vmem:[%s4090_s17 + $0x2c] ss:$0 sps:$4 sm:$0x11]  }
  0x23   : > { %v522_v27 = vshll.u32 %v4174_v18, 16  ;;  %v1538_v28 = vor.u32 %v1537_v13, %v1533_v10  ;;  %v1542_v30 = vrot.slane %v1540_v14, 1  ;;  %v527_v31 = vshll.u32 %v4177_v19, 16  ;;  %v223_v44 = vld [vmem:[%s4090_s17 + $0x24] sm:$0xe] }
  0x24   : > { %689 = vrot.lane.b32.xlu0 %v518_v8, %s4048_s23  ;;  %v4187_v32 = vcombine.low %v178_v24, %v179_v25  ;;  %v520_v33 = vshrl.u32 %v4174_v18, 16  ;;  %v1526_v36 = vor.u32 %v1525_v21, %v1521_v17  ;;  %v1530_v37 = vrot.slane %v1528_v22, 1  ;;  %v222_v50 = vld [vmem:[%s4090_s17 + $0x18] sm:$0xe]  ;;  %v3374_v53 = vld [vmem:[%s4090_s17 + $0x30] sm:$0xf] }
  0x25   : > { %v524_v34 = vrot.slane %v522_v27, 1  ;;  %v1543_v40 = vsel %vm494_vm1, %v1538_v28, %v1542_v30  ;;  %v529_v41 = vrot.slane %v527_v31, 1  ;;  %v1792_v42 = vrot.slane %v3624_v26, 1  ;;  %v3375_v54 = vld [vmem:[%s4090_s17 + $0x34] sm:$0xf] }
  0x26   : > { %1202 = vrot.lane.b32.xlu1 %v1031_v16, %s4049_s26  ;;  %v534_v38 = vshll.u32 %v4187_v32, 16  ;;  %v1793_v43 = vrot.slane %v4159_v7, 1  ;;  %v532_v46 = vshrl.u32 %v4187_v32, 16  ;;  %v539_v49 = vshll.u32 %v3909_v35, 16  ;;  %v3372_v55 = vld [vmem:[%s4090_s17 + $0x24] sm:$0xf] }
  0x27   : > { %v525_v45 = vor.u32 %v524_v34, %v520_v33  ;;  %v3625_v51 = vcombine.low %v3481_v39, %v4136_v48  ;;  %v1531_v52 = vsel %vm494_vm1, %v1526_v36, %v1530_v37  ;;  %v3373_v56 = vld [vmem:[%s4090_s17 + $0x28] sm:$0xf]  ;;  %v3531_v58 = vcombine.low %v223_v44, %v179_v25  ;;  %v4215_v3 = vld [vmem:[%s4090_s17 + $0x38] ss:$0 sps:$4 sm:$0x11]  }
  0x28   : > { %1200 = vrot.lane.b32.xlu0 %v1019_v20, %s4049_s26  ;;  %v536_v47 = vrot.slane %v534_v38, 1  ;;  %v1794_v57 = vsel %vm767_vm0, %v1792_v42, %v1793_v43  ;;  %v3547_v48 = vcombine.low %v3374_v53, %v3375_v54  ;;  %v1796_v63 = vrot.slane %v4155_v2, 1  ;;  %v3917_v11 = vld [vmem:[%s4090_s17 + $0x2c] ss:$0 sps:$4 sm:$0x11]  }
  0x29   : > { %v530_v59 = vsel %vm494_vm1, %v525_v45, %v529_v41  ;;  %v1795_v62 = vrot.slane %v3625_v51, 1  ;;  %v3530_v0 = vcombine.low %v222_v50, %v4169_v15  ;;  %v777_v5 = vrot.slane %v3531_v58, 1  ;;  %v3419_v12 = vld [vmem:[%s4090_s17 + $0x30] sm:$0xe]  ;;  %v3418_v13 = vld [vmem:[%s4090_s17 + $0x24] sm:$0xe] }
  0x2a   : > { %1442 = vrot.lane.b32.xlu1 %v3593_v61, %s4050_s27  ;;  %v537_v60 = vor.u32 %v536_v47, %v532_v46  ;;  %v541_v61 = vrot.slane %v539_v49, 1  ;;  %v778_v6 = vrot.slane %v3909_v35, 1  ;;  %v1047_v7 = vshll.u32 %v3547_v48, 16  ;;  %v3438_v21 = vld [vmem:[%s4090_s17 + $0x3c] sm:$0xf] }
  0x2b   : > { %v1797_v2 = vsel %vm767_vm0, %v1795_v62, %v1796_v63  ;;  %v774_v8 = vrot.slane %v3530_v0, 1  ;;  %v775_v9 = vrot.slane %v4177_v19, 1  ;;  %v1045_v14 = vshrl.u32 %v3547_v48, 16  ;;  %v4230_v22 = vld [vmem:[%s4090_s17 + $0x40] sm:$0xf] }
  0x2c   : > { %1440 = vrot.lane.b32.xlu0 %v3592_v1, %s4050_s27  ;;  %v3546_v1 = vcombine.low %v3372_v55, %v3373_v56  ;;  %v542_v4 = vsel %vm494_vm1, %v537_v60, %v541_v61  ;;  %v1052_v15 = vshll.u32 %v4215_v3, 16  ;;  %v779_v16 = vsel %vm767_vm0, %v777_v5, %v778_v6  ;;  %v3436_v26 = vld [vmem:[%s4090_s17 + $0x30] sm:$0xf]  ;;  %v3437_v27 = vld [vmem:[%s4090_s17 + $0x34] sm:$0xf] }
  0x2d   : > { %v1049_v17 = vrot.slane %v1047_v7, 1  ;;  %v776_v19 = vsel %vm767_vm0, %v774_v8, %v775_v9  ;;  %v1040_v25 = vshll.u32 %v3917_v11, 16  ;;  %v3579_v28 = vcombine.low %v3419_v12, %v3375_v54  ;;  %v180_v38 = vld [vmem:[%s4090_s17 + $0x30] sm:$0xf]  ;;  %v4240_v39 = vld [vmem:[%s4090_s17 + $0x34] sm:$0xf] }
  0x2e   : > { %1714 = vrot.lane.b32.xlu1 %v1543_v40, %s4051_s28  ;;  %v1035_v10 = vshll.u32 %v3546_v1, 16  ;;  %v1033_v20 = vshrl.u32 %v3546_v1, 16  ;;  %v3578_v30 = vcombine.low %v3418_v13, %v3373_v56  ;;  %v3595_v31 = vcombine.low %v3438_v21, %v4230_v22  ;;  %v4245_v45 = vld [vmem:[%s4090_s17 + $0x44] ss:$0 sps:$4 sm:$0x11]  }
  0x2f   : > { %v1050_v33 = vor.u32 %v1049_v17, %v1045_v14  ;;  %v1054_v34 = vrot.slane %v1052_v15, 1  ;;  %v3594_v35 = vcombine.low %v3436_v26, %v3437_v27  ;;  %v1042_v37 = vrot.slane %v1040_v25, 1  ;;  %v3923_v49 = vld [vmem:[%s4090_s17 + $0x38] ss:$0 sps:$4 sm:$0x11]  }
  0x30   : > { %1712 = vrot.lane.b32.xlu0 %v1531_v52, %s4051_s28  ;;  %v1037_v24 = vrot.slane %v1035_v10, 1  ;;  %v1289_v40 = vrot.slane %v3579_v28, 1  ;;  %v1290_v41 = vrot.slane %v4215_v3, 1  ;;  %v1286_v42 = vrot.slane %v3578_v30, 1  ;;  %v182_v52 = vld [vmem:[%s4090_s17 + $0x3c] sm:$0xf] }
  0x31   : > { %v1287_v43 = vrot.slane %v3917_v11, 1  ;;  %v1559_v44 = vshll.u32 %v3595_v31, 16  ;;  %v1055_v46 = vsel %vm494_vm1, %v1050_v33, %v1054_v34  ;;  %v1547_v47 = vshll.u32 %v3594_v35, 16  ;;  %v183_v53 = vld [vmem:[%s4090_s17 + $0x40] sm:$0xf] }
  0x32   : > { %691 = vrot.lane.b32.xlu1 %v530_v59, %s4048_s23  ;;  %v1038_v36 = vor.u32 %v1037_v24, %v1033_v20  ;;  %v4251_v50 = vcombine.low %v180_v38, %v4240_v39  ;;  %v1557_v54 = vshrl.u32 %v3595_v31, 16  ;;  %v1564_v56 = vshll.u32 %v4245_v45, 16  ;;  %v3482_v59 = vld [vmem:[%s4090_s17 + $0x30] sm:$0xe]  ;;  %v225_v24 = vld [vmem:[%s4090_s17 + $0x3c] sm:$0xe] }
  0x33   : > { %v1561_v55 = vrot.slane %v1559_v44, 1  ;;  %v1291_v58 = vsel %vm767_vm0, %v1289_v40, %v1290_v41  ;;  %v4265_v61 = vcombine.low %v182_v52, %v183_v53  ;;  %v1545_v62 = vshrl.u32 %v3594_v35, 16  ;;  %v3927_v8 = vld [vmem:[%s4090_s17 + $0x44] ss:$0 sps:$4 sm:$0x11]  }
  0x34   : > { %1840 = vrot.lane.b32.xlu0 %v1794_v57, %s4052_s29  ;;  %v1043_v51 = vsel %vm494_vm1, %v1038_v36, %v1042_v37  ;;  %v4259_v57 = vld [vmem:[%s4090_s17 + $0x38] ss:$0 sps:$4 sm:$0x11]   ;;  %v546_v60 = vshll.u32 %v4251_v50, 16  ;;  %v1549_v63 = vrot.slane %v1547_v47, 1  ;;  %v1552_v0 = vshll.u32 %v3923_v49, 16 }
  0x35   : > { %v3626_v3 = vcombine.low %v3482_v59, %v3437_v27  ;;  %v1566_v5 = vrot.slane %v1564_v56, 1  ;;  %v551_v6 = vshll.u32 %v4259_v57, 16  ;;  %v544_v7 = vshrl.u32 %v4251_v50, 16  ;;  %v3379_v26 = vld [vmem:[%s4090_s17 + $0x4c] sm:$0xf] }
  0x36   : > { %693 = vrot.lane.b32.xlu1 %v542_v4, %s4048_s23  ;;  %v1562_v4 = vor.u32 %v1561_v55, %v1557_v54  ;;  %v558_v9 = vshll.u32 %v4265_v61, 16  ;;  %v1550_v10 = vor.u32 %v1549_v63, %v1545_v62  ;;  %v1554_v11 = vrot.slane %v1552_v0, 1  ;;  %v224_v27 = vld [vmem:[%s4090_s17 + $0x30] sm:$0xe]  ;;  %v3376_v28 = vld [vmem:[%s4090_s17 + $0x3c] sm:$0xf] }
  0x37   : > { %v553_v14 = vrot.slane %v551_v6, 1  ;;  %v1798_v15 = vrot.slane %v3626_v3, 1  ;;  %v556_v20 = vshrl.u32 %v4265_v61, 16  ;;  %v3377_v30 = vld [vmem:[%s4090_s17 + $0x40] sm:$0xf]  ;;  %v3533_v33 = vcombine.low %v225_v24, %v183_v53 }
  0x38   : > { %1842 = vrot.lane.b32.xlu0 %v1797_v2, %s4052_s29  ;;  %v548_v2 = vrot.slane %v546_v60, 1  ;;  %v1567_v13 = vsel %vm494_vm1, %v1562_v4, %v1566_v5  ;;  %v560_v21 = vrot.slane %v558_v9, 1  ;;  %v1555_v25 = vsel %vm494_vm1, %v1550_v10, %v1554_v11  ;;  %v3935_v53 = vld [vmem:[%s4090_s17 + $0x44] ss:$0 sps:$4 sm:$0x11]  }
  0x39   : > { %v1802_v40 = vrot.slane %v4245_v45, 1  ;;  %v3532_v41 = vcombine.low %v224_v27, %v4240_v39  ;;  %v783_v44 = vrot.slane %v3533_v33, 1  ;;  %v781_v52 = vrot.slane %v4259_v57, 1  ;;  %v3442_v54 = vld [vmem:[%s4090_s17 + $0x54] sm:$0xf] }
  0x3a   : > { %822 = vrot.lane.b32.xlu1 %v779_v16, %s4047_s20  ;;  %v1799_v16 = vrot.slane %v3923_v49, 1  ;;  %v549_v17 = vor.u32 %v548_v2, %v544_v7  ;;  %v3934_v49 = vld [vmem:[%s4090_s17 + $0x50] ss:$0 sps:$4 sm:$0x11]   ;;  %v4303_v55 = vld [vmem:[%s4090_s17 + $0x58] sm:$0xf] }
  0x3b   : > { %v780_v45 = vrot.slane %v3532_v41, 1  ;;  %v3420_v62 = vld [vmem:[%s4090_s17 + $0x3c] sm:$0xe]  ;;  %v3597_v3 = vcombine.low %v3442_v54, %v4303_v55  ;;  %v3440_v4 = vld [vmem:[%s4090_s17 + $0x48] sm:$0xf] }
  0x3c   : > { %820 = vrot.lane.b32.xlu0 %v776_v19, %s4047_s20  ;;  %v563_v19 = vshll.u32 %v3927_v8, 16  ;;  %v554_v34 = vsel %vm494_vm1, %v549_v17, %v553_v14  ;;  %v1800_v38 = vsel %vm767_vm0, %v1798_v15, %v1799_v16  ;;  %v4313_v5 = vld [vmem:[%s4090_s17 + $0x4c] sm:$0xf]  ;;  %v3580_v7 = vcombine.low %v3420_v62, %v3377_v30  ;;  %v184_v9 = vld [vmem:[%s4090_s17 + $0x48] sm:$0xf] }
  0x3d   : > { %v782_v57 = vsel %vm767_vm0, %v780_v45, %v781_v52  ;;  %v4319_v10 = vld [vmem:[%s4090_s17 + $0x4c] sm:$0xf]  ;;  %v1583_v14 = vshll.u32 %v3597_v3, 16  ;;  %v1296_v16 = vrot.slane %v3934_v49, 1  ;;  %v186_v27 = vld [vmem:[%s4090_s17 + $0x54] sm:$0xf] }
  0x3e   : > { %934 = vrot.lane.b32.xlu1 %v3547_v48, %s4045_s18  ;;  %v1288_v48 = vsel %vm767_vm0, %v1286_v42, %v1287_v43  ;;  %v565_v36 = vrot.slane %v563_v19, 1  ;;  %v3548_v42 = vcombine.low %v3376_v28, %v3377_v30  ;;  %v4324_v17 = vld [vmem:[%s4090_s17 + $0x5c] ss:$0 sps:$4 sm:$0x11]   ;;  %v1292_v19 = vrot.slane %v3580_v7, 1 }
  0x3f   : > { %v4332_v24 = vld [vmem:[%s4090_s17 + $0x50] ss:$0 sps:$4 sm:$0x11]   ;;  %v4337_v28 = vld [vmem:[%s4090_s17 + $0x58] sm:$0xf]  ;;  %v1581_v30 = vshrl.u32 %v3597_v3, 16 }
  0x40   : > { %932 = vrot.lane.b32.xlu0 %v3546_v1, %s4045_s18  ;;  %v3483_v1 = vld [vmem:[%s4090_s17 + $0x3c] sm:$0xe]  ;;  %v1059_v39 = vshll.u32 %v3548_v42, 16  ;;  %v1057_v63 = vshrl.u32 %v3548_v42, 16  ;;  %v1588_v33 = vshll.u32 %v4324_v17, 16 }
  0x41   : > { %v3627_v12 = vcombine.low %v3483_v1, %v4230_v22  ;;  %v3378_v22 = vld [vmem:[%s4090_s17 + $0x48] sm:$0xf]  ;;  %v1064_v1 = vshll.u32 %v3935_v53, 16  ;;  %v3945_v52 = vld [vmem:[%s4090_s17 + $0x5c] ss:$0 sps:$4 sm:$0x11]  }
  0x42   : > { %1206 = vrot.lane.b32.xlu1 %v1055_v46, %s4049_s26  ;;  %v3549_v37 = vcombine.low %v3378_v22, %v3379_v26  ;;  %v784_v46 = vrot.slane %v3927_v8, 1  ;;  %v1061_v0 = vrot.slane %v1059_v39, 1  ;;  %v1293_v22 = vrot.slane %v3935_v53, 1  ;;  %v3382_v62 = vld [vmem:[%s4090_s17 + $0x60] sm:$0xf] }
  0x43   : > { %v226_v7 = vld [vmem:[%s4090_s17 + $0x48] sm:$0xe] }
  0x44   : > { %1204 = vrot.lane.b32.xlu0 %v1043_v51, %s4049_s26  ;;  %v1071_v47 = vshll.u32 %v3549_v37, 16  ;;  %v785_v56 = vsel %vm767_vm0, %v783_v44, %v784_v46  ;;  %v1069_v59 = vshrl.u32 %v3549_v37, 16  ;;  %v1062_v11 = vor.u32 %v1061_v0, %v1057_v63  ;;  %v3484_v44 = vld [vmem:[%s4090_s17 + $0x48] sm:$0xe] }
  0x45   : > { %v3628_v53 = vcombine.low %v3484_v44, %v4313_v5 }
  0x46   : > { %1334 = vrot.lane.b32.xlu1 %v1291_v58, %s4046_s19  ;;  %v3421_v58 = vld [vmem:[%s4090_s17 + $0x48] sm:$0xe]  ;;  %v1073_v60 = vrot.slane %v1071_v47, 1  ;;  %v1590_v47 = vrot.slane %v1588_v33, 1 }
  0x47   : > { %v3581_v6 = vcombine.low %v3421_v58, %v3379_v26  ;;  %v3974_v58 = vld [vmem:[%s6078_s1 + $0x10] ss:$0 sps:$4 sm:$0x33]  }
  0x48   : > { %1332 = vrot.lane.b32.xlu0 %v1288_v48, %s4046_s19  ;;  %v1076_v48 = vshll.u32 %v3934_v49, 16  ;;  %v1074_v2 = vor.u32 %v1073_v60, %v1069_v59  ;;  %3868 = vmatprep.subr.msk.bf16.mxu0 %vm2189_vm2, %v3974_v58 }
  0x49   : > { %v1295_v15 = vrot.slane %v3581_v6, 1  ;;  %v1805_v6 = vrot.slane %v4332_v24, 1  ;;  %3869 = vmatprep.subr.msk.bf16.mxu1 %vm2189_vm2, %v3974_v58 }
  0x4a   : > { %1446 = vrot.lane.b32.xlu1 %v3595_v31, %s4050_s27  ;;  %v1801_v31 = vrot.slane %v3627_v12, 1  ;;  %v1078_v8 = vrot.slane %v1076_v48, 1  ;;  %v1066_v12 = vrot.slane %v1064_v1, 1 }
  0x4c   : > { %1444 = vrot.lane.b32.xlu0 %v3594_v35, %s4050_s27  ;;  %v561_v35 = vor.u32 %v560_v21, %v556_v20  ;;  %v1803_v51 = vsel %vm767_vm0, %v1801_v31, %v1802_v40  ;;  %v4327_v20 = vcombine.low %v184_v9, %v4319_v10  ;;  %v1079_v21 = vsel %vm494_vm1, %v1074_v2, %v1078_v8  ;;  %v3380_v2 = vld [vmem:[%s4090_s17 + $0x54] sm:$0xf]  ;;  %v4379_v8 = vld [vmem:[%s4090_s17 + $0x58] sm:$0xf] }
  0x4d   : > { %v1585_v31 = vrot.slane %v1583_v14, 1  ;;  %v2191_v9 = vsel %vm2189_vm2, %v3974_v58, 0 }
  0x4e   : > { %1718 = vrot.lane.b32.xlu1 %v1567_v13, %s4051_s28  ;;  %v566_v43 = vsel %vm494_vm1, %v561_v35, %v565_v36  ;;  %v3596_v13 = vcombine.low %v3440_v4, %v4313_v5  ;;  %v570_v35 = vshll.u32 %v4327_v20, 16  ;;  %v1297_v36 = vsel %vm767_vm0, %v1295_v15, %v1296_v16  ;;  %v4372_v5 = vld [vmem:[%s4090_s17 + $0x64] sm:$0xf]  ;;  %3829 = vmatpush3.bf16.msra.mxu0 %v2191_v9 }
  0x4f   : > { %v1586_v46 = vor.u32 %v1585_v31, %v1581_v30  ;;  %v568_v49 = vshrl.u32 %v4327_v20, 16  ;;  %v587_v4 = vshll.u32 %v3945_v52, 16  ;;  %3867 = vmatpush3.bf16.msra.mxu1 %v2191_v9  ;;  %v3952_v30 = vld [vmem:[%s4090_s17 + $0x68] ss:$0 sps:$4 sm:$0x11]  }
  0x50   : > { %1716 = vrot.lane.b32.xlu0 %v1555_v25, %s4051_s28  ;;  %v1067_v25 = vsel %vm494_vm1, %v1062_v11, %v1066_v12  ;;  %v1571_v26 = vshll.u32 %v3596_v13, 16  ;;  %v1569_v40 = vshrl.u32 %v3596_v13, 16  ;;  %v3551_v12 = vcombine.low %v3382_v62, %v4372_v5  ;;  %v3953_v31 = vld [vmem:[%s4090_s17 + $0x5c] ss:$0 sps:$4 sm:$0x11]  }
  0x51   : > { %v1591_v60 = vsel %vm494_vm1, %v1586_v46, %v1590_v47  ;;  %v589_v15 = vrot.slane %v587_v4, 1  ;;  %v1100_v44 = vshll.u32 %v3952_v30, 16  ;;  %v1088_v46 = vshll.u32 %v3953_v31, 16  ;;  %v4416_v62 = vld [vmem:[%s4090_s17 + $0x64] sm:$0xf] }
  0x52   : > { %695 = vrot.lane.b32.xlu1 %v554_v34, %s4048_s23  ;;  %v4342_v34 = vld [vmem:[%s4090_s17 + $0x50] ss:$0 sps:$4 sm:$0x11]   ;;  %v1573_v41 = vrot.slane %v1571_v26, 1  ;;  %v790_v26 = vrot.slane %v3945_v52, 1 }
  0x53   : > { %v575_v45 = vshll.u32 %v4342_v34, 16  ;;  %v787_v33 = vrot.slane %v4342_v34, 1  ;;  %v3422_v34 = vld [vmem:[%s4090_s17 + $0x54] sm:$0xe]  ;;  %v3444_v52 = vld [vmem:[%s4090_s17 + $0x60] sm:$0xf] }
  0x54   : > { %1844 = vrot.lane.b32.xlu0 %v1800_v38, %s4052_s29  ;;  %v1294_v38 = vsel %vm767_vm0, %v1292_v19, %v1293_v22  ;;  %v1574_v54 = vor.u32 %v1573_v41, %v1569_v40  ;;  %v1808_v19 = vrot.slane %v4324_v17, 1  ;;  %v4401_v40 = vld [vmem:[%s4090_s17 + $0x70] sm:$0xf]  ;;  %v3423_v41 = vld [vmem:[%s4090_s17 + $0x60] sm:$0xe]  ;;  %v1102_v58 = vrot.slane %v1100_v44, 1 }
  0x55   : > { %v577_v48 = vrot.slane %v575_v45, 1  ;;  %v190_v9 = vld [vmem:[%s4090_s17 + $0x6c] sm:$0xf] }
  0x56   : > { %697 = vrot.lane.b32.xlu1 %v566_v43, %s4048_s23  ;;  %v3485_v43 = vld [vmem:[%s4090_s17 + $0x54] sm:$0xe]  ;;  %v3487_v44 = vld [vmem:[%s4090_s17 + $0x6c] sm:$0xe] }
  0x57   : > { %v3629_v59 = vcombine.low %v3485_v43, %v4303_v55 }
  0x58   : > { %1846 = vrot.lane.b32.xlu0 %v1803_v51, %s4052_s29  ;;  %v572_v51 = vrot.slane %v570_v35, 1 }
  0x59   : > { %v1807_v16 = vrot.slane %v3629_v59, 1  ;;  %v1090_v59 = vrot.slane %v1088_v46, 1 }
  0x5a   : > { %826 = vrot.lane.b32.xlu1 %v785_v56, %s4047_s20  ;;  %v573_v63 = vor.u32 %v572_v51, %v568_v49 }
  0x5c   : > { %824 = vrot.lane.b32.xlu0 %v782_v57, %s4047_s20  ;;  %v227_v57 = vld [vmem:[%s4090_s17 + $0x54] sm:$0xe] }
  0x5d   : > { %v3535_v11 = vcombine.low %v227_v57, %v4337_v28  ;;  %v188_v57 = vld [vmem:[%s4090_s17 + $0x60] sm:$0xf] }
  0x5e   : > { %938 = vrot.lane.b32.xlu1 %v3549_v37, %s4045_s18  ;;  %v4348_v37 = vcombine.low %v186_v27, %v4337_v28  ;;  %v1095_v27 = vshll.u32 %v3551_v12, 16 }
  0x5f   : > { %v789_v22 = vrot.slane %v3535_v11, 1  ;;  %v4431_v11 = vld [vmem:[%s4090_s17 + $0x70] sm:$0xf] }
  0x60   : > { %936 = vrot.lane.b32.xlu0 %v3548_v42, %s4045_s18  ;;  %v1576_v42 = vshll.u32 %v4332_v24, 16  ;;  %v582_v39 = vshll.u32 %v4348_v37, 16  ;;  %v580_v0 = vshrl.u32 %v4348_v37, 16  ;;  %v3534_v24 = vcombine.low %v226_v7, %v4319_v10 }
  0x61   : > { %v1809_v10 = vsel %vm767_vm0, %v1807_v16, %v1808_v19  ;;  %v1097_v43 = vrot.slane %v1095_v27, 1 }
  0x62   : > { %1210 = vrot.lane.b32.xlu1 %v1079_v21, %s4049_s26  ;;  %v1578_v56 = vrot.slane %v1576_v42, 1  ;;  %v584_v1 = vrot.slane %v582_v39, 1  ;;  %v786_v17 = vrot.slane %v3534_v24, 1  ;;  %v1093_v42 = vshrl.u32 %v3551_v12, 16  ;;  %v3445_v39 = vld [vmem:[%s4090_s17 + $0x64] sm:$0xf] }
  0x63   : > { %v4443_v24 = vcombine.low %v190_v9, %v4431_v11 }
  0x64   : > { %1208 = vrot.lane.b32.xlu0 %v1067_v25, %s4049_s26  ;;  %v1579_v55 = vsel %vm494_vm1, %v1574_v54, %v1578_v56  ;;  %v585_v14 = vor.u32 %v584_v1, %v580_v0  ;;  %v3550_v25 = vcombine.low %v3380_v2, %v4379_v8  ;;  %v788_v47 = vsel %vm767_vm0, %v786_v17, %v787_v33  ;;  %v4420_v1 = vld [vmem:[%s4090_s17 + $0x74] ss:$0 sps:$4 sm:$0x11]  }
  0x65   : > { %v3582_v54 = vcombine.low %v3422_v34, %v4379_v8  ;;  %v1098_v56 = vor.u32 %v1097_v43, %v1093_v42  ;;  %v1299_v2 = vrot.slane %v3953_v31, 1  ;;  %v1814_v9 = vrot.slane %v4420_v1, 1 }
  0x66   : > { %1338 = vrot.lane.b32.xlu1 %v1297_v36, %s4046_s19  ;;  %v590_v28 = vsel %vm494_vm1, %v585_v14, %v589_v15  ;;  %v1083_v35 = vshll.u32 %v3550_v25, 16  ;;  %v791_v36 = vsel %vm767_vm0, %v789_v22, %v790_v26  ;;  %v1081_v49 = vshrl.u32 %v3550_v25, 16  ;;  %v4436_v15 = vld [vmem:[%s4090_s17 + $0x68] ss:$0 sps:$4 sm:$0x11]  }
  0x67   : > { %v1103_v4 = vsel %vm494_vm1, %v1098_v56, %v1102_v58  ;;  %v1612_v14 = vshll.u32 %v4420_v1, 16  ;;  %v599_v33 = vshll.u32 %v4436_v15, 16  ;;  %v3631_v58 = vcombine.low %v3487_v44, %v4401_v40 }
  0x68   : > { %1336 = vrot.lane.b32.xlu0 %v1294_v38, %s4046_s19  ;;  %v3446_v38 = vld [vmem:[%s4090_s17 + $0x6c] sm:$0xf]  ;;  %v1085_v51 = vrot.slane %v1083_v35, 1 }
  0x69   : > { %v3599_v45 = vcombine.low %v3446_v38, %v4401_v40  ;;  %v1614_v17 = vrot.slane %v1612_v14, 1  ;;  %v3963_v38 = vld [vmem:[%s4090_s17 + $0x74] ss:$0 sps:$4 sm:$0x11]  }
  0x6a   : > { %1450 = vrot.lane.b32.xlu1 %v3597_v3, %s4050_s27  ;;  %v1804_v3 = vrot.slane %v3628_v53, 1  ;;  %v3583_v53 = vcombine.low %v3423_v41, %v4372_v5  ;;  %v1302_v5 = vrot.slane %v3952_v30, 1  ;;  %v606_v41 = vshll.u32 %v4443_v24, 16 }
  0x6b   : > { %v611_v56 = vshll.u32 %v3963_v38, 16  ;;  %v796_v14 = vrot.slane %v3963_v38, 1 }
  0x6c   : > { %1448 = vrot.lane.b32.xlu0 %v3596_v13, %s4050_s27  ;;  %v578_v13 = vsel %vm494_vm1, %v573_v63, %v577_v48  ;;  %v1806_v21 = vsel %vm767_vm0, %v1804_v3, %v1805_v6  ;;  %v3598_v48 = vcombine.low %v3444_v52, %v3445_v39  ;;  %v1607_v63 = vshll.u32 %v3599_v45, 16  ;;  %v3959_v3 = vld [vmem:[%s4090_s17 + $0x68] ss:$0 sps:$4 sm:$0x11]  }
  0x6d   : > { %v1301_v0 = vrot.slane %v3583_v53, 1  ;;  %v4426_v6 = vcombine.low %v188_v57, %v4416_v62  ;;  %v1600_v27 = vshll.u32 %v3959_v3, 16  ;;  %v604_v53 = vshrl.u32 %v4443_v24, 16  ;;  %v3386_v57 = vld [vmem:[%s4090_s17 + $0x78] sm:$0xf] }
  0x6e   : > { %1722 = vrot.lane.b32.xlu1 %v1591_v60, %s4051_s28  ;;  %v1086_v60 = vor.u32 %v1085_v51, %v1081_v49  ;;  %v1595_v8 = vshll.u32 %v3598_v48, 16  ;;  %v1593_v22 = vshrl.u32 %v3598_v48, 16  ;;  %v1811_v49 = vrot.slane %v3959_v3, 1  ;;  %v229_v51 = vld [vmem:[%s4090_s17 + $0x6c] sm:$0xe] }
  0x6f   : > { %v1303_v16 = vsel %vm767_vm0, %v1301_v0, %v1302_v5  ;;  %v594_v19 = vshll.u32 %v4426_v6, 16  ;;  %v592_v35 = vshrl.u32 %v4426_v6, 16  ;;  %v1602_v43 = vrot.slane %v1600_v27, 1  ;;  %v3384_v0 = vld [vmem:[%s4090_s17 + $0x6c] sm:$0xf] }
  0x70   : > { %1720 = vrot.lane.b32.xlu0 %v1579_v55, %s4051_s28  ;;  %v1298_v55 = vrot.slane %v3582_v54, 1  ;;  %v1091_v7 = vsel %vm494_vm1, %v1086_v60, %v1090_v59  ;;  %v1597_v26 = vrot.slane %v1595_v8, 1  ;;  %v608_v54 = vrot.slane %v606_v41, 1 }
  0x71   : > { %v3537_v5 = vcombine.low %v229_v51, %v4431_v11  ;;  %v613_v3 = vrot.slane %v611_v56, 1  ;;  %v1813_v8 = vrot.slane %v3631_v58, 1  ;;  %v4525_v51 = vld [vmem:[%s4090_s17 + $0x7c] sm:$0xf] }
  0x72   : > { %699 = vrot.lane.b32.xlu1 %v578_v13, %s4048_s23  ;;  %v1609_v13 = vrot.slane %v1607_v63, 1  ;;  %v1598_v42 = vor.u32 %v1597_v26, %v1593_v22  ;;  %v4471_v63 = vld [vmem:[%s4090_s17 + $0x7c] sm:$0xf]  ;;  %v793_v26 = vrot.slane %v4436_v15, 1 }
  0x74   : > { %1848 = vrot.lane.b32.xlu0 %v1806_v21, %s4052_s29  ;;  %v3486_v21 = vld [vmem:[%s4090_s17 + $0x60] sm:$0xe]  ;;  %v1603_v60 = vsel %vm494_vm1, %v1598_v42, %v1602_v43  ;;  %v3450_v42 = vld [vmem:[%s4090_s17 + $0x84] sm:$0xf]  ;;  %v4517_v43 = vld [vmem:[%s4090_s17 + $0x88] sm:$0xf] }
  0x75   : > { %v3630_v31 = vcombine.low %v3486_v21, %v3445_v39 }
  0x76   : > { %701 = vrot.lane.b32.xlu1 %v590_v28, %s4048_s23 }
  0x77   : > { %v1810_v34 = vrot.slane %v3630_v31, 1  ;;  %v4505_v31 = vld [vmem:[%s4090_s17 + $0x74] ss:$0 sps:$4 sm:$0x11]  }
  0x78   : > { %1850 = vrot.lane.b32.xlu0 %v1809_v10, %s4052_s29 }
  0x7a   : > { %830 = vrot.lane.b32.xlu1 %v791_v36, %s4047_s20  ;;  %v596_v36 = vrot.slane %v594_v19, 1  ;;  %v795_v19 = vrot.slane %v3537_v5, 1  ;;  %v192_v5 = vld [vmem:[%s4090_s17 + $0x78] sm:$0xf] }
  0x7c   : > { %828 = vrot.lane.b32.xlu0 %v788_v47, %s4047_s20  ;;  %v601_v47 = vrot.slane %v599_v33, 1  ;;  %v597_v39 = vor.u32 %v596_v36, %v592_v35  ;;  %v3424_v33 = vld [vmem:[%s4090_s17 + $0x6c] sm:$0xe]  ;;  %v797_v15 = vsel %vm767_vm0, %v795_v19, %v796_v14 }
  0x7e   : > { %942 = vrot.lane.b32.xlu1 %v3551_v12, %s4045_s18  ;;  %v1605_v12 = vshrl.u32 %v3599_v45, 16  ;;  %v602_v40 = vsel %vm494_vm1, %v597_v39, %v601_v47 }
  0x80   : > { %940 = vrot.lane.b32.xlu0 %v3550_v25, %s4045_s18  ;;  %v1300_v25 = vsel %vm767_vm0, %v1298_v55, %v1299_v2  ;;  %v1610_v10 = vor.u32 %v1609_v13, %v1605_v12  ;;  %v609_v55 = vor.u32 %v608_v54, %v604_v53 }
  0x82   : > { %1214 = vrot.lane.b32.xlu1 %v1103_v4, %s4049_s26  ;;  %v1615_v46 = vsel %vm494_vm1, %v1610_v10, %v1614_v17  ;;  %v4475_v4 = vld [vmem:[%s4090_s17 + $0x70] sm:$0xf]  ;;  %v614_v21 = vsel %vm494_vm1, %v609_v55, %v613_v3  ;;  %v3425_v17 = vld [vmem:[%s4090_s17 + $0x78] sm:$0xe] }
  0x83   : > { %v4490_v13 = vcombine.low %v3384_v0, %v4475_v4  ;;  %v3585_v54 = vcombine.low %v3425_v17, %v4471_v63  ;;  %v3584_v56 = vcombine.low %v3424_v33, %v4475_v4 }
  0x84   : > { %1212 = vrot.lane.b32.xlu0 %v1091_v7, %s4049_s26  ;;  %v4483_v7 = vcombine.low %v3386_v57, %v4471_v63 }
  0x85   : > { %v1107_v27 = vshll.u32 %v4490_v13, 16  ;;  %v1105_v41 = vshrl.u32 %v4490_v13, 16  ;;  %v1307_v55 = vrot.slane %v3585_v54, 1  ;;  %v3489_v54 = vld [vmem:[%s4090_s17 + $0x84] sm:$0xe] }
  0x86   : > { %1342 = vrot.lane.b32.xlu1 %v1303_v16, %s4046_s19  ;;  %v4447_v28 = vpop.permute.xlu1 %930  ;;  %v4494_v16 = vld [vmem:[%s4090_s17 + $0x80] ss:$0 sps:$4 sm:$0x11]   ;;  %v1119_v1 = vshll.u32 %v4483_v7, 16  ;;  %v1117_v35 = vshrl.u32 %v4483_v7, 16 }
  0x87   : > { %v4449_v30 = vpop.permute.xlu0 %928  ;;  %v1124_v36 = vshll.u32 %v4494_v16, 16  ;;  %v1109_v47 = vrot.slane %v1107_v27, 1  ;;  %v1308_v3 = vrot.slane %v4494_v16, 1 }
  0x88   : > { %1340 = vrot.lane.b32.xlu0 %v1300_v25, %s4046_s19  ;;  %v1121_v38 = vrot.slane %v1119_v1, 1 }
  0x89   : > { %v1110_v4 = vor.u32 %v1109_v47, %v1105_v41  ;;  %v1309_v27 = vsel %vm767_vm0, %v1307_v55, %v1308_v3 }
  0x8a   : > { %1454 = vrot.lane.b32.xlu1 %v3599_v45, %s4050_s27  ;;  %v228_v45 = vld [vmem:[%s4090_s17 + $0x60] sm:$0xe] }
  0x8b   : > { %v4461_v52 = vpop.permute.xlu0 %1328  ;;  %v3536_v12 = vcombine.low %v228_v45, %v4416_v62  ;;  %v1815_v62 = vsel %vm767_vm0, %v1813_v8, %v1814_v9  ;;  %v4533_v45 = vcombine.low %v3450_v42, %v4517_v43  ;;  %v1304_v8 = vrot.slane %v3584_v56, 1 }
  0x8c   : > { %1452 = vrot.lane.b32.xlu0 %v3598_v48, %s4050_s27  ;;  %v4466_v59 = vpop.permute.xlu1 %816  ;;  %v1812_v48 = vsel %vm767_vm0, %v1810_v34, %v1811_v49  ;;  %v1112_v34 = vshll.u32 %v4505_v31, 16  ;;  %v3448_v49 = vld [vmem:[%s4090_s17 + $0x78] sm:$0xf]  ;;  %v1305_v9 = vrot.slane %v4505_v31, 1 }
  0x8d   : > { %v792_v22 = vrot.slane %v3536_v12, 1  ;;  %v4539_v57 = vcombine.low %v3448_v49, %v4525_v51  ;;  %v1631_v12 = vshll.u32 %v4533_v45, 16 }
  0x8e   : > { %1726 = vrot.lane.b32.xlu1 %v1615_v46, %s4051_s28  ;;  %v1306_v31 = vsel %vm767_vm0, %v1304_v8, %v1305_v9 }
  0x8f   : > { %v794_v46 = vsel %vm767_vm0, %v792_v22, %v793_v26  ;;  %v194_v22 = vld [vmem:[%s4090_s17 + $0x84] sm:$0xf]  ;;  %v1633_v17 = vrot.slane %v1631_v12, 1  ;;  %v3633_v12 = vcombine.low %v3489_v54, %v4517_v43  ;;  %v3991_v54 = vld [vmem:[%s4090_s17 + $0x98] ss:$0 sps:$4 sm:$0x11]  }
  0x90   : > { %1724 = vrot.lane.b32.xlu0 %v1603_v60, %s4051_s28  ;;  %v4485_v2 = vpop.permute.xlu1 %818  ;;  %v1126_v60 = vrot.slane %v1124_v36, 1  ;;  %v1617_v36 = vshrl.u32 %v4539_v57, 16 }
  0x92   : > { %v688_v11 = vpop.permute.xlu0 %687  ;;  %703 = vrot.lane.b32.xlu1 %v602_v40, %s4048_s23  ;;  %v4547_v40 = vld [vmem:[%s4090_s17 + $0x7c] sm:$0xf] }
  0x93   : > { %v1874_v39 = vsel %vm1872_vm3, %v4118_v23, %v688_v11  ;;  %v1122_v23 = vor.u32 %v1121_v38, %v1117_v35  ;;  %v4557_v11 = vld [vmem:[%s4090_s17 + $0x8c] ss:$0 sps:$4 sm:$0x11]   ;;  %v4585_v35 = vld [vmem:[%s4090_s17 + $0x80] ss:$0 sps:$4 sm:$0x11]  }
  0x94   : > { %1852 = vrot.lane.b32.xlu0 %v1812_v48, %s4052_s29  ;;  %v4499_v25 = vpop.permute.xlu1 %1330  ;;  %v1907_v63 = vsel %vm1905_vm4, %v1874_v39, %v4466_v59  ;;  %v1114_v48 = vrot.slane %v1112_v34, 1  ;;  %v1636_v33 = vshll.u32 %v4557_v11, 16  ;;  %v3488_v39 = vld [vmem:[%s4090_s17 + $0x78] sm:$0xe] }
  0x95   : > { %v1940_v14 = vsel %vm1938_vm5, %v1907_v63, %v4449_v30  ;;  %v1127_v16 = vsel %vm494_vm1, %v1122_v23, %v1126_v60  ;;  %v4575_v30 = vld [vmem:[%s4090_s17 + $0x88] sm:$0xf]  ;;  %v3632_v55 = vcombine.low %v3488_v39, %v4525_v51 }
  0x96   : > { %v690_v10 = vpop.permute.xlu0 %689  ;;  %705 = vrot.lane.b32.xlu1 %v614_v21, %s4048_s23  ;;  %v4566_v21 = vld [vmem:[%s4090_s17 + $0x80] ss:$0 sps:$4 sm:$0x11]   ;;  %v4593_v38 = vcombine.low %v194_v22, %v4575_v30 }
  0x97   : > { %v1876_v58 = vsel %vm1872_vm3, %v4123_v29, %v690_v10  ;;  %v1629_v10 = vshrl.u32 %v4533_v45, 16  ;;  %v1817_v22 = vrot.slane %v4566_v21, 1 }
  0x98   : > { %1854 = vrot.lane.b32.xlu0 %v1815_v62, %s4052_s29  ;;  %v4519_v44 = vpop.permute.xlu1 %1202  ;;  %v1909_v59 = vsel %vm1905_vm4, %v1876_v58, %v4485_v2  ;;  %v1619_v2 = vshll.u32 %v4539_v57, 16  ;;  %v1115_v62 = vsel %vm494_vm1, %v1110_v4, %v1114_v48  ;;  %v1638_v58 = vrot.slane %v1636_v33, 1  ;;  %v4613_v4 = vld [vmem:[%s4090_s17 + $0x8c] ss:$0 sps:$4 sm:$0x11]  }
  0x99   : > { %v1634_v56 = vor.u32 %v1633_v17, %v1629_v10  ;;  %v630_v48 = vshll.u32 %v4593_v38, 16  ;;  %v635_v43 = vshll.u32 %v4613_v4, 16  ;;  %v4646_v10 = vld [vmem:[%s4090_s17 + $0x88] sm:$0xf]  ;;  %v1819_v17 = vrot.slane %v3633_v12, 1 }
  0x9a   : > { %v1201_v53 = vpop.permute.xlu0 %1200  ;;  %834 = vrot.lane.b32.xlu1 %v797_v15, %s4047_s20  ;;  %v1621_v47 = vrot.slane %v1619_v2, 1 }
  0x9b   : > { %v1973_v19 = vsel %vm1971_vm6, %v1940_v14, %v1201_v53  ;;  %v632_v2 = vrot.slane %v630_v48, 1  ;;  %v3427_v48 = vld [vmem:[%s4090_s17 + $0x90] sm:$0xe] }
  0x9c   : > { %832 = vrot.lane.b32.xlu0 %v794_v46, %s4047_s20  ;;  %v4543_v0 = vpop.permute.xlu1 %1442 }
  0x9e   : > { %v1441_v29 = vpop.permute.xlu0 %1440  ;;  %946 = vrot.lane.b32.xlu1 %v4483_v7, %s4045_s18  ;;  %v4569_v7 = vcombine.low %v192_v5, %v4547_v40 }
  0xa0   : > { %944 = vrot.lane.b32.xlu0 %v4490_v13, %s4045_s18  ;;  %v1715_v1 = vpop.permute.xlu1 %1714  ;;  %v1942_v13 = vsel %vm1938_vm5, %v1909_v59, %v4447_v28  ;;  %v2006_v28 = vsel %vm2004_vm7, %v1973_v19, %v4461_v52  ;;  %v618_v15 = vshll.u32 %v4569_v7, 16  ;;  %v1624_v52 = vshll.u32 %v4566_v21, 16  ;;  %v231_v19 = vld [vmem:[%s4090_s17 + $0x84] sm:$0xe] }
  0xa1   : > { %v1975_v41 = vsel %vm1971_vm6, %v1942_v13, %v4519_v44  ;;  %v2039_v42 = vsel %vm2037_vm8, %v2006_v28, %v1441_v29  ;;  %v623_v44 = vshll.u32 %v4585_v35, 16  ;;  %v616_v60 = vshrl.u32 %v4569_v7, 16  ;;  %v3390_v13 = vld [vmem:[%s4090_s17 + $0x90] sm:$0xf] }
  0xa2   : > { %v1713_v26 = vpop.permute.xlu0 %1712  ;;  %1218 = vrot.lane.b32.xlu1 %v1127_v16, %s4049_s26  ;;  %v2008_v23 = vsel %vm2004_vm7, %v1975_v41, %v4499_v25  ;;  %v620_v63 = vrot.slane %v618_v15, 1  ;;  %v1622_v25 = vor.u32 %v1621_v47, %v1617_v36  ;;  %v1626_v3 = vrot.slane %v1624_v52, 1 }
  0xa3   : > { %v2072_v34 = vsel %vm2070_vm9, %v2039_v42, %v1713_v26  ;;  %v2041_v5 = vsel %vm2037_vm8, %v2008_v23, %v4543_v0  ;;  %v1639_v0 = vsel %vm494_vm1, %v1634_v56, %v1638_v58  ;;  %v625_v14 = vrot.slane %v623_v44, 1  ;;  %v4639_v26 = vld [vmem:[%s4090_s17 + $0x94] sm:$0xf] }
  0xa4   : > { %1216 = vrot.lane.b32.xlu0 %v1115_v62, %s4049_s26  ;;  %v4598_v46 = vpop.permute.xlu1 %691  ;;  %v2074_v59 = vsel %vm2070_vm9, %v2041_v5, %v1715_v1  ;;  %v621_v51 = vor.u32 %v620_v63, %v616_v60  ;;  %v628_v16 = vshrl.u32 %v4593_v38, 16  ;;  %v1816_v62 = vrot.slane %v3632_v55, 1  ;;  %v3992_v60 = vld [vmem:[%s4090_s17 + $0x8c] ss:$0 sps:$4 sm:$0x11]  }
  0xa5   : > { %v3539_v33 = vcombine.low %v231_v19, %v4575_v30  ;;  %v637_v36 = vrot.slane %v635_v43, 1  ;;  %v3555_v15 = vcombine.low %v3390_v13, %v4639_v26  ;;  %v1820_v47 = vrot.slane %v4557_v11, 1  ;;  %v3454_v5 = vld [vmem:[%s4090_s17 + $0x9c] sm:$0xf]  ;;  %v4675_v55 = vld [vmem:[%s4090_s17 + $0xa0] sm:$0xf] }
  0xa6   : > { %v1841_v49 = vpop.permute.xlu0 %1840  ;;  %1346 = vrot.lane.b32.xlu1 %v1309_v27, %s4046_s19  ;;  %v230_v27 = vld [vmem:[%s4090_s17 + $0x78] sm:$0xe]  ;;  %v626_v28 = vsel %vm494_vm1, %v621_v51, %v625_v14  ;;  %v633_v21 = vor.u32 %v632_v2, %v628_v16  ;;  %v1818_v42 = vsel %vm767_vm0, %v1816_v62, %v1817_v22  ;;  %v799_v44 = vrot.slane %v4585_v35, 1  ;;  %v3452_v43 = vld [vmem:[%s4090_s17 + $0x90] sm:$0xf] }
  0xa7   : > { %v2105_v53 = vsel %vm2103_vm10, %v2072_v34, %v1841_v49  ;;  %v3538_v52 = vcombine.low %v230_v27, %v4547_v40  ;;  %v801_v39 = vrot.slane %v3539_v33, 1  ;;  %v1143_v11 = vshll.u32 %v3555_v15, 16  ;;  %v4689_v19 = vld [vmem:[%s4090_s17 + $0x94] sm:$0xf] }
  0xa8   : > { %1344 = vrot.lane.b32.xlu0 %v1306_v31, %s4046_s19  ;;  %3830 = vmatprep.mubr.msk.bf16.mxu0 %vm2156_vm11, %v2105_v53  ;;  %v4618_v29 = vpop.permute.xlu1 %693  ;;  %v3388_v31 = vld [vmem:[%s4090_s17 + $0x84] sm:$0xf]  ;;  %v638_v49 = vsel %vm494_vm1, %v633_v21, %v637_v36  ;;  %v802_v53 = vrot.slane %v4613_v4, 1  ;;  %v1821_v56 = vsel %vm767_vm0, %v1819_v17, %v1820_v47  ;;  %v1136_v14 = vshll.u32 %v3992_v60, 16  ;;  %v196_v17 = vld [vmem:[%s4090_s17 + $0x90] sm:$0xf] }
  0xa9   : > { %v3554_v30 = vcombine.low %v3388_v31, %v4646_v10  ;;  %v798_v58 = vrot.slane %v3538_v52, 1  ;;  %v3587_v16 = vcombine.low %v3427_v48, %v4639_v26  ;;  %v4685_v2 = vcombine.low %v3454_v5, %v4675_v55  ;;  %v4701_v33 = vld [vmem:[%s4090_s17 + $0x94] sm:$0xf]  ;;  %v4706_v52 = vld [vmem:[%s4090_s17 + $0xa4] ss:$0 sps:$4 sm:$0x11]  }
  0xaa   : > { %v1843_v8 = vpop.permute.xlu0 %1842  ;;  %1458 = vrot.lane.b32.xlu1 %v4533_v45, %s4050_s27  ;;  %v1627_v45 = vsel %vm494_vm1, %v1622_v25, %v1626_v3  ;;  %v803_v4 = vsel %vm767_vm0, %v801_v39, %v802_v53  ;;  %v3426_v25 = vld [vmem:[%s4090_s17 + $0x84] sm:$0xe]  ;;  %v1141_v3 = vshrl.u32 %v3555_v15, 16  ;;  %v1138_v26 = vrot.slane %v1136_v14, 1 }
  0xab   : > { %v2107_v9 = vsel %vm2103_vm10, %v2074_v59, %v1843_v8  ;;  %v1131_v23 = vshll.u32 %v3554_v30, 16  ;;  %v1145_v59 = vrot.slane %v1143_v11, 1  ;;  %v1148_v8 = vshll.u32 %v3991_v54, 16  ;;  %v4714_v53 = vld [vmem:[%s4090_s17 + $0x98] ss:$0 sps:$4 sm:$0x11]  }
  0xac   : > { %1456 = vrot.lane.b32.xlu0 %v4539_v57, %s4050_s27  ;;  %3831 = vmatmul.mubr.msk.bf16.vlgmr.msra.gmra.mrb[0].mxu0 %vm2156_vm11, %v2107_v9  ;;  %v4633_v1 = vpop.permute.xlu1 %822  ;;  %v800_v9 = vsel %vm767_vm0, %v798_v58, %v799_v44  ;;  %v1129_v12 = vshrl.u32 %v3554_v30, 16  ;;  %v4697_v31 = vcombine.low %v3452_v43, %v4689_v19  ;;  %v1313_v21 = vrot.slane %v3587_v16, 1  ;;  %v198_v44 = vld [vmem:[%s4090_s17 + $0x9c] sm:$0xf]  ;;  %v3490_v43 = vld [vmem:[%s4090_s17 + $0x90] sm:$0xe] }
  0xad   : > { %v1146_v62 = vor.u32 %v1145_v59, %v1141_v3  ;;  %v1150_v22 = vrot.slane %v1148_v8, 1  ;;  %v1655_v36 = vshll.u32 %v4685_v2, 16  ;;  %v1311_v47 = vrot.slane %v3992_v60, 1  ;;  %v4737_v3 = vld [vmem:[%s4090_s17 + $0x98] ss:$0 sps:$4 sm:$0x11]  }
  0xae   : > { %v4641_v57 = vpop.permute.xlu0 %820  ;;  %1730 = vrot.lane.b32.xlu1 %v1639_v0, %s4051_s28  ;;  %v1133_v0 = vrot.slane %v1131_v23, 1  ;;  %v4717_v11 = vcombine.low %v196_v17, %v4701_v33  ;;  %v1643_v58 = vshll.u32 %v4697_v31, 16  ;;  %v1653_v60 = vshrl.u32 %v4685_v2, 16 }
  0xaf   : > { %v1151_v39 = vsel %vm494_vm1, %v1146_v62, %v1150_v22  ;;  %v1657_v48 = vrot.slane %v1655_v36, 1  ;;  %v1648_v16 = vshll.u32 %v4714_v53, 16  ;;  %v3634_v36 = vcombine.low %v3490_v43, %v4689_v19 }
  0xb0   : > { %1728 = vrot.lane.b32.xlu0 %v1627_v45, %s4051_s28  ;;  %v4653_v41 = vpop.permute.xlu1 %934  ;;  %v3586_v45 = vcombine.low %v3426_v25, %v4646_v10  ;;  %v1134_v27 = vor.u32 %v1133_v0, %v1129_v12  ;;  %v1314_v10 = vrot.slane %v3991_v54, 1  ;;  %v1641_v25 = vshrl.u32 %v4697_v31, 16 }
  0xb1   : > { %v1645_v14 = vrot.slane %v1643_v58, 1  ;;  %v233_v58 = vld [vmem:[%s4090_s17 + $0x9c] sm:$0xe]  ;;  %v805_v43 = vrot.slane %v4737_v3, 1 }
  0xb2   : > { %v4659_v34 = vpop.permute.xlu0 %932  ;;  %707 = vrot.lane.b32.xlu1 %v626_v28, %s4048_s23  ;;  %v1315_v23 = vsel %vm767_vm0, %v1313_v21, %v1314_v10 }
  0xb4   : > { %1856 = vrot.lane.b32.xlu0 %v1818_v42, %s4052_s29  ;;  %v4666_v40 = vpop.permute.xlu1 %1206  ;;  %v1310_v42 = vrot.slane %v3586_v45, 1  ;;  %v1658_v45 = vor.u32 %v1657_v48, %v1653_v60  ;;  %v1822_v48 = vrot.slane %v3634_v36, 1 }
  0xb6   : > { %v1205_v63 = vpop.permute.xlu0 %1204  ;;  %709 = vrot.lane.b32.xlu1 %v638_v49, %s4048_s23  ;;  %v1878_v49 = vsel %vm1872_vm3, %v4174_v18, %v4598_v46  ;;  %v4725_v18 = vld [vmem:[%s4090_s17 + $0xa0] sm:$0xf]  ;;  %v1312_v5 = vsel %vm767_vm0, %v1310_v42, %v1311_v47  ;;  %v1650_v42 = vrot.slane %v1648_v16, 1 }
  0xb7   : > { %v4746_v8 = vcombine.low %v198_v44, %v4725_v18 }
  0xb8   : > { %1858 = vrot.lane.b32.xlu0 %v1821_v56, %s4052_s29  ;;  %v4680_v35 = vpop.permute.xlu1 %1334  ;;  %v1139_v56 = vsel %vm494_vm1, %v1134_v27, %v1138_v26  ;;  %v647_v27 = vshll.u32 %v4737_v3, 16 }
  0xba   : > { %v1333_v51 = vpop.permute.xlu0 %1332  ;;  %838 = vrot.lane.b32.xlu1 %v803_v4, %s4047_s20  ;;  %v1660_v4 = vshll.u32 %v4706_v52, 16 }
  0xbc   : > { %836 = vrot.lane.b32.xlu0 %v800_v9, %s4047_s20  ;;  %v4694_v13 = vpop.permute.xlu1 %1446  ;;  %v1662_v22 = vrot.slane %v1660_v4, 1 }
  0xbe   : > { %v1445_v28 = vpop.permute.xlu0 %1444  ;;  %950 = vrot.lane.b32.xlu1 %v3555_v15, %s4045_s18  ;;  %v1911_v15 = vsel %vm1905_vm4, %v1878_v49, %v4641_v57 }
  0xbf   : > { %v1944_v46 = vsel %vm1938_vm5, %v1911_v15, %v4659_v34  ;;  %v1880_v34 = vsel %vm1872_vm3, %v4187_v32, %v4618_v29 }
  0xc0   : > { %948 = vrot.lane.b32.xlu0 %v3554_v30, %s4045_s18  ;;  %v1719_v54 = vpop.permute.xlu1 %1718  ;;  %v1977_v57 = vsel %vm1971_vm6, %v1944_v46, %v1205_v63  ;;  %v642_v63 = vshll.u32 %v4717_v11, 16  ;;  %v1913_v9 = vsel %vm1905_vm4, %v1880_v34, %v4633_v1  ;;  %v4801_v34 = vld [vmem:[%s4090_s17 + $0xa0] sm:$0xf] }
  0xc1   : > { %v2010_v59 = vsel %vm2004_vm7, %v1977_v57, %v1333_v51  ;;  %v1946_v32 = vsel %vm1938_vm5, %v1913_v9, %v4653_v41  ;;  %v640_v41 = vshrl.u32 %v4717_v11, 16  ;;  %v1823_v57 = vrot.slane %v4714_v53, 1 }
  0xc2   : > { %v1717_v30 = vpop.permute.xlu0 %1716  ;;  %1222 = vrot.lane.b32.xlu1 %v1151_v39, %s4049_s26  ;;  %v2043_v12 = vsel %vm2037_vm8, %v2010_v59, %v1445_v28  ;;  %v1979_v62 = vsel %vm1971_vm6, %v1946_v32, %v4666_v40  ;;  %v644_v17 = vrot.slane %v642_v63, 1  ;;  %v4769_v40 = vld [vmem:[%s4090_s17 + $0xa4] ss:$0 sps:$4 sm:$0x11]   ;;  %v654_v28 = vshll.u32 %v4746_v8, 16 }
  0xc3   : > { %v2076_v29 = vsel %vm2070_vm9, %v2043_v12, %v1717_v30  ;;  %v2012_v26 = vsel %vm2004_vm7, %v1979_v62, %v4680_v35  ;;  %v1646_v35 = vor.u32 %v1645_v14, %v1641_v25  ;;  %v3491_v39 = vld [vmem:[%s4090_s17 + $0x9c] sm:$0xe]  ;;  %v659_v46 = vshll.u32 %v4769_v40, 16 }
  0xc4   : > { %1220 = vrot.lane.b32.xlu0 %v1139_v56, %s4049_s26  ;;  %v4751_v0 = vpop.permute.xlu1 %695  ;;  %v2045_v21 = vsel %vm2037_vm8, %v2012_v26, %v4694_v13  ;;  %v1663_v56 = vsel %vm494_vm1, %v1658_v45, %v1662_v22  ;;  %v649_v13 = vrot.slane %v647_v27, 1  ;;  %v645_v19 = vor.u32 %v644_v17, %v640_v41  ;;  %v3392_v25 = vld [vmem:[%s4090_s17 + $0x9c] sm:$0xf]  ;;  %v4007_v22 = vld [vmem:[%s4090_s17 + $0xb0] ss:$0 sps:$4 sm:$0x11]  }
  0xc5   : > { %v2078_v47 = vsel %vm2070_vm9, %v2045_v21, %v1719_v54  ;;  %v652_v54 = vshrl.u32 %v4746_v8, 16  ;;  %v656_v44 = vrot.slane %v654_v28, 1  ;;  %v3635_v30 = vcombine.low %v3491_v39, %v4675_v55  ;;  %v4008_v41 = vld [vmem:[%s4090_s17 + $0xa4] ss:$0 sps:$4 sm:$0x11]  }
  0xc6   : > { %v1845_v51 = vpop.permute.xlu0 %1844  ;;  %1350 = vrot.lane.b32.xlu1 %v1315_v23, %s4046_s19  ;;  %v1651_v60 = vsel %vm494_vm1, %v1646_v35, %v1650_v42  ;;  %v3541_v59 = vcombine.low %v233_v58, %v4725_v18  ;;  %v650_v63 = vsel %vm494_vm1, %v645_v19, %v649_v13  ;;  %v661_v53 = vrot.slane %v659_v46, 1  ;;  %v3428_v21 = vld [vmem:[%s4090_s17 + $0x9c] sm:$0xe]  ;;  %v4832_v39 = vld [vmem:[%s4090_s17 + $0xb8] sm:$0xf] }
  0xc7   : > { %v2109_v1 = vsel %vm2103_vm10, %v2076_v29, %v1845_v51  ;;  %v657_v9 = vor.u32 %v656_v44, %v652_v54  ;;  %v1824_v16 = vsel %vm767_vm0, %v1822_v48, %v1823_v57  ;;  %v1825_v32 = vrot.slane %v3635_v30, 1  ;;  %v3456_v46 = vld [vmem:[%s4090_s17 + $0xa8] sm:$0xf] }
  0xc8   : > { %1348 = vrot.lane.b32.xlu0 %v1312_v5, %s4046_s19  ;;  %3834 = vmatprep.mubr.msk.bf16.mxu0 %vm2156_vm11, %v2109_v1  ;;  %v4774_v10 = vpop.permute.xlu1 %697  ;;  %v3395_v5 = vld [vmem:[%s4090_s17 + $0xac] sm:$0xf]  ;;  %v1826_v29 = vrot.slane %v4706_v52, 1  ;;  %v3556_v18 = vcombine.low %v3392_v25, %v4801_v34  ;;  %v808_v51 = vrot.slane %v4769_v40, 1  ;;  %v807_v62 = vrot.slane %v3541_v59, 1 }
  0xc9   : > { %v662_v45 = vsel %vm494_vm1, %v657_v9, %v661_v53  ;;  %v3429_v40 = vld [vmem:[%s4090_s17 + $0xa8] sm:$0xe]  ;;  %v1172_v42 = vshll.u32 %v4007_v22, 16  ;;  %v1160_v19 = vshll.u32 %v4008_v41, 16  ;;  %v3588_v44 = vcombine.low %v3428_v21, %v4801_v34 }
  0xca   : > { %v1847_v49 = vpop.permute.xlu0 %1846  ;;  %1462 = vrot.lane.b32.xlu1 %v4685_v2, %s4050_s27  ;;  %v232_v2 = vld [vmem:[%s4090_s17 + $0x90] sm:$0xe]  ;;  %v1827_v26 = vsel %vm767_vm0, %v1825_v32, %v1826_v29  ;;  %v1155_v17 = vshll.u32 %v3556_v18, 16  ;;  %v809_v36 = vsel %vm767_vm0, %v807_v62, %v808_v51  ;;  %v1153_v13 = vshrl.u32 %v3556_v18, 16  ;;  %v200_v59 = vld [vmem:[%s4090_s17 + $0xa8] sm:$0xf] }
  0xcb   : > { %v2111_v15 = vsel %vm2103_vm10, %v2078_v47, %v1847_v49  ;;  %v3540_v55 = vcombine.low %v232_v2, %v4701_v33  ;;  %v3589_v47 = vcombine.low %v3429_v40, %v3395_v5  ;;  %v3458_v49 = vld [vmem:[%s4090_s17 + $0xb4] sm:$0xf]  ;;  %v4840_v2 = vld [vmem:[%s4090_s17 + $0xac] sm:$0xf]  ;;  %v1174_v48 = vrot.slane %v1172_v42, 1 }
  0xcc   : > { %1460 = vrot.lane.b32.xlu0 %v4697_v31, %s4050_s27  ;;  %3835 = vmatmul.mubr.msk.bf16.gmra.mrb[4].mxu0 %vm2156_vm11, %v2111_v15  ;;  %v4791_v23 = vpop.permute.xlu1 %826  ;;  %v3394_v31 = vld [vmem:[%s4090_s17 + $0xa8] sm:$0xf]  ;;  %v1157_v58 = vrot.slane %v1155_v17, 1  ;;  %v4844_v30 = vcombine.low %v3458_v49, %v4832_v39  ;;  %v4850_v34 = vcombine.low %v3456_v46, %v4840_v2  ;;  %v1320_v9 = vrot.slane %v4007_v22, 1 }
  0xcd   : > { %v3557_v12 = vcombine.low %v3394_v31, %v3395_v5  ;;  %v804_v1 = vrot.slane %v3540_v55, 1  ;;  %v1162_v5 = vrot.slane %v1160_v19, 1  ;;  %v1319_v25 = vrot.slane %v3589_v47, 1  ;;  %v4854_v55 = vld [vmem:[%s4090_s17 + $0xac] sm:$0xf] }
  0xce   : > { %v4797_v4 = vpop.permute.xlu0 %824  ;;  %1734 = vrot.lane.b32.xlu1 %v1663_v56, %s4051_s28  ;;  %v1158_v31 = vor.u32 %v1157_v58, %v1153_v13  ;;  %v1316_v53 = vrot.slane %v3588_v44, 1  ;;  %v4857_v32 = vld [vmem:[%s4090_s17 + $0xbc] ss:$0 sps:$4 sm:$0x11]   ;;  %v1679_v29 = vshll.u32 %v4844_v30, 16  ;;  %v1882_v51 = vsel %vm1872_vm3, %v4251_v50, %v4751_v0 }
  0xcf   : > { %v1167_v52 = vshll.u32 %v3557_v12, 16  ;;  %v1165_v3 = vshrl.u32 %v3557_v12, 16  ;;  %v806_v56 = vsel %vm767_vm0, %v804_v1, %v805_v43  ;;  %v4870_v62 = vcombine.low %v200_v59, %v4854_v55  ;;  %v4878_v50 = vld [vmem:[%s4090_s17 + $0xb8] sm:$0xf]  ;;  %v3492_v46 = vld [vmem:[%s4090_s17 + $0xa8] sm:$0xe] }
  0xd0   : > { %1732 = vrot.lane.b32.xlu0 %v1651_v60, %s4051_s28  ;;  %v4808_v14 = vpop.permute.xlu1 %938  ;;  %v1915_v1 = vsel %vm1905_vm4, %v1882_v51, %v4797_v4  ;;  %v1163_v22 = vsel %vm494_vm1, %v1158_v31, %v1162_v5  ;;  %v1684_v40 = vshll.u32 %v4857_v32, 16  ;;  %v1681_v21 = vrot.slane %v1679_v29, 1  ;;  %v4922_v59 = vld [vmem:[%s4090_s17 + $0xbc] ss:$0 sps:$4 sm:$0x11]  }
  0xd1   : > { %v1169_v35 = vrot.slane %v1167_v52, 1  ;;  %v1667_v52 = vshll.u32 %v4850_v34, 16 }
  0xd2   : > { %v4813_v33 = vpop.permute.xlu0 %936  ;;  %711 = vrot.lane.b32.xlu1 %v650_v63, %s4048_s23  ;;  %v1686_v44 = vrot.slane %v1684_v40, 1  ;;  %v3398_v40 = vld [vmem:[%s4090_s17 + $0xc0] sm:$0xf] }
  0xd3   : > { %v1170_v60 = vor.u32 %v1169_v35, %v1165_v3  ;;  %v1948_v0 = vsel %vm1938_vm5, %v1915_v1, %v4813_v33  ;;  %v1677_v3 = vshrl.u32 %v4844_v30, 16  ;;  %v4890_v35 = vld [vmem:[%s4090_s17 + $0xb0] ss:$0 sps:$4 sm:$0x11]   ;;  %v1884_v33 = vsel %vm1872_vm3, %v4265_v61, %v4774_v10 }
  0xd4   : > { %1860 = vrot.lane.b32.xlu0 %v1824_v16, %s4052_s29  ;;  %v4821_v27 = vpop.permute.xlu1 %1210  ;;  %v1317_v16 = vrot.slane %v4008_v41, 1  ;;  %v1321_v41 = vsel %vm767_vm0, %v1319_v25, %v1320_v9  ;;  %v1917_v49 = vsel %vm1905_vm4, %v1884_v33, %v4791_v23  ;;  %v1669_v58 = vrot.slane %v1667_v52, 1  ;;  %v4956_v33 = vld [vmem:[%s4090_s17 + $0xb8] sm:$0xf] }
  0xd5   : > { %v1175_v43 = vsel %vm494_vm1, %v1170_v60, %v1174_v48  ;;  %v1950_v61 = vsel %vm1938_vm5, %v1917_v49, %v4808_v14  ;;  %v1682_v48 = vor.u32 %v1681_v21, %v1677_v3  ;;  %v671_v31 = vshll.u32 %v4890_v35, 16  ;;  %v234_v21 = vld [vmem:[%s4090_s17 + $0xa8] sm:$0xe] }
  0xd6   : > { %v1209_v28 = vpop.permute.xlu0 %1208  ;;  %713 = vrot.lane.b32.xlu1 %v662_v45, %s4048_s23  ;;  %v4867_v45 = vld [vmem:[%s4090_s17 + $0xb0] ss:$0 sps:$4 sm:$0x11]   ;;  %v1318_v17 = vsel %vm767_vm0, %v1316_v53, %v1317_v16  ;;  %v1983_v60 = vsel %vm1971_vm6, %v1950_v61, %v4821_v27  ;;  %v664_v14 = vshrl.u32 %v4870_v62, 16 }
  0xd7   : > { %v1981_v4 = vsel %vm1971_vm6, %v1948_v0, %v1209_v28  ;;  %v666_v28 = vshll.u32 %v4870_v62, 16  ;;  %v1672_v19 = vshll.u32 %v4867_v45, 16  ;;  %v235_v0 = vld [vmem:[%s4090_s17 + $0xb4] sm:$0xe] }
  0xd8   : > { %1862 = vrot.lane.b32.xlu0 %v1827_v26, %s4052_s29  ;;  %v4834_v15 = vpop.permute.xlu1 %1338  ;;  %v202_v26 = vld [vmem:[%s4090_s17 + $0xb4] sm:$0xf] }
  0xd9   : > { %v4899_v47 = vcombine.low %v202_v26, %v4878_v50  ;;  %v2016_v5 = vsel %vm2004_vm7, %v1983_v60, %v4834_v15  ;;  %v668_v25 = vrot.slane %v666_v28, 1  ;;  %v1674_v16 = vrot.slane %v1672_v19, 1  ;;  %v4025_v60 = vld [vmem:[%s4090_s17 + $0xc8] ss:$0 sps:$4 sm:$0x11]  }
  0xda   : > { %v1337_v54 = vpop.permute.xlu0 %1336  ;;  %842 = vrot.lane.b32.xlu1 %v809_v36, %s4047_s20  ;;  %v1665_v36 = vshrl.u32 %v4850_v34, 16  ;;  %v3636_v15 = vcombine.low %v3492_v46, %v4840_v2  ;;  %v683_v26 = vshll.u32 %v4922_v59, 16  ;;  %v3543_v28 = vcombine.low %v235_v0, %v4878_v50 }
  0xdb   : > { %v2014_v42 = vsel %vm2004_vm7, %v1981_v4, %v1337_v54  ;;  %v678_v27 = vshll.u32 %v4899_v47, 16  ;;  %v669_v2 = vor.u32 %v668_v25, %v664_v14  ;;  %v4949_v4 = vld [vmem:[%s4090_s17 + $0xc4] sm:$0xf]  ;;  %v814_v46 = vrot.slane %v4922_v59, 1  ;;  %v3430_v59 = vld [vmem:[%s4090_s17 + $0xb4] sm:$0xe] }
  0xdc   : > { %840 = vrot.lane.b32.xlu0 %v806_v56, %s4047_s20  ;;  %v4847_v57 = vpop.permute.xlu1 %1450  ;;  %v1670_v53 = vor.u32 %v1669_v58, %v1665_v36  ;;  %v3396_v36 = vld [vmem:[%s4090_s17 + $0xb4] sm:$0xf]  ;;  %v685_v49 = vrot.slane %v683_v26, 1  ;;  %v4026_v14 = vld [vmem:[%s4090_s17 + $0xbc] ss:$0 sps:$4 sm:$0x11]  }
  0xdd   : > { %v680_v52 = vrot.slane %v678_v27, 1  ;;  %v4993_v26 = vld [vmem:[%s4090_s17 + $0xc4] sm:$0xf] }
  0xde   : > { %v1449_v63 = vpop.permute.xlu0 %1448  ;;  %954 = vrot.lane.b32.xlu1 %v3557_v12, %s4045_s18 }
  0xdf   : > { %v2047_v56 = vsel %vm2037_vm8, %v2014_v42, %v1449_v63  ;;  %v2049_v63 = vsel %vm2037_vm8, %v2016_v5, %v4847_v57  ;;  %v1687_v57 = vsel %vm494_vm1, %v1682_v48, %v1686_v44  ;;  %v1832_v42 = vrot.slane %v4857_v32, 1 }
  0xe0   : > { %952 = vrot.lane.b32.xlu0 %v3556_v18, %s4045_s18  ;;  %v1723_v12 = vpop.permute.xlu1 %1722  ;;  %v3558_v32 = vcombine.low %v3396_v36, %v4956_v33  ;;  %v813_v44 = vrot.slane %v3543_v28, 1  ;;  %v811_v5 = vrot.slane %v4890_v35, 1 }
  0xe1   : > { %v2082_v29 = vsel %vm2070_vm9, %v2049_v63, %v1723_v12  ;;  %v676_v12 = vshrl.u32 %v4899_v47, 16  ;;  %v3431_v63 = vld [vmem:[%s4090_s17 + $0xc0] sm:$0xe] }
  0xe2   : > { %v1721_v18 = vpop.permute.xlu0 %1720  ;;  %1226 = vrot.lane.b32.xlu1 %v1175_v43, %s4049_s26  ;;  %v3493_v43 = vld [vmem:[%s4090_s17 + $0xb4] sm:$0xe]  ;;  %v1179_v25 = vshll.u32 %v3558_v32, 16  ;;  %v3591_v0 = vcombine.low %v3431_v63, %v4949_v4 }
  0xe3   : > { %v2080_v10 = vsel %vm2070_vm9, %v2047_v56, %v1721_v18  ;;  %v1675_v18 = vsel %vm494_vm1, %v1670_v53, %v1674_v16  ;;  %v3559_v56 = vcombine.low %v3398_v40, %v4949_v4  ;;  %v815_v53 = vsel %vm767_vm0, %v813_v44, %v814_v46 }
  0xe4   : > { %1224 = vrot.lane.b32.xlu0 %v1163_v22, %s4049_s26  ;;  %v4904_v13 = vpop.permute.xlu1 %699  ;;  %v673_v22 = vrot.slane %v671_v31, 1  ;;  %v1325_v4 = vrot.slane %v3591_v0, 1 }
  0xe5   : > { %v1189_v16 = vshrl.u32 %v3559_v56, 16 }
  0xe6   : > { %v1849_v54 = vpop.permute.xlu0 %1848  ;;  %1354 = vrot.lane.b32.xlu1 %v1321_v41, %s4046_s19  ;;  %v1828_v41 = vrot.slane %v3636_v15, 1 }
  0xe7   : > { %v2113_v23 = vsel %vm2103_vm10, %v2080_v10, %v1849_v54  ;;  %v3542_v10 = vcombine.low %v234_v21, %v4854_v55 }
  0xe8   : > { %1352 = vrot.lane.b32.xlu0 %v1318_v17, %s4046_s19  ;;  %3838 = vmatprep.mubr.msk.bf16.mxu0 %vm2156_vm11, %v2113_v23  ;;  %v4927_v9 = vpop.permute.xlu1 %701  ;;  %v1829_v17 = vrot.slane %v4867_v45, 1  ;;  %v681_v45 = vor.u32 %v680_v52, %v676_v12  ;;  %v1191_v23 = vshll.u32 %v3559_v56, 16  ;;  %v3460_v52 = vld [vmem:[%s4090_s17 + $0xc0] sm:$0xf] }
  0xe9   : > { %v810_v31 = vrot.slane %v3542_v10, 1 }
  0xea   : > { %v1851_v51 = vpop.permute.xlu0 %1850  ;;  %1466 = vrot.lane.b32.xlu1 %v4844_v30, %s4050_s27  ;;  %v1830_v19 = vsel %vm767_vm0, %v1828_v41, %v1829_v17  ;;  %v686_v54 = vsel %vm494_vm1, %v681_v45, %v685_v49  ;;  %v1193_v15 = vrot.slane %v1191_v23, 1  ;;  %v1326_v45 = vrot.slane %v4025_v60, 1 }
  0xeb   : > { %v2115_v1 = vsel %vm2103_vm10, %v2082_v29, %v1851_v51  ;;  %v1196_v29 = vshll.u32 %v4025_v60, 16  ;;  %v3462_v51 = vld [vmem:[%s4090_s17 + $0xcc] sm:$0xf]  ;;  %v812_v35 = vsel %vm767_vm0, %v810_v31, %v811_v5  ;;  %v1323_v49 = vrot.slane %v4026_v14, 1 }
  0xec   : > { %1464 = vrot.lane.b32.xlu0 %v4850_v34, %s4050_s27  ;;  %3839 = vmatmul.mubr.msk.bf16.gmra.mrb[8].mxu0 %vm2156_vm11, %v2115_v1  ;;  %v4942_v30 = vpop.permute.xlu1 %830  ;;  %v3637_v34 = vcombine.low %v3493_v43, %v4832_v39  ;;  %v674_v39 = vsel %vm494_vm1, %v669_v2, %v673_v22  ;;  %v1177_v1 = vshrl.u32 %v3558_v32, 16  ;;  %v1184_v22 = vshll.u32 %v4026_v14, 16  ;;  %v4989_v2 = vld [vmem:[%s4090_s17 + $0xd0] sm:$0xf] }
  0xed   : > { %v1194_v41 = vor.u32 %v1193_v15, %v1189_v16  ;;  %v1198_v17 = vrot.slane %v1196_v29, 1  ;;  %v1888_v5 = vsel %vm1872_vm3, %v4348_v37, %v4927_v9  ;;  %v3495_v15 = vld [vmem:[%s4090_s17 + $0xcc] sm:$0xe] }
  0xee   : > { %v4951_v3 = vpop.permute.xlu0 %828  ;;  %1738 = vrot.lane.b32.xlu1 %v1687_v57, %s4051_s28  ;;  %v1831_v61 = vrot.slane %v3637_v34, 1  ;;  %v1181_v57 = vrot.slane %v1179_v25, 1  ;;  %v3607_v34 = vcombine.low %v3462_v51, %v4989_v2  ;;  %v1186_v36 = vrot.slane %v1184_v22, 1  ;;  %v3494_v51 = vld [vmem:[%s4090_s17 + $0xc0] sm:$0xe] }
  0xef   : > { %v3639_v22 = vcombine.low %v3495_v15, %v4989_v2 }
  0xf0   : > { %1736 = vrot.lane.b32.xlu0 %v1675_v18, %s4051_s28  ;;  %v4964_v58 = vpop.permute.xlu1 %942  ;;  %v1833_v55 = vsel %vm767_vm0, %v1831_v61, %v1832_v42  ;;  %v3590_v18 = vcombine.low %v3430_v59, %v4956_v33  ;;  %v1182_v21 = vor.u32 %v1181_v57, %v1177_v1  ;;  %v3606_v42 = vcombine.low %v3460_v52, %v4993_v26 }
  0xf1   : > { %v1199_v61 = vsel %vm494_vm1, %v1194_v41, %v1198_v17  ;;  %v1703_v10 = vshll.u32 %v3607_v34, 16  ;;  %v1701_v31 = vshrl.u32 %v3607_v34, 16 }
  0xf2   : > { %v941_v50 = vpop.permute.xlu0 %940  ;;  %715 = vrot.lane.b32.xlu1 %v674_v39, %s4048_s23  ;;  %v5002_v39 = vld [vmem:[%s4090_s17 + $0xd4] ss:$0 sps:$4 sm:$0x11]   ;;  %v1322_v33 = vrot.slane %v3590_v18, 1  ;;  %v1187_v46 = vsel %vm494_vm1, %v1182_v21, %v1186_v36  ;;  %v1691_v23 = vshll.u32 %v3606_v42, 16  ;;  %v1689_v25 = vshrl.u32 %v3606_v42, 16 }
  0xf3   : > { %v1705_v14 = vrot.slane %v1703_v10, 1  ;;  %v3638_v18 = vcombine.low %v3494_v51, %v4993_v26  ;;  %v1837_v21 = vrot.slane %v3639_v22, 1 }
  0xf4   : > { %1864 = vrot.lane.b32.xlu0 %v1830_v19, %s4052_s29  ;;  %v4974_v48 = vpop.permute.xlu1 %1214  ;;  %v1886_v19 = vsel %vm1872_vm3, %v4327_v20, %v4904_v13  ;;  %v1327_v13 = vsel %vm767_vm0, %v1325_v4, %v1326_v45 }
  0xf5   : > { %v1706_v57 = vor.u32 %v1705_v14, %v1701_v31  ;;  %v1834_v26 = vrot.slane %v3638_v18, 1 }
  0xf6   : > { %v1213_v27 = vpop.permute.xlu0 %1212  ;;  %717 = vrot.lane.b32.xlu1 %v686_v54, %s4048_s23  ;;  %v1919_v54 = vsel %vm1905_vm4, %v1886_v19, %v4951_v3  ;;  %v1708_v3 = vshll.u32 %v5002_v39, 16 }
  0xf7   : > { %v1952_v60 = vsel %vm1938_vm5, %v1919_v54, %v941_v50 }
  0xf8   : > { %1866 = vrot.lane.b32.xlu0 %v1833_v55, %s4052_s29  ;;  %v4985_v43 = vpop.permute.xlu1 %1342  ;;  %v1985_v20 = vsel %vm1971_vm6, %v1952_v60, %v1213_v27  ;;  %v1921_v27 = vsel %vm1905_vm4, %v1888_v5, %v4942_v30 }
  0xf9   : > { %v1954_v29 = vsel %vm1938_vm5, %v1921_v27, %v4964_v58  ;;  %v1710_v58 = vrot.slane %v1708_v3, 1 }
  0xfa   : > { %v1341_v12 = vpop.permute.xlu0 %1340  ;;  %846 = vrot.lane.b32.xlu1 %v815_v53, %s4047_s20  ;;  %v1693_v53 = vrot.slane %v1691_v23, 1 }
  0xfb   : > { %v2018_v50 = vsel %vm2004_vm7, %v1985_v20, %v1341_v12  ;;  %v1711_v2 = vsel %vm494_vm1, %v1706_v57, %v1710_v58 }
  0xfc   : > { %844 = vrot.lane.b32.xlu0 %v812_v35, %s4047_s20  ;;  %v1455_v40 = vpop.permute.xlu1 %1454  ;;  %v1987_v35 = vsel %vm1971_vm6, %v1954_v29, %v4974_v48  ;;  %v1694_v0 = vor.u32 %v1693_v53, %v1689_v25 }
  0xfd   : > { %v2020_v30 = vsel %vm2004_vm7, %v1987_v35, %v4985_v43 }
  0xfe   : > { %v1453_v28 = vpop.permute.xlu0 %1452  ;;  %958 = vrot.lane.b32.xlu1 %v3559_v56, %s4045_s18  ;;  %v4032_v56 = vld [vmem:[%s4090_s17 + $0xc8] ss:$0 sps:$4 sm:$0x11]   ;;  %v2053_v12 = vsel %vm2037_vm8, %v2020_v30, %v1455_v40  ;;  %v1838_v40 = vrot.slane %v5002_v39, 1 }
  0xff   : > { %v2051_v63 = vsel %vm2037_vm8, %v2018_v50, %v1453_v28  ;;  %v1696_v16 = vshll.u32 %v4032_v56, 16  ;;  %v1835_v4 = vrot.slane %v4032_v56, 1 }
 0x100   : > { %956 = vrot.lane.b32.xlu0 %v3558_v32, %s4045_s18  ;;  %v1727_v44 = vpop.permute.xlu1 %1726  ;;  %v1324_v32 = vsel %vm767_vm0, %v1322_v33, %v1323_v49 }
 0x101   : > { %v1698_v48 = vrot.slane %v1696_v16, 1  ;;  %v2086_v41 = vsel %vm2070_vm9, %v2053_v12, %v1727_v44  ;;  %v1836_v33 = vsel %vm767_vm0, %v1834_v26, %v1835_v4 }
 0x102   : > { %v1725_v55 = vpop.permute.xlu0 %1724  ;;  %1230 = vrot.lane.b32.xlu1 %v1199_v61, %s4049_s26 }
 0x103   : > { %v2084_v37 = vsel %vm2070_vm9, %v2051_v63, %v1725_v55  ;;  %v1699_v28 = vsel %vm494_vm1, %v1694_v0, %v1698_v48 }
 0x104   : > { %1228 = vrot.lane.b32.xlu0 %v1187_v46, %s4049_s26  ;;  %v704_v59 = vpop.permute.xlu1 %703 }
 0x105   : > { %v1890_v46 = vsel %vm1872_vm3, %v4426_v6, %v704_v59 }
 0x106   : > { %v1853_v9 = vpop.permute.xlu0 %1852  ;;  %1358 = vrot.lane.b32.xlu1 %v1327_v13, %s4046_s19 }
 0x107   : > { %v2117_v1 = vsel %vm2103_vm10, %v2084_v37, %v1853_v9 }
 0x108   : > { %1356 = vrot.lane.b32.xlu0 %v1324_v32, %s4046_s19  ;;  %3842 = vmatprep.mubr.msk.bf16.mxu0 %vm2156_vm11, %v2117_v1  ;;  %v706_v52 = vpop.permute.xlu1 %705 }
 0x109   : > { %v1892_v20 = vsel %vm1872_vm3, %v4443_v24, %v706_v52 }
 0x10a   : > { %v1855_v17 = vpop.permute.xlu0 %1854  ;;  %1470 = vrot.lane.b32.xlu1 %v3607_v34, %s4050_s27  ;;  %v1839_v34 = vsel %vm767_vm0, %v1837_v21, %v1838_v40 }
 0x10b   : > { %v2119_v43 = vsel %vm2103_vm10, %v2086_v41, %v1855_v17 }
 0x10c   : > { %1468 = vrot.lane.b32.xlu0 %v3606_v42, %s4050_s27  ;;  %3843 = vmatmul.mubr.msk.bf16.gmra.mrb[12].mxu0 %vm2156_vm11, %v2119_v43  ;;  %v835_v36 = vpop.permute.xlu1 %834 }
 0x10d   : > { %v1925_v32 = vsel %vm1905_vm4, %v1892_v20, %v835_v36 }
 0x10e   : > { %v833_v45 = vpop.permute.xlu0 %832  ;;  %1742 = vrot.lane.b32.xlu1 %v1711_v2, %s4051_s28 }
 0x10f   : > { %v1923_v56 = vsel %vm1905_vm4, %v1890_v46, %v833_v45 }
 0x110   : > { %1740 = vrot.lane.b32.xlu0 %v1699_v28, %s4051_s28  ;;  %v947_v42 = vpop.permute.xlu1 %946 }
 0x111   : > { %v1958_v6 = vsel %vm1938_vm5, %v1925_v32, %v947_v42 }
 0x112   : > { %v945_v49 = vpop.permute.xlu0 %944  ;;  %1870 = vrot.lane.b32.xlu1 %v1839_v34, %s4052_s29 }
 0x113   : > { %v1956_v60 = vsel %vm1938_vm5, %v1923_v56, %v945_v49 }
 0x114   : > { %1868 = vrot.lane.b32.xlu0 %v1836_v33, %s4052_s29  ;;  %v1219_v39 = vpop.permute.xlu1 %1218 }
 0x115   : > { %v1991_v25 = vsel %vm1971_vm6, %v1958_v6, %v1219_v39 }
 0x116   : > { %v1217_v19 = vpop.permute.xlu0 %1216 }
 0x117   : > { %v1989_v31 = vsel %vm1971_vm6, %v1956_v60, %v1217_v19 }
 0x118   : > { %v1347_v61 = vpop.permute.xlu1 %1346 }
 0x119   : > { %v2024_v63 = vsel %vm2004_vm7, %v1991_v25, %v1347_v61 }
 0x11a   : > { %v1345_v10 = vpop.permute.xlu0 %1344 }
 0x11b   : > { %v2022_v13 = vsel %vm2004_vm7, %v1989_v31, %v1345_v10 }
 0x11c   : > { %v1459_v54 = vpop.permute.xlu1 %1458 }
 0x11d   : > { %v2057_v24 = vsel %vm2037_vm8, %v2024_v63, %v1459_v54 }
 0x11e   : > { %v1457_v44 = vpop.permute.xlu0 %1456 }
 0x11f   : > { %v2055_v3 = vsel %vm2037_vm8, %v2022_v13, %v1457_v44 }
 0x120   : > { %v1731_v23 = vpop.permute.xlu1 %1730 }
 0x121   : > { %v2090_v53 = vsel %vm2070_vm9, %v2057_v24, %v1731_v23 }
 0x122   : > { %v1729_v55 = vpop.permute.xlu0 %1728 }
 0x123   : > { %v2088_v50 = vsel %vm2070_vm9, %v2055_v3, %v1729_v55 }
 0x124   : > { %v708_v5 = vpop.permute.xlu1 %707 }
 0x125   : > { %v1894_v12 = vsel %vm1872_vm3, %v4569_v7, %v708_v5 }
 0x126   : > { %v1857_v14 = vpop.permute.xlu0 %1856 }
 0x127   : > { %v2121_v27 = vsel %vm2103_vm10, %v2088_v50, %v1857_v14 }
 0x128   : > { %3846 = vmatprep.mubr.msk.bf16.mxu1 %vm2156_vm11, %v2121_v27  ;;  %v710_v59 = vpop.permute.xlu1 %709 }
 0x129   : > { %v1896_v17 = vsel %vm1872_vm3, %v4593_v38, %v710_v59 }
 0x12a   : > { %v1859_v16 = vpop.permute.xlu0 %1858 }
 0x12b   : > { %v2123_v15 = vsel %vm2103_vm10, %v2090_v53, %v1859_v16 }
 0x12c   : > { %3847 = vmatmul.mubr.msk.bf16.vlgmr.msra.gmra.mrb[0].mxu1 %vm2156_vm11, %v2123_v15  ;;  %v839_v29 = vpop.permute.xlu1 %838 }
 0x12d   : > { %v1929_v2 = vsel %vm1905_vm4, %v1896_v17, %v839_v29 }
 0x12e   : > { %v837_v37 = vpop.permute.xlu0 %836 }
 0x12f   : > { %v1927_v52 = vsel %vm1905_vm4, %v1894_v12, %v837_v37 }
 0x130   : > { %v951_v9 = vpop.permute.xlu1 %950 }
 0x131   : > { %v1962_v7 = vsel %vm1938_vm5, %v1929_v2, %v951_v9 }
 0x132   : > { %v949_v51 = vpop.permute.xlu0 %948 }
 0x133   : > { %v1960_v48 = vsel %vm1938_vm5, %v1927_v52, %v949_v51 }
 0x134   : > { %v1223_v35 = vpop.permute.xlu1 %1222 }
 0x135   : > { %v1995_v26 = vsel %vm1971_vm6, %v1962_v7, %v1223_v35 }
 0x136   : > { %v1221_v1 = vpop.permute.xlu0 %1220 }
 0x137   : > { %v1993_v41 = vsel %vm1971_vm6, %v1960_v48, %v1221_v1 }
 0x138   : > { %v1351_v30 = vpop.permute.xlu1 %1350 }
 0x139   : > { %v2028_v45 = vsel %vm2004_vm7, %v1995_v26, %v1351_v30 }
 0x13a   : > { %v1349_v57 = vpop.permute.xlu0 %1348 }
 0x13b   : > { %v2026_v43 = vsel %vm2004_vm7, %v1993_v41, %v1349_v57 }
 0x13c   : > { %v1463_v58 = vpop.permute.xlu1 %1462 }
 0x13d   : > { %v2061_v38 = vsel %vm2037_vm8, %v2028_v45, %v1463_v58 }
 0x13e   : > { %v1461_v22 = vpop.permute.xlu0 %1460 }
 0x13f   : > { %v2059_v21 = vsel %vm2037_vm8, %v2026_v43, %v1461_v22 }
 0x140   : > { %v1735_v0 = vpop.permute.xlu1 %1734 }
 0x141   : > { %v2094_v42 = vsel %vm2070_vm9, %v2061_v38, %v1735_v0 }
 0x142   : > { %v1733_v18 = vpop.permute.xlu0 %1732 }
 0x143   : > { %v2092_v36 = vsel %vm2070_vm9, %v2059_v21, %v1733_v18 }
 0x144   : > { %v712_v40 = vpop.permute.xlu1 %711 }
 0x145   : > { %v1898_v55 = vsel %vm1872_vm3, %v4717_v11, %v712_v40 }
 0x146   : > { %v1861_v28 = vpop.permute.xlu0 %1860 }
 0x147   : > { %v2125_v4 = vsel %vm2103_vm10, %v2092_v36, %v1861_v28 }
 0x148   : > { %3850 = vmatprep.mubr.msk.bf16.mxu1 %vm2156_vm11, %v2125_v4  ;;  %v714_v34 = vpop.permute.xlu1 %713 }
 0x149   : > { %v1900_v5 = vsel %vm1872_vm3, %v4746_v8, %v714_v34 }
 0x14a   : > { %v1863_v33 = vpop.permute.xlu0 %1862 }
 0x14b   : > { %v2127_v49 = vsel %vm2103_vm10, %v2094_v42, %v1863_v33 }
 0x14c   : > { %3851 = vmatmul.mubr.msk.bf16.gmra.mrb[4].mxu1 %vm2156_vm11, %v2127_v49  ;;  %v843_v39 = vpop.permute.xlu1 %842 }
 0x14d   : > { %v1933_v50 = vsel %vm1905_vm4, %v1900_v5, %v843_v39 }
 0x14e   : > { %v841_v19 = vpop.permute.xlu0 %840 }
 0x14f   : > { %v1931_v31 = vsel %vm1905_vm4, %v1898_v55, %v841_v19 }
 0x150   : > { %v955_v61 = vpop.permute.xlu1 %954 }
 0x151   : > { %v1966_v11 = vsel %vm1938_vm5, %v1933_v50, %v955_v61 }
 0x152   : > { %v953_v10 = vpop.permute.xlu0 %952 }
 0x153   : > { %v1964_v13 = vsel %vm1938_vm5, %v1931_v31, %v953_v10 }
 0x154   : > { %v1227_v54 = vpop.permute.xlu1 %1226 }
 0x155   : > { %v1999_v24 = vsel %vm1971_vm6, %v1966_v11, %v1227_v54 }
 0x156   : > { %v1225_v44 = vpop.permute.xlu0 %1224 }
 0x157   : > { %v1997_v3 = vsel %vm1971_vm6, %v1964_v13, %v1225_v44 }
 0x158   : > { %v1355_v46 = vpop.permute.xlu1 %1354 }
 0x159   : > { %v2032_v53 = vsel %vm2004_vm7, %v1999_v24, %v1355_v46 }
 0x15a   : > { %v1353_v56 = vpop.permute.xlu0 %1352 }
 0x15b   : > { %v2030_v6 = vsel %vm2004_vm7, %v1997_v3, %v1353_v56 }
 0x15c   : > { %v1467_v23 = vpop.permute.xlu1 %1466 }
 0x15d   : > { %v2065_v8 = vsel %vm2037_vm8, %v2032_v53, %v1467_v23 }
 0x15e   : > { %v1465_v60 = vpop.permute.xlu0 %1464 }
 0x15f   : > { %v2063_v14 = vsel %vm2037_vm8, %v2030_v6, %v1465_v60 }
 0x160   : > { %v1739_v20 = vpop.permute.xlu1 %1738 }
 0x161   : > { %v2098_v15 = vsel %vm2070_vm9, %v2065_v8, %v1739_v20 }
 0x162   : > { %v1737_v32 = vpop.permute.xlu0 %1736 }
 0x163   : > { %v2096_v27 = vsel %vm2070_vm9, %v2063_v14, %v1737_v32 }
 0x164   : > { %v716_v25 = vpop.permute.xlu1 %715 }
 0x165   : > { %v1902_v48 = vsel %vm1872_vm3, %v4870_v62, %v716_v25 }
 0x166   : > { %v1865_v63 = vpop.permute.xlu0 %1864 }
 0x167   : > { %v2129_v59 = vsel %vm2103_vm10, %v2096_v27, %v1865_v63 }
 0x168   : > { %3854 = vmatprep.mubr.msk.bf16.mxu1 %vm2156_vm11, %v2129_v59  ;;  %v718_v16 = vpop.permute.xlu1 %717 }
 0x169   : > { %v1904_v52 = vsel %vm1872_vm3, %v4899_v47, %v718_v16 }
 0x16a   : > { %v1867_v29 = vpop.permute.xlu0 %1866 }
 0x16b   : > { %v2131_v37 = vsel %vm2103_vm10, %v2098_v15, %v1867_v29 }
 0x16c   : > { %3855 = vmatmul.mubr.msk.bf16.gmra.mrb[8].mxu1 %vm2156_vm11, %v2131_v37  ;;  %v847_v9 = vpop.permute.xlu1 %846 }
 0x16d   : > { %v1937_v18 = vsel %vm1905_vm4, %v1904_v52, %v847_v9 }
 0x16e   : > { %v845_v51 = vpop.permute.xlu0 %844 }
 0x16f   : > { %v1935_v17 = vsel %vm1905_vm4, %v1902_v48, %v845_v51 }
 0x170   : > { %v959_v35 = vpop.permute.xlu1 %958 }
 0x171   : > { %v1970_v43 = vsel %vm1938_vm5, %v1937_v18, %v959_v35 }
 0x172   : > { %v957_v1 = vpop.permute.xlu0 %956 }
 0x173   : > { %v1968_v21 = vsel %vm1938_vm5, %v1935_v17, %v957_v1 }
 0x174   : > { %v1231_v30 = vpop.permute.xlu1 %1230 }
 0x175   : > { %v2003_v40 = vsel %vm1971_vm6, %v1970_v43, %v1231_v30 }
 0x176   : > { %v1229_v57 = vpop.permute.xlu0 %1228 }
 0x177   : > { %v2001_v36 = vsel %vm1971_vm6, %v1968_v21, %v1229_v57 }
 0x178   : > { %v1359_v58 = vpop.permute.xlu1 %1358 }
 0x179   : > { %v2036_v62 = vsel %vm2004_vm7, %v2003_v40, %v1359_v58 }
 0x17a   : > { %v1357_v22 = vpop.permute.xlu0 %1356 }
 0x17b   : > { %v2034_v4 = vsel %vm2004_vm7, %v2001_v36, %v1357_v22 }
 0x17c   : > { %v1471_v12 = vpop.permute.xlu1 %1470 }
 0x17d   : > { %v2069_v42 = vsel %vm2037_vm8, %v2036_v62, %v1471_v12 }
 0x17e   : > { %v1469_v0 = vpop.permute.xlu0 %1468 }
 0x17f   : > { %v5123_v41 = vpop.f32.mrb[0].mxu0  ;;  %v2067_v33 = vsel %vm2037_vm8, %v2034_v4, %v1469_v0 }
 0x180   : > { %v5127_v2 = vpop.f32.mrb[1].mxu0  ;;  %v1743_v47 = vpop.permute.xlu1 %1742  ;;  %v2437_v49 = vmul.f32 %v5123_v41, %v5123_v41 }
 0x181   : > { %v5131_v7 = vpop.f32.mrb[2].mxu0  ;;  %v2435_v45 = vmul.f32 %v5127_v2, %v5127_v2  ;;  %v2102_v39 = vsel %vm2070_vm9, %v2069_v42, %v1743_v47 }
 0x182   : > { %v5135_v28 = vpop.f32.mrb[3].mxu0  ;;  %v1741_v26 = vpop.permute.xlu0 %1740  ;;  %v2438_v56 = vmul.f32 %v5131_v7, %v5131_v7 }
 0x183   : > { %v2397_v38 = vadd.f32 %v5135_v28, %v5127_v2  ;;  %v2436_v34 = vmul.f32 %v5135_v28, %v5135_v28  ;;  %v2100_v54 = vsel %vm2070_vm9, %v2067_v33, %v1741_v26 }
 0x184   : > { %v1871_v10 = vpop.permute.xlu1 %1870 }
 0x185   : > { %v2398_v19 = vadd.f32 %v5123_v41, %v2397_v38  ;;  %v2467_v61 = vadd.f32 %v2436_v34, %v2435_v45  ;;  %v2135_v44 = vsel %vm2103_vm10, %v2102_v39, %v1871_v10 }
 0x186   : > { %v1869_v46 = vpop.permute.xlu0 %1868 }
 0x187   : > { %v2468_v23 = vadd.f32 %v2467_v61, %v2437_v49  ;;  %v2133_v60 = vsel %vm2103_vm10, %v2100_v54, %v1869_v46  ;;  %v2399_v55 = vadd.f32 %v5131_v7, %v2398_v19 }
 0x188   : > { %3858 = vmatprep.mubr.msk.bf16.mxu1 %vm2156_vm11, %v2133_v60 }
 0x189   : > { %3859 = vmatmul.mubr.msk.bf16.gmra.mrb[12].mxu1 %vm2156_vm11, %v2135_v44  ;;  %v2469_v31 = vadd.f32 %v2468_v23, %v2438_v56 }
 0x19f   : > { %v5158_v20 = vpop.f32.mrb[4].mxu0 }
 0x1a0   : > { %v5160_v13 = vpop.f32.mrb[5].mxu0  ;;  %v2441_v11 = vmul.f32 %v5158_v20, %v5158_v20 }
 0x1a1   : > { %v2400_v32 = vadd.f32 %v2399_v55, %v5160_v13  ;;  %v2439_v3 = vmul.f32 %v5160_v13, %v5160_v13  ;;  %v5165_v5 = vpop.f32.mrb[6].mxu0 }
 0x1a2   : > { %v5167_v6 = vpop.f32.mrb[7].mxu0  ;;  %v2442_v24 = vmul.f32 %v5165_v5, %v5165_v5 }
 0x1a3   : > { %v2470_v50 = vadd.f32 %v2469_v31, %v2439_v3  ;;  %v2401_v14 = vadd.f32 %v2400_v32, %v5167_v6  ;;  %v2440_v25 = vmul.f32 %v5167_v6, %v5167_v6 }
 0x1a5   : > { %v2402_v27 = vadd.f32 %v5158_v20, %v2401_v14  ;;  %v2471_v63 = vadd.f32 %v2470_v50, %v2440_v25 }
 0x1a7   : > { %v2472_v59 = vadd.f32 %v2471_v63, %v2441_v11  ;;  %v2403_v53 = vadd.f32 %v5165_v5, %v2402_v27 }
 0x1a9   : > { %v2473_v8 = vadd.f32 %v2472_v59, %v2442_v24 }
 0x1bf   : > { %v5178_v16 = vpop.f32.mrb[8].mxu0 }
 0x1c0   : > { %v5180_v15 = vpop.f32.mrb[9].mxu0  ;;  %v2445_v57 = vmul.f32 %v5178_v16, %v5178_v16 }
 0x1c1   : > { %v2404_v29 = vadd.f32 %v2403_v53, %v5180_v15  ;;  %v2443_v37 = vmul.f32 %v5180_v15, %v5180_v15  ;;  %v5185_v9 = vpop.f32.mrb[10].mxu0 }
 0x1c2   : > { %v5187_v51 = vpop.f32.mrb[11].mxu0  ;;  %v2446_v12 = vmul.f32 %v5185_v9, %v5185_v9 }
 0x1c3   : > { %v2474_v35 = vadd.f32 %v2473_v8, %v2443_v37  ;;  %v2405_v1 = vadd.f32 %v2404_v29, %v5187_v51  ;;  %v2444_v30 = vmul.f32 %v5187_v51, %v5187_v51 }
 0x1c5   : > { %v2406_v58 = vadd.f32 %v5178_v16, %v2405_v1  ;;  %v2475_v22 = vadd.f32 %v2474_v35, %v2444_v30 }
 0x1c7   : > { %v2476_v52 = vadd.f32 %v2475_v22, %v2445_v57  ;;  %v2407_v0 = vadd.f32 %v5185_v9, %v2406_v58 }
 0x1c9   : > { %v2477_v48 = vadd.f32 %v2476_v52, %v2446_v12  ;;  %v4053_v12 = vmov 0  }
 0x1ca   : > { %2734 = vst [vmem:[%s5265_s7 + $0xc] sm:$0xf] %v4053_v12  ;;  %2735 = vst [vmem:[%s5265_s7 + $0x10] sm:$0xf] %v4053_v12 }
 0x1cb   : > { %2736 = vst [vmem:[%s5265_s7 + $0x14] sm:$0x1] %v4053_v12  ;;  %2737 = vst [vmem:[%s5265_s7 + $0x18] sm:$0xf] %v4053_v12 }
 0x1cc   : > { %2738 = vst [vmem:[%s5265_s7 + $0x1c] sm:$0xf] %v4053_v12  ;;  %2739 = vst [vmem:[%s5265_s7 + $0x20] sm:$0x1] %v4053_v12 }
 0x1cd   : > { %2740 = vst [vmem:[%s5265_s7 + $0x24] sm:$0xf] %v4053_v12  ;;  %2741 = vst [vmem:[%s5265_s7 + $0x28] sm:$0xf] %v4053_v12 }
 0x1ce   : > { %2742 = vst [vmem:[%s5265_s7 + $0x2c] sm:$0x1] %v4053_v12  ;;  %2743 = vst [vmem:[%s5265_s7 + $0x30] sm:$0xf] %v4053_v12 }
 0x1cf   : > { %2744 = vst [vmem:[%s5265_s7 + $0x34] sm:$0xf] %v4053_v12  ;;  %2745 = vst [vmem:[%s5265_s7 + $0x38] sm:$0x1] %v4053_v12 }
 0x1d0   : > { %2746 = vst [vmem:[%s5265_s7 + $0x3c] sm:$0xf] %v4053_v12  ;;  %2747 = vst [vmem:[%s5265_s7 + $0x40] sm:$0xf] %v4053_v12 }
 0x1d1   : > { %2748 = vst [vmem:[%s5265_s7 + $0x44] sm:$0x1] %v4053_v12  ;;  %2749 = vst [vmem:[%s5265_s7 + $0x48] sm:$0xf] %v4053_v12 }
 0x1d2   : > { %2750 = vst [vmem:[%s5265_s7 + $0x4c] sm:$0xf] %v4053_v12  ;;  %2751 = vst [vmem:[%s5265_s7 + $0x50] sm:$0x1] %v4053_v12 }
 0x1d3   : > { %2752 = vst [vmem:[%s5265_s7 + $0x54] sm:$0xf] %v4053_v12  ;;  %2753 = vst [vmem:[%s5265_s7 + $0x58] sm:$0xf] %v4053_v12 }
 0x1d4   : > { %2754 = vst [vmem:[%s5265_s7 + $0x5c] sm:$0x1] %v4053_v12  ;;  %2755 = vst [vmem:[%s5265_s7 + $0x60] sm:$0xf] %v4053_v12 }
 0x1d5   : > { %2756 = vst [vmem:[%s5265_s7 + $0x64] sm:$0xf] %v4053_v12  ;;  %2757 = vst [vmem:[%s5265_s7 + $0x68] sm:$0x1] %v4053_v12 }
 0x1d6   : > { %2758 = vst [vmem:[%s5265_s7 + $0x6c] sm:$0xf] %v4053_v12  ;;  %2759 = vst [vmem:[%s5265_s7 + $0x70] sm:$0xf] %v4053_v12 }
 0x1d7   : > { %2760 = vst [vmem:[%s5265_s7 + $0x74] sm:$0x1] %v4053_v12  ;;  %2761 = vst [vmem:[%s5265_s7 + $0x78] sm:$0xf] %v4053_v12 }
 0x1d8   : > { %2762 = vst [vmem:[%s5265_s7 + $0x7c] sm:$0xf] %v4053_v12  ;;  %2763 = vst [vmem:[%s5265_s7 + $0x80] sm:$0x1] %v4053_v12 }
 0x1d9   : > { %2764 = vst [vmem:[%s5265_s7 + $0x84] sm:$0xf] %v4053_v12  ;;  %2765 = vst [vmem:[%s5265_s7 + $0x88] sm:$0xf] %v4053_v12 }
 0x1da   : > { %2766 = vst [vmem:[%s5265_s7 + $0x8c] sm:$0x1] %v4053_v12  ;;  %2767 = vst [vmem:[%s5265_s7 + $0x90] sm:$0xf] %v4053_v12 }
 0x1db   : > { %2768 = vst [vmem:[%s5265_s7 + $0x94] sm:$0xf] %v4053_v12  ;;  %2769 = vst [vmem:[%s5265_s7 + $0x98] sm:$0x1] %v4053_v12 }
 0x1dc   : > { %2770 = vst [vmem:[%s5265_s7 + $0x9c] sm:$0xf] %v4053_v12  ;;  %2771 = vst [vmem:[%s5265_s7 + $0xa0] sm:$0xf] %v4053_v12 }
 0x1dd   : > { %2772 = vst [vmem:[%s5265_s7 + $0xa4] sm:$0x1] %v4053_v12  ;;  %2773 = vst [vmem:[%s5265_s7 + $0xa8] sm:$0xf] %v4053_v12 }
 0x1de   : > { %2774 = vst [vmem:[%s5265_s7 + $0xac] sm:$0xf] %v4053_v12  ;;  %2775 = vst [vmem:[%s5265_s7 + $0xb0] sm:$0x1] %v4053_v12 }
 0x1df   : > { %v5198_v18 = vpop.f32.mrb[12].mxu0  ;;  %2776 = vst [vmem:[%s5265_s7 + $0xb4] sm:$0xf] %v4053_v12  ;;  %2777 = vst [vmem:[%s5265_s7 + $0xb8] sm:$0xf] %v4053_v12 }
 0x1e0   : > { %v5200_v17 = vpop.f32.mrb[13].mxu0  ;;  %v2449_v4 = vmul.f32 %v5198_v18, %v5198_v18  ;;  %2778 = vst [vmem:[%s5265_s7 + $0xbc] sm:$0x1] %v4053_v12  ;;  %2779 = vst [vmem:[%s5265_s7 + $0xc0] sm:$0xf] %v4053_v12 }
 0x1e1   : > { %v2408_v43 = vadd.f32 %v2407_v0, %v5200_v17  ;;  %v2447_v21 = vmul.f32 %v5200_v17, %v5200_v17  ;;  %v5205_v40 = vpop.f32.mrb[14].mxu0  ;;  %2780 = vst [vmem:[%s5265_s7 + $0xc4] sm:$0xf] %v4053_v12  ;;  %2781 = vst [vmem:[%s5265_s7 + $0xc8] sm:$0x1] %v4053_v12 }
 0x1e2   : > { %v5207_v47 = vpop.f32.mrb[15].mxu0  ;;  %v2450_v34 = vmul.f32 %v5205_v40, %v5205_v40  ;;  %2731 = vst [vmem:[%s5265_s7] sm:$0xf] %v4053_v12  ;;  %2732 = vst [vmem:[%s5265_s7 + $0x4] sm:$0xf] %v4053_v12 }
 0x1e3   : > { %v2478_v36 = vadd.f32 %v2477_v48, %v2447_v21  ;;  %v2409_v62 = vadd.f32 %v2408_v43, %v5207_v47  ;;  %v2448_v26 = vmul.f32 %v5207_v47, %v5207_v47  ;;  %2733 = vst [vmem:[%s5265_s7 + $0x8] sm:$0x1] %v4053_v12  ;;  %2782 = vst [vmem:[%s5265_s7 + $0xcc] sm:$0xf] %v4053_v12 }
 0x1e4   : > { %2783 = vst [vmem:[%s5265_s7 + $0xd0] sm:$0xf] %v4053_v12  ;;  %2784 = vst [vmem:[%s5265_s7 + $0xd4] sm:$0x1] %v4053_v12 }
 0x1e5   : > { %v2410_v45 = vadd.f32 %v5198_v18, %v2409_v62  ;;  %v2479_v38 = vadd.f32 %v2478_v36, %v2448_v26 }
 0x1e7   : > { %v2480_v42 = vadd.f32 %v2479_v38, %v2449_v4  ;;  %v2411_v33 = vadd.f32 %v5205_v40, %v2410_v45 }
 0x1e9   : > { %v2481_v49 = vadd.f32 %v2480_v42, %v2450_v34 }
 0x1ff   : > { %v5218_v39 = vpop.f32.mrb[0].mxu1 }
 0x200   : > { %v5220_v19 = vpop.f32.mrb[1].mxu1  ;;  %v2453_v60 = vmul.f32 %v5218_v39, %v5218_v39 }
 0x201   : > { %v2412_v61 = vadd.f32 %v2411_v33, %v5220_v19  ;;  %v2451_v10 = vmul.f32 %v5220_v19, %v5220_v19  ;;  %v5225_v54 = vpop.f32.mrb[2].mxu1 }
 0x202   : > { %v5227_v44 = vpop.f32.mrb[3].mxu1  ;;  %v2454_v32 = vmul.f32 %v5225_v54, %v5225_v54 }
 0x203   : > { %v2482_v46 = vadd.f32 %v2481_v49, %v2451_v10  ;;  %v2413_v56 = vadd.f32 %v2412_v61, %v5227_v44  ;;  %v2452_v23 = vmul.f32 %v5227_v44, %v5227_v44 }
 0x205   : > { %v2414_v55 = vadd.f32 %v5218_v39, %v2413_v56  ;;  %v2483_v31 = vadd.f32 %v2482_v46, %v2452_v23 }
 0x207   : > { %v2484_v3 = vadd.f32 %v2483_v31, %v2453_v60  ;;  %v2415_v50 = vadd.f32 %v5225_v54, %v2414_v55 }
 0x209   : > { %v2485_v14 = vadd.f32 %v2484_v3, %v2454_v32 }
 0x21f   : > { %v5238_v25 = vpop.f32.mrb[4].mxu1 }
 0x220   : > { %v5240_v11 = vpop.f32.mrb[5].mxu1  ;;  %v2457_v37 = vmul.f32 %v5238_v25, %v5238_v25 }
 0x221   : > { %v2416_v27 = vadd.f32 %v2415_v50, %v5240_v11  ;;  %v2455_v63 = vmul.f32 %v5240_v11, %v5240_v11  ;;  %v5245_v24 = vpop.f32.mrb[6].mxu1 }
 0x222   : > { %v5247_v59 = vpop.f32.mrb[7].mxu1  ;;  %v2458_v30 = vmul.f32 %v5245_v24, %v5245_v24 }
 0x223   : > { %v2486_v53 = vadd.f32 %v2485_v14, %v2455_v63  ;;  %v2417_v8 = vadd.f32 %v2416_v27, %v5247_v59  ;;  %v2456_v29 = vmul.f32 %v5247_v59, %v5247_v59 }
 0x225   : > { %v2418_v35 = vadd.f32 %v5238_v25, %v2417_v8  ;;  %v2487_v1 = vadd.f32 %v2486_v53, %v2456_v29 }
 0x227   : > { %v2488_v57 = vadd.f32 %v2487_v1, %v2457_v37  ;;  %v2419_v58 = vadd.f32 %v5245_v24, %v2418_v35 }
 0x229   : > { %v5258_v22 = vadd.f32 %v2488_v57, %v2458_v30 }
 0x23f   : > { %v5321_v52 = vpop.f32.mrb[8].mxu1 }
 0x240   : > { %v5323_v0 = vpop.f32.mrb[9].mxu1  ;;  %v2461_v45 = vmul.f32 %v5321_v52, %v5321_v52 }
 0x241   : > { %v2420_v48 = vadd.f32 %v2419_v58, %v5323_v0  ;;  %v2459_v43 = vmul.f32 %v5323_v0, %v5323_v0  ;;  %v5328_v21 = vpop.f32.mrb[10].mxu1 }
 0x242   : > { %v5330_v36 = vpop.f32.mrb[11].mxu1  ;;  %v2462_v42 = vmul.f32 %v5328_v21, %v5328_v21 }
 0x243   : > { %v2490_v62 = vadd.f32 %v5258_v22, %v2459_v43  ;;  %v2421_v26 = vadd.f32 %v2420_v48, %v5330_v36  ;;  %v2460_v4 = vmul.f32 %v5330_v36, %v5330_v36 }
 0x245   : > { %v2422_v38 = vadd.f32 %v5321_v52, %v2421_v26  ;;  %v2491_v34 = vadd.f32 %v2490_v62, %v2460_v4 }
 0x247   : > { %v2492_v33 = vadd.f32 %v2491_v34, %v2461_v45  ;;  %v2423_v49 = vadd.f32 %v5328_v21, %v2422_v38 }
 0x249   : > { %v2493_v61 = vadd.f32 %v2492_v33, %v2462_v42  ;;  %v2515_v33 = vlaneseq }
 0x25c   : > { %v5342_v10 = vpop.f32.mrb[12].mxu1 }
 0x25d   : > { %v5344_v46 = vpop.f32.mrb[13].mxu1  ;;  %v2465_v50 = vmul.f32 %v5342_v10, %v5342_v10 }
 0x25e   : > { %v2424_v56 = vadd.f32 %v2423_v49, %v5344_v46  ;;  %v2463_v23 = vmul.f32 %v5344_v46, %v5344_v46  ;;  %v5349_v60 = vpop.f32.mrb[14].mxu1  ;;  %v2516_v49 = vshrl.u32 %v2515_v33, 7 }
 0x25f   : > { %v5351_v55 = vpop.f32.mrb[15].mxu1  ;;  %v2466_v63 = vmul.f32 %v5349_v60, %v5349_v60 }
 0x260   : > { %v2494_v31 = vadd.f32 %v2493_v61, %v2463_v23  ;;  %v2425_v32 = vadd.f32 %v2424_v56, %v5351_v55  ;;  %v2464_v3 = vmul.f32 %v5351_v55, %v5351_v55  ;;  %v2509_v61 = vld [vmem:[%s6079_s2] sm:$0x1]  ;;  %v2517_v23 = vsub.s32 0, %v2516_v49 }
 0x262   : > { %v2426_v14 = vadd.f32 %v5342_v10, %v2425_v32  ;;  %v2495_v27 = vadd.f32 %v2494_v31, %v2464_v3  ;;  %v2510_v32 = vld [vmem:[%s6079_s2 + $0x1] sm:$0x1] }
 0x264   : > { %v2427_v53 = vadd.f32 %v5349_v60, %v2426_v14  ;;  %v2496_v8 = vadd.f32 %v2495_v27, %v2465_v50 }
 0x266   : > { %v2428_v29 = vrot.slane %v2427_v53, 4  ;;  %v2497_v37 = vadd.f32 %v2496_v8, %v2466_v63 }
 0x268   : > { %v2429_v35 = vadd.f32 %v2428_v29, %v2427_v53  ;;  %v2498_v1 = vrot.slane %v2497_v37, 4 }
 0x26a   : > { %v2430_v30 = vrot.slane %v2429_v35, 2  ;;  %v2499_v57 = vadd.f32 %v2498_v1, %v2497_v37 }
 0x26c   : > { %v2431_v58 = vadd.f32 %v2430_v30, %v2429_v35  ;;  %v2500_v22 = vrot.slane %v2499_v57, 2 }
 0x26e   : > { %v2432_v12 = vrot.slane %v2431_v58, 1  ;;  %v2501_v48 = vadd.f32 %v2500_v22, %v2499_v57 }
 0x270   : > { %v2433_v43 = vadd.f32 %v2432_v12, %v2431_v58  ;;  %v2502_v62 = vrot.slane %v2501_v48, 1 }
 0x272   : > { %v2434_v26 = vmul.f32 0.00390625, %v2433_v43  ;;  %v2503_v4 = vadd.f32 %v2502_v62, %v2501_v48 }
 0x274   : > { %v2504_v45 = vmul.f32 0.00390625, %v2503_v4  ;;  %v2505_v38 = vmul.f32 %v2434_v26, %v2434_v26  ;;  %v2512_v56 = vmul.f32 %v2509_v61, %v2434_v26 }
 0x276   : > { %v2506_v34 = vsub.f32 %v2504_v45, %v2505_v38 }
 0x278   : > { %v2507_v42 = vadd.f32 1e-05, %v2506_v34 }
 0x27a   : > { %4035 = vrsqrt.f32 %v2507_v42 }
 0x284   : > { %v4036_v31 = vpop.eup %4035 }
 0x285   : > { %v2511_v3 = vmul.f32 %v4036_v31, %v2509_v61  ;;  %v2513_v50 = vmul.f32 %v4036_v31, %v2512_v56 }
 0x287   : > { %v2518_v14 = vrot.slane %v2511_v3, %v2517_v23  ;;  %v2514_v27 = vsub.f32 %v2510_v32, %v2513_v50 }
 0x289   : > { %v2519_v63 = vmul.f32 %v2518_v14, %v5127_v2  ;;  %v2520_v53 = vmul.f32 %v2518_v14, %v5135_v28  ;;  %v2521_v8 = vmul.f32 %v5123_v41, %v2518_v14  ;;  %v2522_v29 = vmul.f32 %v5131_v7, %v2518_v14 }
 0x28a   : > { %v2523_v37 = vmul.f32 %v2518_v14, %v5160_v13  ;;  %v2524_v35 = vmul.f32 %v2518_v14, %v5167_v6  ;;  %v2525_v1 = vmul.f32 %v5158_v20, %v2518_v14  ;;  %v2526_v30 = vmul.f32 %v5165_v5, %v2518_v14 }
 0x28b   : > { %v2527_v57 = vmul.f32 %v2518_v14, %v5180_v15  ;;  %v2528_v58 = vmul.f32 %v2518_v14, %v5187_v51  ;;  %v2529_v2 = vmul.f32 %v5178_v16, %v2518_v14  ;;  %v2530_v28 = vmul.f32 %v5185_v9, %v2518_v14 }
 0x28c   : > { %v2531_v41 = vmul.f32 %v2518_v14, %v5200_v17  ;;  %v2532_v7 = vmul.f32 %v2518_v14, %v5207_v47  ;;  %v2533_v13 = vmul.f32 %v5198_v18, %v2518_v14  ;;  %v2534_v6 = vmul.f32 %v5205_v40, %v2518_v14 }
 0x28d   : > { %v2535_v20 = vmul.f32 %v2518_v14, %v5220_v19  ;;  %v2536_v5 = vmul.f32 %v2518_v14, %v5227_v44  ;;  %v2537_v15 = vmul.f32 %v5218_v39, %v2518_v14  ;;  %v2538_v51 = vmul.f32 %v5225_v54, %v2518_v14 }
 0x28e   : > { %v2539_v16 = vmul.f32 %v2518_v14, %v5240_v11  ;;  %v2540_v9 = vmul.f32 %v2518_v14, %v5247_v59  ;;  %v2541_v17 = vmul.f32 %v5238_v25, %v2518_v14  ;;  %v2542_v47 = vmul.f32 %v5245_v24, %v2518_v14 }
 0x28f   : > { %v2543_v18 = vmul.f32 %v2518_v14, %v5323_v0  ;;  %v2544_v40 = vmul.f32 %v2518_v14, %v5330_v36  ;;  %v2545_v19 = vmul.f32 %v5321_v52, %v2518_v14  ;;  %v2546_v44 = vmul.f32 %v5328_v21, %v2518_v14 }
 0x290   : > { %v2547_v39 = vmul.f32 %v2518_v14, %v5344_v46  ;;  %v2548_v54 = vmul.f32 %v2518_v14, %v5351_v55  ;;  %v2549_v11 = vmul.f32 %v5342_v10, %v2518_v14  ;;  %v2550_v59 = vmul.f32 %v5349_v60, %v2518_v14 }
 0x291   : > { %v2554_v22 = vrot.slane %v2514_v27, %v2517_v23 }
 0x293   : > { %v5400_v25 = vadd.f32 %v2554_v22, %v2519_v63  ;;  %v5402_v24 = vadd.f32 %v2554_v22, %v2520_v53  ;;  %v5404_v0 = vadd.f32 %v2554_v22, %v2521_v8  ;;  %v5406_v36 = vadd.f32 %v2554_v22, %v2522_v29 }
 0x294   : > { %v5408_v52 = vadd.f32 %v2554_v22, %v2523_v37  ;;  %v5410_v21 = vadd.f32 %v2554_v22, %v2524_v35  ;;  %v5412_v46 = vadd.f32 %v2554_v22, %v2525_v1  ;;  %v5414_v55 = vadd.f32 %v2554_v22, %v2526_v30 }
 0x295   : > { %v5416_v10 = vadd.f32 %v2554_v22, %v2527_v57  ;;  %v5418_v60 = vadd.f32 %v2554_v22, %v2528_v58  ;;  %v5420_v12 = vadd.f32 %v2554_v22, %v2529_v2  ;;  %v5422_v48 = vadd.f32 %v2554_v22, %v2530_v28 }
 0x296   : > { %v5424_v43 = vadd.f32 %v2554_v22, %v2531_v41  ;;  %v5426_v62 = vadd.f32 %v2554_v22, %v2532_v7  ;;  %v5428_v26 = vadd.f32 %v2554_v22, %v2533_v13  ;;  %v5430_v4 = vadd.f32 %v2554_v22, %v2534_v6 }
 0x297   : > { %v5432_v45 = vadd.f32 %v2554_v22, %v2535_v20  ;;  %v5434_v38 = vadd.f32 %v2554_v22, %v2536_v5  ;;  %v5436_v34 = vadd.f32 %v2554_v22, %v2537_v15  ;;  %v5438_v42 = vadd.f32 %v2554_v22, %v2538_v51 }
 0x298   : > { %v5440_v33 = vadd.f32 %v2554_v22, %v2539_v16  ;;  %v5442_v49 = vadd.f32 %v2554_v22, %v2540_v9  ;;  %v5444_v61 = vadd.f32 %v2554_v22, %v2541_v17  ;;  %v5446_v56 = vadd.f32 %v2554_v22, %v2542_v47 }
 0x299   : > { %v5448_v23 = vadd.f32 %v2554_v22, %v2543_v18  ;;  %v5450_v31 = vadd.f32 %v2554_v22, %v2544_v40  ;;  %v5452_v32 = vadd.f32 %v2554_v22, %v2545_v19  ;;  %v5454_v3 = vadd.f32 %v2554_v22, %v2546_v44 }
 0x29a   : > { %v5456_v50 = vadd.f32 %v2554_v22, %v2547_v39  ;;  %v5458_v14 = vadd.f32 %v2554_v22, %v2548_v54  ;;  %v5460_v27 = vadd.f32 %v2554_v22, %v2549_v11  ;;  %v5462_v63 = vadd.f32 %v2554_v22, %v2550_v59 }
 0x29b   : > { %vm2587_vm12 = vcmp.ge.f32.partialorder %v5400_v25, 0.0  ;;  %vm2588_vm13 = vcmp.ge.f32.partialorder %v5402_v24, 0.0  ;;  %vm2589_vm14 = vcmp.ge.f32.partialorder %v5404_v0, 0.0  ;;  %vm2590_vm15 = vcmp.ge.f32.partialorder %v5406_v36, 0.0 }
 0x29c   : > { %vm2591_vm0 = vcmp.ge.f32.partialorder %v5408_v52, 0.0  ;;  %vm2592_vm1 = vcmp.ge.f32.partialorder %v5410_v21, 0.0  ;;  %vm2593_vm2 = vcmp.ge.f32.partialorder %v5412_v46, 0.0  ;;  %vm2594_vm3 = vcmp.ge.f32.partialorder %v5414_v55, 0.0 }
 0x29d   : > { %vm2595_vm4 = vcmp.ge.f32.partialorder %v5416_v10, 0.0  ;;  %v2619_v53 = vmul.f32 0.01, %v5400_v25  ;;  %v2620_v8 = vmul.f32 0.01, %v5402_v24  ;;  %vm2602_vm11 = vcmp.ge.f32.partialorder %v5430_v4, 0.0 }
 0x29e   : > { %v2621_v29 = vmul.f32 0.01, %v5404_v0  ;;  %vm2603_vm5 = vcmp.ge.f32.partialorder %v5432_v45, 0.0  ;;  %v2622_v37 = vmul.f32 0.01, %v5406_v36  ;;  %vm2608_vm10 = vcmp.ge.f32.partialorder %v5442_v49, 0.0 }
 0x29f   : > { %v2623_v35 = vmul.f32 0.01, %v5408_v52  ;;  %v2624_v1 = vmul.f32 0.01, %v5410_v21  ;;  %v2625_v30 = vmul.f32 0.01, %v5412_v46  ;;  %v5498_v2 = vsel %vm2587_vm12, %v5400_v25, %v2619_v53 }
 0x2a0   : > { %v2626_v57 = vmul.f32 0.01, %v5414_v55  ;;  %v2627_v58 = vmul.f32 0.01, %v5416_v10  ;;  %vm2612_vm7 = vcmp.ge.f32.partialorder %v5450_v31, 0.0  ;;  %v2652_v13 = vsel %vm2588_vm13, %v5402_v24, %v2620_v8 }
 0x2a1   : > { %v2628_v28 = vmul.f32 0.01, %v5418_v60  ;;  %v2629_v41 = vmul.f32 0.01, %v5420_v12  ;;  %v2630_v7 = vmul.f32 0.01, %v5422_v48  ;;  %v2653_v15 = vsel %vm2589_vm14, %v5404_v0, %v2621_v29 }
 0x2a2   : > { %vm2614_vm6 = vcmp.ge.f32.partialorder %v5454_v3, 0.0  ;;  %vm2615_vm9 = vcmp.ge.f32.partialorder %v5456_v50, 0.0  ;;  %vm2616_vm8 = vcmp.ge.f32.partialorder %v5458_v14, 0.0  ;;  %v2631_v6 = vmul.f32 0.01, %v5424_v43 }
 0x2a3   : > { %v2632_v20 = vmul.f32 0.01, %v5426_v62  ;;  %v2633_v5 = vmul.f32 0.01, %v5428_v26  ;;  %vm2617_vm13 = vcmp.ge.f32.partialorder %v5460_v27, 0.0  ;;  %vm2618_vm12 = vcmp.ge.f32.partialorder %v5462_v63, 0.0 }
 0x2a4   : > { %v2634_v51 = vmul.f32 0.01, %v5430_v4  ;;  %v2635_v16 = vmul.f32 0.01, %v5432_v45  ;;  %v2636_v9 = vmul.f32 0.01, %v5434_v38  ;;  %v2654_v17 = vsel %vm2590_vm15, %v5406_v36, %v2622_v37 }
 0x2a5   : > { %v2637_v47 = vmul.f32 0.01, %v5436_v34  ;;  %v2638_v18 = vmul.f32 0.01, %v5438_v42  ;;  %v2639_v40 = vmul.f32 0.01, %v5440_v33  ;;  %v2655_v19 = vsel %vm2591_vm0, %v5408_v52, %v2623_v35 }
 0x2a6   : > { %v2640_v44 = vmul.f32 0.01, %v5442_v49  ;;  %v2641_v39 = vmul.f32 0.01, %v5444_v61  ;;  %v2642_v54 = vmul.f32 0.01, %v5446_v56  ;;  %v2656_v11 = vsel %vm2592_vm1, %v5410_v21, %v2624_v1 }
 0x2a7   : > { %v2643_v59 = vmul.f32 0.01, %v5448_v23  ;;  %v2644_v22 = vmul.f32 0.01, %v5450_v31  ;;  %v2645_v25 = vmul.f32 0.01, %v5452_v32  ;;  %v2657_v24 = vsel %vm2593_vm2, %v5412_v46, %v2625_v30 }
 0x2a8   : > { %v2646_v0 = vmul.f32 0.01, %v5454_v3  ;;  %v2647_v36 = vmul.f32 0.01, %v5456_v50  ;;  %v2648_v52 = vmul.f32 0.01, %v5458_v14  ;;  %v2658_v21 = vsel %vm2594_vm3, %v5414_v55, %v2626_v57 }
 0x2a9   : > { %v2649_v53 = vmul.f32 0.01, %v5460_v27  ;;  %v2650_v8 = vmul.f32 0.01, %v5462_v63  ;;  %v2659_v29 = vsel %vm2595_vm4, %v5416_v10, %v2627_v58  ;;  %vm6081_vm14 = vcmp.ge.f32.partialorder %v5418_v60, 0.0 }
 0x2aa   : > { %v2660_v46 = vsel %vm6081_vm14, %v5418_v60, %v2628_v28  ;;  %vm6082_vm15 = vcmp.ge.f32.partialorder %v5420_v12, 0.0  ;;  %vm6083_vm0 = vcmp.ge.f32.partialorder %v5422_v48, 0.0  ;;  %vm6084_vm1 = vcmp.ge.f32.partialorder %v5424_v43, 0.0 }
 0x2ab   : > { %v2661_v37 = vsel %vm6082_vm15, %v5420_v12, %v2629_v41  ;;  %v2662_v55 = vsel %vm6083_vm0, %v5422_v48, %v2630_v7  ;;  %v2663_v35 = vsel %vm6084_vm1, %v5424_v43, %v2631_v6  ;;  %vm6085_vm2 = vcmp.ge.f32.partialorder %v5426_v62, 0.0 }
 0x2ac   : > { %v2664_v10 = vsel %vm6085_vm2, %v5426_v62, %v2632_v20  ;;  %vm6086_vm3 = vcmp.ge.f32.partialorder %v5428_v26, 0.0  ;;  %v2666_v12 = vsel %vm2602_vm11, %v5430_v4, %v2634_v51  ;;  %v2667_v48 = vsel %vm2603_vm5, %v5432_v45, %v2635_v16 }
 0x2ad   : > { %v2665_v60 = vsel %vm6086_vm3, %v5428_v26, %v2633_v5  ;;  %vm6087_vm4 = vcmp.ge.f32.partialorder %v5434_v38, 0.0  ;;  %vm6088_vm14 = vcmp.ge.f32.partialorder %v5436_v34, 0.0  ;;  %vm6089_vm15 = vcmp.ge.f32.partialorder %v5438_v42, 0.0 }
 0x2ae   : > { %v2668_v43 = vsel %vm6087_vm4, %v5434_v38, %v2636_v9  ;;  %v2669_v62 = vsel %vm6088_vm14, %v5436_v34, %v2637_v47  ;;  %v2670_v26 = vsel %vm6089_vm15, %v5438_v42, %v2638_v18  ;;  %vm6090_vm0 = vcmp.ge.f32.partialorder %v5440_v33, 0.0 }
 0x2af   : > { %v2671_v4 = vsel %vm6090_vm0, %v5440_v33, %v2639_v40  ;;  %v2672_v45 = vsel %vm2608_vm10, %v5442_v49, %v2640_v44  ;;  %vm6091_vm5 = vcmp.ge.f32.partialorder %v5444_v61, 0.0  ;;  %vm6092_vm11 = vcmp.ge.f32.partialorder %v5446_v56, 0.0 }
 0x2b0   : > { %v2673_v38 = vsel %vm6091_vm5, %v5444_v61, %v2641_v39  ;;  %v2674_v34 = vsel %vm6092_vm11, %v5446_v56, %v2642_v54  ;;  %vm6093_vm1 = vcmp.ge.f32.partialorder %v5448_v23, 0.0  ;;  %v2676_v33 = vsel %vm2612_vm7, %v5450_v31, %v2644_v22 }
 0x2b1   : > { %v2675_v42 = vsel %vm6093_vm1, %v5448_v23, %v2643_v59  ;;  %vm6094_vm2 = vcmp.ge.f32.partialorder %v5452_v32, 0.0  ;;  %v2678_v61 = vsel %vm2614_vm6, %v5454_v3, %v2646_v0  ;;  %v2679_v56 = vsel %vm2615_vm9, %v5456_v50, %v2647_v36 }
 0x2b2   : > { %v2677_v49 = vsel %vm6094_vm2, %v5452_v32, %v2645_v25  ;;  %v2680_v23 = vsel %vm2616_vm8, %v5458_v14, %v2648_v52  ;;  %v2681_v31 = vsel %vm2617_vm13, %v5460_v27, %v2649_v53  ;;  %v2682_v32 = vsel %vm2618_vm12, %v5462_v63, %v2650_v8 }
 0x2b3   : > { %v3773_v1 = vpack.c.bf16 %v5498_v2, %v5498_v2  ;;  %v3774_v3 = vpack.c.bf16 %v2652_v13, %v2652_v13  ;;  %v3775_v30 = vpack.c.bf16 %v2653_v15, %v2653_v15  ;;  %v3776_v57 = vpack.c.bf16 %v2654_v17, %v2654_v17 }
 0x2b4   : > { %v3777_v58 = vpack.c.bf16 %v2655_v19, %v2655_v19  ;;  %v5628_v50 = vpack.c.bf16 %v2656_v11, %v2656_v11  ;;  %vm2865_vm6 = vsmask.f32 256  ;;  %vm2866_vm7 = vsmask.f32 4368 }
 0x2b5   : > { %v5630_v14 = vpack.c.bf16 %v2657_v24, %v2657_v24  ;;  %v5632_v28 = vpack.c.bf16 %v2658_v21, %v2658_v21  ;;  %v5634_v27 = vpack.c.bf16 %v2659_v29, %v2659_v29  ;;  %v5636_v41 = vpack.c.bf16 %v2660_v46, %v2660_v46  ;;  %vm5687_vm8 = vmor %vm2865_vm6, %vm2866_vm7 }
 0x2b6   : > { %v5638_v63 = vpack.c.bf16 %v2661_v37, %v2661_v37  ;;  %v5640_v7 = vpack.c.bf16 %v2662_v55, %v2662_v55  ;;  %v5642_v2 = vpack.c.bf16 %v2663_v35, %v2663_v35  ;;  %v5644_v13 = vpack.c.bf16 %v2664_v10, %v2664_v10 }
 0x2b7   : > { %v5646_v6 = vpack.c.bf16 %v2665_v60, %v2665_v60  ;;  %v5648_v20 = vpack.c.bf16 %v2666_v12, %v2666_v12  ;;  %v5650_v5 = vpack.c.bf16 %v2667_v48, %v2667_v48  ;;  %v5652_v15 = vpack.c.bf16 %v2668_v43, %v2668_v43 }
 0x2b8   : > { %v5654_v51 = vpack.c.bf16 %v2669_v62, %v2669_v62  ;;  %v5656_v16 = vpack.c.bf16 %v2670_v26, %v2670_v26  ;;  %v5658_v9 = vpack.c.bf16 %v2671_v4, %v2671_v4  ;;  %v5660_v17 = vpack.c.bf16 %v2672_v45, %v2672_v45 }
 0x2b9   : > { %v5662_v47 = vpack.c.bf16 %v2673_v38, %v2673_v38  ;;  %v5664_v18 = vpack.c.bf16 %v2674_v34, %v2674_v34  ;;  %v5666_v40 = vpack.c.bf16 %v2675_v42, %v2675_v42  ;;  %v5668_v19 = vpack.c.bf16 %v2676_v33, %v2676_v33 }
 0x2ba   : > { %v5670_v44 = vpack.c.bf16 %v2677_v49, %v2677_v49  ;;  %v5672_v39 = vpack.c.bf16 %v2678_v61, %v2678_v61  ;;  %v5674_v54 = vpack.c.bf16 %v2679_v56, %v2679_v56  ;;  %v5676_v11 = vpack.c.bf16 %v2680_v23, %v2680_v23 }
 0x2bb   : > { %v5678_v59 = vpack.c.bf16 %v2681_v31, %v2681_v31  ;;  %v5680_v22 = vpack.c.bf16 %v2682_v32, %v2682_v32  ;;  %v2869_v25 = vshrl.u32 %v3773_v1, 16  ;;  %v2872_v24 = vshll.u32 %v3773_v1, 16 }
 0x2bc   : > { %v2877_v0 = vshrl.u32 %v3774_v3, 16  ;;  %v2880_v36 = vshll.u32 %v3774_v3, 16  ;;  %v2886_v52 = vshrl.u32 %v3775_v30, 16  ;;  %v2889_v21 = vshll.u32 %v3775_v30, 16 }
 0x2bd   : > { %v2871_v53 = vrot.slane %v2869_v25, 7  ;;  %v2894_v8 = vshrl.u32 %v3776_v57, 16  ;;  %v2897_v29 = vshll.u32 %v3776_v57, 16  ;;  %v2903_v46 = vshrl.u32 %v3777_v58, 16 }
 0x2be   : > { %v5682_v37 = vrot.slane %v2877_v0, 7  ;;  %v2888_v55 = vrot.slane %v2886_v52, 7  ;;  %v2906_v35 = vshll.u32 %v3777_v58, 16  ;;  %v2911_v10 = vshrl.u32 %v5628_v50, 16 }
 0x2bf   : > { %v5691_v12 = vor.u32 %v2872_v24, %v2871_v53  ;;  %v2875_v48 = vrot.slane %v2871_v53, 4  ;;  %v5693_v43 = vrot.slane %v2894_v8, 7  ;;  %v2905_v62 = vrot.slane %v2903_v46, 7 }
 0x2c0   : > { %v2882_v26 = vor.u32 %v2880_v36, %v5682_v37  ;;  %v2884_v4 = vrot.slane %v5682_v37, 4  ;;  %v5697_v45 = vor.u32 %v2889_v21, %v2888_v55  ;;  %v2892_v38 = vrot.slane %v2888_v55, 4 }
 0x2c1   : > { %v2899_v34 = vor.u32 %v2897_v29, %v5693_v43  ;;  %v2901_v42 = vrot.slane %v5693_v43, 4  ;;  %v5701_v33 = vor.u32 %v2906_v35, %v2905_v62  ;;  %v2909_v49 = vrot.slane %v2905_v62, 4 }
 0x2c2   : > { %v2883_v61 = vsel %vm5687_vm8, %v2875_v48, %v2882_v26  ;;  %v5705_v56 = vrot.slane %v2911_v10, 7  ;;  %v2914_v23 = vshll.u32 %v5628_v50, 16  ;;  %v2920_v31 = vshrl.u32 %v5630_v14, 16 }
 0x2c3   : > { %v2900_v32 = vsel %vm5687_vm8, %v2892_v38, %v2899_v34  ;;  %v2923_v1 = vshll.u32 %v5630_v14, 16  ;;  %v2928_v3 = vshrl.u32 %v5632_v28, 16  ;;  %v2931_v30 = vshll.u32 %v5632_v28, 16  ;;  %3693 = vst [vmem:[%s5265_s7 + $0x10] sm:$0xf] %v2883_v61 }
 0x2c4   : > { %v2916_v57 = vor.u32 %v2914_v23, %v5705_v56  ;;  %v2918_v58 = vrot.slane %v5705_v56, 4  ;;  %v2922_v25 = vrot.slane %v2920_v31, 7  ;;  %v2937_v50 = vshrl.u32 %v5634_v27, 16  ;;  %3698 = vst [vmem:[%s5265_s7 + $0x1c] sm:$0xf] %v2900_v32 }
 0x2c5   : > { %v5719_v24 = vrot.slane %v2928_v3, 7  ;;  %v2940_v0 = vshll.u32 %v5634_v27, 16  ;;  %v2945_v14 = vshrl.u32 %v5636_v41, 16  ;;  %v2948_v36 = vshll.u32 %v5636_v41, 16 }
 0x2c6   : > { %v2917_v28 = vsel %vm5687_vm8, %v2909_v49, %v2916_v57  ;;  %v5726_v52 = vor.u32 %v2923_v1, %v2922_v25  ;;  %v2926_v21 = vrot.slane %v2922_v25, 4  ;;  %v2939_v53 = vrot.slane %v2937_v50, 7 }
 0x2c7   : > { %v2933_v8 = vor.u32 %v2931_v30, %v5719_v24  ;;  %v2935_v29 = vrot.slane %v5719_v24, 4  ;;  %v5730_v46 = vrot.slane %v2945_v14, 7  ;;  %v2954_v27 = vshrl.u32 %v5638_v63, 16  ;;  %3703 = vst [vmem:[%s5265_s7 + $0x28] sm:$0xf] %v2917_v28 }
 0x2c8   : > { %v5734_v55 = vor.u32 %v2940_v0, %v2939_v53  ;;  %v2943_v41 = vrot.slane %v2939_v53, 4  ;;  %v2957_v35 = vshll.u32 %v5638_v63, 16  ;;  %v2962_v10 = vshrl.u32 %v5640_v7, 16 }
 0x2c9   : > { %v2934_v48 = vsel %vm5687_vm8, %v2926_v21, %v2933_v8  ;;  %v2950_v62 = vor.u32 %v2948_v36, %v5730_v46  ;;  %v2952_v26 = vrot.slane %v5730_v46, 4  ;;  %v2956_v38 = vrot.slane %v2954_v27, 7 }
 0x2ca   : > { %v5742_v34 = vrot.slane %v2962_v10, 7  ;;  %v2965_v49 = vshll.u32 %v5640_v7, 16  ;;  %v2971_v61 = vshrl.u32 %v5642_v2, 16  ;;  %v2974_v23 = vshll.u32 %v5642_v2, 16  ;;  %3708 = vst [vmem:[%s5265_s7 + $0x34] sm:$0xf] %v2934_v48 }
 0x2cb   : > { %v2951_v63 = vsel %vm5687_vm8, %v2943_v41, %v2950_v62  ;;  %v5750_v31 = vor.u32 %v2957_v35, %v2956_v38  ;;  %v2960_v32 = vrot.slane %v2956_v38, 4  ;;  %v2979_v1 = vshrl.u32 %v5644_v13, 16 }
 0x2cc   : > { %v2967_v3 = vor.u32 %v2965_v49, %v5742_v34  ;;  %v2973_v57 = vrot.slane %v2971_v61, 7  ;;  %v2982_v7 = vshll.u32 %v5644_v13, 16  ;;  %3713 = vst [vmem:[%s5265_s7 + $0x40] sm:$0xf] %v2951_v63  ;;  %v2988_v2 = vshrl.u32 %v5646_v6, 16 }
 0x2cd   : > { %v5757_v25 = vrot.slane %v2979_v1, 7  ;;  %v2991_v50 = vshll.u32 %v5646_v6, 16  ;;  %v2996_v0 = vshrl.u32 %v5648_v20, 16  ;;  %v2999_v21 = vshll.u32 %v5648_v20, 16 }
 0x2ce   : > { %v2968_v14 = vsel %vm5687_vm8, %v2960_v32, %v2967_v3  ;;  %v5764_v36 = vor.u32 %v2974_v23, %v2973_v57  ;;  %v2977_v28 = vrot.slane %v2973_v57, 4  ;;  %v2990_v8 = vrot.slane %v2988_v2, 7  ;;  %v3716_v2 = vld [vmem:[%s5265_s7 + $0x48] sm:$0xf] }
 0x2cf   : > { %v2984_v53 = vor.u32 %v2982_v7, %v5757_v25  ;;  %v5769_v27 = vrot.slane %v2996_v0, 7  ;;  %3718 = vst [vmem:[%s5265_s7 + $0x4c] sm:$0xf] %v2968_v14  ;;  %v3005_v6 = vshrl.u32 %v5650_v5, 16  ;;  %v3008_v41 = vshll.u32 %v5650_v5, 16 }
 0x2d0   : > { %v3013_v35 = vshrl.u32 %v5652_v15, 16  ;;  %v3016_v10 = vshll.u32 %v5652_v15, 16  ;;  %v5778_v48 = vor.u32 %v2991_v50, %v2990_v8  ;;  %v2994_v62 = vrot.slane %v2990_v8, 4 }
 0x2d1   : > { %v2985_v20 = vsel %vm5687_vm8, %v2977_v28, %v2984_v53  ;;  %v3001_v38 = vor.u32 %v2999_v21, %v5769_v27  ;;  %v3007_v61 = vrot.slane %v3005_v6, 7  ;;  %v3022_v5 = vshrl.u32 %v5654_v51, 16 }
 0x2d2   : > { %v5782_v23 = vrot.slane %v3013_v35, 7  ;;  %3723 = vst [vmem:[%s5265_s7 + $0x58] sm:$0xf] %v2985_v20  ;;  %v3025_v63 = vshll.u32 %v5654_v51, 16  ;;  %v3030_v32 = vshrl.u32 %v5656_v16, 16  ;;  %v3033_v1 = vshll.u32 %v5656_v16, 16 }
 0x2d3   : > { %v3002_v15 = vsel %vm5687_vm8, %v2994_v62, %v3001_v38  ;;  %v5791_v3 = vor.u32 %v3008_v41, %v3007_v61  ;;  %v3011_v57 = vrot.slane %v3007_v61, 4  ;;  %v3024_v50 = vrot.slane %v3022_v5, 7  ;;  %v3714_v35 = vld [vmem:[%s5265_s7 + $0x44] sm:$0x1] }
 0x2d4   : > { %v3018_v7 = vor.u32 %v3016_v10, %v5782_v23  ;;  %3728 = vst [vmem:[%s5265_s7 + $0x64] sm:$0xf] %v3002_v15  ;;  %v5796_v0 = vrot.slane %v3030_v32, 7  ;;  %v3039_v14 = vshrl.u32 %v5658_v9, 16  ;;  %v3042_v51 = vshll.u32 %v5658_v9, 16 }
 0x2d5   : > { %v3047_v16 = vshrl.u32 %v5660_v17, 16  ;;  %v3050_v21 = vshll.u32 %v5660_v17, 16  ;;  %v3056_v53 = vshrl.u32 %v5662_v47, 16  ;;  %v5805_v8 = vor.u32 %v3025_v63, %v3024_v50 }
 0x2d6   : > { %v3019_v28 = vsel %vm5687_vm8, %v3011_v57, %v3018_v7  ;;  %v3028_v6 = vrot.slane %v3024_v50, 4  ;;  %v3035_v41 = vor.u32 %v3033_v1, %v5796_v0  ;;  %vm3189_vm9 = vcmask 1043456   ;;  %v3711_v1 = vld [vmem:[%s5265_s7 + $0x3c] sm:$0xf] }
 0x2d7   : > { %vm3190_vm10 = vsmask.f32 7938  ;;  %3733 = vst [vmem:[%s5265_s7 + $0x70] sm:$0xf] %v3019_v28  ;;  %v3041_v9 = vrot.slane %v3039_v14, 7  ;;  %v5810_v10 = vrot.slane %v3047_v16, 7 }
 0x2d8   : > { %v3058_v20 = vrot.slane %v3056_v53, 7  ;;  %v3059_v62 = vshll.u32 %v5662_v47, 16  ;;  %vm3196_vm12 = vcmask 1040384   ;;  %v3036_v17 = vsel %vm5687_vm8, %v3028_v6, %v3035_v41  ;;  %vm5865_vm13 = vmand %vm3189_vm9, %vm3190_vm10 }
 0x2d9   : > { %v3064_v38 = vshrl.u32 %v5664_v18, 16  ;;  %v3067_v61 = vshll.u32 %v5664_v18, 16  ;;  %v3073_v5 = vshrl.u32 %v5666_v40, 16  ;;  %v5818_v15 = vor.u32 %v3042_v51, %v3041_v9  ;;  %3738 = vst [vmem:[%s5265_s7 + $0x7c] sm:$0xf] %v3036_v17  ;;  %vm5878_vm3 = vmand %vm3196_vm12, %vm2865_vm6 }
 0x2da   : > { %v3045_v63 = vrot.slane %v3041_v9, 4  ;;  %v3052_v32 = vor.u32 %v3050_v21, %v5810_v10  ;;  %v5823_v47 = vor.u32 %v3059_v62, %v3058_v20  ;;  %v3062_v57 = vrot.slane %v3058_v20, 4  ;;  %v3709_v21 = vld [vmem:[%s5265_s7 + $0x38] sm:$0x1] }
 0x2db   : > { %v5825_v7 = vrot.slane %v3064_v38, 7  ;;  %v3075_v50 = vrot.slane %v3073_v5, 7  ;;  %v3076_v14 = vshll.u32 %v5666_v40, 16  ;;  %v3081_v51 = vshrl.u32 %v5668_v19, 16 }
 0x2dc   : > { %v3053_v18 = vsel %vm5687_vm8, %v3045_v63, %v3052_v32  ;;  %v3084_v28 = vshll.u32 %v5668_v19, 16  ;;  %v3090_v6 = vshrl.u32 %v5670_v44, 16  ;;  %v3093_v40 = vshll.u32 %v5670_v44, 16  ;;  %v3691_v32 = vld [vmem:[%s5265_s7 + $0xc] sm:$0xf] }
 0x2dd   : > { %v3069_v16 = vor.u32 %v3067_v61, %v5825_v7  ;;  %v3079_v53 = vrot.slane %v3075_v50, 4  ;;  %3743 = vst [vmem:[%s5265_s7 + $0x88] sm:$0xf] %v3053_v18  ;;  %v5836_v41 = vor.u32 %v3076_v14, %v3075_v50  ;;  %v5838_v9 = vrot.slane %v3081_v51, 7  ;;  %v3694_v14 = vld [vmem:[%s5265_s7 + $0x14] sm:$0x1] }
 0x2de   : > { %v3098_v20 = vshrl.u32 %v5672_v39, 16  ;;  %v3092_v62 = vrot.slane %v3090_v6, 7  ;;  %v3101_v17 = vshll.u32 %v5672_v39, 16  ;;  %v3107_v38 = vshrl.u32 %v5674_v54, 16  ;;  %v3696_v51 = vld [vmem:[%s5265_s7 + $0x18] sm:$0xf] }
 0x2df   : > { %v3070_v19 = vsel %vm5687_vm8, %v3062_v57, %v3069_v16  ;;  %v3086_v61 = vor.u32 %v3084_v28, %v5838_v9  ;;  %v3110_v44 = vshll.u32 %v5674_v54, 16  ;;  %v3115_v39 = vshrl.u32 %v5676_v11, 16  ;;  %v3706_v54 = vld [vmem:[%s5265_s7 + $0x30] sm:$0xf] }
 0x2e0   : > { %v5848_v63 = vrot.slane %v3098_v20, 7  ;;  %3748 = vst [vmem:[%s5265_s7 + $0x94] sm:$0xf] %v3070_v19  ;;  %v5853_v50 = vor.u32 %v3093_v40, %v3092_v62  ;;  %v3096_v57 = vrot.slane %v3092_v62, 4  ;;  %v3109_v18 = vrot.slane %v3107_v38, 7 }
 0x2e1   : > { %v3087_v28 = vsel %vm5687_vm8, %v3079_v53, %v3086_v61  ;;  %v3118_v6 = vshll.u32 %v5676_v11, 16  ;;  %v3699_v20 = vld [vmem:[%s5265_s7 + $0x20] sm:$0x1]  ;;  %v3701_v19 = vld [vmem:[%s5265_s7 + $0x24] sm:$0xf]  ;;  %v3124_v38 = vshrl.u32 %v5678_v59, 16  ;;  %v3220_v56 = vsel %vm5878_vm3, %v2935_v29, %v3709_v21 }
 0x2e2   : > { %v3103_v16 = vor.u32 %v3101_v17, %v5848_v63  ;;  %v5871_v62 = vor.u32 %v3110_v44, %v3109_v18  ;;  %v3113_v53 = vrot.slane %v3109_v18, 4  ;;  %v5873_v17 = vrot.slane %v3115_v39, 7  ;;  %v3704_v61 = vld [vmem:[%s5265_s7 + $0x2c] sm:$0x1]  ;;  %3753 = vst [vmem:[%s5265_s7 + $0xa0] sm:$0xf] %v3087_v28 }
 0x2e3   : > { %v3127_v18 = vshll.u32 %v5678_v59, 16  ;;  %v3132_v39 = vshrl.u32 %v5680_v22, 16  ;;  %v3135_v5 = vshll.u32 %v5680_v22, 16  ;;  %v3126_v13 = vrot.slane %v3124_v38, 7  ;;  %v3721_v22 = vld [vmem:[%s5265_s7 + $0x54] sm:$0xf] }
 0x2e4   : > { %v3104_v44 = vsel %vm5687_vm8, %v3096_v57, %v3103_v16  ;;  %v3120_v28 = vor.u32 %v3118_v6, %v5873_v17  ;;  %v3122_v49 = vrot.slane %v5873_v17, 4  ;;  %v3193_v59 = vsel %vm5865_vm13, %v5691_v12, %v3691_v32  ;;  %v3719_v57 = vld [vmem:[%s5265_s7 + $0x50] sm:$0x1]  ;;  %v3724_v16 = vld [vmem:[%s5265_s7 + $0x5c] sm:$0x1] }
 0x2e5   : > { %3758 = vst [vmem:[%s5265_s7 + $0xac] sm:$0xf] %v3104_v44  ;;  %v5903_v30 = vrot.slane %v3132_v39, 7  ;;  %3692 = vst [vmem:[%s5265_s7 + $0xc] sm:$0xf] %v3193_v59  ;;  %v3199_v6 = vsel %vm5878_vm3, %v2884_v4, %v3694_v14  ;;  %v3202_v12 = vsel %vm5865_vm13, %v5697_v45, %v3696_v51  ;;  %v3206_v32 = vsel %vm5878_vm3, %v2901_v42, %v3699_v20 }
 0x2e6   : > { %v3726_v38 = vld [vmem:[%s5265_s7 + $0x60] sm:$0xf]  ;;  %v3729_v44 = vld [vmem:[%s5265_s7 + $0x68] sm:$0x1]  ;;  %v3731_v39 = vld [vmem:[%s5265_s7 + $0x6c] sm:$0xf]  ;;  %v3121_v37 = vsel %vm5687_vm8, %v3113_v53, %v3120_v28  ;;  %v5922_v4 = vor.u32 %v3127_v18, %v3126_v13  ;;  %v3209_v43 = vsel %vm5865_vm13, %v5701_v33, %v3701_v19  ;;  %v3216_v33 = vsel %vm5865_vm13, %v5726_v52, %v3706_v54 }
 0x2e7   : > { %v3130_v14 = vrot.slane %v3126_v13, 4  ;;  %3695 = vst [vmem:[%s5265_s7 + $0x14] sm:$0x1] %v3199_v6  ;;  %3697 = vst [vmem:[%s5265_s7 + $0x18] sm:$0xf] %v3202_v12  ;;  %v3137_v51 = vor.u32 %v3135_v5, %v5903_v30  ;;  %v3139_v20 = vrot.slane %v5903_v30, 4  ;;  %v3213_v13 = vsel %vm5878_vm3, %v2918_v58, %v3704_v61 }
 0x2e8   : > { %3700 = vst [vmem:[%s5265_s7 + $0x20] sm:$0x1] %v3206_v32  ;;  %v3734_v45 = vld [vmem:[%s5265_s7 + $0x74] sm:$0x1]  ;;  %v3736_v42 = vld [vmem:[%s5265_s7 + $0x78] sm:$0xf]  ;;  %v3223_v58 = vsel %vm5865_vm13, %v5734_v55, %v3711_v1  ;;  %v3227_v52 = vsel %vm5878_vm3, %v2952_v26, %v3714_v35  ;;  %v3230_v24 = vsel %vm5865_vm13, %v5750_v31, %v3716_v2  ;;  %v3237_v26 = vsel %vm5865_vm13, %v5764_v36, %v3721_v22 }
 0x2e9   : > { %3702 = vst [vmem:[%s5265_s7 + $0x24] sm:$0xf] %v3209_v43  ;;  %v3739_v19 = vld [vmem:[%s5265_s7 + $0x80] sm:$0x1]  ;;  %v3741_v53 = vld [vmem:[%s5265_s7 + $0x84] sm:$0xf]  ;;  %v3138_v54 = vsel %vm5687_vm8, %v3130_v14, %v3137_v51  ;;  %v3244_v1 = vsel %vm5865_vm13, %v5778_v48, %v3726_v38  ;;  %v3251_v61 = vsel %vm5865_vm13, %v5791_v3, %v3731_v39 }
 0x2ea   : > { %3763 = vst [vmem:[%s5265_s7 + $0xb8] sm:$0xf] %v3121_v37  ;;  %3705 = vst [vmem:[%s5265_s7 + $0x2c] sm:$0x1] %v3213_v13  ;;  %v3744_v5 = vld [vmem:[%s5265_s7 + $0x8c] sm:$0x1]  ;;  %v3265_v22 = vsel %vm5865_vm13, %v5818_v15, %v3741_v53 }
 0x2eb   : > { %3707 = vst [vmem:[%s5265_s7 + $0x30] sm:$0xf] %v3216_v33  ;;  %v3746_v29 = vld [vmem:[%s5265_s7 + $0x90] sm:$0xf]  ;;  %v3749_v21 = vld [vmem:[%s5265_s7 + $0x98] sm:$0x1] }
 0x2ec   : > { %3710 = vst [vmem:[%s5265_s7 + $0x38] sm:$0x1] %v3220_v56  ;;  %3712 = vst [vmem:[%s5265_s7 + $0x3c] sm:$0xf] %v3223_v58  ;;  %v6101_v46 = vrot.slane %v5742_v34, 4  ;;  %v6102_v60 = vrot.slane %v5757_v25, 4 }
 0x2ed   : > { %3715 = vst [vmem:[%s5265_s7 + $0x44] sm:$0x1] %v3227_v52  ;;  %3717 = vst [vmem:[%s5265_s7 + $0x48] sm:$0xf] %v3230_v24  ;;  %v3751_v2 = vld [vmem:[%s5265_s7 + $0x9c] sm:$0xf] }
 0x2ee   : > { %v3234_v55 = vsel %vm5878_vm3, %v6101_v46, %v3719_v57  ;;  %v3241_v31 = vsel %vm5878_vm3, %v6102_v60, %v3724_v16  ;;  %v3754_v35 = vld [vmem:[%s5265_s7 + $0xa4] sm:$0x1]  ;;  %v3756_v34 = vld [vmem:[%s5265_s7 + $0xa8] sm:$0xf]  ;;  %3722 = vst [vmem:[%s5265_s7 + $0x54] sm:$0xf] %v3237_v26  ;;  %v3279_v15 = vsel %vm5865_vm13, %v5836_v41, %v3751_v2 }
 0x2ef   : > { %3720 = vst [vmem:[%s5265_s7 + $0x50] sm:$0x1] %v3234_v55  ;;  %3725 = vst [vmem:[%s5265_s7 + $0x5c] sm:$0x1] %v3241_v31  ;;  %v6103_v36 = vrot.slane %v5769_v27, 4  ;;  %v6104_v18 = vrot.slane %v5782_v23, 4  ;;  %v3258_v23 = vsel %vm5865_vm13, %v5805_v8, %v3736_v42 }
 0x2f0   : > { %v3759_v59 = vld [vmem:[%s5265_s7 + $0xb0] sm:$0x1]  ;;  %v3761_v48 = vld [vmem:[%s5265_s7 + $0xb4] sm:$0xf]  ;;  %v3764_v27 = vld [vmem:[%s5265_s7 + $0xbc] sm:$0x1] }
 0x2f1   : > { %v3248_v25 = vsel %vm5878_vm3, %v6103_v36, %v3729_v44  ;;  %v3255_v28 = vsel %vm5878_vm3, %v6104_v18, %v3734_v45  ;;  %3768 = vst [vmem:[%s5265_s7 + $0xc4] sm:$0xf] %v3138_v54  ;;  %3727 = vst [vmem:[%s5265_s7 + $0x60] sm:$0xf] %v3244_v1  ;;  %v6105_v3 = vrot.slane %v5796_v0, 4  ;;  %v6106_v16 = vrot.slane %v5810_v10, 4 }
 0x2f2   : > { %3730 = vst [vmem:[%s5265_s7 + $0x68] sm:$0x1] %v3248_v25  ;;  %3732 = vst [vmem:[%s5265_s7 + $0x6c] sm:$0xf] %v3251_v61  ;;  %v3766_v12 = vld [vmem:[%s5265_s7 + $0xc0] sm:$0xf]  ;;  %v3272_v0 = vsel %vm5865_vm13, %v5823_v47, %v3746_v29  ;;  %v3286_v47 = vsel %vm5865_vm13, %v5853_v50, %v3756_v34  ;;  %v3297_v39 = vsel %vm5878_vm3, %v3122_v49, %v3764_v27 }
 0x2f3   : > { %3735 = vst [vmem:[%s5265_s7 + $0x74] sm:$0x1] %v3255_v28  ;;  %v3262_v57 = vsel %vm5878_vm3, %v6105_v3, %v3739_v19  ;;  %v3269_v6 = vsel %vm5878_vm3, %v6106_v16, %v3744_v5  ;;  %v3769_v32 = vld [vmem:[%s5265_s7 + $0xc8] sm:$0x1]  ;;  %3737 = vst [vmem:[%s5265_s7 + $0x78] sm:$0xf] %v3258_v23 }
 0x2f4   : > { %3740 = vst [vmem:[%s5265_s7 + $0x80] sm:$0x1] %v3262_v57  ;;  %3742 = vst [vmem:[%s5265_s7 + $0x84] sm:$0xf] %v3265_v22  ;;  %v6107_v8 = vrot.slane %v5825_v7, 4  ;;  %v6108_v38 = vrot.slane %v5838_v9, 4  ;;  %v3293_v9 = vsel %vm5865_vm13, %v5871_v62, %v3761_v48  ;;  %v3304_v50 = vsel %vm5878_vm3, %v3139_v20, %v3769_v32 }
 0x2f5   : > { %3745 = vst [vmem:[%s5265_s7 + $0x8c] sm:$0x1] %v3269_v6  ;;  %3747 = vst [vmem:[%s5265_s7 + $0x90] sm:$0xf] %v3272_v0  ;;  %v6109_v7 = vrot.slane %v5848_v63, 4  ;;  %v3300_v63 = vsel %vm5865_vm13, %v5922_v4, %v3766_v12 }
 0x2f6   : > { %v3276_v10 = vsel %vm5878_vm3, %v6107_v8, %v3749_v21  ;;  %v3283_v44 = vsel %vm5878_vm3, %v6108_v38, %v3754_v35  ;;  %3752 = vst [vmem:[%s5265_s7 + $0x9c] sm:$0xf] %v3279_v15  ;;  %3757 = vst [vmem:[%s5265_s7 + $0xa8] sm:$0xf] %v3286_v47 }
 0x2f7   : > { %3750 = vst [vmem:[%s5265_s7 + $0x98] sm:$0x1] %v3276_v10  ;;  %3755 = vst [vmem:[%s5265_s7 + $0xa4] sm:$0x1] %v3283_v44  ;;  %v3290_v41 = vsel %vm5878_vm3, %v6109_v7, %v3759_v59 }
 0x2f8   : > { %3760 = vst [vmem:[%s5265_s7 + $0xb0] sm:$0x1] %v3290_v41  ;;  %3762 = vst [vmem:[%s5265_s7 + $0xb4] sm:$0xf] %v3293_v9 }
 0x2f9   : > { %3765 = vst [vmem:[%s5265_s7 + $0xbc] sm:$0x1] %v3297_v39  ;;  %3767 = vst [vmem:[%s5265_s7 + $0xc0] sm:$0xf] %v3300_v63 }
 0x2fa   : > { %3770 = vst [vmem:[%s5265_s7 + $0xc8] sm:$0x1] %v3304_v50 }
 0x2fb PF: > { %s13_s12 = sadd.s32 1, %s4043_s12  }
 0x2fc   : > { %p10_p4 = scmp.ge.s32.totalorder %s13_s12, 4  }
 0x2fe   :  { %12 = sbr.rel (!%p10_p4) target bundleno = 1 (0x1), region = 65 }

// kernel: _lambda_.10
= control target key start
LH: loop header
LB: loop body
LE: loop exit
PB: predicated region body
PF: predicated region fallthrough
CT: control target
= control target key end

     0   :  { %s1128_s12 = smov 0   ;;  %s1399_s0 = inlined_call_operand.vmem [shape: bf16[8,5,9,128], index: 0, kind: input, shape index: {}]   ;;  %s1400_s1 = inlined_call_operand.vmem [shape: bf16[144,128], index: 1, kind: input, shape index: {}]   ;;  %s1401_s2 = inlined_call_operand.vmem [shape: f32[8,128], index: 2, kind: input, shape index: {}]   ;;  %s1402_s3 = inlined_call_operand.vmem [shape: bf16[2,6,10,128], index: 3, kind: output, shape index: {}]  }
   0x1 LB: > { %s1134_s13 = sadd.s32 4294967295, %s1098_s12   ;;  %p908_p0 = scmp.ge.s32.totalorder %s1098_s12, 1  ;;  %s1098_s12 = sphi %s1128_s12, %s13_s12  }
   0x2   : > { %p139_p1 = scmp.lt.s32.totalorder %s1098_s12, 3 }
   0x4   : > { %p140_p2 = pnand %p908_p0, %p139_p1 }
   0x5   : > { %s909_s14 = sshll.u32 (!%p140_p2), %s1134_s13, 2  ;;  %v1100_v0 = vmov (!%p140_p2), 0   ;;  %v1081_v1 = vld [vmem:[%s1400_s1] sm:$0xff] (!%p140_p2)   ;;  %v1082_v2 = vld [vmem:[%s1400_s1 + $0x8] sm:$0xff] (!%p140_p2)   ;;  %s1101_s23 = smov (!%p140_p2), 48   ;;  %v1083_v22 = vld [vmem:[%s1400_s1 + $0x10] sm:$0xff] (!%p140_p2)  }
   0x6   : > { %143 = sbr.rel (%p140_p2) target bundleno = 465 (0x1d1), region = 32  ;;  %p165_p3 = scmp.lt.s32.totalorder (!%p140_p2), %s909_s14, 7  ;;  %625 = vmatprep.subr.bf16.mxu0 (!%p140_p2), %v1100_v0  ;;  %1013 = vmatprep.subr.bf16.mxu1 (!%p140_p2), %v1100_v0  ;;  %v1084_v30 = vld [vmem:[%s1400_s1 + $0x18] sm:$0xff] (!%p140_p2)   ;;  %v1085_v41 = vld [vmem:[%s1400_s1 + $0x20] sm:$0xff] (!%p140_p2)   ;;  %v1086_v52 = vld [vmem:[%s1400_s1 + $0x28] sm:$0xff] (!%p140_p2)   ;;  %vm462_vm0 = vcmask (!%p140_p2), 130048  }
   0x7   : > { %626 = vmatpush1.bf16.msra.mxu0 (!%p140_p2), %v1081_v1  ;;  %1022 = vmatpush1.bf16.msra.mxu1 (!%p140_p2), %v1081_v1  ;;  %s1102_s24 = smov (!%p140_p2), 16   ;;  %s1103_s25 = smov (!%p140_p2), 64   ;;  %v1087_v61 = vld [vmem:[%s1400_s1 + $0x30] sm:$0xff] (!%p140_p2)   ;;  %vm475_vm1 = vcmask (!%p140_p2), 261120   ;;  %vm484_vm2 = vcmask (!%p140_p2), 392192   ;;  %vm493_vm3 = vcmask (!%p140_p2), 523264  }
   0x8   : > { %627 = vmatprep.subr.bf16.mxu0 (!%p140_p2), %v1100_v0  ;;  %1014 = vmatprep.subr.bf16.mxu1 (!%p140_p2), %v1100_v0  ;;  %s1104_s5 = smov (!%p140_p2), 32   ;;  %s1105_s10 = smov (!%p140_p2), 80   ;;  %vm502_vm4 = vcmask (!%p140_p2), 654336   ;;  %vm511_vm5 = vcmask (!%p140_p2), 785408   ;;  %vm520_vm6 = vcmask (!%p140_p2), 916480   ;;  %vm819_vm12 = vcmask (!%p140_p2), 1043456  }
   0x9   : > { %s1107_s18 = smov (!%p140_p2), 112   ;;  %p171_p4 = scmp.lt.s32.totalorder (!%p140_p2), %s1134_s13, 1  ;;  %vm820_vm13 = vsmask.f32 (!%p140_p2), 7938  ;;  %vm825_vm14 = vcmask (!%p140_p2), 1040384  }
   0xa   : > { %vm826_vm15 = vsmask.f32 (!%p140_p2), 256 }
   0xb   : > { %628 = vmatpush1.bf16.msra.mxu0 (!%p140_p2), %v1082_v2  ;;  %1023 = vmatpush1.bf16.msra.mxu1 (!%p140_p2), %v1082_v2 }
   0xc   : > { %629 = vmatprep.subr.bf16.mxu0 (!%p140_p2), %v1100_v0  ;;  %1015 = vmatprep.subr.bf16.mxu1 (!%p140_p2), %v1100_v0 }
   0xd   : > { %s1408_s14 = smov (!%p165_p3, %s909_s14), 7  ;;  %s1410_s13 = smov (!%p171_p4, %s1134_s13), 1 }
   0xe   : > { %s1031_s17 = smul.u32 40, %s1408_s14 }
   0xf   : > { %630 = vmatpush1.bf16.msra.mxu0 %v1083_v22  ;;  %1024 = vmatpush1.bf16.msra.mxu1 %v1083_v22  ;;  %s1032_s19 = smul.u32 48, %s1410_s13 }
  0x10   : > { %s1152_s22 = scalar_lea.vmem %s1399_s0, %s1031_s17  ;;  %631 = vmatprep.subr.bf16.mxu0 %v1100_v0  ;;  %1016 = vmatprep.subr.bf16.mxu1 %v1100_v0  ;;  %s1106_s17 = smov 96  }
  0x11   : > { %v917_v3 = vld [vmem:[%s1152_s22 + $0x58] sm:$0xf]  ;;  %v1051_v5 = vld [vmem:[%s1152_s22 + $0x28] ss:$0 sps:$4 sm:$0xff]   ;;  %v925_v6 = vld [vmem:[%s1152_s22 + $0x5c] sm:$0x1] }
  0x12   : > { %v949_v4 = vcombine.low %v917_v3, %v917_v3  ;;  %230 = vrot.lane.b32.xlu0 %v1051_v5, %s1102_s24  ;;  %v1052_v7 = vld [vmem:[%s1152_s22 + $0x80] ss:$0 sps:$4 sm:$0xff]   ;;  %v1053_v8 = vld [vmem:[%s1152_s22 + $0x30] ss:$0 sps:$4 sm:$0xff]   ;;  %v924_v10 = vld [vmem:[%s1152_s22 + $0x54] sm:$0x1]  ;;  %v957_v11 = vcombine.low %v917_v3, %v925_v6 }
  0x13   : > { %v916_v9 = vld [vmem:[%s1152_s22 + $0x50] sm:$0xf]  ;;  %v1166_v12 = vld [vmem:[%s1152_s22] sm:$0xf]  ;;  %v186_v13 = vld [vmem:[%s1152_s22 + $0x4] sm:$0x1]  ;;  %632 = vmatpush1.bf16.msra.mxu0 %v1084_v30  ;;  %1025 = vmatpush1.bf16.msra.mxu1 %v1084_v30 }
  0x14   : > { %308 = vrot.lane.b32.xlu1 %v949_v4, %s1101_s23  ;;  %v1054_v14 = vld [vmem:[%s1152_s22 + $0x40] ss:$0 sps:$4 sm:$0xff]   ;;  %v944_v15 = vcombine.low %v1166_v12, %v186_v13  ;;  %v1172_v16 = vld [vmem:[%s1152_s22 + $0x8] sm:$0xf]  ;;  %v187_v17 = vld [vmem:[%s1152_s22 + $0xc] sm:$0x1]  ;;  %v948_v18 = vcombine.low %v916_v9, %v916_v9  ;;  %v956_v19 = vcombine.low %v916_v9, %v924_v10  ;;  %633 = vmatprep.subr.bf16.mxu0 %v1100_v0 }
  0x15   : > { %v945_v20 = vcombine.low %v1172_v16, %v187_v17  ;;  %v1179_v21 = vld [vmem:[%s1152_s22 + $0x10] sm:$0xf]  ;;  %v188_v25 = vld [vmem:[%s1152_s22 + $0x14] sm:$0x1]  ;;  %v1186_v26 = vld [vmem:[%s1152_s22 + $0x18] sm:$0xf]  ;;  %1017 = vmatprep.subr.bf16.mxu1 %v1100_v0 }
  0x16   : > { %232 = vrot.lane.b32.xlu0 %v1053_v8, %s1102_s24  ;;  %v259_v23 = vshrl.u32 %v944_v15, 16  ;;  %v261_v24 = vshll.u32 %v944_v15, 16  ;;  %v356_v27 = vshll.u32 %v957_v11, 16  ;;  %v189_v29 = vld [vmem:[%s1152_s22 + $0x1c] sm:$0x1]  ;;  %v946_v32 = vcombine.low %v1179_v21, %v188_v25 }
  0x17   : > { %v268_v28 = vshll.u32 %v945_v20, 16  ;;  %v947_v33 = vcombine.low %v1186_v26, %v189_v29  ;;  %v1057_v34 = vld [vmem:[%s1152_s22 + $0x78] ss:$0 sps:$4 sm:$0xff]   ;;  %v266_v35 = vshrl.u32 %v945_v20, 16  ;;  %v349_v37 = vshll.u32 %v956_v19, 16  ;;  %634 = vmatpush1.bf16.msra.mxu0 %v1085_v41  ;;  %1026 = vmatpush1.bf16.msra.mxu1 %v1085_v41 }
  0x18   : > { %328 = vrot.lane.b32.xlu1 %v1052_v7, %s1103_s25  ;;  %v263_v31 = vrot.slane %v261_v24, 1  ;;  %v354_v39 = vshrl.u32 %v957_v11, 16  ;;  %v358_v40 = vrot.slane %v356_v27, 1  ;;  %v275_v42 = vshll.u32 %v946_v32, 16  ;;  %v1059_v44 = vld [vmem:[%s1152_s22 + $0x38] ss:$0 sps:$4 sm:$0xff]   ;;  %635 = vmatprep.subr.bf16.mxu0 %v1100_v0 }
  0x19   : > { %v270_v36 = vrot.slane %v268_v28, 1  ;;  %v282_v43 = vshll.u32 %v947_v33, 16  ;;  %v347_v46 = vshrl.u32 %v956_v19, 16  ;;  %v351_v47 = vrot.slane %v349_v37, 1  ;;  %v936_v48 = vld [vmem:[%s1152_s22 + $0xc] sm:$0x1]  ;;  %1018 = vmatprep.subr.bf16.mxu1 %v1100_v0 }
  0x1a   : > { %306 = vrot.lane.b32.xlu0 %v948_v18, %s1101_s23  ;;  %v264_v38 = vor.u32 %v263_v31, %v259_v23  ;;  %v937_v49 = vld [vmem:[%s1152_s22 + $0x14] sm:$0x1]  ;;  %v359_v50 = vor.u32 %v358_v40, %v354_v39  ;;  %v928_v51 = vld [vmem:[%s1152_s22 + $0x8] sm:$0xf]  ;;  %v273_v53 = vshrl.u32 %v946_v32, 16  ;;  %v277_v54 = vrot.slane %v275_v42, 1 }
  0x1b   : > { %v271_v45 = vor.u32 %v270_v36, %v266_v35  ;;  %v280_v55 = vshrl.u32 %v947_v33, 16  ;;  %v284_v56 = vrot.slane %v282_v43, 1  ;;  %v929_v57 = vld [vmem:[%s1152_s22 + $0x10] sm:$0xf]  ;;  %v352_v58 = vor.u32 %v351_v47, %v347_v46  ;;  %636 = vmatpush1.bf16.msra.mxu0 %v1086_v52  ;;  %1027 = vmatpush1.bf16.msra.mxu1 %v1086_v52  ;;  %v1088_v5 = vld [vmem:[%s1400_s1 + $0x38] sm:$0xff]   ;;  %v1089_v18 = vld [vmem:[%s1400_s1 + $0x40] sm:$0xff]  }
  0x1c   : > { %236 = vrot.lane.b32.xlu1 %v1054_v14, %s1102_s24  ;;  %v968_v59 = vcombine.low %v928_v51, %v936_v48  ;;  %v969_v60 = vcombine.low %v929_v57, %v937_v49  ;;  %v278_v62 = vor.u32 %v277_v54, %v273_v53  ;;  %637 = vmatprep.subr.bf16.mxu0 %v1100_v0  ;;  %v926_v10 = vld [vmem:[%s1152_s22 + $0x64] sm:$0x1]  ;;  %v927_v11 = vld [vmem:[%s1152_s22 + $0x6c] sm:$0x1]  ;;  %v918_v15 = vld [vmem:[%s1152_s22 + $0x60] sm:$0xf] }
  0x1d   : > { %v285_v63 = vor.u32 %v284_v56, %v280_v55  ;;  %1019 = vmatprep.subr.bf16.mxu1 %v1100_v0  ;;  %v960_v8 = vcombine.low %v928_v51, %v928_v51  ;;  %v961_v9 = vcombine.low %v929_v57, %v929_v57  ;;  %v919_v17 = vld [vmem:[%s1152_s22 + $0x68] sm:$0xf]  ;;  %v958_v20 = vcombine.low %v918_v15, %v926_v10  ;;  %v938_v23 = vld [vmem:[%s1152_s22 + $0x1c] sm:$0x1]  ;;  %v939_v24 = vld [vmem:[%s1152_s22 + $0x24] sm:$0x1] }
  0x1e   : > { %326 = vrot.lane.b32.xlu0 %v1057_v34, %s1103_s25  ;;  %v435_v1 = vshrl.u32 %v968_v59, 16  ;;  %v437_v2 = vshll.u32 %v968_v59, 16  ;;  %v442_v3 = vshrl.u32 %v969_v60, 16  ;;  %v444_v4 = vshll.u32 %v969_v60, 16  ;;  %v930_v28 = vld [vmem:[%s1152_s22 + $0x18] sm:$0xf] }
  0x1f   : > { %638 = vmatpush1.bf16.msra.mxu0 %v1087_v61  ;;  %1028 = vmatpush1.bf16.msra.mxu1 %v1087_v61  ;;  %v959_v22 = vcombine.low %v919_v17, %v927_v11  ;;  %v950_v25 = vcombine.low %v918_v15, %v918_v15  ;;  %v951_v27 = vcombine.low %v919_v17, %v919_v17  ;;  %v931_v29 = vld [vmem:[%s1152_s22 + $0x20] sm:$0xf]  ;;  %v363_v32 = vshll.u32 %v958_v20, 16  ;;  %v1071_v34 = vld [vmem:[%s1152_s22 + $0x30] ss:$0 sps:$4 sm:$0xff]  }
  0x20   : > { %286 = vrot.lane.b32.xlu1 %v264_v38, %s1104_s5  ;;  %v439_v6 = vrot.slane %v437_v2, 1  ;;  %v446_v7 = vrot.slane %v444_v4, 1  ;;  %639 = vmatprep.subr.bf16.mxu0 %v1100_v0  ;;  %v970_v30 = vcombine.low %v930_v28, %v938_v23  ;;  %v971_v31 = vcombine.low %v931_v29, %v939_v24  ;;  %v1072_v35 = vld [vmem:[%s1152_s22 + $0x38] ss:$0 sps:$4 sm:$0xff]   ;;  %v1073_v38 = vld [vmem:[%s1152_s22 + $0x88] ss:$0 sps:$4 sm:$0xff]  }
  0x21   : > { %1020 = vmatprep.subr.bf16.mxu1 %v1100_v0  ;;  %v370_v33 = vshll.u32 %v959_v22, 16  ;;  %v361_v39 = vshrl.u32 %v958_v20, 16  ;;  %v365_v40 = vrot.slane %v363_v32, 1  ;;  %v368_v41 = vshrl.u32 %v959_v22, 16  ;;  %v1074_v43 = vld [vmem:[%s1152_s22 + $0x90] ss:$0 sps:$4 sm:$0xff]  }
  0x22   : > { %234 = vrot.lane.b32.xlu0 %v1059_v44, %s1102_s24  ;;  %v440_v13 = vor.u32 %v439_v6, %v435_v1  ;;  %v447_v14 = vor.u32 %v446_v7, %v442_v3  ;;  %v451_v36 = vshll.u32 %v970_v30, 16  ;;  %v458_v37 = vshll.u32 %v971_v31, 16  ;;  %v1079_v55 = vld [vmem:[%s1152_s22 + $0x40] ss:$0 sps:$4 sm:$0xff]   ;;  %v1080_v56 = vld [vmem:[%s1152_s22 + $0x48] ss:$0 sps:$4 sm:$0xff]   ;;  %s1300_s22 = scalar_lea.vmem %s1402_s3, %s1032_s19 }
  0x23   : > { %640 = vmatpush1.bf16.msra.mxu0 %v1088_v5  ;;  %1029 = vmatpush1.bf16.msra.mxu1 %v1088_v5  ;;  %v372_v42 = vrot.slane %v370_v33, 1  ;;  %v449_v44 = vshrl.u32 %v970_v30, 16  ;;  %v456_v46 = vshrl.u32 %v971_v31, 16  ;;  %v962_v53 = vcombine.low %v930_v28, %v930_v28  ;;  %756 = vst [vmem:[%s1300_s22 + $0x8] sm:$0xf] %v1100_v0  ;;  %754 = vst [vmem:[%s1300_s22] sm:$0xf] %v1100_v0 }
  0x24   : > { %288 = vrot.lane.b32.xlu1 %v271_v45, %s1104_s5  ;;  %v973_v19 = vcombine.low %v440_v13, %v447_v14  ;;  %641 = vmatprep.subr.bf16.mxu0 %v1100_v0  ;;  %v453_v45 = vrot.slane %v451_v36, 1  ;;  %v460_v47 = vrot.slane %v458_v37, 1  ;;  %v963_v54 = vcombine.low %v931_v29, %v931_v29  ;;  %757 = vst [vmem:[%s1300_s22 + $0xc] sm:$0x1] %v1100_v0 }
  0x25   : > { %1021 = vmatprep.subr.bf16.mxu1 %v1100_v0  ;;  %v373_v51 = vor.u32 %v372_v42, %v368_v41  ;;  %758 = vst [vmem:[%s1300_s22 + $0x10] sm:$0xf] %v1100_v0  ;;  %759 = vst [vmem:[%s1300_s22 + $0x14] sm:$0x1] %v1100_v0 }
  0x26   : > { %374 = vrot.lane.b32.xlu0 %v352_v58, %s1105_s10  ;;  %985 = vmatprep.mubr.msk.bf16.mxu0 %vm462_vm0, %v973_v19  ;;  %v454_v48 = vor.u32 %v453_v45, %v449_v44  ;;  %v461_v49 = vor.u32 %v460_v47, %v456_v46  ;;  %760 = vst [vmem:[%s1300_s22 + $0x18] sm:$0xf] %v1100_v0  ;;  %761 = vst [vmem:[%s1300_s22 + $0x1c] sm:$0x1] %v1100_v0 }
  0x27   : > { %642 = vmatpush1.bf16.msra.mxu0 %v1089_v18  ;;  %1030 = vmatpush1.bf16.msra.mxu1 %v1089_v18  ;;  %762 = vst [vmem:[%s1300_s22 + $0x20] sm:$0xf] %v1100_v0  ;;  %763 = vst [vmem:[%s1300_s22 + $0x24] sm:$0x1] %v1100_v0 }
  0x28   : > { %376 = vrot.lane.b32.xlu1 %v359_v50, %s1105_s10  ;;  %v366_v50 = vor.u32 %v365_v40, %v361_v39  ;;  %v975_v52 = vcombine.low %v454_v48, %v461_v49  ;;  %755 = vst [vmem:[%s1300_s22 + $0x4] sm:$0x1] %v1100_v0  ;;  %764 = vst [vmem:[%s1300_s22 + $0x28] sm:$0xf] %v1100_v0 }
  0x29   : > { %765 = vst [vmem:[%s1300_s22 + $0x2c] sm:$0x1] %v1100_v0 }
  0x2a   : > { %290 = vrot.lane.b32.xlu0 %v278_v62, %s1104_s5  ;;  %986 = vmatprep.mubr.msk.bf16.mxu1 %vm462_vm0, %v975_v52  ;;  %v674_v52 = vlaneseq }
  0x2c   : > { %292 = vrot.lane.b32.xlu1 %v285_v63, %s1104_s5 }
  0x2e   : > { %394 = vrot.lane.b32.xlu0 %v960_v8, %s1106_s17 }
  0x30   : > { %396 = vrot.lane.b32.xlu1 %v961_v9, %s1106_s17 }
  0x32   : > { %310 = vrot.lane.b32.xlu0 %v950_v25, %s1101_s23 }
  0x34   : > { %312 = vrot.lane.b32.xlu1 %v951_v27, %s1101_s23 }
  0x36   : > { %414 = vrot.lane.b32.xlu0 %v1071_v34, %s1107_s18 }
  0x38   : > { %416 = vrot.lane.b32.xlu1 %v1072_v35, %s1107_s18 }
  0x3a   : > { %330 = vrot.lane.b32.xlu0 %v1073_v38, %s1103_s25 }
  0x3c   : > { %332 = vrot.lane.b32.xlu1 %v1074_v43, %s1103_s25 }
  0x3e   : > { %378 = vrot.lane.b32.xlu0 %v366_v50, %s1105_s10 }
  0x40   : > { %380 = vrot.lane.b32.xlu1 %v373_v51, %s1105_s10 }
  0x42   : > { %398 = vrot.lane.b32.xlu0 %v962_v53, %s1106_s17  ;;  %v1326_v53 = vshrl.u32 %v674_v52, 7 }
  0x44   : > { %400 = vrot.lane.b32.xlu1 %v963_v54, %s1106_s17  ;;  %vm676_vm7 = vcmp.lt.s32.totalorder %v1326_v53, 4 }
  0x46   : > { %418 = vrot.lane.b32.xlu0 %v1079_v55, %s1107_s18 }
  0x48   : > { %420 = vrot.lane.b32.xlu1 %v1080_v56, %s1107_s18 }
  0x84   : > { %v231_v58 = vpop.permute.xlu0 %230 }
  0x85   : > { %v465_v10 = vsel %vm462_vm0, %v1166_v12, %v231_v58 }
  0x86   : > { %v309_v57 = vpop.permute.xlu1 %308 }
  0x88   : > { %v233_v60 = vpop.permute.xlu0 %232 }
  0x89   : > { %v468_v8 = vsel %vm462_vm0, %v1172_v16, %v233_v60 }
  0x8a   : > { %v329_v59 = vpop.permute.xlu1 %328 }
  0x8c   : > { %v307_v62 = vpop.permute.xlu0 %306 }
  0x8e   : > { %v237_v61 = vpop.permute.xlu1 %236 }
  0x8f   : > { %v474_v35 = vsel %vm462_vm0, %v1186_v26, %v237_v61 }
  0x90   : > { %v327_v63 = vpop.permute.xlu0 %326 }
  0x92   : > { %v287_v1 = vpop.permute.xlu1 %286 }
  0x93   : > { %v477_v11 = vsel %vm475_vm1, %v465_v10, %v287_v1 }
  0x94   : > { %v235_v2 = vpop.permute.xlu0 %234  ;;  %v486_v17 = vsel %vm484_vm2, %v477_v11, %v307_v62 }
  0x95   : > { %v495_v20 = vsel %vm493_vm3, %v486_v17, %v327_v63  ;;  %v471_v36 = vsel %vm462_vm0, %v1179_v21, %v235_v2  ;;  %vm1358_vm0 = vmand %vm819_vm12, %vm820_vm13 }
  0x96   : > { %v289_v3 = vpop.permute.xlu1 %288 }
  0x97   : > { %v479_v9 = vsel %vm475_vm1, %v468_v8, %v289_v3 }
  0x98   : > { %v375_v4 = vpop.permute.xlu0 %374  ;;  %v488_v15 = vsel %vm484_vm2, %v479_v9, %v309_v57 }
  0x99   : > { %v497_v18 = vsel %vm493_vm3, %v488_v15, %v329_v59  ;;  %v504_v12 = vsel %vm502_vm4, %v495_v20, %v375_v4 }
  0x9a   : > { %v377_v5 = vpop.permute.xlu1 %376 }
  0x9b   : > { %v506_v22 = vsel %vm502_vm4, %v497_v18, %v377_v5 }
  0x9c   : > { %v291_v6 = vpop.permute.xlu0 %290 }
  0x9d   : > { %v481_v37 = vsel %vm475_vm1, %v471_v36, %v291_v6 }
  0x9e   : > { %v293_v7 = vpop.permute.xlu1 %292 }
  0x9f   : > { %v483_v38 = vsel %vm475_vm1, %v474_v35, %v293_v7  ;;  %v713_v35 = vld [vmem:[%s1401_s2 + $0x1] sm:$0x1]  ;;  %vm1365_vm1 = vmand %vm825_vm14, %vm826_vm15 }
  0xa0   : > { %v395_v13 = vpop.permute.xlu0 %394 }
  0xa1   : > { %v513_v23 = vsel %vm511_vm5, %v504_v12, %v395_v13 }
  0xa2   : > { %v397_v14 = vpop.permute.xlu1 %396 }
  0xa3   : > { %v515_v24 = vsel %vm511_vm5, %v506_v22, %v397_v14 }
  0xa4   : > { %v311_v16 = vpop.permute.xlu0 %310 }
  0xa5   : > { %v490_v41 = vsel %vm484_vm2, %v481_v37, %v311_v16 }
  0xa6   : > { %v313_v19 = vpop.permute.xlu1 %312 }
  0xa7   : > { %v492_v42 = vsel %vm484_vm2, %v483_v38, %v313_v19 }
  0xa8   : > { %v415_v25 = vpop.permute.xlu0 %414 }
  0xa9   : > { %v522_v28 = vsel %vm520_vm6, %v513_v23, %v415_v25 }
  0xaa   : > { %v417_v27 = vpop.permute.xlu1 %416 }
  0xab   : > { %v524_v29 = vsel %vm520_vm6, %v515_v24, %v417_v27 }
  0xac   : > { %v972_v30 = vcombine.low %v522_v28, %v524_v29  ;;  %v331_v31 = vpop.permute.xlu0 %330 }
  0xad   : > { %v499_v43 = vsel %vm493_vm3, %v490_v41, %v331_v31  ;;  %v712_v31 = vld [vmem:[%s1401_s2] sm:$0x1] }
  0xae   : > { %658 = vmatmul.mubr.bf16.vlgmr.msra.gmra.mrb[0].mxu0 %v972_v30  ;;  %v333_v32 = vpop.permute.xlu1 %332 }
  0xaf   : > { %v501_v44 = vsel %vm493_vm3, %v492_v42, %v333_v32 }
  0xb0   : > { %v379_v33 = vpop.permute.xlu0 %378 }
  0xb1   : > { %v508_v26 = vsel %vm502_vm4, %v499_v43, %v379_v33  ;;  %v720_v33 = vsub.s32 0, %v1326_v53  ;;  %v995_v53 = vld [vmem:[%s1300_s22 + $0x10] sm:$0xf] }
  0xb2   : > { %v381_v34 = vpop.permute.xlu1 %380 }
  0xb3   : > { %v510_v21 = vsel %vm502_vm4, %v501_v44, %v381_v34 }
  0xb4   : > { %v399_v39 = vpop.permute.xlu0 %398 }
  0xb5   : > { %v517_v45 = vsel %vm511_vm5, %v508_v26, %v399_v39 }
  0xb6   : > { %v401_v40 = vpop.permute.xlu1 %400 }
  0xb7   : > { %v519_v46 = vsel %vm511_vm5, %v510_v21, %v401_v40 }
  0xb8   : > { %v419_v47 = vpop.permute.xlu0 %418 }
  0xb9   : > { %v526_v49 = vsel %vm520_vm6, %v517_v45, %v419_v47 }
  0xba   : > { %v421_v48 = vpop.permute.xlu1 %420 }
  0xbb   : > { %v528_v50 = vsel %vm520_vm6, %v519_v46, %v421_v48 }
  0xbc   : > { %v974_v51 = vcombine.low %v526_v49, %v528_v50 }
  0xbe   : > { %666 = vmatmul.mubr.bf16.vlgmr.msra.gmra.mrb[0].mxu1 %v974_v51 }
 0x181   : > { %v659_v54 = vpop.f32.mrb[0].mxu0 }
 0x182   : > { %v680_v55 = vsel %vm676_vm7, %v659_v54, 0.0  ;;  %v661_v56 = vpop.f32.mrb[1].mxu0 }
 0x183   : > { %v662_v57 = vpop.f32.mrb[2].mxu0  ;;  %v694_v60 = vmul.f32 %v680_v55, %v680_v55 }
 0x184   : > { %v681_v58 = vsel %vm676_vm7, %v662_v57, 0.0  ;;  %v664_v59 = vpop.f32.mrb[3].mxu0 }
 0x185   : > { %v684_v61 = vadd.f32 %v681_v58, %v680_v55  ;;  %v695_v62 = vmul.f32 %v681_v58, %v681_v58 }
 0x187   : > { %v698_v63 = vadd.f32 %v695_v62, %v694_v60 }
 0x191   : > { %v667_v0 = vpop.f32.mrb[0].mxu1 }
 0x192   : > { %v682_v1 = vsel %vm676_vm7, %v667_v0, 0.0  ;;  %v669_v2 = vpop.f32.mrb[1].mxu1 }
 0x193   : > { %v685_v3 = vadd.f32 %v684_v61, %v682_v1  ;;  %v696_v4 = vmul.f32 %v682_v1, %v682_v1  ;;  %v670_v5 = vpop.f32.mrb[2].mxu1 }
 0x194   : > { %v683_v6 = vsel %vm676_vm7, %v670_v5, 0.0  ;;  %v672_v7 = vpop.f32.mrb[3].mxu1 }
 0x195   : > { %v699_v8 = vadd.f32 %v698_v63, %v696_v4  ;;  %v686_v9 = vadd.f32 %v685_v3, %v683_v6  ;;  %v697_v10 = vmul.f32 %v683_v6, %v683_v6  ;;  %v991_v4 = vld [vmem:[%s1300_s22 + $0x8] sm:$0xf]  ;;  %v997_v6 = vld [vmem:[%s1300_s22 + $0x14] sm:$0x1] }
 0x197   : > { %v687_v11 = vrot.slane %v686_v9, 4  ;;  %v700_v13 = vadd.f32 %v699_v8, %v697_v10 }
 0x199   : > { %v688_v14 = vadd.f32 %v687_v11, %v686_v9  ;;  %v701_v15 = vrot.slane %v700_v13, 4 }
 0x19b   : > { %v689_v17 = vrot.slane %v688_v14, 2  ;;  %v702_v18 = vadd.f32 %v701_v15, %v700_v13  ;;  %v999_v13 = vld [vmem:[%s1300_s22 + $0x18] sm:$0xf] }
 0x19d   : > { %v690_v16 = vadd.f32 %v689_v17, %v688_v14  ;;  %v703_v19 = vrot.slane %v702_v18, 2 }
 0x19f   : > { %v691_v20 = vrot.slane %v690_v16, 1  ;;  %v704_v12 = vadd.f32 %v703_v19, %v702_v18  ;;  %v1001_v19 = vld [vmem:[%s1300_s22 + $0x1c] sm:$0x1] }
 0x1a1   : > { %v692_v22 = vadd.f32 %v691_v20, %v690_v16  ;;  %v705_v23 = vrot.slane %v704_v12, 1 }
 0x1a3   : > { %v693_v24 = vmul.f32 0.0625, %v692_v22  ;;  %v706_v25 = vadd.f32 %v705_v23, %v704_v12 }
 0x1a5   : > { %v707_v27 = vmul.f32 0.0625, %v706_v25  ;;  %v708_v28 = vmul.f32 %v693_v24, %v693_v24  ;;  %v715_v32 = vmul.f32 %v712_v31, %v693_v24  ;;  %v1003_v24 = vld [vmem:[%s1300_s22 + $0x20] sm:$0xf]  ;;  %v1005_v25 = vld [vmem:[%s1300_s22 + $0x24] sm:$0x1] }
 0x1a7   : > { %v709_v29 = vsub.f32 %v707_v27, %v708_v28 }
 0x1a9   : > { %v710_v30 = vadd.f32 1e-05, %v709_v29 }
 0x1ab   : > { %1090 = vrsqrt.f32 %v710_v30 }
 0x1b5   : > { %v1091_v34 = vpop.eup %1090 }
 0x1b6   : > { %v714_v36 = vmul.f32 %v1091_v34, %v712_v31  ;;  %v716_v37 = vmul.f32 %v1091_v34, %v715_v32 }
 0x1b8   : > { %v717_v38 = vsub.f32 %v713_v35, %v716_v37  ;;  %v721_v39 = vrot.slane %v714_v36, %v720_v33 }
 0x1ba   : > { %v722_v40 = vmul.f32 %v721_v39, %v659_v54  ;;  %v723_v41 = vmul.f32 %v721_v39, %v662_v57  ;;  %v724_v42 = vmul.f32 %v721_v39, %v667_v0  ;;  %v725_v43 = vmul.f32 %v721_v39, %v670_v5  ;;  %v993_v5 = vld [vmem:[%s1300_s22 + $0xc] sm:$0x1] }
 0x1bb   : > { %v729_v44 = vrot.slane %v717_v38, %v720_v33 }
 0x1bd   : > { %v730_v26 = vadd.f32 %v729_v44, %v722_v40  ;;  %v731_v21 = vadd.f32 %v729_v44, %v723_v41  ;;  %v732_v45 = vadd.f32 %v729_v44, %v724_v42  ;;  %v733_v46 = vadd.f32 %v729_v44, %v725_v43 }
 0x1bf   : > { %vm734_vm8 = vcmp.ge.f32.partialorder %v730_v26, 0.0  ;;  %vm735_vm9 = vcmp.ge.f32.partialorder %v731_v21, 0.0  ;;  %vm736_vm10 = vcmp.ge.f32.partialorder %v732_v45, 0.0  ;;  %vm737_vm11 = vcmp.ge.f32.partialorder %v733_v46, 0.0 }
 0x1c0   : > { %v738_v47 = vmul.f32 0.01, %v730_v26  ;;  %v739_v48 = vmul.f32 0.01, %v731_v21  ;;  %v740_v49 = vmul.f32 0.01, %v732_v45 }
 0x1c1   : > { %v741_v50 = vmul.f32 0.01, %v733_v46 }
 0x1c2   : > { %v742_v51 = vsel %vm734_vm8, %v730_v26, %v738_v47  ;;  %v743_v52 = vsel %vm735_vm9, %v731_v21, %v739_v48  ;;  %v744_v55 = vsel %vm736_vm10, %v732_v45, %v740_v49 }
 0x1c3   : > { %v745_v54 = vsel %vm737_vm11, %v733_v46, %v741_v50  ;;  %v746_v56 = vsel %vm676_vm7, %v742_v51, 0.0  ;;  %v747_v57 = vsel %vm676_vm7, %v743_v52, 0.0  ;;  %v748_v58 = vsel %vm676_vm7, %v744_v55, 0.0 }
 0x1c4   : > { %v749_v59 = vsel %vm676_vm7, %v745_v54, 0.0  ;;  %v1009_v60 = vpack.c.bf16 %v746_v56, %v746_v56  ;;  %v1010_v61 = vpack.c.bf16 %v747_v57, %v747_v57  ;;  %v1011_v62 = vpack.c.bf16 %v748_v58, %v748_v58 }
 0x1c5   : > { %v1012_v63 = vpack.c.bf16 %v749_v59, %v749_v59 }
 0x1c6   : > { %v779_v0 = vshrl.u32 %v1009_v60, 16  ;;  %v787_v1 = vshrl.u32 %v1010_v61, 16  ;;  %v795_v2 = vshrl.u32 %v1011_v62, 16  ;;  %v782_v8 = vshll.u32 %v1009_v60, 16 }
 0x1c7   : > { %v803_v3 = vshrl.u32 %v1012_v63, 16  ;;  %v790_v10 = vshll.u32 %v1010_v61, 16  ;;  %v798_v15 = vshll.u32 %v1011_v62, 16  ;;  %v806_v18 = vshll.u32 %v1012_v63, 16 }
 0x1c8   : > { %v781_v7 = vrot.slane %v779_v0, 7  ;;  %v789_v9 = vrot.slane %v787_v1, 7  ;;  %v797_v14 = vrot.slane %v795_v2, 7 }
 0x1c9   : > { %v805_v17 = vrot.slane %v803_v3, 7 }
 0x1ca   : > { %v784_v20 = vor.u32 %v782_v8, %v781_v7  ;;  %v785_v12 = vrot.slane %v781_v7, 4  ;;  %v792_v22 = vor.u32 %v790_v10, %v789_v9  ;;  %v793_v23 = vrot.slane %v789_v9, 4 }
 0x1cb   : > { %v800_v27 = vor.u32 %v798_v15, %v797_v14  ;;  %v801_v28 = vrot.slane %v797_v14, 4  ;;  %v808_v29 = vor.u32 %v806_v18, %v805_v17  ;;  %v809_v30 = vrot.slane %v805_v17, 4 }
 0x1cc   : > { %v823_v31 = vsel %vm1358_vm0, %v784_v20, %v991_v4  ;;  %v829_v32 = vsel %vm1365_vm1, %v785_v12, %v993_v5  ;;  %v832_v33 = vsel %vm1358_vm0, %v792_v22, %v995_v53  ;;  %v835_v34 = vsel %vm1365_vm1, %v793_v23, %v997_v6 }
 0x1cd   : > { %992 = vst [vmem:[%s1300_s22 + $0x8] sm:$0xf] %v823_v31  ;;  %994 = vst [vmem:[%s1300_s22 + $0xc] sm:$0x1] %v829_v32  ;;  %v838_v35 = vsel %vm1358_vm0, %v800_v27, %v999_v13  ;;  %v841_v36 = vsel %vm1365_vm1, %v801_v28, %v1001_v19  ;;  %v844_v37 = vsel %vm1358_vm0, %v808_v29, %v1003_v24 }
 0x1ce   : > { %996 = vst [vmem:[%s1300_s22 + $0x10] sm:$0xf] %v832_v33  ;;  %998 = vst [vmem:[%s1300_s22 + $0x14] sm:$0x1] %v835_v34  ;;  %v847_v38 = vsel %vm1365_vm1, %v809_v30, %v1005_v25 }
 0x1cf   : > { %1000 = vst [vmem:[%s1300_s22 + $0x18] sm:$0xf] %v838_v35  ;;  %1002 = vst [vmem:[%s1300_s22 + $0x1c] sm:$0x1] %v841_v36 }
 0x1d0   : > { %1004 = vst [vmem:[%s1300_s22 + $0x20] sm:$0xf] %v844_v37  ;;  %1006 = vst [vmem:[%s1300_s22 + $0x24] sm:$0x1] %v847_v38 }
 0x1d1 PF: > { %s13_s12 = sadd.s32 1, %s1098_s12  }
 0x1d2   : > { %p10_p5 = scmp.ge.s32.totalorder %s13_s12, 4  }
 0x1d4   :  { %12 = sbr.rel (!%p10_p5) target bundleno = 1 (0x1), region = 68 }

// kernel: _lambda_.11
= control target key start
LH: loop header
LB: loop body
LE: loop exit
PB: predicated region body
PF: predicated region fallthrough
CT: control target
= control target key end

     0   :  { %s1173_s12 = smov 0   ;;  %s1430_s0 = inlined_call_operand.vmem [shape: bf16[2,6,10,128], index: 0, kind: input, shape index: {}]   ;;  %s1431_s1 = inlined_call_operand.vmem [shape: bf16[288,128], index: 1, kind: input, shape index: {}]   ;;  %s1432_s2 = inlined_call_operand.vmem [shape: f32[8,128], index: 2, kind: input, shape index: {}]   ;;  %s1433_s3 = inlined_call_operand.vmem [shape: bf16[2,4,8,128], index: 3, kind: output, shape index: {}]  }
   0x1 LB: > { %s934_s13 = sadd.s32 4294967295, %s1148_s12   ;;  %p938_p0 = scmp.ge.s32.totalorder %s1148_s12, 1  ;;  %s1148_s12 = sphi %s1173_s12, %s13_s12  }
   0x2   : > { %p137_p1 = scmp.lt.s32.totalorder %s1148_s12, 3 }
   0x4   : > { %p138_p2 = pnand %p938_p0, %p137_p1 }
   0x5   : > { %p161_p3 = scmp.lt.s32.totalorder (!%p138_p2), %s934_s13, 1  ;;  %v1120_v0 = vld [vmem:[%s1431_s1 + $0x40] sm:$0xff] (!%p138_p2)   ;;  %v1122_v2 = vld [vmem:[%s1431_s1 + $0x48] sm:$0xff] (!%p138_p2)   ;;  %v1124_v4 = vld [vmem:[%s1431_s1 + $0x50] sm:$0xff] (!%p138_p2)   ;;  %s1150_s30 = smov (!%p138_p2), 64   ;;  %vm458_vm0 = vcmask (!%p138_p2), 261120  }
   0x6   : > { %141 = sbr.rel (%p138_p2) target bundleno = 455 (0x1c7), region = 32  ;;  %v1121_v1 = vld [vmem:[%s1431_s1] sm:$0xff] (!%p138_p2)   ;;  %1038 = vmatprep.subr.bf16.mxu0 (!%p138_p2), %v1120_v0  ;;  %v1123_v3 = vld [vmem:[%s1431_s1 + $0x8] sm:$0xff] (!%p138_p2)   ;;  %v1125_v5 = vld [vmem:[%s1431_s1 + $0x10] sm:$0xff] (!%p138_p2)   ;;  %s1151_s6 = smov (!%p138_p2), 32   ;;  %vm471_vm1 = vcmask (!%p138_p2), 523264  }
   0x7   : > { %1039 = vmatpush3.bf16.msra.mxu0 (!%p138_p2), %v1121_v1  ;;  %v1126_v26 = vld [vmem:[%s1431_s1 + $0x58] sm:$0xff] (!%p138_p2)   ;;  %v1128_v0 = vld [vmem:[%s1431_s1 + $0x60] sm:$0xff] (!%p138_p2)   ;;  %s1152_s19 = smov (!%p138_p2), 96   ;;  %vm480_vm2 = vcmask (!%p138_p2), 785408  }
   0x8   : > { %1040 = vmatprep.subr.bf16.mxu0 (!%p138_p2), %v1122_v2  ;;  %v1127_v47 = vld [vmem:[%s1431_s1 + $0x18] sm:$0xff] (!%p138_p2)  }
   0xb   : > { %1041 = vmatpush3.bf16.msra.mxu0 (!%p138_p2), %v1123_v3  ;;  %v1129_v3 = vld [vmem:[%s1431_s1 + $0x20] sm:$0xff] (!%p138_p2)  }
   0xc   : > { %1042 = vmatprep.subr.bf16.mxu0 (!%p138_p2), %v1124_v4 }
   0xd   : > { %s1435_s13 = smov (!%p161_p3, %s934_s13), 1 }
   0xe   : > { %s1078_s20 = smul.u32 48, %s1435_s13  ;;  %s1026_s9 = sshll.u32 %s1435_s13, 4 }
   0xf   : > { %1043 = vmatpush3.bf16.msra.mxu0 %v1125_v5  ;;  %v1130_v5 = vld [vmem:[%s1431_s1 + $0x68] sm:$0xff]   ;;  %s170_s14 = scalar_lea.vmem %s1433_s3, %s1026_s9 }
  0x10   : > { %s1202_s27 = scalar_lea.vmem %s1430_s0, %s1078_s20  ;;  %1044 = vmatprep.subr.bf16.mxu0 %v1126_v26 }
  0x11   : > { %v955_v6 = vld [vmem:[%s1202_s27 + $0x18] sm:$0xf]  ;;  %v1209_v7 = vld [vmem:[%s1202_s27 + $0x1c] sm:$0x1]  ;;  %v954_v8 = vld [vmem:[%s1202_s27 + $0x10] sm:$0xf] }
  0x12   : > { %v987_v9 = vcombine.low %v955_v6, %v955_v6  ;;  %v1213_v10 = vld [vmem:[%s1202_s27 + $0x14] sm:$0x1]  ;;  %v986_v11 = vcombine.low %v954_v8, %v954_v8  ;;  %v946_v12 = vld [vmem:[%s1202_s27 + $0xc] sm:$0x1]  ;;  %v950_v13 = vld [vmem:[%s1202_s27 + $0x8] sm:$0xe]  ;;  %v991_v27 = vcombine.low %v955_v6, %v1209_v7 }
  0x13   : > { %v982_v14 = vcombine.low %v950_v13, %v946_v12  ;;  %v177_v15 = vld [vmem:[%s1202_s27 + $0xc] sm:$0x1]  ;;  %v181_v16 = vld [vmem:[%s1202_s27 + $0x8] sm:$0xe]  ;;  %v990_v18 = vcombine.low %v954_v8, %v1213_v10  ;;  %v947_v21 = vld [vmem:[%s1202_s27 + $0x14] sm:$0x1]  ;;  %1045 = vmatpush3.bf16.msra.mxu0 %v1127_v47 }
  0x14   : > { %v1220_v17 = vld [vmem:[%s1202_s27 + $0x8] sm:$0xf]  ;;  %388 = vrot.lane.b32.xlu1 %v987_v9, %s1150_s30  ;;  %386 = vrot.lane.b32.xlu0 %v986_v11, %s1150_s30  ;;  %v971_v19 = vcombine.low %v181_v16, %v177_v15  ;;  %v951_v22 = vld [vmem:[%s1202_s27 + $0x10] sm:$0xe]  ;;  %v416_v40 = vshll.u32 %v991_v27, 16  ;;  %v414_v57 = vshrl.u32 %v991_v27, 16 }
  0x15   : > { %v967_v20 = vcombine.low %v1220_v17, %v177_v15  ;;  %v362_v23 = vrot.slane %v982_v14, 1  ;;  %v983_v24 = vcombine.low %v951_v22, %v947_v21  ;;  %v1229_v25 = vld [vmem:[%s1202_s27] sm:$0xf]  ;;  %v176_v29 = vld [vmem:[%s1202_s27 + $0x4] sm:$0x1]  ;;  %v409_v34 = vshll.u32 %v990_v18, 16  ;;  %1046 = vmatprep.subr.bf16.mxu0 %v1128_v0 }
  0x16   : > { %v279_v28 = vrot.slane %v971_v19, 1  ;;  %v180_v30 = vld [vmem:[%s1202_s27] sm:$0xe]  ;;  %v966_v31 = vcombine.low %v1229_v25, %v176_v29  ;;  %v1239_v33 = vld [vmem:[%s1202_s27 + $0x8] sm:$0xf]  ;;  %v407_v41 = vshrl.u32 %v990_v18, 16 }
  0x17   : > { %v240_v32 = vshll.u32 %v967_v20, 16  ;;  %v363_v35 = vrot.slane %v983_v24, 1  ;;  %v970_v36 = vcombine.low %v180_v30, %v176_v29  ;;  %v1244_v37 = vcombine.low %v1239_v33, %v946_v12  ;;  %v1247_v42 = vld [vmem:[%s1202_s27 + $0x10] sm:$0xf]  ;;  %v1260_v51 = vld [vmem:[%s1202_s27 + $0x14] sm:$0x1]  ;;  %1047 = vmatpush3.bf16.msra.mxu0 %v1129_v3 }
  0x18   : > { %366 = vrot.lane.b32.xlu0 %v362_v23, %s1151_s6  ;;  %284 = vrot.lane.b32.xlu1 %v279_v28, %s1150_s30  ;;  %v231_v38 = vshrl.u32 %v966_v31, 16  ;;  %v233_v39 = vshll.u32 %v966_v31, 16  ;;  %v238_v44 = vshrl.u32 %v967_v20, 16  ;;  %v1250_v46 = vcombine.low %v1247_v42, %v947_v21  ;;  %v1257_v50 = vld [vmem:[%s1202_s27 + $0x10] sm:$0xf]  ;;  %v1131_v11 = vld [vmem:[%s1431_s1 + $0x28] sm:$0xff]  }
  0x19   : > { %v242_v45 = vrot.slane %v240_v32, 1  ;;  %v278_v48 = vrot.slane %v970_v36, 1  ;;  %v411_v49 = vrot.slane %v409_v34, 1  ;;  %v948_v53 = vld [vmem:[%s1202_s27 + $0x1c] sm:$0x1]  ;;  %v418_v59 = vrot.slane %v416_v40, 1  ;;  %1048 = vmatprep.subr.bf16.mxu0 %v1130_v5 }
  0x1a   : > { %v235_v43 = vrot.slane %v233_v39, 1  ;;  %v952_v54 = vld [vmem:[%s1202_s27 + $0x18] sm:$0xe]  ;;  %v949_v55 = vld [vmem:[%s1202_s27 + $0x24] sm:$0x1]  ;;  %v968_v60 = vcombine.low %v1257_v50, %v1260_v51  ;;  %v974_v12 = vcombine.low %v1239_v33, %v1239_v33  ;;  %v1132_v14 = vld [vmem:[%s1431_s1 + $0x70] sm:$0xff]   ;;  %v975_v23 = vcombine.low %v1247_v42, %v1247_v42 }
  0x1b   : > { %v953_v56 = vld [vmem:[%s1202_s27 + $0x20] sm:$0xe]  ;;  %v243_v58 = vor.u32 %v242_v45, %v238_v44  ;;  %v1270_v61 = vld [vmem:[%s1202_s27 + $0x18] sm:$0xf]  ;;  %v1273_v62 = vld [vmem:[%s1202_s27 + $0x1c] sm:$0x1]  ;;  %v412_v63 = vor.u32 %v411_v49, %v407_v41  ;;  %v984_v1 = vcombine.low %v952_v54, %v948_v53  ;;  %v419_v6 = vor.u32 %v418_v59, %v414_v57  ;;  %1049 = vmatpush3.bf16.msra.mxu0 %v1131_v11 }
  0x1c   : > { %368 = vrot.lane.b32.xlu0 %v363_v35, %s1151_s6  ;;  %v236_v52 = vor.u32 %v235_v43, %v231_v38  ;;  %v985_v2 = vcombine.low %v953_v56, %v949_v55  ;;  %v969_v4 = vcombine.low %v1270_v61, %v1273_v62  ;;  %v247_v8 = vshll.u32 %v968_v60, 16  ;;  %v1289_v9 = vld [vmem:[%s1202_s27 + $0x18] sm:$0xf]  ;;  %v1298_v13 = vld [vmem:[%s1202_s27 + $0x20] sm:$0xf]  ;;  %v1133_v29 = vld [vmem:[%s1431_s1 + $0x30] sm:$0xff]   ;;  %1050 = vmatprep.subr.bf16.mxu0 %v1132_v14 }
  0x1d   : > { %v364_v15 = vrot.slane %v984_v1, 1  ;;  %v964_v18 = vld [vmem:[%s1202_s27 + $0x20] sm:$0xe]  ;;  %v1305_v19 = vcombine.low %v1289_v9, %v948_v53  ;;  %v1308_v20 = vcombine.low %v1298_v13, %v949_v55  ;;  %v245_v21 = vshrl.u32 %v968_v60, 16  ;;  %v960_v26 = vld [vmem:[%s1202_s27 + $0x24] sm:$0x1] }
  0x1e   : > { %258 = vrot.lane.b32.xlu1 %v236_v52, %s1151_s6  ;;  %v365_v16 = vrot.slane %v985_v2, 1  ;;  %v254_v22 = vshll.u32 %v969_v4, 16  ;;  %v249_v24 = vrot.slane %v247_v8, 1  ;;  %v961_v27 = vld [vmem:[%s1202_s27 + $0x2c] sm:$0x1]  ;;  %v252_v31 = vshrl.u32 %v969_v4, 16 }
  0x1f   : > { %v965_v28 = vld [vmem:[%s1202_s27 + $0x28] sm:$0xe]  ;;  %v956_v30 = vld [vmem:[%s1202_s27 + $0x20] sm:$0xf]  ;;  %v996_v32 = vcombine.low %v964_v18, %v960_v26  ;;  %v182_v36 = vld [vmem:[%s1202_s27 + $0x10] sm:$0xe]  ;;  %1051 = vmatpush3.bf16.msra.mxu0 %v1133_v29  ;;  %v976_v11 = vcombine.low %v1289_v9, %v1289_v9 }
  0x20   : > { %282 = vrot.lane.b32.xlu0 %v278_v48, %s1150_s30  ;;  %v997_v33 = vcombine.low %v965_v28, %v961_v27  ;;  %v1134_v34 = vld [vmem:[%s1431_s1 + $0x80] sm:$0xff]   ;;  %v256_v35 = vrot.slane %v254_v22, 1  ;;  %v1135_v38 = vld [vmem:[%s1431_s1 + $0x78] sm:$0xff]   ;;  %v250_v39 = vor.u32 %v249_v24, %v245_v21  ;;  %v992_v40 = vcombine.low %v956_v30, %v960_v26  ;;  %v1137_v42 = vld [vmem:[%s1431_s1 + $0x88] sm:$0xff]  }
  0x21   : > { %1070 = vmatprep.subr.bf16.mxu1 %v1134_v34  ;;  %v1136_v41 = vld [vmem:[%s1431_s1 + $0x38] sm:$0xff]   ;;  %1052 = vmatprep.subr.bf16.mxu0 %v1135_v38  ;;  %v962_v43 = vld [vmem:[%s1202_s27 + $0x10] sm:$0xe]  ;;  %v456_v44 = vrot.slane %v996_v32, 1  ;;  %v957_v45 = vld [vmem:[%s1202_s27 + $0x28] sm:$0xf]  ;;  %v988_v55 = vcombine.low %v956_v30, %v956_v30  ;;  %v972_v56 = vcombine.low %v182_v36, %v1260_v51 }
  0x22   : > { %260 = vrot.lane.b32.xlu1 %v243_v58, %s1151_s6  ;;  %1071 = vmatpush3.bf16.msra.mxu1 %v1134_v34  ;;  %v457_v47 = vrot.slane %v997_v33, 1  ;;  %v963_v48 = vld [vmem:[%s1202_s27 + $0x18] sm:$0xe]  ;;  %v994_v49 = vcombine.low %v962_v43, %v1213_v10  ;;  %v257_v52 = vor.u32 %v256_v35, %v252_v31  ;;  %v993_v53 = vcombine.low %v957_v45, %v961_v27 }
  0x23   : > { %1053 = vmatpush3.bf16.msra.mxu0 %v1136_v41  ;;  %v995_v54 = vcombine.low %v963_v48, %v1209_v7  ;;  %v183_v57 = vld [vmem:[%s1202_s27 + $0x18] sm:$0xe]  ;;  %v423_v58 = vshll.u32 %v992_v40, 16  ;;  %1072 = vmatprep.subr.bf16.mxu1 %v1137_v42  ;;  %v989_v10 = vcombine.low %v957_v45, %v957_v45  ;;  %v280_v7 = vrot.slane %v972_v56, 1 }
  0x24   : > { %434 = vrot.lane.b32.xlu0 %v412_v63, %s1152_s19  ;;  %v454_v59 = vrot.slane %v994_v49, 1  ;;  %v1003_v63 = vcombine.low %v456_v44, %v457_v47  ;;  %v973_v0 = vcombine.low %v183_v57, %v1273_v62  ;;  %v430_v1 = vshll.u32 %v993_v53, 16 }
  0x25   : > { %v455_v60 = vrot.slane %v995_v54, 1  ;;  %v421_v3 = vshrl.u32 %v992_v40, 16  ;;  %v425_v4 = vrot.slane %v423_v58, 1  ;;  %v428_v5 = vshrl.u32 %v993_v53, 16 }
  0x26   : > { %436 = vrot.lane.b32.xlu1 %v419_v6, %s1152_s19  ;;  %1073 = vmatpush3.bf16.msra.mxu1 %v1137_v42  ;;  %v281_v51 = vrot.slane %v973_v0, 1  ;;  %v432_v6 = vrot.slane %v430_v1, 1  ;;  %v332_v18 = vshll.u32 %v1250_v46, 16  ;;  %v330_v24 = vshrl.u32 %v1250_v46, 16 }
  0x27   : > { %v1000_v2 = vcombine.low %v454_v59, %v455_v60  ;;  %v426_v62 = vor.u32 %v425_v4, %v421_v3  ;;  %v346_v54 = vshll.u32 %v1308_v20, 16  ;;  %v337_v56 = vshrl.u32 %v1305_v19, 16 }
  0x28   : > { %302 = vrot.lane.b32.xlu0 %v974_v12, %s1152_s19  ;;  %v433_v8 = vor.u32 %v432_v6, %v428_v5  ;;  %v977_v12 = vcombine.low %v1298_v13, %v1298_v13  ;;  %v334_v27 = vrot.slane %v332_v18, 1  ;;  %v344_v59 = vshrl.u32 %v1308_v20, 16 }
  0x29   : > { %1074 = vmatprep.mubr.msk.bf16.mxu1 %vm458_vm0, %v1000_v2  ;;  %v348_v60 = vrot.slane %v346_v54, 1 }
  0x2a   : > { %304 = vrot.lane.b32.xlu1 %v975_v23, %s1152_s19  ;;  %1075 = vmatmul.mubr.msk.bf16.vlgmr.msra.gmra.mrb[0].mxu1 %vm458_vm0, %v1003_v63  ;;  %v323_v23 = vshrl.u32 %v1244_v37, 16  ;;  %v335_v29 = vor.u32 %v334_v27, %v330_v24 }
  0x2b   : > { %v349_v1 = vor.u32 %v348_v60, %v344_v59 }
  0x2c   : > { %370 = vrot.lane.b32.xlu0 %v364_v15, %s1151_s6 }
  0x2e   : > { %372 = vrot.lane.b32.xlu1 %v365_v16, %s1151_s6  ;;  %v325_v16 = vshll.u32 %v1244_v37, 16 }
  0x30   : > { %262 = vrot.lane.b32.xlu0 %v250_v39, %s1151_s6  ;;  %v327_v9 = vrot.slane %v325_v16, 1 }
  0x32   : > { %264 = vrot.lane.b32.xlu1 %v257_v52, %s1151_s6  ;;  %v328_v13 = vor.u32 %v327_v9, %v323_v23 }
  0x34   : > { %390 = vrot.lane.b32.xlu0 %v988_v55, %s1150_s30 }
  0x36   : > { %392 = vrot.lane.b32.xlu1 %v989_v10, %s1150_s30 }
  0x38   : > { %286 = vrot.lane.b32.xlu0 %v280_v7, %s1150_s30 }
  0x3a   : > { %288 = vrot.lane.b32.xlu1 %v281_v51, %s1150_s30 }
  0x3c   : > { %438 = vrot.lane.b32.xlu0 %v426_v62, %s1152_s19 }
  0x3e   : > { %440 = vrot.lane.b32.xlu1 %v433_v8, %s1152_s19 }
  0x40   : > { %306 = vrot.lane.b32.xlu0 %v976_v11, %s1152_s19 }
  0x42   : > { %308 = vrot.lane.b32.xlu1 %v977_v12, %s1152_s19 }
  0x86   : > { %v389_v14 = vpop.permute.xlu1 %388  ;;  %v387_v15 = vpop.permute.xlu0 %386 }
  0x8a   : > { %v367_v21 = vpop.permute.xlu0 %366  ;;  %v285_v22 = vpop.permute.xlu1 %284 }
  0x8b   : > { %v491_v31 = vsel %vm458_vm0, %v328_v13, %v367_v21 }
  0x8c   : > { %v502_v35 = vsel %vm471_vm1, %v491_v31, %v387_v15 }
  0x8e   : > { %v369_v26 = vpop.permute.xlu0 %368 }
  0x8f   : > { %v494_v33 = vsel %vm458_vm0, %v335_v29, %v369_v26  ;;  %v795_v26 = vlaneseq }
  0x90   : > { %v259_v28 = vpop.permute.xlu1 %258  ;;  %v504_v46 = vsel %vm471_vm1, %v494_v33, %v389_v14 }
  0x91   : > { %v461_v38 = vsel %vm458_vm0, %v1229_v25, %v259_v28  ;;  %v1397_v27 = vshrl.u32 %v795_v26, 7 }
  0x92   : > { %v283_v30 = vpop.permute.xlu0 %282 }
  0x93   : > { %v473_v42 = vsel %vm471_vm1, %v461_v38, %v283_v30  ;;  %vm797_vm3 = vcmp.lt.s32.totalorder %v1397_v27, 4 }
  0x94   : > { %v261_v32 = vpop.permute.xlu1 %260 }
  0x95   : > { %v464_v39 = vsel %vm458_vm0, %v1220_v17, %v261_v32  ;;  %v339_v17 = vshll.u32 %v1305_v19, 16 }
  0x96   : > { %v435_v34 = vpop.permute.xlu0 %434  ;;  %v475_v45 = vsel %vm471_vm1, %v464_v39, %v285_v22 }
  0x97   : > { %v510_v37 = vsel %vm480_vm2, %v502_v35, %v435_v34  ;;  %v341_v57 = vrot.slane %v339_v17, 1 }
  0x98   : > { %v437_v36 = vpop.permute.xlu1 %436 }
  0x99   : > { %v512_v41 = vsel %vm480_vm2, %v504_v46, %v437_v36  ;;  %v342_v10 = vor.u32 %v341_v57, %v337_v56 }
  0x9a   : > { %v303_v40 = vpop.permute.xlu0 %302  ;;  %v999_v43 = vcombine.low %v510_v37, %v512_v41 }
  0x9b   : > { %v482_v44 = vsel %vm480_vm2, %v473_v42, %v303_v40 }
  0x9c   : > { %729 = vmatprep.mubr.bf16.mxu0 %v999_v43  ;;  %v305_v47 = vpop.permute.xlu1 %304 }
  0x9d   : > { %v484_v48 = vsel %vm480_vm2, %v475_v45, %v305_v47 }
  0x9e   : > { %v371_v49 = vpop.permute.xlu0 %370  ;;  %v998_v52 = vcombine.low %v482_v44, %v484_v48 }
  0x9f   : > { %v497_v7 = vsel %vm458_vm0, %v342_v10, %v371_v49 }
  0xa0   : > { %730 = vmatmul.mubr.bf16.vlgmr.msra.gmra.mrb[0].mxu0 %v998_v52  ;;  %v373_v25 = vpop.permute.xlu1 %372 }
  0xa1   : > { %v500_v51 = vsel %vm458_vm0, %v349_v1, %v373_v25 }
  0xa2   : > { %v263_v53 = vpop.permute.xlu0 %262 }
  0xa3   : > { %v467_v20 = vsel %vm458_vm0, %v1257_v50, %v263_v53 }
  0xa4   : > { %v265_v55 = vpop.permute.xlu1 %264 }
  0xa5   : > { %v470_v14 = vsel %vm458_vm0, %v1270_v61, %v265_v55 }
  0xa6   : > { %v391_v58 = vpop.permute.xlu0 %390 }
  0xa7   : > { %v506_v4 = vsel %vm471_vm1, %v497_v7, %v391_v58 }
  0xa8   : > { %v393_v63 = vpop.permute.xlu1 %392 }
  0xa9   : > { %v508_v19 = vsel %vm471_vm1, %v500_v51, %v393_v63 }
  0xaa   : > { %v287_v0 = vpop.permute.xlu0 %286 }
  0xab   : > { %v477_v11 = vsel %vm471_vm1, %v467_v20, %v287_v0  ;;  %v833_v20 = vld [vmem:[%s1432_s2] sm:$0x1] }
  0xac   : > { %v289_v2 = vpop.permute.xlu1 %288 }
  0xad   : > { %v479_v16 = vsel %vm471_vm1, %v470_v14, %v289_v2 }
  0xae   : > { %v439_v3 = vpop.permute.xlu0 %438 }
  0xaf   : > { %v514_v5 = vsel %vm480_vm2, %v506_v4, %v439_v3 }
  0xb0   : > { %v441_v6 = vpop.permute.xlu1 %440 }
  0xb1   : > { %v516_v62 = vsel %vm480_vm2, %v508_v19, %v441_v6 }
  0xb2   : > { %v307_v8 = vpop.permute.xlu0 %306  ;;  %v1002_v12 = vcombine.low %v514_v5, %v516_v62 }
  0xb3   : > { %v486_v15 = vsel %vm480_vm2, %v477_v11, %v307_v8  ;;  %v841_v8 = vsub.s32 0, %v1397_v27 }
  0xb4   : > { %737 = vmatprep.mubr.bf16.mxu0 %v1002_v12  ;;  %v309_v18 = vpop.permute.xlu1 %308  ;;  %v834_v12 = vld [vmem:[%s1432_s2 + $0x1] sm:$0x1] }
  0xb5   : > { %v488_v21 = vsel %vm480_vm2, %v479_v16, %v309_v18 }
  0xb6   : > { %v1001_v22 = vcombine.low %v486_v15, %v488_v21 }
  0xb8   : > { %738 = vmatmul.mubr.bf16.gmra.mrb[4].mxu0 %v1001_v22 }
  0xfd   : > { %v1076_v50 = vpop.f32.mrb[0].mxu1 }
  0xfe   : > { %v780_v23 = vpop.f32.mrb[1].mxu1 }
  0xff   : > { %v1077_v9 = vpop.f32.mrb[2].mxu1 }
 0x100   : > { %v783_v24 = vpop.f32.mrb[3].mxu1 }
 0x173   : > { %v1054_v13 = vpop.f32.mrb[0].mxu0 }
 0x174   : > { %v1055_v28 = vpop.f32.mrb[1].mxu0 }
 0x175   : > { %v1056_v61 = vadd.f32 %v1055_v28, %v1054_v13  ;;  %v1057_v29 = vpop.f32.mrb[2].mxu0 }
 0x176   : > { %v1058_v30 = vpop.f32.mrb[3].mxu0 }
 0x177   : > { %v1059_v31 = vadd.f32 %v1058_v30, %v1057_v29  ;;  %v781_v32 = vadd.f32 %v1056_v61, %v780_v23 }
 0x179   : > { %v801_v33 = vsel %vm797_vm3, %v781_v32, 0.0  ;;  %v784_v34 = vadd.f32 %v1059_v31, %v783_v24 }
 0x17a   : > { %v815_v37 = vmul.f32 %v801_v33, %v801_v33 }
 0x17b   : > { %v802_v35 = vsel %vm797_vm3, %v784_v34, 0.0 }
 0x17c   : > { %v805_v36 = vadd.f32 %v802_v35, %v801_v33  ;;  %v816_v46 = vmul.f32 %v802_v35, %v802_v35 }
 0x17e   : > { %v819_v38 = vadd.f32 %v816_v46, %v815_v37 }
 0x18b   : > { %v1060_v39 = vpop.f32.mrb[4].mxu0 }
 0x18c   : > { %v1061_v40 = vpop.f32.mrb[5].mxu0 }
 0x18d   : > { %v1062_v41 = vadd.f32 %v1061_v40, %v1060_v39  ;;  %v1063_v42 = vpop.f32.mrb[6].mxu0 }
 0x18e   : > { %v1064_v43 = vpop.f32.mrb[7].mxu0 }
 0x18f   : > { %v789_v44 = vadd.f32 %v1076_v50, %v1062_v41  ;;  %v1065_v45 = vadd.f32 %v1064_v43, %v1063_v42 }
 0x191   : > { %v803_v47 = vsel %vm797_vm3, %v789_v44, 0.0  ;;  %v792_v48 = vadd.f32 %v1077_v9, %v1065_v45 }
 0x192   : > { %v806_v49 = vadd.f32 %v805_v36, %v803_v47  ;;  %v817_v52 = vmul.f32 %v803_v47, %v803_v47 }
 0x193   : > { %v804_v25 = vsel %vm797_vm3, %v792_v48, 0.0 }
 0x194   : > { %v820_v17 = vadd.f32 %v819_v38, %v817_v52  ;;  %v807_v53 = vadd.f32 %v806_v49, %v804_v25  ;;  %v818_v54 = vmul.f32 %v804_v25, %v804_v25 }
 0x196   : > { %v808_v55 = vrot.slane %v807_v53, 4  ;;  %v821_v56 = vadd.f32 %v820_v17, %v818_v54 }
 0x198   : > { %v809_v57 = vadd.f32 %v808_v55, %v807_v53  ;;  %v822_v58 = vrot.slane %v821_v56, 4 }
 0x19a   : > { %v810_v59 = vrot.slane %v809_v57, 2  ;;  %v823_v60 = vadd.f32 %v822_v58, %v821_v56 }
 0x19c   : > { %v811_v63 = vadd.f32 %v810_v59, %v809_v57  ;;  %v824_v10 = vrot.slane %v823_v60, 2 }
 0x19e   : > { %v812_v0 = vrot.slane %v811_v63, 1  ;;  %v825_v1 = vadd.f32 %v824_v10, %v823_v60 }
 0x1a0   : > { %v813_v2 = vadd.f32 %v812_v0, %v811_v63  ;;  %v826_v7 = vrot.slane %v825_v1, 1 }
 0x1a2   : > { %v814_v3 = vmul.f32 0.0625, %v813_v2  ;;  %v827_v4 = vadd.f32 %v826_v7, %v825_v1 }
 0x1a4   : > { %v828_v51 = vmul.f32 0.0625, %v827_v4  ;;  %v829_v5 = vmul.f32 %v814_v3, %v814_v3  ;;  %v836_v62 = vmul.f32 %v833_v20, %v814_v3 }
 0x1a6   : > { %v830_v19 = vsub.f32 %v828_v51, %v829_v5 }
 0x1a8   : > { %v831_v6 = vadd.f32 1e-05, %v830_v19 }
 0x1aa   : > { %1140 = vrsqrt.f32 %v831_v6 }
 0x1b4   : > { %v1141_v11 = vpop.eup %1140 }
 0x1b5   : > { %v835_v14 = vmul.f32 %v1141_v11, %v833_v20  ;;  %v837_v15 = vmul.f32 %v1141_v11, %v836_v62 }
 0x1b7   : > { %v838_v16 = vsub.f32 %v834_v12, %v837_v15  ;;  %v842_v18 = vrot.slane %v835_v14, %v841_v8 }
 0x1b9   : > { %v843_v21 = vmul.f32 %v842_v18, %v781_v32  ;;  %v844_v22 = vmul.f32 %v842_v18, %v784_v34  ;;  %v845_v50 = vmul.f32 %v842_v18, %v789_v44  ;;  %v846_v23 = vmul.f32 %v842_v18, %v792_v48 }
 0x1ba   : > { %v850_v9 = vrot.slane %v838_v16, %v841_v8 }
 0x1bc   : > { %v851_v24 = vadd.f32 %v850_v9, %v843_v21  ;;  %v852_v26 = vadd.f32 %v850_v9, %v844_v22  ;;  %v853_v13 = vadd.f32 %v850_v9, %v845_v50  ;;  %v854_v28 = vadd.f32 %v850_v9, %v846_v23 }
 0x1be   : > { %vm855_vm4 = vcmp.ge.f32.partialorder %v851_v24, 0.0  ;;  %vm856_vm5 = vcmp.ge.f32.partialorder %v852_v26, 0.0  ;;  %vm857_vm6 = vcmp.ge.f32.partialorder %v853_v13, 0.0  ;;  %vm858_vm7 = vcmp.ge.f32.partialorder %v854_v28, 0.0 }
 0x1bf   : > { %v859_v61 = vmul.f32 0.01, %v851_v24  ;;  %v860_v29 = vmul.f32 0.01, %v852_v26  ;;  %v861_v30 = vmul.f32 0.01, %v853_v13 }
 0x1c0   : > { %v862_v31 = vmul.f32 0.01, %v854_v28 }
 0x1c1   : > { %v863_v33 = vsel %vm855_vm4, %v851_v24, %v859_v61  ;;  %v864_v35 = vsel %vm856_vm5, %v852_v26, %v860_v29  ;;  %v865_v32 = vsel %vm857_vm6, %v853_v13, %v861_v30 }
 0x1c2   : > { %v866_v34 = vsel %vm858_vm7, %v854_v28, %v862_v31  ;;  %v867_v37 = vsel %vm797_vm3, %v863_v33, 0.0  ;;  %v868_v36 = vsel %vm797_vm3, %v864_v35, 0.0  ;;  %v869_v46 = vsel %vm797_vm3, %v865_v32, 0.0 }
 0x1c3   : > { %v870_v38 = vsel %vm797_vm3, %v866_v34, 0.0  ;;  %v1030_v39 = vpack.c.bf16 %v868_v36, %v867_v37 }
 0x1c4   : > { %v1035_v40 = vpack.c.bf16 %v870_v38, %v869_v46 }
 0x1c5   : > { %1031 = vst [vmem:[%s170_s14] sm:$0xff] %v1030_v39  }
 0x1c6   : > { %1037 = vst [vmem:[%s170_s14 + $0x8] sm:$0xff] %v1035_v40  }
 0x1c7 PF: > { %s13_s12 = sadd.s32 1, %s1148_s12  }
 0x1c8   : > { %p10_p4 = scmp.ge.s32.totalorder %s13_s12, 4  }
 0x1ca   :  { %12 = sbr.rel (!%p10_p4) target bundleno = 1 (0x1), region = 64 }

</bundles_post_ra>
